<compile_context>
chip_gen: v7x
topology: tpu7x:2x2x1
jax: 0.10.0
libtpu: 0.0.40
codegen_flags: <defaults>
</compile_context>

<pallas_src>
import jax
import jax.numpy as jnp
from jax import lax
from jax.experimental import pallas as pl
from jax.experimental.pallas import tpu as pltpu

LANE = 128      # lane width: pad hidden to a multiple of this
SUBLANE = 8     # sublane count: pad / tile batch to a multiple of this


def _round_up(x, m):
    return (x + m - 1) // m * m


def bilstm_kernel(x_ref, len_ref, wih_ref, b_ref, whh_ref,
                  out_ref, hx_ref, cx_ref,
                  gih, h_cat, h_fw, c_fw, h_bw, c_bw):
    """One batch tile of the packed-sequence bidirectional LSTM.

    x_ref:   (T, Bt, Hp)  bf16   embedded inputs, time-major
    len_ref: (Bt, 1)      int32  sequence lengths (0 for padded batch rows)
    wih_ref: (Hp, 8Hp)    bf16   [W_ih_fw | W_ih_bw], gate-slot padded
    b_ref:   (1, 8Hp)     f32    [b_fw | b_bw]  (b_ih + b_hh folded per dir)
    whh_ref: (2Hp, 8Hp)   bf16   blockdiag(W_hh_fw, W_hh_bw)
    out_ref: (T, Bt, Hp)  f32    fwd + bwd hidden per step (0 at pad steps)
    hx_ref/cx_ref: (Bt, Hp) f32  final states summed over directions
    scratch:
      gih   (T*Bt, 8Hp) bf16   hoisted input projection, both directions
      h_cat (Bt, 2Hp)   bf16   [h_fw | h_bw], MXU LHS of the recurrence
      h_fw/c_fw/h_bw/c_bw (Bt, Hp) f32
    """
    T, Bt, Hp = out_ref.shape
    H4 = 4 * Hp

    # ---- input projection for BOTH directions hoisted out of the recurrence:
    # one (T*Bt, Hp) @ (Hp, 8Hp) MXU matmul; stored bf16 (bias re-added later).
    x2 = x_ref[...].reshape(T * Bt, Hp)
    gih[...] = jnp.dot(x2, wih_ref[...],
                       preferred_element_type=jnp.float32).astype(jnp.bfloat16)

    zeros = jnp.zeros((Bt, Hp), jnp.float32)
    h_fw[...] = zeros
    c_fw[...] = zeros
    h_bw[...] = zeros
    c_bw[...] = zeros
    h_cat[...] = jnp.zeros((Bt, 2 * Hp), jnp.bfloat16)

    # Hoisted out of the loop: f32 bias slices, lengths broadcast, whh load.
    b_fw = b_ref[:, :H4]
    b_bw = b_ref[:, H4:]
    len_bh = jnp.broadcast_to(len_ref[...], (Bt, Hp))      # int32 (Bt, Hp)
    whh = whh_ref[...]                                      # (2Hp, 8Hp) bf16

    def cell(gates, c):
        # PyTorch gate order i, f, g, o; each slice is one full 128-lane slot.
        i_g = jax.nn.sigmoid(gates[:, 0 * Hp:1 * Hp])
        f_g = jax.nn.sigmoid(gates[:, 1 * Hp:2 * Hp])
        g_g = jnp.tanh(gates[:, 2 * Hp:3 * Hp])
        o_g = jax.nn.sigmoid(gates[:, 3 * Hp:4 * Hp])
        c_new = f_g * c + i_g * g_g
        h_new = o_g * jnp.tanh(c_new)
        return h_new, c_new

    # ---- fused forward/backward recurrence, fully unrolled (T small, static).
    for i in range(T):
        tf = i              # forward time index
        tb = T - 1 - i      # backward time index

        # Single block-diagonal recurrent matmul for both directions:
        # (Bt, 2Hp) @ (2Hp, 8Hp) = one 256-deep MXU pass on v6e/v7x.
        r = jnp.dot(h_cat[...], whh, preferred_element_type=jnp.float32)

        g_f = gih[tf * Bt:(tf + 1) * Bt, :H4].astype(jnp.float32) + b_fw + r[:, :H4]
        g_b = gih[tb * Bt:(tb + 1) * Bt, H4:].astype(jnp.float32) + b_bw + r[:, H4:]

        hn_f, cn_f = cell(g_f, c_fw[...])
        hn_b, cn_b = cell(g_b, c_bw[...])

        m_f = tf < len_bh                       # (Bt, Hp) bool
        m_b = tb < len_bh

        # Packed-sequence semantics: state frozen once t >= length[b].
        hf_sel = jnp.where(m_f, hn_f, h_fw[...])
        hb_sel = jnp.where(m_b, hn_b, h_bw[...])
        c_fw[...] = jnp.where(m_f, cn_f, c_fw[...])
        c_bw[...] = jnp.where(m_b, cn_b, c_bw[...])
        h_fw[...] = hf_sel
        h_bw[...] = hb_sel
        # bf16 copy produced once per step; feeds the next step's MXU matmul.
        h_cat[:, :Hp] = hf_sel.astype(jnp.bfloat16)
        h_cat[:, Hp:] = hb_sel.astype(jnp.bfloat16)

        out_f = jnp.where(m_f, hn_f, 0.0)
        out_b = jnp.where(m_b, hn_b, 0.0)
        # Bidirectional sum written directly into out_ref (no bw_out scratch,
        # no full (T,Bt,Hp) epilogue pass): each step is fresh-written by the
        # direction that reaches it first and accumulated by the other.
        if tf < tb:
            out_ref[tf] = out_f
            out_ref[tb] = out_b
        elif tf == tb:                          # middle step when T is odd
            out_ref[tf] = out_f + out_b
        else:
            out_ref[tf] = out_ref[tf] + out_f
            out_ref[tb] = out_ref[tb] + out_b

    # hx.view(-1, 2, b, H).sum(1) (and same for cx)
    hx_ref[...] = h_fw[...] + h_bw[...]
    cx_ref[...] = c_fw[...] + c_bw[...]


# ---------------------------------------------------------------------------
# Parameter construction / padding helpers
# ---------------------------------------------------------------------------

def init_params(key, source_size, hidden_size):
    H = hidden_size
    ks = jax.random.split(key, 11)
    bound = 1.0 / jnp.sqrt(jnp.float32(H))

    def u(kk, shape):
        return jax.random.uniform(kk, shape, jnp.float32, -bound, bound)

    embed = jax.random.normal(ks[0], (source_size, H), jnp.float32)
    embed = embed.at[0].set(0.0)  # padding_idx=0

    return dict(
        embed=embed,
        wih_fw=u(ks[1], (H, 4 * H)),
        whh_fw=u(ks[2], (H, 4 * H)),
        # two independent uniform biases summed (b_ih + b_hh), like nn.LSTM
        b_fw=u(ks[3], (1, 4 * H)) + u(ks[4], (1, 4 * H)),
        wih_bw=u(ks[5], (H, 4 * H)),
        whh_bw=u(ks[6], (H, 4 * H)),
        b_bw=u(ks[7], (1, 4 * H)) + u(ks[8], (1, 4 * H)),
    )


def _pad_gate_cols(w, H, Hp):
    """(..., 4H) -> (..., 4Hp): each of the 4 gate blocks placed at k*Hp."""
    out = jnp.zeros(w.shape[:-1] + (4 * Hp,), w.dtype)
    for k in range(4):
        out = out.at[..., k * Hp:k * Hp + H].set(w[..., k * H:(k + 1) * H])
    return out


def _pad_weight(w, H, Hp):
    """(H, 4H) -> (Hp, 4Hp), zero-padded rows and gate-slot-padded columns."""
    wc = _pad_gate_cols(w, H, Hp)                      # (H, 4Hp)
    return jnp.zeros((Hp, 4 * Hp), w.dtype).at[:H].set(wc)


# ---------------------------------------------------------------------------
# Forward pass
# ---------------------------------------------------------------------------

def encoder_forward(sentences, params):
    """Forward pass equivalent to Encoder.forward with opts['bidirectional']=True."""
    B, T = sentences.shape
    H = params["embed"].shape[1]

    Hp = _round_up(H, LANE)                    # lane-padded hidden
    B_TILE = min(_round_up(B, SUBLANE), 128)   # sublane-aligned batch tile
    Bp = _round_up(B, B_TILE)                  # padded batch (grid = Bp//B_TILE)

    # input_lengths = sentences.ne(0).sum(-1)
    lengths = jnp.sum((sentences != 0).astype(jnp.int32), axis=-1)      # (B,)

    # Embedding lookup (glue; padding row is zero by construction).
    embed = jnp.take(params["embed"], sentences, axis=0)                # (B, T, H)
    # TODO(synk): nn.Dropout(p=0.2) is identity in eval mode; training-mode
    # stochastic dropout is not applied here.

    # Time-major, batch- and lane-padded, bf16 (halves x DMA traffic;
    # padded rows/lanes are zero and never selected by the length mask).
    x = jnp.zeros((T, Bp, Hp), jnp.float32)
    x = x.at[:, :B, :H].set(jnp.transpose(embed, (1, 0, 2)))
    x = x.astype(jnp.bfloat16)                                          # (T, Bp, Hp)

    len_pad = jnp.zeros((Bp, 1), jnp.int32).at[:B, 0].set(lengths)      # (Bp, 1)

    wih_cat = jnp.concatenate(
        [_pad_weight(params["wih_fw"], H, Hp),
         _pad_weight(params["wih_bw"], H, Hp)], axis=1).astype(jnp.bfloat16)  # (Hp, 8Hp)

    b_cat = jnp.concatenate(
        [_pad_gate_cols(params["b_fw"], H, Hp),
         _pad_gate_cols(params["b_bw"], H, Hp)], axis=1)                # (1, 8Hp) f32

    # Block-diagonal recurrent weight: one fused h @ W_hh per step.
    whh_bd = jnp.zeros((2 * Hp, 8 * Hp), jnp.float32)
    whh_bd = whh_bd.at[:Hp, :4 * Hp].set(_pad_weight(params["whh_fw"], H, Hp))
    whh_bd = whh_bd.at[Hp:, 4 * Hp:].set(_pad_weight(params["whh_bw"], H, Hp))
    whh_bd = whh_bd.astype(jnp.bfloat16)                                # (2Hp, 8Hp)

    out_pad, hx_pad, cx_pad = pl.pallas_call(
        bilstm_kernel,
        out_shape=(
            jax.ShapeDtypeStruct((T, Bp, Hp), jnp.float32),
            jax.ShapeDtypeStruct((Bp, Hp), jnp.float32),
            jax.ShapeDtypeStruct((Bp, Hp), jnp.float32),
        ),
        grid_spec=pltpu.PrefetchScalarGridSpec(
            num_scalar_prefetch=0,
            grid=(Bp // B_TILE,),
            in_specs=[
                pl.BlockSpec((T, B_TILE, Hp), lambda b: (0, b, 0)),      # x
                pl.BlockSpec((B_TILE, 1), lambda b: (b, 0)),             # lengths
                pl.BlockSpec((Hp, 8 * Hp), lambda b: (0, 0)),            # W_ih cat
                pl.BlockSpec((1, 8 * Hp), lambda b: (0, 0)),             # bias cat
                pl.BlockSpec((2 * Hp, 8 * Hp), lambda b: (0, 0)),        # W_hh blockdiag
            ],
            out_specs=(
                pl.BlockSpec((T, B_TILE, Hp), lambda b: (0, b, 0)),      # output
                pl.BlockSpec((B_TILE, Hp), lambda b: (b, 0)),            # hx
                pl.BlockSpec((B_TILE, Hp), lambda b: (b, 0)),            # cx
            ),
            scratch_shapes=[
                pltpu.VMEM((T * B_TILE, 8 * Hp), jnp.bfloat16),  # gih (bf16)
                pltpu.VMEM((B_TILE, 2 * Hp), jnp.bfloat16),      # [h_fw|h_bw] bf16
                pltpu.VMEM((B_TILE, Hp), jnp.float32),           # h_fw
                pltpu.VMEM((B_TILE, Hp), jnp.float32),           # c_fw
                pltpu.VMEM((B_TILE, Hp), jnp.float32),           # h_bw
                pltpu.VMEM((B_TILE, Hp), jnp.float32),           # c_bw
            ],
        ),
        compiler_params=pltpu.CompilerParams(
            dimension_semantics=("parallel",),   # batch tiles -> v7x megacore
        ),
    )(x, len_pad, wih_cat, b_cat, whh_bd)

    # pad_packed_sequence would trim the time axis to max(lengths).  We return
    # the full-T output (padded steps are already zero) to avoid a host-syncing
    # int(max(lengths)); callers can slice on device if a trimmed view is needed.
    return out_pad[:, :B, :H], hx_pad[:B, :H], cx_pad[:B, :H]


# ---------------------------------------------------------------------------
# Pure-JAX reference (f32) for correctness checking
# ---------------------------------------------------------------------------

def _reference_forward(sentences, params):
    B, T = sentences.shape
    H = params["embed"].shape[1]
    lengths = jnp.sum((sentences != 0).astype(jnp.int32), axis=-1)
    embed = jnp.take(params["embed"], sentences, axis=0)        # (B, T, H)
    x = jnp.transpose(embed, (1, 0, 2))                         # (T, B, H)
    mask = (jnp.arange(T)[:, None] < lengths[None, :]).astype(jnp.float32)[..., None]

    def direction(wih, whh, b, reverse):
        def step(carry, xt_mt):
            h, c = carry
            xt, mt = xt_mt
            gates = xt @ wih + h @ whh + b
            i = jax.nn.sigmoid(gates[:, 0 * H:1 * H])
            f = jax.nn.sigmoid(gates[:, 1 * H:2 * H])
            g = jnp.tanh(gates[:, 2 * H:3 * H])
            o = jax.nn.sigmoid(gates[:, 3 * H:4 * H])
            c_new = f * c + i * g
            h_new = o * jnp.tanh(c_new)
            h = jnp.where(mt > 0, h_new, h)
            c = jnp.where(mt > 0, c_new, c)
            out = jnp.where(mt > 0, h_new, 0.0)
            return (h, c), out

        xs = (x[::-1], mask[::-1]) if reverse else (x, mask)
        (h, c), outs = lax.scan(step, (jnp.zeros((B, H)), jnp.zeros((B, H))), xs)
        if reverse:
            outs = outs[::-1]
        return outs, h, c

    of, hf, cf = direction(params["wih_fw"], params["whh_fw"], params["b_fw"], False)
    ob, hb, cb = direction(params["wih_bw"], params["whh_bw"], params["b_bw"], True)
    return of + ob, hf + hb, cf + cb


if __name__ == "__main__":
    SOURCE_SIZE = 16   # vocabulary size
    HIDDEN = 32        # hidden_size
    B, T = 2, 8        # batch, max sequence length

    key = jax.random.PRNGKey(0)
    k_param, k_tok = jax.random.split(key)

    params = init_params(k_param, SOURCE_SIZE, HIDDEN)

    # Deterministic token ids in [1, SOURCE_SIZE), padded with 0 at the tail.
    tokens = jax.random.randint(k_tok, (B, T), 1, SOURCE_SIZE, dtype=jnp.int32)
    lengths = jnp.array([T, 5], dtype=jnp.int32)   # sorted descending (packed)
    pad_mask = (jnp.arange(T)[None, :] < lengths[:, None]).astype(jnp.int32)
    sentences = tokens * pad_mask                  # (B, T) with trailing zeros

    fwd = jax.jit(encoder_forward)
    output, hx, cx = fwd(sentences, params)
    jax.block_until_ready((output, hx, cx))

    assert output.shape == (T, B, HIDDEN)
    assert hx.shape == (B, HIDDEN) and cx.shape == (B, HIDDEN)

    # Sanity check vs. a pure-JAX f32 reference (kernel uses bf16 MXU operands
    # and a bf16 gih scratch, hence the loose tolerance).
    ref_out, ref_hx, ref_cx = _reference_forward(sentences, params)
    err = max(float(jnp.max(jnp.abs(output - ref_out))),
              float(jnp.max(jnp.abs(hx - ref_hx))),
              float(jnp.max(jnp.abs(cx - ref_cx))))
    assert err < 5e-2, f"kernel/reference mismatch: max abs err = {err}"

    print("KERNEL_OK")
</pallas_src>

<mosaic_0001>
module attributes {stable_mosaic.version = 11 : i64} {
  func.func @bilstm_kernel(%arg0: i32, %arg1: memref<8x8x128xbf16, #tpu.memory_space<vmem>>, %arg2: memref<8x1xi32, #tpu.memory_space<vmem>>, %arg3: memref<128x1024xbf16, #tpu.memory_space<vmem>>, %arg4: memref<1x1024xf32, #tpu.memory_space<vmem>>, %arg5: memref<256x1024xbf16, #tpu.memory_space<vmem>>, %arg6: memref<8x8x128xf32, #tpu.memory_space<vmem>>, %arg7: memref<8x128xf32, #tpu.memory_space<vmem>>, %arg8: memref<8x128xf32, #tpu.memory_space<vmem>>, %arg9: memref<64x1024xbf16, #tpu.memory_space<vmem>>, %arg10: memref<8x256xbf16, #tpu.memory_space<vmem>>, %arg11: memref<8x128xf32, #tpu.memory_space<vmem>>, %arg12: memref<8x128xf32, #tpu.memory_space<vmem>>, %arg13: memref<8x128xf32, #tpu.memory_space<vmem>>, %arg14: memref<8x128xf32, #tpu.memory_space<vmem>>) attributes {dimension_semantics = [#tpu.dimension_semantics<parallel>], iteration_bounds = array<i64: 1>, scalar_prefetch = 0 : i64, scratch_operands = 6 : i64, tpu.core_type = #tpu.core_type<tc>, window_params = [{transform_indices = @transform_0, window_bounds = array<i64: 8, 8, 128>}, {transform_indices = @transform_1, window_bounds = array<i64: 8, 1>}, {pipeline_mode = #tpu.pipeline_mode<synchronous>, transform_indices = @transform_2, window_bounds = array<i64: 128, 1024>}, {pipeline_mode = #tpu.pipeline_mode<synchronous>, transform_indices = @transform_3, window_bounds = array<i64: 1, 1024>}, {pipeline_mode = #tpu.pipeline_mode<synchronous>, transform_indices = @transform_4, window_bounds = array<i64: 256, 1024>}, {transform_indices = @transform_5, window_bounds = array<i64: 8, 8, 128>}, {transform_indices = @transform_6, window_bounds = array<i64: 8, 128>}, {transform_indices = @transform_7, window_bounds = array<i64: 8, 128>}]} {
    %c0 = arith.constant 0 : index
    %c0_0 = arith.constant 0 : index
    %c0_1 = arith.constant 0 : index
    %0 = vector.load %arg1[%c0, %c0_0, %c0_1] : memref<8x8x128xbf16, #tpu.memory_space<vmem>>, vector<8x8x128xbf16>
    %1 = vector.shape_cast %0 : vector<8x8x128xbf16> to vector<64x128xbf16>
    %c0_2 = arith.constant 0 : index
    %c0_3 = arith.constant 0 : index
    %2 = vector.load %arg3[%c0_2, %c0_3] : memref<128x1024xbf16, #tpu.memory_space<vmem>>, vector<128x1024xbf16>
    %cst = arith.constant dense<0.000000e+00> : vector<64x1024xf32>
    %3 = tpu.matmul %1, %2, %cst {dimension_numbers = #tpu.dot_dimension_numbers<[1], [0], [0], [1], [0, 0, 1, 1], [], []>} : vector<64x128xbf16>, vector<128x1024xbf16>, vector<64x1024xf32> -> vector<64x1024xf32>
    %4 = arith.truncf %3 : vector<64x1024xf32> to vector<64x1024xbf16>
    %c0_4 = arith.constant 0 : index
    %c0_5 = arith.constant 0 : index
    %5 = vector.load %arg9[%c0_4, %c0_5] : memref<64x1024xbf16, #tpu.memory_space<vmem>>, vector<64x1024xbf16>
    tpu.vector_store %arg9[%c0_4, %c0_5], %4 {strides = array<i32>} : memref<64x1024xbf16, #tpu.memory_space<vmem>>, vector<64x1024xbf16>,
    %cst_6 = arith.constant 0.000000e+00 : f32
    %6 = vector.broadcast %cst_6 : f32 to vector<8x128xf32>
    %c0_7 = arith.constant 0 : index
    %c0_8 = arith.constant 0 : index
    %7 = vector.load %arg11[%c0_7, %c0_8] : memref<8x128xf32, #tpu.memory_space<vmem>>, vector<8x128xf32>
    tpu.vector_store %arg11[%c0_7, %c0_8], %6 {strides = array<i32>} : memref<8x128xf32, #tpu.memory_space<vmem>>, vector<8x128xf32>,
    %c0_9 = arith.constant 0 : index
    %c0_10 = arith.constant 0 : index
    %8 = vector.load %arg12[%c0_9, %c0_10] : memref<8x128xf32, #tpu.memory_space<vmem>>, vector<8x128xf32>
    tpu.vector_store %arg12[%c0_9, %c0_10], %6 {strides = array<i32>} : memref<8x128xf32, #tpu.memory_space<vmem>>, vector<8x128xf32>,
    %c0_11 = arith.constant 0 : index
    %c0_12 = arith.constant 0 : index
    %9 = vector.load %arg13[%c0_11, %c0_12] : memref<8x128xf32, #tpu.memory_space<vmem>>, vector<8x128xf32>
    tpu.vector_store %arg13[%c0_11, %c0_12], %6 {strides = array<i32>} : memref<8x128xf32, #tpu.memory_space<vmem>>, vector<8x128xf32>,
    %c0_13 = arith.constant 0 : index
    %c0_14 = arith.constant 0 : index
    %10 = vector.load %arg14[%c0_13, %c0_14] : memref<8x128xf32, #tpu.memory_space<vmem>>, vector<8x128xf32>
    tpu.vector_store %arg14[%c0_13, %c0_14], %6 {strides = array<i32>} : memref<8x128xf32, #tpu.memory_space<vmem>>, vector<8x128xf32>,
    %cst_15 = arith.constant 0.000000e+00 : bf16
    %11 = vector.broadcast %cst_15 : bf16 to vector<8x256xbf16>
    %c0_16 = arith.constant 0 : index
    %c0_17 = arith.constant 0 : index
    %12 = vector.load %arg10[%c0_16, %c0_17] : memref<8x256xbf16, #tpu.memory_space<vmem>>, vector<8x256xbf16>
    tpu.vector_store %arg10[%c0_16, %c0_17], %11 {strides = array<i32>} : memref<8x256xbf16, #tpu.memory_space<vmem>>, vector<8x256xbf16>,
    %c0_18 = arith.constant 0 : index
    %c0_19 = arith.constant 0 : index
    %13 = vector.load %arg4[%c0_18, %c0_19] : memref<1x1024xf32, #tpu.memory_space<vmem>>, vector<1x512xf32>
    %c0_20 = arith.constant 0 : index
    %c512 = arith.constant 512 : index
    %14 = vector.load %arg4[%c0_20, %c512] : memref<1x1024xf32, #tpu.memory_space<vmem>>, vector<1x512xf32>
    %c0_21 = arith.constant 0 : index
    %c0_22 = arith.constant 0 : index
    %15 = vector.load %arg2[%c0_21, %c0_22] : memref<8x1xi32, #tpu.memory_space<vmem>>, vector<8x1xi32>
    %16 = vector.shape_cast %15 : vector<8x1xi32> to vector<8x1xi32>
    %17 = vector.broadcast %16 : vector<8x1xi32> to vector<8x128xi32>
    %c0_23 = arith.constant 0 : index
    %c0_24 = arith.constant 0 : index
    %18 = vector.load %arg5[%c0_23, %c0_24] : memref<256x1024xbf16, #tpu.memory_space<vmem>>, vector<256x1024xbf16>
    %c0_25 = arith.constant 0 : index
    %c0_26 = arith.constant 0 : index
    %19 = vector.load %arg10[%c0_25, %c0_26] : memref<8x256xbf16, #tpu.memory_space<vmem>>, vector<8x256xbf16>
    %cst_27 = arith.constant dense<0.000000e+00> : vector<8x1024xf32>
    %20 = tpu.matmul %19, %18, %cst_27 {dimension_numbers = #tpu.dot_dimension_numbers<[1], [0], [0], [1], [0, 0, 1, 1], [], []>} : vector<8x256xbf16>, vector<256x1024xbf16>, vector<8x1024xf32> -> vector<8x1024xf32>
    %c0_28 = arith.constant 0 : index
    %c0_29 = arith.constant 0 : index
    %21 = vector.load %arg9[%c0_28, %c0_29] : memref<64x1024xbf16, #tpu.memory_space<vmem>>, vector<8x512xbf16>
    %22 = arith.extf %21 : vector<8x512xbf16> to vector<8x512xf32>
    %23 = vector.broadcast %13 : vector<1x512xf32> to vector<8x512xf32>
    %24 = arith.addf %22, %23 : vector<8x512xf32>
    %25 = vector.extract_strided_slice %20 {offsets = [0, 0], sizes = [8, 512], strides = [1, 1]} : vector<8x1024xf32> to vector<8x512xf32>
    %26 = arith.addf %24, %25 : vector<8x512xf32>
    %c56 = arith.constant 56 : index
    %c512_30 = arith.constant 512 : index
    %27 = vector.load %arg9[%c56, %c512_30] : memref<64x1024xbf16, #tpu.memory_space<vmem>>, vector<8x512xbf16>
    %28 = arith.extf %27 : vector<8x512xbf16> to vector<8x512xf32>
    %29 = vector.broadcast %14 : vector<1x512xf32> to vector<8x512xf32>
    %30 = arith.addf %28, %29 : vector<8x512xf32>
    %31 = vector.extract_strided_slice %20 {offsets = [0, 512], sizes = [8, 512], strides = [1, 1]} : vector<8x1024xf32> to vector<8x512xf32>
    %32 = arith.addf %30, %31 : vector<8x512xf32>
    %c0_31 = arith.constant 0 : index
    %c0_32 = arith.constant 0 : index
    %33 = vector.load %arg12[%c0_31, %c0_32] : memref<8x128xf32, #tpu.memory_space<vmem>>, vector<8x128xf32>
    %34 = vector.extract_strided_slice %26 {offsets = [0, 0], sizes = [8, 128], strides = [1, 1]} : vector<8x512xf32> to vector<8x128xf32>
    %35 = arith.negf %34 : vector<8x128xf32>
    %36 = math.exp %35 : vector<8x128xf32>
    %cst_33 = arith.constant 1.000000e+00 : f32
    %37 = vector.broadcast %cst_33 : f32 to vector<8x128xf32>
    %38 = arith.addf %37, %36 : vector<8x128xf32>
    %39 = arith.divf %37, %38 : vector<8x128xf32>
    %40 = vector.extract_strided_slice %26 {offsets = [0, 128], sizes = [8, 128], strides = [1, 1]} : vector<8x512xf32> to vector<8x128xf32>
    %41 = arith.negf %40 : vector<8x128xf32>
    %42 = math.exp %41 : vector<8x128xf32>
    %cst_34 = arith.constant 1.000000e+00 : f32
    %43 = vector.broadcast %cst_34 : f32 to vector<8x128xf32>
    %44 = arith.addf %43, %42 : vector<8x128xf32>
    %45 = arith.divf %43, %44 : vector<8x128xf32>
    %46 = vector.extract_strided_slice %26 {offsets = [0, 256], sizes = [8, 128], strides = [1, 1]} : vector<8x512xf32> to vector<8x128xf32>
    %47 = math.tanh %46 : vector<8x128xf32>
    %48 = vector.extract_strided_slice %26 {offsets = [0, 384], sizes = [8, 128], strides = [1, 1]} : vector<8x512xf32> to vector<8x128xf32>
    %49 = arith.negf %48 : vector<8x128xf32>
    %50 = math.exp %49 : vector<8x128xf32>
    %cst_35 = arith.constant 1.000000e+00 : f32
    %51 = vector.broadcast %cst_35 : f32 to vector<8x128xf32>
    %52 = arith.addf %51, %50 : vector<8x128xf32>
    %53 = arith.divf %51, %52 : vector<8x128xf32>
    %54 = arith.mulf %45, %33 : vector<8x128xf32>
    %55 = arith.mulf %39, %47 : vector<8x128xf32>
    %56 = arith.addf %54, %55 : vector<8x128xf32>
    %57 = math.tanh %56 : vector<8x128xf32>
    %58 = arith.mulf %53, %57 : vector<8x128xf32>
    %c0_36 = arith.constant 0 : index
    %c0_37 = arith.constant 0 : index
    %59 = vector.load %arg14[%c0_36, %c0_37] : memref<8x128xf32, #tpu.memory_space<vmem>>, vector<8x128xf32>
    %60 = vector.extract_strided_slice %32 {offsets = [0, 0], sizes = [8, 128], strides = [1, 1]} : vector<8x512xf32> to vector<8x128xf32>
    %61 = arith.negf %60 : vector<8x128xf32>
    %62 = math.exp %61 : vector<8x128xf32>
    %cst_38 = arith.constant 1.000000e+00 : f32
    %63 = vector.broadcast %cst_38 : f32 to vector<8x128xf32>
    %64 = arith.addf %63, %62 : vector<8x128xf32>
    %65 = arith.divf %63, %64 : vector<8x128xf32>
    %66 = vector.extract_strided_slice %32 {offsets = [0, 128], sizes = [8, 128], strides = [1, 1]} : vector<8x512xf32> to vector<8x128xf32>
    %67 = arith.negf %66 : vector<8x128xf32>
    %68 = math.exp %67 : vector<8x128xf32>
    %cst_39 = arith.constant 1.000000e+00 : f32
    %69 = vector.broadcast %cst_39 : f32 to vector<8x128xf32>
    %70 = arith.addf %69, %68 : vector<8x128xf32>
    %71 = arith.divf %69, %70 : vector<8x128xf32>
    %72 = vector.extract_strided_slice %32 {offsets = [0, 256], sizes = [8, 128], strides = [1, 1]} : vector<8x512xf32> to vector<8x128xf32>
    %73 = math.tanh %72 : vector<8x128xf32>
    %74 = vector.extract_strided_slice %32 {offsets = [0, 384], sizes = [8, 128], strides = [1, 1]} : vector<8x512xf32> to vector<8x128xf32>
    %75 = arith.negf %74 : vector<8x128xf32>
    %76 = math.exp %75 : vector<8x128xf32>
    %cst_40 = arith.constant 1.000000e+00 : f32
    %77 = vector.broadcast %cst_40 : f32 to vector<8x128xf32>
    %78 = arith.addf %77, %76 : vector<8x128xf32>
    %79 = arith.divf %77, %78 : vector<8x128xf32>
    %80 = arith.mulf %71, %59 : vector<8x128xf32>
    %81 = arith.mulf %65, %73 : vector<8x128xf32>
    %82 = arith.addf %80, %81 : vector<8x128xf32>
    %83 = math.tanh %82 : vector<8x128xf32>
    %84 = arith.mulf %79, %83 : vector<8x128xf32>
    %c0_i32 = arith.constant 0 : i32
    %85 = vector.broadcast %c0_i32 : i32 to vector<8x128xi32>
    %86 = arith.cmpi sgt, %17, %85 : vector<8x128xi32>
    %c7_i32 = arith.constant 7 : i32
    %87 = vector.broadcast %c7_i32 : i32 to vector<8x128xi32>
    %88 = arith.cmpi sgt, %17, %87 : vector<8x128xi32>
    %c0_41 = arith.constant 0 : index
    %c0_42 = arith.constant 0 : index
    %89 = vector.load %arg11[%c0_41, %c0_42] : memref<8x128xf32, #tpu.memory_space<vmem>>, vector<8x128xf32>
    %90 = arith.select %86, %58, %89 : vector<8x128xi1>, vector<8x128xf32>
    %c0_43 = arith.constant 0 : index
    %c0_44 = arith.constant 0 : index
    %91 = vector.load %arg13[%c0_43, %c0_44] : memref<8x128xf32, #tpu.memory_space<vmem>>, vector<8x128xf32>
    %92 = arith.select %88, %84, %91 : vector<8x128xi1>, vector<8x128xf32>
    %c0_45 = arith.constant 0 : index
    %c0_46 = arith.constant 0 : index
    %93 = vector.load %arg12[%c0_45, %c0_46] : memref<8x128xf32, #tpu.memory_space<vmem>>, vector<8x128xf32>
    %94 = arith.select %86, %56, %93 : vector<8x128xi1>, vector<8x128xf32>
    %c0_47 = arith.constant 0 : index
    %c0_48 = arith.constant 0 : index
    %95 = vector.load %arg12[%c0_47, %c0_48] : memref<8x128xf32, #tpu.memory_space<vmem>>, vector<8x128xf32>
    tpu.vector_store %arg12[%c0_47, %c0_48], %94 {strides = array<i32>} : memref<8x128xf32, #tpu.memory_space<vmem>>, vector<8x128xf32>,
    %c0_49 = arith.constant 0 : index
    %c0_50 = arith.constant 0 : index
    %96 = vector.load %arg14[%c0_49, %c0_50] : memref<8x128xf32, #tpu.memory_space<vmem>>, vector<8x128xf32>
    %97 = arith.select %88, %82, %96 : vector<8x128xi1>, vector<8x128xf32>
    %c0_51 = arith.constant 0 : index
    %c0_52 = arith.constant 0 : index
    %98 = vector.load %arg14[%c0_51, %c0_52] : memref<8x128xf32, #tpu.memory_space<vmem>>, vector<8x128xf32>
    tpu.vector_store %arg14[%c0_51, %c0_52], %97 {strides = array<i32>} : memref<8x128xf32, #tpu.memory_space<vmem>>, vector<8x128xf32>,
    %c0_53 = arith.constant 0 : index
    %c0_54 = arith.constant 0 : index
    %99 = vector.load %arg11[%c0_53, %c0_54] : memref<8x128xf32, #tpu.memory_space<vmem>>, vector<8x128xf32>
    tpu.vector_store %arg11[%c0_53, %c0_54], %90 {strides = array<i32>} : memref<8x128xf32, #tpu.memory_space<vmem>>, vector<8x128xf32>,
    %c0_55 = arith.constant 0 : index
    %c0_56 = arith.constant 0 : index
    %100 = vector.load %arg13[%c0_55, %c0_56] : memref<8x128xf32, #tpu.memory_space<vmem>>, vector<8x128xf32>
    tpu.vector_store %arg13[%c0_55, %c0_56], %92 {strides = array<i32>} : memref<8x128xf32, #tpu.memory_space<vmem>>, vector<8x128xf32>,
    %101 = arith.truncf %90 : vector<8x128xf32> to vector<8x128xbf16>
    %c0_57 = arith.constant 0 : index
    %c0_58 = arith.constant 0 : index
    %102 = vector.load %arg10[%c0_57, %c0_58] : memref<8x256xbf16, #tpu.memory_space<vmem>>, vector<8x128xbf16>
    tpu.vector_store %arg10[%c0_57, %c0_58], %101 {strides = array<i32>} : memref<8x256xbf16, #tpu.memory_space<vmem>>, vector<8x128xbf16>,
    %103 = arith.truncf %92 : vector<8x128xf32> to vector<8x128xbf16>
    %c0_59 = arith.constant 0 : index
    %c128 = arith.constant 128 : index
    %104 = vector.load %arg10[%c0_59, %c128] : memref<8x256xbf16, #tpu.memory_space<vmem>>, vector<8x128xbf16>
    tpu.vector_store %arg10[%c0_59, %c128], %103 {strides = array<i32>} : memref<8x256xbf16, #tpu.memory_space<vmem>>, vector<8x128xbf16>,
    %cst_60 = arith.constant 0.000000e+00 : f32
    %105 = vector.broadcast %cst_60 : f32 to vector<8x128xf32>
    %106 = arith.select %86, %58, %105 : vector<8x128xi1>, vector<8x128xf32>
    %cst_61 = arith.constant 0.000000e+00 : f32
    %107 = vector.broadcast %cst_61 : f32 to vector<8x128xf32>
    %108 = arith.select %88, %84, %107 : vector<8x128xi1>, vector<8x128xf32>
    %c0_62 = arith.constant 0 : index
    %c0_63 = arith.constant 0 : index
    %c0_64 = arith.constant 0 : index
    %109 = vector.load %arg6[%c0_62, %c0_63, %c0_64] : memref<8x8x128xf32, #tpu.memory_space<vmem>>, vector<1x8x128xf32>
    %110 = vector.shape_cast %109 : vector<1x8x128xf32> to vector<8x128xf32>
    %111 = vector.shape_cast %106 : vector<8x128xf32> to vector<1x8x128xf32>
    tpu.vector_store %arg6[%c0_62, %c0_63, %c0_64], %111 {strides = array<i32>} : memref<8x8x128xf32, #tpu.memory_space<vmem>>, vector<1x8x128xf32>,
    %c7 = arith.constant 7 : index
    %c0_65 = arith.constant 0 : index
    %c0_66 = arith.constant 0 : index
    %112 = vector.load %arg6[%c7, %c0_65, %c0_66] : memref<8x8x128xf32, #tpu.memory_space<vmem>>, vector<1x8x128xf32>
    %113 = vector.shape_cast %112 : vector<1x8x128xf32> to vector<8x128xf32>
    %114 = vector.shape_cast %108 : vector<8x128xf32> to vector<1x8x128xf32>
    tpu.vector_store %arg6[%c7, %c0_65, %c0_66], %114 {strides = array<i32>} : memref<8x8x128xf32, #tpu.memory_space<vmem>>, vector<1x8x128xf32>,
    %c0_67 = arith.constant 0 : index
    %c0_68 = arith.constant 0 : index
    %115 = vector.load %arg10[%c0_67, %c0_68] : memref<8x256xbf16, #tpu.memory_space<vmem>>, vector<8x256xbf16>
    %cst_69 = arith.constant dense<0.000000e+00> : vector<8x1024xf32>
    %116 = tpu.matmul %115, %18, %cst_69 {dimension_numbers = #tpu.dot_dimension_numbers<[1], [0], [0], [1], [0, 0, 1, 1], [], []>} : vector<8x256xbf16>, vector<256x1024xbf16>, vector<8x1024xf32> -> vector<8x1024xf32>
    %c8 = arith.constant 8 : index
    %c0_70 = arith.constant 0 : index
    %117 = vector.load %arg9[%c8, %c0_70] : memref<64x1024xbf16, #tpu.memory_space<vmem>>, vector<8x512xbf16>
    %118 = arith.extf %117 : vector<8x512xbf16> to vector<8x512xf32>
    %119 = vector.broadcast %13 : vector<1x512xf32> to vector<8x512xf32>
    %120 = arith.addf %118, %119 : vector<8x512xf32>
    %121 = vector.extract_strided_slice %116 {offsets = [0, 0], sizes = [8, 512], strides = [1, 1]} : vector<8x1024xf32> to vector<8x512xf32>
    %122 = arith.addf %120, %121 : vector<8x512xf32>
    %c48 = arith.constant 48 : index
    %c512_71 = arith.constant 512 : index
    %123 = vector.load %arg9[%c48, %c512_71] : memref<64x1024xbf16, #tpu.memory_space<vmem>>, vector<8x512xbf16>
    %124 = arith.extf %123 : vector<8x512xbf16> to vector<8x512xf32>
    %125 = vector.broadcast %14 : vector<1x512xf32> to vector<8x512xf32>
    %126 = arith.addf %124, %125 : vector<8x512xf32>
    %127 = vector.extract_strided_slice %116 {offsets = [0, 512], sizes = [8, 512], strides = [1, 1]} : vector<8x1024xf32> to vector<8x512xf32>
    %128 = arith.addf %126, %127 : vector<8x512xf32>
    %c0_72 = arith.constant 0 : index
    %c0_73 = arith.constant 0 : index
    %129 = vector.load %arg12[%c0_72, %c0_73] : memref<8x128xf32, #tpu.memory_space<vmem>>, vector<8x128xf32>
    %130 = vector.extract_strided_slice %122 {offsets = [0, 0], sizes = [8, 128], strides = [1, 1]} : vector<8x512xf32> to vector<8x128xf32>
    %131 = arith.negf %130 : vector<8x128xf32>
    %132 = math.exp %131 : vector<8x128xf32>
    %cst_74 = arith.constant 1.000000e+00 : f32
    %133 = vector.broadcast %cst_74 : f32 to vector<8x128xf32>
    %134 = arith.addf %133, %132 : vector<8x128xf32>
    %135 = arith.divf %133, %134 : vector<8x128xf32>
    %136 = vector.extract_strided_slice %122 {offsets = [0, 128], sizes = [8, 128], strides = [1, 1]} : vector<8x512xf32> to vector<8x128xf32>
    %137 = arith.negf %136 : vector<8x128xf32>
    %138 = math.exp %137 : vector<8x128xf32>
    %cst_75 = arith.constant 1.000000e+00 : f32
    %139 = vector.broadcast %cst_75 : f32 to vector<8x128xf32>
    %140 = arith.addf %139, %138 : vector<8x128xf32>
    %141 = arith.divf %139, %140 : vector<8x128xf32>
    %142 = vector.extract_strided_slice %122 {offsets = [0, 256], sizes = [8, 128], strides = [1, 1]} : vector<8x512xf32> to vector<8x128xf32>
    %143 = math.tanh %142 : vector<8x128xf32>
    %144 = vector.extract_strided_slice %122 {offsets = [0, 384], sizes = [8, 128], strides = [1, 1]} : vector<8x512xf32> to vector<8x128xf32>
    %145 = arith.negf %144 : vector<8x128xf32>
    %146 = math.exp %145 : vector<8x128xf32>
    %cst_76 = arith.constant 1.000000e+00 : f32
    %147 = vector.broadcast %cst_76 : f32 to vector<8x128xf32>
    %148 = arith.addf %147, %146 : vector<8x128xf32>
    %149 = arith.divf %147, %148 : vector<8x128xf32>
    %150 = arith.mulf %141, %129 : vector<8x128xf32>
    %151 = arith.mulf %135, %143 : vector<8x128xf32>
    %152 = arith.addf %150, %151 : vector<8x128xf32>
    %153 = math.tanh %152 : vector<8x128xf32>
    %154 = arith.mulf %149, %153 : vector<8x128xf32>
    %c0_77 = arith.constant 0 : index
    %c0_78 = arith.constant 0 : index
    %155 = vector.load %arg14[%c0_77, %c0_78] : memref<8x128xf32, #tpu.memory_space<vmem>>, vector<8x128xf32>
    %156 = vector.extract_strided_slice %128 {offsets = [0, 0], sizes = [8, 128], strides = [1, 1]} : vector<8x512xf32> to vector<8x128xf32>
    %157 = arith.negf %156 : vector<8x128xf32>
    %158 = math.exp %157 : vector<8x128xf32>
    %cst_79 = arith.constant 1.000000e+00 : f32
    %159 = vector.broadcast %cst_79 : f32 to vector<8x128xf32>
    %160 = arith.addf %159, %158 : vector<8x128xf32>
    %161 = arith.divf %159, %160 : vector<8x128xf32>
    %162 = vector.extract_strided_slice %128 {offsets = [0, 128], sizes = [8, 128], strides = [1, 1]} : vector<8x512xf32> to vector<8x128xf32>
    %163 = arith.negf %162 : vector<8x128xf32>
    %164 = math.exp %163 : vector<8x128xf32>
    %cst_80 = arith.constant 1.000000e+00 : f32
    %165 = vector.broadcast %cst_80 : f32 to vector<8x128xf32>
    %166 = arith.addf %165, %164 : vector<8x128xf32>
    %167 = arith.divf %165, %166 : vector<8x128xf32>
    %168 = vector.extract_strided_slice %128 {offsets = [0, 256], sizes = [8, 128], strides = [1, 1]} : vector<8x512xf32> to vector<8x128xf32>
    %169 = math.tanh %168 : vector<8x128xf32>
    %170 = vector.extract_strided_slice %128 {offsets = [0, 384], sizes = [8, 128], strides = [1, 1]} : vector<8x512xf32> to vector<8x128xf32>
    %171 = arith.negf %170 : vector<8x128xf32>
    %172 = math.exp %171 : vector<8x128xf32>
    %cst_81 = arith.constant 1.000000e+00 : f32
    %173 = vector.broadcast %cst_81 : f32 to vector<8x128xf32>
    %174 = arith.addf %173, %172 : vector<8x128xf32>
    %175 = arith.divf %173, %174 : vector<8x128xf32>
    %176 = arith.mulf %167, %155 : vector<8x128xf32>
    %177 = arith.mulf %161, %169 : vector<8x128xf32>
    %178 = arith.addf %176, %177 : vector<8x128xf32>
    %179 = math.tanh %178 : vector<8x128xf32>
    %180 = arith.mulf %175, %179 : vector<8x128xf32>
    %c1_i32 = arith.constant 1 : i32
    %181 = vector.broadcast %c1_i32 : i32 to vector<8x128xi32>
    %182 = arith.cmpi sgt, %17, %181 : vector<8x128xi32>
    %c6_i32 = arith.constant 6 : i32
    %183 = vector.broadcast %c6_i32 : i32 to vector<8x128xi32>
    %184 = arith.cmpi sgt, %17, %183 : vector<8x128xi32>
    %c0_82 = arith.constant 0 : index
    %c0_83 = arith.constant 0 : index
    %185 = vector.load %arg11[%c0_82, %c0_83] : memref<8x128xf32, #tpu.memory_space<vmem>>, vector<8x128xf32>
    %186 = arith.select %182, %154, %185 : vector<8x128xi1>, vector<8x128xf32>
    %c0_84 = arith.constant 0 : index
    %c0_85 = arith.constant 0 : index
    %187 = vector.load %arg13[%c0_84, %c0_85] : memref<8x128xf32, #tpu.memory_space<vmem>>, vector<8x128xf32>
    %188 = arith.select %184, %180, %187 : vector<8x128xi1>, vector<8x128xf32>
    %c0_86 = arith.constant 0 : index
    %c0_87 = arith.constant 0 : index
    %189 = vector.load %arg12[%c0_86, %c0_87] : memref<8x128xf32, #tpu.memory_space<vmem>>, vector<8x128xf32>
    %190 = arith.select %182, %152, %189 : vector<8x128xi1>, vector<8x128xf32>
    %c0_88 = arith.constant 0 : index
    %c0_89 = arith.constant 0 : index
    %191 = vector.load %arg12[%c0_88, %c0_89] : memref<8x128xf32, #tpu.memory_space<vmem>>, vector<8x128xf32>
    tpu.vector_store %arg12[%c0_88, %c0_89], %190 {strides = array<i32>} : memref<8x128xf32, #tpu.memory_space<vmem>>, vector<8x128xf32>,
    %c0_90 = arith.constant 0 : index
    %c0_91 = arith.constant 0 : index
    %192 = vector.load %arg14[%c0_90, %c0_91] : memref<8x128xf32, #tpu.memory_space<vmem>>, vector<8x128xf32>
    %193 = arith.select %184, %178, %192 : vector<8x128xi1>, vector<8x128xf32>
    %c0_92 = arith.constant 0 : index
    %c0_93 = arith.constant 0 : index
    %194 = vector.load %arg14[%c0_92, %c0_93] : memref<8x128xf32, #tpu.memory_space<vmem>>, vector<8x128xf32>
    tpu.vector_store %arg14[%c0_92, %c0_93], %193 {strides = array<i32>} : memref<8x128xf32, #tpu.memory_space<vmem>>, vector<8x128xf32>,
    %c0_94 = arith.constant 0 : index
    %c0_95 = arith.constant 0 : index
    %195 = vector.load %arg11[%c0_94, %c0_95] : memref<8x128xf32, #tpu.memory_space<vmem>>, vector<8x128xf32>
    tpu.vector_store %arg11[%c0_94, %c0_95], %186 {strides = array<i32>} : memref<8x128xf32, #tpu.memory_space<vmem>>, vector<8x128xf32>,
    %c0_96 = arith.constant 0 : index
    %c0_97 = arith.constant 0 : index
    %196 = vector.load %arg13[%c0_96, %c0_97] : memref<8x128xf32, #tpu.memory_space<vmem>>, vector<8x128xf32>
    tpu.vector_store %arg13[%c0_96, %c0_97], %188 {strides = array<i32>} : memref<8x128xf32, #tpu.memory_space<vmem>>, vector<8x128xf32>,
    %197 = arith.truncf %186 : vector<8x128xf32> to vector<8x128xbf16>
    %c0_98 = arith.constant 0 : index
    %c0_99 = arith.constant 0 : index
    %198 = vector.load %arg10[%c0_98, %c0_99] : memref<8x256xbf16, #tpu.memory_space<vmem>>, vector<8x128xbf16>
    tpu.vector_store %arg10[%c0_98, %c0_99], %197 {strides = array<i32>} : memref<8x256xbf16, #tpu.memory_space<vmem>>, vector<8x128xbf16>,
    %199 = arith.truncf %188 : vector<8x128xf32> to vector<8x128xbf16>
    %c0_100 = arith.constant 0 : index
    %c128_101 = arith.constant 128 : index
    %200 = vector.load %arg10[%c0_100, %c128_101] : memref<8x256xbf16, #tpu.memory_space<vmem>>, vector<8x128xbf16>
    tpu.vector_store %arg10[%c0_100, %c128_101], %199 {strides = array<i32>} : memref<8x256xbf16, #tpu.memory_space<vmem>>, vector<8x128xbf16>,
    %cst_102 = arith.constant 0.000000e+00 : f32
    %201 = vector.broadcast %cst_102 : f32 to vector<8x128xf32>
    %202 = arith.select %182, %154, %201 : vector<8x128xi1>, vector<8x128xf32>
    %cst_103 = arith.constant 0.000000e+00 : f32
    %203 = vector.broadcast %cst_103 : f32 to vector<8x128xf32>
    %204 = arith.select %184, %180, %203 : vector<8x128xi1>, vector<8x128xf32>
    %c1 = arith.constant 1 : index
    %c0_104 = arith.constant 0 : index
    %c0_105 = arith.constant 0 : index
    %205 = vector.load %arg6[%c1, %c0_104, %c0_105] : memref<8x8x128xf32, #tpu.memory_space<vmem>>, vector<1x8x128xf32>
    %206 = vector.shape_cast %205 : vector<1x8x128xf32> to vector<8x128xf32>
    %207 = vector.shape_cast %202 : vector<8x128xf32> to vector<1x8x128xf32>
    tpu.vector_store %arg6[%c1, %c0_104, %c0_105], %207 {strides = array<i32>} : memref<8x8x128xf32, #tpu.memory_space<vmem>>, vector<1x8x128xf32>,
    %c6 = arith.constant 6 : index
    %c0_106 = arith.constant 0 : index
    %c0_107 = arith.constant 0 : index
    %208 = vector.load %arg6[%c6, %c0_106, %c0_107] : memref<8x8x128xf32, #tpu.memory_space<vmem>>, vector<1x8x128xf32>
    %209 = vector.shape_cast %208 : vector<1x8x128xf32> to vector<8x128xf32>
    %210 = vector.shape_cast %204 : vector<8x128xf32> to vector<1x8x128xf32>
    tpu.vector_store %arg6[%c6, %c0_106, %c0_107], %210 {strides = array<i32>} : memref<8x8x128xf32, #tpu.memory_space<vmem>>, vector<1x8x128xf32>,
    %c0_108 = arith.constant 0 : index
    %c0_109 = arith.constant 0 : index
    %211 = vector.load %arg10[%c0_108, %c0_109] : memref<8x256xbf16, #tpu.memory_space<vmem>>, vector<8x256xbf16>
    %cst_110 = arith.constant dense<0.000000e+00> : vector<8x1024xf32>
    %212 = tpu.matmul %211, %18, %cst_110 {dimension_numbers = #tpu.dot_dimension_numbers<[1], [0], [0], [1], [0, 0, 1, 1], [], []>} : vector<8x256xbf16>, vector<256x1024xbf16>, vector<8x1024xf32> -> vector<8x1024xf32>
    %c16 = arith.constant 16 : index
    %c0_111 = arith.constant 0 : index
    %213 = vector.load %arg9[%c16, %c0_111] : memref<64x1024xbf16, #tpu.memory_space<vmem>>, vector<8x512xbf16>
    %214 = arith.extf %213 : vector<8x512xbf16> to vector<8x512xf32>
    %215 = vector.broadcast %13 : vector<1x512xf32> to vector<8x512xf32>
    %216 = arith.addf %214, %215 : vector<8x512xf32>
    %217 = vector.extract_strided_slice %212 {offsets = [0, 0], sizes = [8, 512], strides = [1, 1]} : vector<8x1024xf32> to vector<8x512xf32>
    %218 = arith.addf %216, %217 : vector<8x512xf32>
    %c40 = arith.constant 40 : index
    %c512_112 = arith.constant 512 : index
    %219 = vector.load %arg9[%c40, %c512_112] : memref<64x1024xbf16, #tpu.memory_space<vmem>>, vector<8x512xbf16>
    %220 = arith.extf %219 : vector<8x512xbf16> to vector<8x512xf32>
    %221 = vector.broadcast %14 : vector<1x512xf32> to vector<8x512xf32>
    %222 = arith.addf %220, %221 : vector<8x512xf32>
    %223 = vector.extract_strided_slice %212 {offsets = [0, 512], sizes = [8, 512], strides = [1, 1]} : vector<8x1024xf32> to vector<8x512xf32>
    %224 = arith.addf %222, %223 : vector<8x512xf32>
    %c0_113 = arith.constant 0 : index
    %c0_114 = arith.constant 0 : index
    %225 = vector.load %arg12[%c0_113, %c0_114] : memref<8x128xf32, #tpu.memory_space<vmem>>, vector<8x128xf32>
    %226 = vector.extract_strided_slice %218 {offsets = [0, 0], sizes = [8, 128], strides = [1, 1]} : vector<8x512xf32> to vector<8x128xf32>
    %227 = arith.negf %226 : vector<8x128xf32>
    %228 = math.exp %227 : vector<8x128xf32>
    %cst_115 = arith.constant 1.000000e+00 : f32
    %229 = vector.broadcast %cst_115 : f32 to vector<8x128xf32>
    %230 = arith.addf %229, %228 : vector<8x128xf32>
    %231 = arith.divf %229, %230 : vector<8x128xf32>
    %232 = vector.extract_strided_slice %218 {offsets = [0, 128], sizes = [8, 128], strides = [1, 1]} : vector<8x512xf32> to vector<8x128xf32>
    %233 = arith.negf %232 : vector<8x128xf32>
    %234 = math.exp %233 : vector<8x128xf32>
    %cst_116 = arith.constant 1.000000e+00 : f32
    %235 = vector.broadcast %cst_116 : f32 to vector<8x128xf32>
    %236 = arith.addf %235, %234 : vector<8x128xf32>
    %237 = arith.divf %235, %236 : vector<8x128xf32>
    %238 = vector.extract_strided_slice %218 {offsets = [0, 256], sizes = [8, 128], strides = [1, 1]} : vector<8x512xf32> to vector<8x128xf32>
    %239 = math.tanh %238 : vector<8x128xf32>
    %240 = vector.extract_strided_slice %218 {offsets = [0, 384], sizes = [8, 128], strides = [1, 1]} : vector<8x512xf32> to vector<8x128xf32>
    %241 = arith.negf %240 : vector<8x128xf32>
    %242 = math.exp %241 : vector<8x128xf32>
    %cst_117 = arith.constant 1.000000e+00 : f32
    %243 = vector.broadcast %cst_117 : f32 to vector<8x128xf32>
    %244 = arith.addf %243, %242 : vector<8x128xf32>
    %245 = arith.divf %243, %244 : vector<8x128xf32>
    %246 = arith.mulf %237, %225 : vector<8x128xf32>
    %247 = arith.mulf %231, %239 : vector<8x128xf32>
    %248 = arith.addf %246, %247 : vector<8x128xf32>
    %249 = math.tanh %248 : vector<8x128xf32>
    %250 = arith.mulf %245, %249 : vector<8x128xf32>
    %c0_118 = arith.constant 0 : index
    %c0_119 = arith.constant 0 : index
    %251 = vector.load %arg14[%c0_118, %c0_119] : memref<8x128xf32, #tpu.memory_space<vmem>>, vector<8x128xf32>
    %252 = vector.extract_strided_slice %224 {offsets = [0, 0], sizes = [8, 128], strides = [1, 1]} : vector<8x512xf32> to vector<8x128xf32>
    %253 = arith.negf %252 : vector<8x128xf32>
    %254 = math.exp %253 : vector<8x128xf32>
    %cst_120 = arith.constant 1.000000e+00 : f32
    %255 = vector.broadcast %cst_120 : f32 to vector<8x128xf32>
    %256 = arith.addf %255, %254 : vector<8x128xf32>
    %257 = arith.divf %255, %256 : vector<8x128xf32>
    %258 = vector.extract_strided_slice %224 {offsets = [0, 128], sizes = [8, 128], strides = [1, 1]} : vector<8x512xf32> to vector<8x128xf32>
    %259 = arith.negf %258 : vector<8x128xf32>
    %260 = math.exp %259 : vector<8x128xf32>
    %cst_121 = arith.constant 1.000000e+00 : f32
    %261 = vector.broadcast %cst_121 : f32 to vector<8x128xf32>
    %262 = arith.addf %261, %260 : vector<8x128xf32>
    %263 = arith.divf %261, %262 : vector<8x128xf32>
    %264 = vector.extract_strided_slice %224 {offsets = [0, 256], sizes = [8, 128], strides = [1, 1]} : vector<8x512xf32> to vector<8x128xf32>
    %265 = math.tanh %264 : vector<8x128xf32>
    %266 = vector.extract_strided_slice %224 {offsets = [0, 384], sizes = [8, 128], strides = [1, 1]} : vector<8x512xf32> to vector<8x128xf32>
    %267 = arith.negf %266 : vector<8x128xf32>
    %268 = math.exp %267 : vector<8x128xf32>
    %cst_122 = arith.constant 1.000000e+00 : f32
    %269 = vector.broadcast %cst_122 : f32 to vector<8x128xf32>
    %270 = arith.addf %269, %268 : vector<8x128xf32>
    %271 = arith.divf %269, %270 : vector<8x128xf32>
    %272 = arith.mulf %263, %251 : vector<8x128xf32>
    %273 = arith.mulf %257, %265 : vector<8x128xf32>
    %274 = arith.addf %272, %273 : vector<8x128xf32>
    %275 = math.tanh %274 : vector<8x128xf32>
    %276 = arith.mulf %271, %275 : vector<8x128xf32>
    %c2_i32 = arith.constant 2 : i32
    %277 = vector.broadcast %c2_i32 : i32 to vector<8x128xi32>
    %278 = arith.cmpi sgt, %17, %277 : vector<8x128xi32>
    %c5_i32 = arith.constant 5 : i32
    %279 = vector.broadcast %c5_i32 : i32 to vector<8x128xi32>
    %280 = arith.cmpi sgt, %17, %279 : vector<8x128xi32>
    %c0_123 = arith.constant 0 : index
    %c0_124 = arith.constant 0 : index
    %281 = vector.load %arg11[%c0_123, %c0_124] : memref<8x128xf32, #tpu.memory_space<vmem>>, vector<8x128xf32>
    %282 = arith.select %278, %250, %281 : vector<8x128xi1>, vector<8x128xf32>
    %c0_125 = arith.constant 0 : index
    %c0_126 = arith.constant 0 : index
    %283 = vector.load %arg13[%c0_125, %c0_126] : memref<8x128xf32, #tpu.memory_space<vmem>>, vector<8x128xf32>
    %284 = arith.select %280, %276, %283 : vector<8x128xi1>, vector<8x128xf32>
    %c0_127 = arith.constant 0 : index
    %c0_128 = arith.constant 0 : index
    %285 = vector.load %arg12[%c0_127, %c0_128] : memref<8x128xf32, #tpu.memory_space<vmem>>, vector<8x128xf32>
    %286 = arith.select %278, %248, %285 : vector<8x128xi1>, vector<8x128xf32>
    %c0_129 = arith.constant 0 : index
    %c0_130 = arith.constant 0 : index
    %287 = vector.load %arg12[%c0_129, %c0_130] : memref<8x128xf32, #tpu.memory_space<vmem>>, vector<8x128xf32>
    tpu.vector_store %arg12[%c0_129, %c0_130], %286 {strides = array<i32>} : memref<8x128xf32, #tpu.memory_space<vmem>>, vector<8x128xf32>,
    %c0_131 = arith.constant 0 : index
    %c0_132 = arith.constant 0 : index
    %288 = vector.load %arg14[%c0_131, %c0_132] : memref<8x128xf32, #tpu.memory_space<vmem>>, vector<8x128xf32>
    %289 = arith.select %280, %274, %288 : vector<8x128xi1>, vector<8x128xf32>
    %c0_133 = arith.constant 0 : index
    %c0_134 = arith.constant 0 : index
    %290 = vector.load %arg14[%c0_133, %c0_134] : memref<8x128xf32, #tpu.memory_space<vmem>>, vector<8x128xf32>
    tpu.vector_store %arg14[%c0_133, %c0_134], %289 {strides = array<i32>} : memref<8x128xf32, #tpu.memory_space<vmem>>, vector<8x128xf32>,
    %c0_135 = arith.constant 0 : index
    %c0_136 = arith.constant 0 : index
    %291 = vector.load %arg11[%c0_135, %c0_136] : memref<8x128xf32, #tpu.memory_space<vmem>>, vector<8x128xf32>
    tpu.vector_store %arg11[%c0_135, %c0_136], %282 {strides = array<i32>} : memref<8x128xf32, #tpu.memory_space<vmem>>, vector<8x128xf32>,
    %c0_137 = arith.constant 0 : index
    %c0_138 = arith.constant 0 : index
    %292 = vector.load %arg13[%c0_137, %c0_138] : memref<8x128xf32, #tpu.memory_space<vmem>>, vector<8x128xf32>
    tpu.vector_store %arg13[%c0_137, %c0_138], %284 {strides = array<i32>} : memref<8x128xf32, #tpu.memory_space<vmem>>, vector<8x128xf32>,
    %293 = arith.truncf %282 : vector<8x128xf32> to vector<8x128xbf16>
    %c0_139 = arith.constant 0 : index
    %c0_140 = arith.constant 0 : index
    %294 = vector.load %arg10[%c0_139, %c0_140] : memref<8x256xbf16, #tpu.memory_space<vmem>>, vector<8x128xbf16>
    tpu.vector_store %arg10[%c0_139, %c0_140], %293 {strides = array<i32>} : memref<8x256xbf16, #tpu.memory_space<vmem>>, vector<8x128xbf16>,
    %295 = arith.truncf %284 : vector<8x128xf32> to vector<8x128xbf16>
    %c0_141 = arith.constant 0 : index
    %c128_142 = arith.constant 128 : index
    %296 = vector.load %arg10[%c0_141, %c128_142] : memref<8x256xbf16, #tpu.memory_space<vmem>>, vector<8x128xbf16>
    tpu.vector_store %arg10[%c0_141, %c128_142], %295 {strides = array<i32>} : memref<8x256xbf16, #tpu.memory_space<vmem>>, vector<8x128xbf16>,
    %cst_143 = arith.constant 0.000000e+00 : f32
    %297 = vector.broadcast %cst_143 : f32 to vector<8x128xf32>
    %298 = arith.select %278, %250, %297 : vector<8x128xi1>, vector<8x128xf32>
    %cst_144 = arith.constant 0.000000e+00 : f32
    %299 = vector.broadcast %cst_144 : f32 to vector<8x128xf32>
    %300 = arith.select %280, %276, %299 : vector<8x128xi1>, vector<8x128xf32>
    %c2 = arith.constant 2 : index
    %c0_145 = arith.constant 0 : index
    %c0_146 = arith.constant 0 : index
    %301 = vector.load %arg6[%c2, %c0_145, %c0_146] : memref<8x8x128xf32, #tpu.memory_space<vmem>>, vector<1x8x128xf32>
    %302 = vector.shape_cast %301 : vector<1x8x128xf32> to vector<8x128xf32>
    %303 = vector.shape_cast %298 : vector<8x128xf32> to vector<1x8x128xf32>
    tpu.vector_store %arg6[%c2, %c0_145, %c0_146], %303 {strides = array<i32>} : memref<8x8x128xf32, #tpu.memory_space<vmem>>, vector<1x8x128xf32>,
    %c5 = arith.constant 5 : index
    %c0_147 = arith.constant 0 : index
    %c0_148 = arith.constant 0 : index
    %304 = vector.load %arg6[%c5, %c0_147, %c0_148] : memref<8x8x128xf32, #tpu.memory_space<vmem>>, vector<1x8x128xf32>
    %305 = vector.shape_cast %304 : vector<1x8x128xf32> to vector<8x128xf32>
    %306 = vector.shape_cast %300 : vector<8x128xf32> to vector<1x8x128xf32>
    tpu.vector_store %arg6[%c5, %c0_147, %c0_148], %306 {strides = array<i32>} : memref<8x8x128xf32, #tpu.memory_space<vmem>>, vector<1x8x128xf32>,
    %c0_149 = arith.constant 0 : index
    %c0_150 = arith.constant 0 : index
    %307 = vector.load %arg10[%c0_149, %c0_150] : memref<8x256xbf16, #tpu.memory_space<vmem>>, vector<8x256xbf16>
    %cst_151 = arith.constant dense<0.000000e+00> : vector<8x1024xf32>
    %308 = tpu.matmul %307, %18, %cst_151 {dimension_numbers = #tpu.dot_dimension_numbers<[1], [0], [0], [1], [0, 0, 1, 1], [], []>} : vector<8x256xbf16>, vector<256x1024xbf16>, vector<8x1024xf32> -> vector<8x1024xf32>
    %c24 = arith.constant 24 : index
    %c0_152 = arith.constant 0 : index
    %309 = vector.load %arg9[%c24, %c0_152] : memref<64x1024xbf16, #tpu.memory_space<vmem>>, vector<8x512xbf16>
    %310 = arith.extf %309 : vector<8x512xbf16> to vector<8x512xf32>
    %311 = vector.broadcast %13 : vector<1x512xf32> to vector<8x512xf32>
    %312 = arith.addf %310, %311 : vector<8x512xf32>
    %313 = vector.extract_strided_slice %308 {offsets = [0, 0], sizes = [8, 512], strides = [1, 1]} : vector<8x1024xf32> to vector<8x512xf32>
    %314 = arith.addf %312, %313 : vector<8x512xf32>
    %c32 = arith.constant 32 : index
    %c512_153 = arith.constant 512 : index
    %315 = vector.load %arg9[%c32, %c512_153] : memref<64x1024xbf16, #tpu.memory_space<vmem>>, vector<8x512xbf16>
    %316 = arith.extf %315 : vector<8x512xbf16> to vector<8x512xf32>
    %317 = vector.broadcast %14 : vector<1x512xf32> to vector<8x512xf32>
    %318 = arith.addf %316, %317 : vector<8x512xf32>
    %319 = vector.extract_strided_slice %308 {offsets = [0, 512], sizes = [8, 512], strides = [1, 1]} : vector<8x1024xf32> to vector<8x512xf32>
    %320 = arith.addf %318, %319 : vector<8x512xf32>
    %c0_154 = arith.constant 0 : index
    %c0_155 = arith.constant 0 : index
    %321 = vector.load %arg12[%c0_154, %c0_155] : memref<8x128xf32, #tpu.memory_space<vmem>>, vector<8x128xf32>
    %322 = vector.extract_strided_slice %314 {offsets = [0, 0], sizes = [8, 128], strides = [1, 1]} : vector<8x512xf32> to vector<8x128xf32>
    %323 = arith.negf %322 : vector<8x128xf32>
    %324 = math.exp %323 : vector<8x128xf32>
    %cst_156 = arith.constant 1.000000e+00 : f32
    %325 = vector.broadcast %cst_156 : f32 to vector<8x128xf32>
    %326 = arith.addf %325, %324 : vector<8x128xf32>
    %327 = arith.divf %325, %326 : vector<8x128xf32>
    %328 = vector.extract_strided_slice %314 {offsets = [0, 128], sizes = [8, 128], strides = [1, 1]} : vector<8x512xf32> to vector<8x128xf32>
    %329 = arith.negf %328 : vector<8x128xf32>
    %330 = math.exp %329 : vector<8x128xf32>
    %cst_157 = arith.constant 1.000000e+00 : f32
    %331 = vector.broadcast %cst_157 : f32 to vector<8x128xf32>
    %332 = arith.addf %331, %330 : vector<8x128xf32>
    %333 = arith.divf %331, %332 : vector<8x128xf32>
    %334 = vector.extract_strided_slice %314 {offsets = [0, 256], sizes = [8, 128], strides = [1, 1]} : vector<8x512xf32> to vector<8x128xf32>
    %335 = math.tanh %334 : vector<8x128xf32>
    %336 = vector.extract_strided_slice %314 {offsets = [0, 384], sizes = [8, 128], strides = [1, 1]} : vector<8x512xf32> to vector<8x128xf32>
    %337 = arith.negf %336 : vector<8x128xf32>
    %338 = math.exp %337 : vector<8x128xf32>
    %cst_158 = arith.constant 1.000000e+00 : f32
    %339 = vector.broadcast %cst_158 : f32 to vector<8x128xf32>
    %340 = arith.addf %339, %338 : vector<8x128xf32>
    %341 = arith.divf %339, %340 : vector<8x128xf32>
    %342 = arith.mulf %333, %321 : vector<8x128xf32>
    %343 = arith.mulf %327, %335 : vector<8x128xf32>
    %344 = arith.addf %342, %343 : vector<8x128xf32>
    %345 = math.tanh %344 : vector<8x128xf32>
    %346 = arith.mulf %341, %345 : vector<8x128xf32>
    %c0_159 = arith.constant 0 : index
    %c0_160 = arith.constant 0 : index
    %347 = vector.load %arg14[%c0_159, %c0_160] : memref<8x128xf32, #tpu.memory_space<vmem>>, vector<8x128xf32>
    %348 = vector.extract_strided_slice %320 {offsets = [0, 0], sizes = [8, 128], strides = [1, 1]} : vector<8x512xf32> to vector<8x128xf32>
    %349 = arith.negf %348 : vector<8x128xf32>
    %350 = math.exp %349 : vector<8x128xf32>
    %cst_161 = arith.constant 1.000000e+00 : f32
    %351 = vector.broadcast %cst_161 : f32 to vector<8x128xf32>
    %352 = arith.addf %351, %350 : vector<8x128xf32>
    %353 = arith.divf %351, %352 : vector<8x128xf32>
    %354 = vector.extract_strided_slice %320 {offsets = [0, 128], sizes = [8, 128], strides = [1, 1]} : vector<8x512xf32> to vector<8x128xf32>
    %355 = arith.negf %354 : vector<8x128xf32>
    %356 = math.exp %355 : vector<8x128xf32>
    %cst_162 = arith.constant 1.000000e+00 : f32
    %357 = vector.broadcast %cst_162 : f32 to vector<8x128xf32>
    %358 = arith.addf %357, %356 : vector<8x128xf32>
    %359 = arith.divf %357, %358 : vector<8x128xf32>
    %360 = vector.extract_strided_slice %320 {offsets = [0, 256], sizes = [8, 128], strides = [1, 1]} : vector<8x512xf32> to vector<8x128xf32>
    %361 = math.tanh %360 : vector<8x128xf32>
    %362 = vector.extract_strided_slice %320 {offsets = [0, 384], sizes = [8, 128], strides = [1, 1]} : vector<8x512xf32> to vector<8x128xf32>
    %363 = arith.negf %362 : vector<8x128xf32>
    %364 = math.exp %363 : vector<8x128xf32>
    %cst_163 = arith.constant 1.000000e+00 : f32
    %365 = vector.broadcast %cst_163 : f32 to vector<8x128xf32>
    %366 = arith.addf %365, %364 : vector<8x128xf32>
    %367 = arith.divf %365, %366 : vector<8x128xf32>
    %368 = arith.mulf %359, %347 : vector<8x128xf32>
    %369 = arith.mulf %353, %361 : vector<8x128xf32>
    %370 = arith.addf %368, %369 : vector<8x128xf32>
    %371 = math.tanh %370 : vector<8x128xf32>
    %372 = arith.mulf %367, %371 : vector<8x128xf32>
    %c3_i32 = arith.constant 3 : i32
    %373 = vector.broadcast %c3_i32 : i32 to vector<8x128xi32>
    %374 = arith.cmpi sgt, %17, %373 : vector<8x128xi32>
    %c4_i32 = arith.constant 4 : i32
    %375 = vector.broadcast %c4_i32 : i32 to vector<8x128xi32>
    %376 = arith.cmpi sgt, %17, %375 : vector<8x128xi32>
    %c0_164 = arith.constant 0 : index
    %c0_165 = arith.constant 0 : index
    %377 = vector.load %arg11[%c0_164, %c0_165] : memref<8x128xf32, #tpu.memory_space<vmem>>, vector<8x128xf32>
    %378 = arith.select %374, %346, %377 : vector<8x128xi1>, vector<8x128xf32>
    %c0_166 = arith.constant 0 : index
    %c0_167 = arith.constant 0 : index
    %379 = vector.load %arg13[%c0_166, %c0_167] : memref<8x128xf32, #tpu.memory_space<vmem>>, vector<8x128xf32>
    %380 = arith.select %376, %372, %379 : vector<8x128xi1>, vector<8x128xf32>
    %c0_168 = arith.constant 0 : index
    %c0_169 = arith.constant 0 : index
    %381 = vector.load %arg12[%c0_168, %c0_169] : memref<8x128xf32, #tpu.memory_space<vmem>>, vector<8x128xf32>
    %382 = arith.select %374, %344, %381 : vector<8x128xi1>, vector<8x128xf32>
    %c0_170 = arith.constant 0 : index
    %c0_171 = arith.constant 0 : index
    %383 = vector.load %arg12[%c0_170, %c0_171] : memref<8x128xf32, #tpu.memory_space<vmem>>, vector<8x128xf32>
    tpu.vector_store %arg12[%c0_170, %c0_171], %382 {strides = array<i32>} : memref<8x128xf32, #tpu.memory_space<vmem>>, vector<8x128xf32>,
    %c0_172 = arith.constant 0 : index
    %c0_173 = arith.constant 0 : index
    %384 = vector.load %arg14[%c0_172, %c0_173] : memref<8x128xf32, #tpu.memory_space<vmem>>, vector<8x128xf32>
    %385 = arith.select %376, %370, %384 : vector<8x128xi1>, vector<8x128xf32>
    %c0_174 = arith.constant 0 : index
    %c0_175 = arith.constant 0 : index
    %386 = vector.load %arg14[%c0_174, %c0_175] : memref<8x128xf32, #tpu.memory_space<vmem>>, vector<8x128xf32>
    tpu.vector_store %arg14[%c0_174, %c0_175], %385 {strides = array<i32>} : memref<8x128xf32, #tpu.memory_space<vmem>>, vector<8x128xf32>,
    %c0_176 = arith.constant 0 : index
    %c0_177 = arith.constant 0 : index
    %387 = vector.load %arg11[%c0_176, %c0_177] : memref<8x128xf32, #tpu.memory_space<vmem>>, vector<8x128xf32>
    tpu.vector_store %arg11[%c0_176, %c0_177], %378 {strides = array<i32>} : memref<8x128xf32, #tpu.memory_space<vmem>>, vector<8x128xf32>,
    %c0_178 = arith.constant 0 : index
    %c0_179 = arith.constant 0 : index
    %388 = vector.load %arg13[%c0_178, %c0_179] : memref<8x128xf32, #tpu.memory_space<vmem>>, vector<8x128xf32>
    tpu.vector_store %arg13[%c0_178, %c0_179], %380 {strides = array<i32>} : memref<8x128xf32, #tpu.memory_space<vmem>>, vector<8x128xf32>,
    %389 = arith.truncf %378 : vector<8x128xf32> to vector<8x128xbf16>
    %c0_180 = arith.constant 0 : index
    %c0_181 = arith.constant 0 : index
    %390 = vector.load %arg10[%c0_180, %c0_181] : memref<8x256xbf16, #tpu.memory_space<vmem>>, vector<8x128xbf16>
    tpu.vector_store %arg10[%c0_180, %c0_181], %389 {strides = array<i32>} : memref<8x256xbf16, #tpu.memory_space<vmem>>, vector<8x128xbf16>,
    %391 = arith.truncf %380 : vector<8x128xf32> to vector<8x128xbf16>
    %c0_182 = arith.constant 0 : index
    %c128_183 = arith.constant 128 : index
    %392 = vector.load %arg10[%c0_182, %c128_183] : memref<8x256xbf16, #tpu.memory_space<vmem>>, vector<8x128xbf16>
    tpu.vector_store %arg10[%c0_182, %c128_183], %391 {strides = array<i32>} : memref<8x256xbf16, #tpu.memory_space<vmem>>, vector<8x128xbf16>,
    %cst_184 = arith.constant 0.000000e+00 : f32
    %393 = vector.broadcast %cst_184 : f32 to vector<8x128xf32>
    %394 = arith.select %374, %346, %393 : vector<8x128xi1>, vector<8x128xf32>
    %cst_185 = arith.constant 0.000000e+00 : f32
    %395 = vector.broadcast %cst_185 : f32 to vector<8x128xf32>
    %396 = arith.select %376, %372, %395 : vector<8x128xi1>, vector<8x128xf32>
    %c3 = arith.constant 3 : index
    %c0_186 = arith.constant 0 : index
    %c0_187 = arith.constant 0 : index
    %397 = vector.load %arg6[%c3, %c0_186, %c0_187] : memref<8x8x128xf32, #tpu.memory_space<vmem>>, vector<1x8x128xf32>
    %398 = vector.shape_cast %397 : vector<1x8x128xf32> to vector<8x128xf32>
    %399 = vector.shape_cast %394 : vector<8x128xf32> to vector<1x8x128xf32>
    tpu.vector_store %arg6[%c3, %c0_186, %c0_187], %399 {strides = array<i32>} : memref<8x8x128xf32, #tpu.memory_space<vmem>>, vector<1x8x128xf32>,
    %c4 = arith.constant 4 : index
    %c0_188 = arith.constant 0 : index
    %c0_189 = arith.constant 0 : index
    %400 = vector.load %arg6[%c4, %c0_188, %c0_189] : memref<8x8x128xf32, #tpu.memory_space<vmem>>, vector<1x8x128xf32>
    %401 = vector.shape_cast %400 : vector<1x8x128xf32> to vector<8x128xf32>
    %402 = vector.shape_cast %396 : vector<8x128xf32> to vector<1x8x128xf32>
    tpu.vector_store %arg6[%c4, %c0_188, %c0_189], %402 {strides = array<i32>} : memref<8x8x128xf32, #tpu.memory_space<vmem>>, vector<1x8x128xf32>,
    %c0_190 = arith.constant 0 : index
    %c0_191 = arith.constant 0 : index
    %403 = vector.load %arg10[%c0_190, %c0_191] : memref<8x256xbf16, #tpu.memory_space<vmem>>, vector<8x256xbf16>
    %cst_192 = arith.constant dense<0.000000e+00> : vector<8x1024xf32>
    %404 = tpu.matmul %403, %18, %cst_192 {dimension_numbers = #tpu.dot_dimension_numbers<[1], [0], [0], [1], [0, 0, 1, 1], [], []>} : vector<8x256xbf16>, vector<256x1024xbf16>, vector<8x1024xf32> -> vector<8x1024xf32>
    %c32_193 = arith.constant 32 : index
    %c0_194 = arith.constant 0 : index
    %405 = vector.load %arg9[%c32_193, %c0_194] : memref<64x1024xbf16, #tpu.memory_space<vmem>>, vector<8x512xbf16>
    %406 = arith.extf %405 : vector<8x512xbf16> to vector<8x512xf32>
    %407 = vector.broadcast %13 : vector<1x512xf32> to vector<8x512xf32>
    %408 = arith.addf %406, %407 : vector<8x512xf32>
    %409 = vector.extract_strided_slice %404 {offsets = [0, 0], sizes = [8, 512], strides = [1, 1]} : vector<8x1024xf32> to vector<8x512xf32>
    %410 = arith.addf %408, %409 : vector<8x512xf32>
    %c24_195 = arith.constant 24 : index
    %c512_196 = arith.constant 512 : index
    %411 = vector.load %arg9[%c24_195, %c512_196] : memref<64x1024xbf16, #tpu.memory_space<vmem>>, vector<8x512xbf16>
    %412 = arith.extf %411 : vector<8x512xbf16> to vector<8x512xf32>
    %413 = vector.broadcast %14 : vector<1x512xf32> to vector<8x512xf32>
    %414 = arith.addf %412, %413 : vector<8x512xf32>
    %415 = vector.extract_strided_slice %404 {offsets = [0, 512], sizes = [8, 512], strides = [1, 1]} : vector<8x1024xf32> to vector<8x512xf32>
    %416 = arith.addf %414, %415 : vector<8x512xf32>
    %c0_197 = arith.constant 0 : index
    %c0_198 = arith.constant 0 : index
    %417 = vector.load %arg12[%c0_197, %c0_198] : memref<8x128xf32, #tpu.memory_space<vmem>>, vector<8x128xf32>
    %418 = vector.extract_strided_slice %410 {offsets = [0, 0], sizes = [8, 128], strides = [1, 1]} : vector<8x512xf32> to vector<8x128xf32>
    %419 = arith.negf %418 : vector<8x128xf32>
    %420 = math.exp %419 : vector<8x128xf32>
    %cst_199 = arith.constant 1.000000e+00 : f32
    %421 = vector.broadcast %cst_199 : f32 to vector<8x128xf32>
    %422 = arith.addf %421, %420 : vector<8x128xf32>
    %423 = arith.divf %421, %422 : vector<8x128xf32>
    %424 = vector.extract_strided_slice %410 {offsets = [0, 128], sizes = [8, 128], strides = [1, 1]} : vector<8x512xf32> to vector<8x128xf32>
    %425 = arith.negf %424 : vector<8x128xf32>
    %426 = math.exp %425 : vector<8x128xf32>
    %cst_200 = arith.constant 1.000000e+00 : f32
    %427 = vector.broadcast %cst_200 : f32 to vector<8x128xf32>
    %428 = arith.addf %427, %426 : vector<8x128xf32>
    %429 = arith.divf %427, %428 : vector<8x128xf32>
    %430 = vector.extract_strided_slice %410 {offsets = [0, 256], sizes = [8, 128], strides = [1, 1]} : vector<8x512xf32> to vector<8x128xf32>
    %431 = math.tanh %430 : vector<8x128xf32>
    %432 = vector.extract_strided_slice %410 {offsets = [0, 384], sizes = [8, 128], strides = [1, 1]} : vector<8x512xf32> to vector<8x128xf32>
    %433 = arith.negf %432 : vector<8x128xf32>
    %434 = math.exp %433 : vector<8x128xf32>
    %cst_201 = arith.constant 1.000000e+00 : f32
    %435 = vector.broadcast %cst_201 : f32 to vector<8x128xf32>
    %436 = arith.addf %435, %434 : vector<8x128xf32>
    %437 = arith.divf %435, %436 : vector<8x128xf32>
    %438 = arith.mulf %429, %417 : vector<8x128xf32>
    %439 = arith.mulf %423, %431 : vector<8x128xf32>
    %440 = arith.addf %438, %439 : vector<8x128xf32>
    %441 = math.tanh %440 : vector<8x128xf32>
    %442 = arith.mulf %437, %441 : vector<8x128xf32>
    %c0_202 = arith.constant 0 : index
    %c0_203 = arith.constant 0 : index
    %443 = vector.load %arg14[%c0_202, %c0_203] : memref<8x128xf32, #tpu.memory_space<vmem>>, vector<8x128xf32>
    %444 = vector.extract_strided_slice %416 {offsets = [0, 0], sizes = [8, 128], strides = [1, 1]} : vector<8x512xf32> to vector<8x128xf32>
    %445 = arith.negf %444 : vector<8x128xf32>
    %446 = math.exp %445 : vector<8x128xf32>
    %cst_204 = arith.constant 1.000000e+00 : f32
    %447 = vector.broadcast %cst_204 : f32 to vector<8x128xf32>
    %448 = arith.addf %447, %446 : vector<8x128xf32>
    %449 = arith.divf %447, %448 : vector<8x128xf32>
    %450 = vector.extract_strided_slice %416 {offsets = [0, 128], sizes = [8, 128], strides = [1, 1]} : vector<8x512xf32> to vector<8x128xf32>
    %451 = arith.negf %450 : vector<8x128xf32>
    %452 = math.exp %451 : vector<8x128xf32>
    %cst_205 = arith.constant 1.000000e+00 : f32
    %453 = vector.broadcast %cst_205 : f32 to vector<8x128xf32>
    %454 = arith.addf %453, %452 : vector<8x128xf32>
    %455 = arith.divf %453, %454 : vector<8x128xf32>
    %456 = vector.extract_strided_slice %416 {offsets = [0, 256], sizes = [8, 128], strides = [1, 1]} : vector<8x512xf32> to vector<8x128xf32>
    %457 = math.tanh %456 : vector<8x128xf32>
    %458 = vector.extract_strided_slice %416 {offsets = [0, 384], sizes = [8, 128], strides = [1, 1]} : vector<8x512xf32> to vector<8x128xf32>
    %459 = arith.negf %458 : vector<8x128xf32>
    %460 = math.exp %459 : vector<8x128xf32>
    %cst_206 = arith.constant 1.000000e+00 : f32
    %461 = vector.broadcast %cst_206 : f32 to vector<8x128xf32>
    %462 = arith.addf %461, %460 : vector<8x128xf32>
    %463 = arith.divf %461, %462 : vector<8x128xf32>
    %464 = arith.mulf %455, %443 : vector<8x128xf32>
    %465 = arith.mulf %449, %457 : vector<8x128xf32>
    %466 = arith.addf %464, %465 : vector<8x128xf32>
    %467 = math.tanh %466 : vector<8x128xf32>
    %468 = arith.mulf %463, %467 : vector<8x128xf32>
    %c4_i32_207 = arith.constant 4 : i32
    %469 = vector.broadcast %c4_i32_207 : i32 to vector<8x128xi32>
    %470 = arith.cmpi sgt, %17, %469 : vector<8x128xi32>
    %c3_i32_208 = arith.constant 3 : i32
    %471 = vector.broadcast %c3_i32_208 : i32 to vector<8x128xi32>
    %472 = arith.cmpi sgt, %17, %471 : vector<8x128xi32>
    %c0_209 = arith.constant 0 : index
    %c0_210 = arith.constant 0 : index
    %473 = vector.load %arg11[%c0_209, %c0_210] : memref<8x128xf32, #tpu.memory_space<vmem>>, vector<8x128xf32>
    %474 = arith.select %470, %442, %473 : vector<8x128xi1>, vector<8x128xf32>
    %c0_211 = arith.constant 0 : index
    %c0_212 = arith.constant 0 : index
    %475 = vector.load %arg13[%c0_211, %c0_212] : memref<8x128xf32, #tpu.memory_space<vmem>>, vector<8x128xf32>
    %476 = arith.select %472, %468, %475 : vector<8x128xi1>, vector<8x128xf32>
    %c0_213 = arith.constant 0 : index
    %c0_214 = arith.constant 0 : index
    %477 = vector.load %arg12[%c0_213, %c0_214] : memref<8x128xf32, #tpu.memory_space<vmem>>, vector<8x128xf32>
    %478 = arith.select %470, %440, %477 : vector<8x128xi1>, vector<8x128xf32>
    %c0_215 = arith.constant 0 : index
    %c0_216 = arith.constant 0 : index
    %479 = vector.load %arg12[%c0_215, %c0_216] : memref<8x128xf32, #tpu.memory_space<vmem>>, vector<8x128xf32>
    tpu.vector_store %arg12[%c0_215, %c0_216], %478 {strides = array<i32>} : memref<8x128xf32, #tpu.memory_space<vmem>>, vector<8x128xf32>,
    %c0_217 = arith.constant 0 : index
    %c0_218 = arith.constant 0 : index
    %480 = vector.load %arg14[%c0_217, %c0_218] : memref<8x128xf32, #tpu.memory_space<vmem>>, vector<8x128xf32>
    %481 = arith.select %472, %466, %480 : vector<8x128xi1>, vector<8x128xf32>
    %c0_219 = arith.constant 0 : index
    %c0_220 = arith.constant 0 : index
    %482 = vector.load %arg14[%c0_219, %c0_220] : memref<8x128xf32, #tpu.memory_space<vmem>>, vector<8x128xf32>
    tpu.vector_store %arg14[%c0_219, %c0_220], %481 {strides = array<i32>} : memref<8x128xf32, #tpu.memory_space<vmem>>, vector<8x128xf32>,
    %c0_221 = arith.constant 0 : index
    %c0_222 = arith.constant 0 : index
    %483 = vector.load %arg11[%c0_221, %c0_222] : memref<8x128xf32, #tpu.memory_space<vmem>>, vector<8x128xf32>
    tpu.vector_store %arg11[%c0_221, %c0_222], %474 {strides = array<i32>} : memref<8x128xf32, #tpu.memory_space<vmem>>, vector<8x128xf32>,
    %c0_223 = arith.constant 0 : index
    %c0_224 = arith.constant 0 : index
    %484 = vector.load %arg13[%c0_223, %c0_224] : memref<8x128xf32, #tpu.memory_space<vmem>>, vector<8x128xf32>
    tpu.vector_store %arg13[%c0_223, %c0_224], %476 {strides = array<i32>} : memref<8x128xf32, #tpu.memory_space<vmem>>, vector<8x128xf32>,
    %485 = arith.truncf %474 : vector<8x128xf32> to vector<8x128xbf16>
    %c0_225 = arith.constant 0 : index
    %c0_226 = arith.constant 0 : index
    %486 = vector.load %arg10[%c0_225, %c0_226] : memref<8x256xbf16, #tpu.memory_space<vmem>>, vector<8x128xbf16>
    tpu.vector_store %arg10[%c0_225, %c0_226], %485 {strides = array<i32>} : memref<8x256xbf16, #tpu.memory_space<vmem>>, vector<8x128xbf16>,
    %487 = arith.truncf %476 : vector<8x128xf32> to vector<8x128xbf16>
    %c0_227 = arith.constant 0 : index
    %c128_228 = arith.constant 128 : index
    %488 = vector.load %arg10[%c0_227, %c128_228] : memref<8x256xbf16, #tpu.memory_space<vmem>>, vector<8x128xbf16>
    tpu.vector_store %arg10[%c0_227, %c128_228], %487 {strides = array<i32>} : memref<8x256xbf16, #tpu.memory_space<vmem>>, vector<8x128xbf16>,
    %cst_229 = arith.constant 0.000000e+00 : f32
    %489 = vector.broadcast %cst_229 : f32 to vector<8x128xf32>
    %490 = arith.select %470, %442, %489 : vector<8x128xi1>, vector<8x128xf32>
    %cst_230 = arith.constant 0.000000e+00 : f32
    %491 = vector.broadcast %cst_230 : f32 to vector<8x128xf32>
    %492 = arith.select %472, %468, %491 : vector<8x128xi1>, vector<8x128xf32>
    %c4_231 = arith.constant 4 : index
    %c0_232 = arith.constant 0 : index
    %c0_233 = arith.constant 0 : index
    %493 = vector.load %arg6[%c4_231, %c0_232, %c0_233] : memref<8x8x128xf32, #tpu.memory_space<vmem>>, vector<1x8x128xf32>
    %494 = vector.shape_cast %493 : vector<1x8x128xf32> to vector<8x128xf32>
    %495 = arith.addf %494, %490 : vector<8x128xf32>
    %c4_234 = arith.constant 4 : index
    %c0_235 = arith.constant 0 : index
    %c0_236 = arith.constant 0 : index
    %496 = vector.load %arg6[%c4_234, %c0_235, %c0_236] : memref<8x8x128xf32, #tpu.memory_space<vmem>>, vector<1x8x128xf32>
    %497 = vector.shape_cast %496 : vector<1x8x128xf32> to vector<8x128xf32>
    %498 = vector.shape_cast %495 : vector<8x128xf32> to vector<1x8x128xf32>
    tpu.vector_store %arg6[%c4_234, %c0_235, %c0_236], %498 {strides = array<i32>} : memref<8x8x128xf32, #tpu.memory_space<vmem>>, vector<1x8x128xf32>,
    %c3_237 = arith.constant 3 : index
    %c0_238 = arith.constant 0 : index
    %c0_239 = arith.constant 0 : index
    %499 = vector.load %arg6[%c3_237, %c0_238, %c0_239] : memref<8x8x128xf32, #tpu.memory_space<vmem>>, vector<1x8x128xf32>
    %500 = vector.shape_cast %499 : vector<1x8x128xf32> to vector<8x128xf32>
    %501 = arith.addf %500, %492 : vector<8x128xf32>
    %c3_240 = arith.constant 3 : index
    %c0_241 = arith.constant 0 : index
    %c0_242 = arith.constant 0 : index
    %502 = vector.load %arg6[%c3_240, %c0_241, %c0_242] : memref<8x8x128xf32, #tpu.memory_space<vmem>>, vector<1x8x128xf32>
    %503 = vector.shape_cast %502 : vector<1x8x128xf32> to vector<8x128xf32>
    %504 = vector.shape_cast %501 : vector<8x128xf32> to vector<1x8x128xf32>
    tpu.vector_store %arg6[%c3_240, %c0_241, %c0_242], %504 {strides = array<i32>} : memref<8x8x128xf32, #tpu.memory_space<vmem>>, vector<1x8x128xf32>,
    %c0_243 = arith.constant 0 : index
    %c0_244 = arith.constant 0 : index
    %505 = vector.load %arg10[%c0_243, %c0_244] : memref<8x256xbf16, #tpu.memory_space<vmem>>, vector<8x256xbf16>
    %cst_245 = arith.constant dense<0.000000e+00> : vector<8x1024xf32>
    %506 = tpu.matmul %505, %18, %cst_245 {dimension_numbers = #tpu.dot_dimension_numbers<[1], [0], [0], [1], [0, 0, 1, 1], [], []>} : vector<8x256xbf16>, vector<256x1024xbf16>, vector<8x1024xf32> -> vector<8x1024xf32>
    %c40_246 = arith.constant 40 : index
    %c0_247 = arith.constant 0 : index
    %507 = vector.load %arg9[%c40_246, %c0_247] : memref<64x1024xbf16, #tpu.memory_space<vmem>>, vector<8x512xbf16>
    %508 = arith.extf %507 : vector<8x512xbf16> to vector<8x512xf32>
    %509 = vector.broadcast %13 : vector<1x512xf32> to vector<8x512xf32>
    %510 = arith.addf %508, %509 : vector<8x512xf32>
    %511 = vector.extract_strided_slice %506 {offsets = [0, 0], sizes = [8, 512], strides = [1, 1]} : vector<8x1024xf32> to vector<8x512xf32>
    %512 = arith.addf %510, %511 : vector<8x512xf32>
    %c16_248 = arith.constant 16 : index
    %c512_249 = arith.constant 512 : index
    %513 = vector.load %arg9[%c16_248, %c512_249] : memref<64x1024xbf16, #tpu.memory_space<vmem>>, vector<8x512xbf16>
    %514 = arith.extf %513 : vector<8x512xbf16> to vector<8x512xf32>
    %515 = vector.broadcast %14 : vector<1x512xf32> to vector<8x512xf32>
    %516 = arith.addf %514, %515 : vector<8x512xf32>
    %517 = vector.extract_strided_slice %506 {offsets = [0, 512], sizes = [8, 512], strides = [1, 1]} : vector<8x1024xf32> to vector<8x512xf32>
    %518 = arith.addf %516, %517 : vector<8x512xf32>
    %c0_250 = arith.constant 0 : index
    %c0_251 = arith.constant 0 : index
    %519 = vector.load %arg12[%c0_250, %c0_251] : memref<8x128xf32, #tpu.memory_space<vmem>>, vector<8x128xf32>
    %520 = vector.extract_strided_slice %512 {offsets = [0, 0], sizes = [8, 128], strides = [1, 1]} : vector<8x512xf32> to vector<8x128xf32>
    %521 = arith.negf %520 : vector<8x128xf32>
    %522 = math.exp %521 : vector<8x128xf32>
    %cst_252 = arith.constant 1.000000e+00 : f32
    %523 = vector.broadcast %cst_252 : f32 to vector<8x128xf32>
    %524 = arith.addf %523, %522 : vector<8x128xf32>
    %525 = arith.divf %523, %524 : vector<8x128xf32>
    %526 = vector.extract_strided_slice %512 {offsets = [0, 128], sizes = [8, 128], strides = [1, 1]} : vector<8x512xf32> to vector<8x128xf32>
    %527 = arith.negf %526 : vector<8x128xf32>
    %528 = math.exp %527 : vector<8x128xf32>
    %cst_253 = arith.constant 1.000000e+00 : f32
    %529 = vector.broadcast %cst_253 : f32 to vector<8x128xf32>
    %530 = arith.addf %529, %528 : vector<8x128xf32>
    %531 = arith.divf %529, %530 : vector<8x128xf32>
    %532 = vector.extract_strided_slice %512 {offsets = [0, 256], sizes = [8, 128], strides = [1, 1]} : vector<8x512xf32> to vector<8x128xf32>
    %533 = math.tanh %532 : vector<8x128xf32>
    %534 = vector.extract_strided_slice %512 {offsets = [0, 384], sizes = [8, 128], strides = [1, 1]} : vector<8x512xf32> to vector<8x128xf32>
    %535 = arith.negf %534 : vector<8x128xf32>
    %536 = math.exp %535 : vector<8x128xf32>
    %cst_254 = arith.constant 1.000000e+00 : f32
    %537 = vector.broadcast %cst_254 : f32 to vector<8x128xf32>
    %538 = arith.addf %537, %536 : vector<8x128xf32>
    %539 = arith.divf %537, %538 : vector<8x128xf32>
    %540 = arith.mulf %531, %519 : vector<8x128xf32>
    %541 = arith.mulf %525, %533 : vector<8x128xf32>
    %542 = arith.addf %540, %541 : vector<8x128xf32>
    %543 = math.tanh %542 : vector<8x128xf32>
    %544 = arith.mulf %539, %543 : vector<8x128xf32>
    %c0_255 = arith.constant 0 : index
    %c0_256 = arith.constant 0 : index
    %545 = vector.load %arg14[%c0_255, %c0_256] : memref<8x128xf32, #tpu.memory_space<vmem>>, vector<8x128xf32>
    %546 = vector.extract_strided_slice %518 {offsets = [0, 0], sizes = [8, 128], strides = [1, 1]} : vector<8x512xf32> to vector<8x128xf32>
    %547 = arith.negf %546 : vector<8x128xf32>
    %548 = math.exp %547 : vector<8x128xf32>
    %cst_257 = arith.constant 1.000000e+00 : f32
    %549 = vector.broadcast %cst_257 : f32 to vector<8x128xf32>
    %550 = arith.addf %549, %548 : vector<8x128xf32>
    %551 = arith.divf %549, %550 : vector<8x128xf32>
    %552 = vector.extract_strided_slice %518 {offsets = [0, 128], sizes = [8, 128], strides = [1, 1]} : vector<8x512xf32> to vector<8x128xf32>
    %553 = arith.negf %552 : vector<8x128xf32>
    %554 = math.exp %553 : vector<8x128xf32>
    %cst_258 = arith.constant 1.000000e+00 : f32
    %555 = vector.broadcast %cst_258 : f32 to vector<8x128xf32>
    %556 = arith.addf %555, %554 : vector<8x128xf32>
    %557 = arith.divf %555, %556 : vector<8x128xf32>
    %558 = vector.extract_strided_slice %518 {offsets = [0, 256], sizes = [8, 128], strides = [1, 1]} : vector<8x512xf32> to vector<8x128xf32>
    %559 = math.tanh %558 : vector<8x128xf32>
    %560 = vector.extract_strided_slice %518 {offsets = [0, 384], sizes = [8, 128], strides = [1, 1]} : vector<8x512xf32> to vector<8x128xf32>
    %561 = arith.negf %560 : vector<8x128xf32>
    %562 = math.exp %561 : vector<8x128xf32>
    %cst_259 = arith.constant 1.000000e+00 : f32
    %563 = vector.broadcast %cst_259 : f32 to vector<8x128xf32>
    %564 = arith.addf %563, %562 : vector<8x128xf32>
    %565 = arith.divf %563, %564 : vector<8x128xf32>
    %566 = arith.mulf %557, %545 : vector<8x128xf32>
    %567 = arith.mulf %551, %559 : vector<8x128xf32>
    %568 = arith.addf %566, %567 : vector<8x128xf32>
    %569 = math.tanh %568 : vector<8x128xf32>
    %570 = arith.mulf %565, %569 : vector<8x128xf32>
    %c5_i32_260 = arith.constant 5 : i32
    %571 = vector.broadcast %c5_i32_260 : i32 to vector<8x128xi32>
    %572 = arith.cmpi sgt, %17, %571 : vector<8x128xi32>
    %c2_i32_261 = arith.constant 2 : i32
    %573 = vector.broadcast %c2_i32_261 : i32 to vector<8x128xi32>
    %574 = arith.cmpi sgt, %17, %573 : vector<8x128xi32>
    %c0_262 = arith.constant 0 : index
    %c0_263 = arith.constant 0 : index
    %575 = vector.load %arg11[%c0_262, %c0_263] : memref<8x128xf32, #tpu.memory_space<vmem>>, vector<8x128xf32>
    %576 = arith.select %572, %544, %575 : vector<8x128xi1>, vector<8x128xf32>
    %c0_264 = arith.constant 0 : index
    %c0_265 = arith.constant 0 : index
    %577 = vector.load %arg13[%c0_264, %c0_265] : memref<8x128xf32, #tpu.memory_space<vmem>>, vector<8x128xf32>
    %578 = arith.select %574, %570, %577 : vector<8x128xi1>, vector<8x128xf32>
    %c0_266 = arith.constant 0 : index
    %c0_267 = arith.constant 0 : index
    %579 = vector.load %arg12[%c0_266, %c0_267] : memref<8x128xf32, #tpu.memory_space<vmem>>, vector<8x128xf32>
    %580 = arith.select %572, %542, %579 : vector<8x128xi1>, vector<8x128xf32>
    %c0_268 = arith.constant 0 : index
    %c0_269 = arith.constant 0 : index
    %581 = vector.load %arg12[%c0_268, %c0_269] : memref<8x128xf32, #tpu.memory_space<vmem>>, vector<8x128xf32>
    tpu.vector_store %arg12[%c0_268, %c0_269], %580 {strides = array<i32>} : memref<8x128xf32, #tpu.memory_space<vmem>>, vector<8x128xf32>,
    %c0_270 = arith.constant 0 : index
    %c0_271 = arith.constant 0 : index
    %582 = vector.load %arg14[%c0_270, %c0_271] : memref<8x128xf32, #tpu.memory_space<vmem>>, vector<8x128xf32>
    %583 = arith.select %574, %568, %582 : vector<8x128xi1>, vector<8x128xf32>
    %c0_272 = arith.constant 0 : index
    %c0_273 = arith.constant 0 : index
    %584 = vector.load %arg14[%c0_272, %c0_273] : memref<8x128xf32, #tpu.memory_space<vmem>>, vector<8x128xf32>
    tpu.vector_store %arg14[%c0_272, %c0_273], %583 {strides = array<i32>} : memref<8x128xf32, #tpu.memory_space<vmem>>, vector<8x128xf32>,
    %c0_274 = arith.constant 0 : index
    %c0_275 = arith.constant 0 : index
    %585 = vector.load %arg11[%c0_274, %c0_275] : memref<8x128xf32, #tpu.memory_space<vmem>>, vector<8x128xf32>
    tpu.vector_store %arg11[%c0_274, %c0_275], %576 {strides = array<i32>} : memref<8x128xf32, #tpu.memory_space<vmem>>, vector<8x128xf32>,
    %c0_276 = arith.constant 0 : index
    %c0_277 = arith.constant 0 : index
    %586 = vector.load %arg13[%c0_276, %c0_277] : memref<8x128xf32, #tpu.memory_space<vmem>>, vector<8x128xf32>
    tpu.vector_store %arg13[%c0_276, %c0_277], %578 {strides = array<i32>} : memref<8x128xf32, #tpu.memory_space<vmem>>, vector<8x128xf32>,
    %587 = arith.truncf %576 : vector<8x128xf32> to vector<8x128xbf16>
    %c0_278 = arith.constant 0 : index
    %c0_279 = arith.constant 0 : index
    %588 = vector.load %arg10[%c0_278, %c0_279] : memref<8x256xbf16, #tpu.memory_space<vmem>>, vector<8x128xbf16>
    tpu.vector_store %arg10[%c0_278, %c0_279], %587 {strides = array<i32>} : memref<8x256xbf16, #tpu.memory_space<vmem>>, vector<8x128xbf16>,
    %589 = arith.truncf %578 : vector<8x128xf32> to vector<8x128xbf16>
    %c0_280 = arith.constant 0 : index
    %c128_281 = arith.constant 128 : index
    %590 = vector.load %arg10[%c0_280, %c128_281] : memref<8x256xbf16, #tpu.memory_space<vmem>>, vector<8x128xbf16>
    tpu.vector_store %arg10[%c0_280, %c128_281], %589 {strides = array<i32>} : memref<8x256xbf16, #tpu.memory_space<vmem>>, vector<8x128xbf16>,
    %cst_282 = arith.constant 0.000000e+00 : f32
    %591 = vector.broadcast %cst_282 : f32 to vector<8x128xf32>
    %592 = arith.select %572, %544, %591 : vector<8x128xi1>, vector<8x128xf32>
    %cst_283 = arith.constant 0.000000e+00 : f32
    %593 = vector.broadcast %cst_283 : f32 to vector<8x128xf32>
    %594 = arith.select %574, %570, %593 : vector<8x128xi1>, vector<8x128xf32>
    %c5_284 = arith.constant 5 : index
    %c0_285 = arith.constant 0 : index
    %c0_286 = arith.constant 0 : index
    %595 = vector.load %arg6[%c5_284, %c0_285, %c0_286] : memref<8x8x128xf32, #tpu.memory_space<vmem>>, vector<1x8x128xf32>
    %596 = vector.shape_cast %595 : vector<1x8x128xf32> to vector<8x128xf32>
    %597 = arith.addf %596, %592 : vector<8x128xf32>
    %c5_287 = arith.constant 5 : index
    %c0_288 = arith.constant 0 : index
    %c0_289 = arith.constant 0 : index
    %598 = vector.load %arg6[%c5_287, %c0_288, %c0_289] : memref<8x8x128xf32, #tpu.memory_space<vmem>>, vector<1x8x128xf32>
    %599 = vector.shape_cast %598 : vector<1x8x128xf32> to vector<8x128xf32>
    %600 = vector.shape_cast %597 : vector<8x128xf32> to vector<1x8x128xf32>
    tpu.vector_store %arg6[%c5_287, %c0_288, %c0_289], %600 {strides = array<i32>} : memref<8x8x128xf32, #tpu.memory_space<vmem>>, vector<1x8x128xf32>,
    %c2_290 = arith.constant 2 : index
    %c0_291 = arith.constant 0 : index
    %c0_292 = arith.constant 0 : index
    %601 = vector.load %arg6[%c2_290, %c0_291, %c0_292] : memref<8x8x128xf32, #tpu.memory_space<vmem>>, vector<1x8x128xf32>
    %602 = vector.shape_cast %601 : vector<1x8x128xf32> to vector<8x128xf32>
    %603 = arith.addf %602, %594 : vector<8x128xf32>
    %c2_293 = arith.constant 2 : index
    %c0_294 = arith.constant 0 : index
    %c0_295 = arith.constant 0 : index
    %604 = vector.load %arg6[%c2_293, %c0_294, %c0_295] : memref<8x8x128xf32, #tpu.memory_space<vmem>>, vector<1x8x128xf32>
    %605 = vector.shape_cast %604 : vector<1x8x128xf32> to vector<8x128xf32>
    %606 = vector.shape_cast %603 : vector<8x128xf32> to vector<1x8x128xf32>
    tpu.vector_store %arg6[%c2_293, %c0_294, %c0_295], %606 {strides = array<i32>} : memref<8x8x128xf32, #tpu.memory_space<vmem>>, vector<1x8x128xf32>,
    %c0_296 = arith.constant 0 : index
    %c0_297 = arith.constant 0 : index
    %607 = vector.load %arg10[%c0_296, %c0_297] : memref<8x256xbf16, #tpu.memory_space<vmem>>, vector<8x256xbf16>
    %cst_298 = arith.constant dense<0.000000e+00> : vector<8x1024xf32>
    %608 = tpu.matmul %607, %18, %cst_298 {dimension_numbers = #tpu.dot_dimension_numbers<[1], [0], [0], [1], [0, 0, 1, 1], [], []>} : vector<8x256xbf16>, vector<256x1024xbf16>, vector<8x1024xf32> -> vector<8x1024xf32>
    %c48_299 = arith.constant 48 : index
    %c0_300 = arith.constant 0 : index
    %609 = vector.load %arg9[%c48_299, %c0_300] : memref<64x1024xbf16, #tpu.memory_space<vmem>>, vector<8x512xbf16>
    %610 = arith.extf %609 : vector<8x512xbf16> to vector<8x512xf32>
    %611 = vector.broadcast %13 : vector<1x512xf32> to vector<8x512xf32>
    %612 = arith.addf %610, %611 : vector<8x512xf32>
    %613 = vector.extract_strided_slice %608 {offsets = [0, 0], sizes = [8, 512], strides = [1, 1]} : vector<8x1024xf32> to vector<8x512xf32>
    %614 = arith.addf %612, %613 : vector<8x512xf32>
    %c8_301 = arith.constant 8 : index
    %c512_302 = arith.constant 512 : index
    %615 = vector.load %arg9[%c8_301, %c512_302] : memref<64x1024xbf16, #tpu.memory_space<vmem>>, vector<8x512xbf16>
    %616 = arith.extf %615 : vector<8x512xbf16> to vector<8x512xf32>
    %617 = vector.broadcast %14 : vector<1x512xf32> to vector<8x512xf32>
    %618 = arith.addf %616, %617 : vector<8x512xf32>
    %619 = vector.extract_strided_slice %608 {offsets = [0, 512], sizes = [8, 512], strides = [1, 1]} : vector<8x1024xf32> to vector<8x512xf32>
    %620 = arith.addf %618, %619 : vector<8x512xf32>
    %c0_303 = arith.constant 0 : index
    %c0_304 = arith.constant 0 : index
    %621 = vector.load %arg12[%c0_303, %c0_304] : memref<8x128xf32, #tpu.memory_space<vmem>>, vector<8x128xf32>
    %622 = vector.extract_strided_slice %614 {offsets = [0, 0], sizes = [8, 128], strides = [1, 1]} : vector<8x512xf32> to vector<8x128xf32>
    %623 = arith.negf %622 : vector<8x128xf32>
    %624 = math.exp %623 : vector<8x128xf32>
    %cst_305 = arith.constant 1.000000e+00 : f32
    %625 = vector.broadcast %cst_305 : f32 to vector<8x128xf32>
    %626 = arith.addf %625, %624 : vector<8x128xf32>
    %627 = arith.divf %625, %626 : vector<8x128xf32>
    %628 = vector.extract_strided_slice %614 {offsets = [0, 128], sizes = [8, 128], strides = [1, 1]} : vector<8x512xf32> to vector<8x128xf32>
    %629 = arith.negf %628 : vector<8x128xf32>
    %630 = math.exp %629 : vector<8x128xf32>
    %cst_306 = arith.constant 1.000000e+00 : f32
    %631 = vector.broadcast %cst_306 : f32 to vector<8x128xf32>
    %632 = arith.addf %631, %630 : vector<8x128xf32>
    %633 = arith.divf %631, %632 : vector<8x128xf32>
    %634 = vector.extract_strided_slice %614 {offsets = [0, 256], sizes = [8, 128], strides = [1, 1]} : vector<8x512xf32> to vector<8x128xf32>
    %635 = math.tanh %634 : vector<8x128xf32>
    %636 = vector.extract_strided_slice %614 {offsets = [0, 384], sizes = [8, 128], strides = [1, 1]} : vector<8x512xf32> to vector<8x128xf32>
    %637 = arith.negf %636 : vector<8x128xf32>
    %638 = math.exp %637 : vector<8x128xf32>
    %cst_307 = arith.constant 1.000000e+00 : f32
    %639 = vector.broadcast %cst_307 : f32 to vector<8x128xf32>
    %640 = arith.addf %639, %638 : vector<8x128xf32>
    %641 = arith.divf %639, %640 : vector<8x128xf32>
    %642 = arith.mulf %633, %621 : vector<8x128xf32>
    %643 = arith.mulf %627, %635 : vector<8x128xf32>
    %644 = arith.addf %642, %643 : vector<8x128xf32>
    %645 = math.tanh %644 : vector<8x128xf32>
    %646 = arith.mulf %641, %645 : vector<8x128xf32>
    %c0_308 = arith.constant 0 : index
    %c0_309 = arith.constant 0 : index
    %647 = vector.load %arg14[%c0_308, %c0_309] : memref<8x128xf32, #tpu.memory_space<vmem>>, vector<8x128xf32>
    %648 = vector.extract_strided_slice %620 {offsets = [0, 0], sizes = [8, 128], strides = [1, 1]} : vector<8x512xf32> to vector<8x128xf32>
    %649 = arith.negf %648 : vector<8x128xf32>
    %650 = math.exp %649 : vector<8x128xf32>
    %cst_310 = arith.constant 1.000000e+00 : f32
    %651 = vector.broadcast %cst_310 : f32 to vector<8x128xf32>
    %652 = arith.addf %651, %650 : vector<8x128xf32>
    %653 = arith.divf %651, %652 : vector<8x128xf32>
    %654 = vector.extract_strided_slice %620 {offsets = [0, 128], sizes = [8, 128], strides = [1, 1]} : vector<8x512xf32> to vector<8x128xf32>
    %655 = arith.negf %654 : vector<8x128xf32>
    %656 = math.exp %655 : vector<8x128xf32>
    %cst_311 = arith.constant 1.000000e+00 : f32
    %657 = vector.broadcast %cst_311 : f32 to vector<8x128xf32>
    %658 = arith.addf %657, %656 : vector<8x128xf32>
    %659 = arith.divf %657, %658 : vector<8x128xf32>
    %660 = vector.extract_strided_slice %620 {offsets = [0, 256], sizes = [8, 128], strides = [1, 1]} : vector<8x512xf32> to vector<8x128xf32>
    %661 = math.tanh %660 : vector<8x128xf32>
    %662 = vector.extract_strided_slice %620 {offsets = [0, 384], sizes = [8, 128], strides = [1, 1]} : vector<8x512xf32> to vector<8x128xf32>
    %663 = arith.negf %662 : vector<8x128xf32>
    %664 = math.exp %663 : vector<8x128xf32>
    %cst_312 = arith.constant 1.000000e+00 : f32
    %665 = vector.broadcast %cst_312 : f32 to vector<8x128xf32>
    %666 = arith.addf %665, %664 : vector<8x128xf32>
    %667 = arith.divf %665, %666 : vector<8x128xf32>
    %668 = arith.mulf %659, %647 : vector<8x128xf32>
    %669 = arith.mulf %653, %661 : vector<8x128xf32>
    %670 = arith.addf %668, %669 : vector<8x128xf32>
    %671 = math.tanh %670 : vector<8x128xf32>
    %672 = arith.mulf %667, %671 : vector<8x128xf32>
    %c6_i32_313 = arith.constant 6 : i32
    %673 = vector.broadcast %c6_i32_313 : i32 to vector<8x128xi32>
    %674 = arith.cmpi sgt, %17, %673 : vector<8x128xi32>
    %c1_i32_314 = arith.constant 1 : i32
    %675 = vector.broadcast %c1_i32_314 : i32 to vector<8x128xi32>
    %676 = arith.cmpi sgt, %17, %675 : vector<8x128xi32>
    %c0_315 = arith.constant 0 : index
    %c0_316 = arith.constant 0 : index
    %677 = vector.load %arg11[%c0_315, %c0_316] : memref<8x128xf32, #tpu.memory_space<vmem>>, vector<8x128xf32>
    %678 = arith.select %674, %646, %677 : vector<8x128xi1>, vector<8x128xf32>
    %c0_317 = arith.constant 0 : index
    %c0_318 = arith.constant 0 : index
    %679 = vector.load %arg13[%c0_317, %c0_318] : memref<8x128xf32, #tpu.memory_space<vmem>>, vector<8x128xf32>
    %680 = arith.select %676, %672, %679 : vector<8x128xi1>, vector<8x128xf32>
    %c0_319 = arith.constant 0 : index
    %c0_320 = arith.constant 0 : index
    %681 = vector.load %arg12[%c0_319, %c0_320] : memref<8x128xf32, #tpu.memory_space<vmem>>, vector<8x128xf32>
    %682 = arith.select %674, %644, %681 : vector<8x128xi1>, vector<8x128xf32>
    %c0_321 = arith.constant 0 : index
    %c0_322 = arith.constant 0 : index
    %683 = vector.load %arg12[%c0_321, %c0_322] : memref<8x128xf32, #tpu.memory_space<vmem>>, vector<8x128xf32>
    tpu.vector_store %arg12[%c0_321, %c0_322], %682 {strides = array<i32>} : memref<8x128xf32, #tpu.memory_space<vmem>>, vector<8x128xf32>,
    %c0_323 = arith.constant 0 : index
    %c0_324 = arith.constant 0 : index
    %684 = vector.load %arg14[%c0_323, %c0_324] : memref<8x128xf32, #tpu.memory_space<vmem>>, vector<8x128xf32>
    %685 = arith.select %676, %670, %684 : vector<8x128xi1>, vector<8x128xf32>
    %c0_325 = arith.constant 0 : index
    %c0_326 = arith.constant 0 : index
    %686 = vector.load %arg14[%c0_325, %c0_326] : memref<8x128xf32, #tpu.memory_space<vmem>>, vector<8x128xf32>
    tpu.vector_store %arg14[%c0_325, %c0_326], %685 {strides = array<i32>} : memref<8x128xf32, #tpu.memory_space<vmem>>, vector<8x128xf32>,
    %c0_327 = arith.constant 0 : index
    %c0_328 = arith.constant 0 : index
    %687 = vector.load %arg11[%c0_327, %c0_328] : memref<8x128xf32, #tpu.memory_space<vmem>>, vector<8x128xf32>
    tpu.vector_store %arg11[%c0_327, %c0_328], %678 {strides = array<i32>} : memref<8x128xf32, #tpu.memory_space<vmem>>, vector<8x128xf32>,
    %c0_329 = arith.constant 0 : index
    %c0_330 = arith.constant 0 : index
    %688 = vector.load %arg13[%c0_329, %c0_330] : memref<8x128xf32, #tpu.memory_space<vmem>>, vector<8x128xf32>
    tpu.vector_store %arg13[%c0_329, %c0_330], %680 {strides = array<i32>} : memref<8x128xf32, #tpu.memory_space<vmem>>, vector<8x128xf32>,
    %689 = arith.truncf %678 : vector<8x128xf32> to vector<8x128xbf16>
    %c0_331 = arith.constant 0 : index
    %c0_332 = arith.constant 0 : index
    %690 = vector.load %arg10[%c0_331, %c0_332] : memref<8x256xbf16, #tpu.memory_space<vmem>>, vector<8x128xbf16>
    tpu.vector_store %arg10[%c0_331, %c0_332], %689 {strides = array<i32>} : memref<8x256xbf16, #tpu.memory_space<vmem>>, vector<8x128xbf16>,
    %691 = arith.truncf %680 : vector<8x128xf32> to vector<8x128xbf16>
    %c0_333 = arith.constant 0 : index
    %c128_334 = arith.constant 128 : index
    %692 = vector.load %arg10[%c0_333, %c128_334] : memref<8x256xbf16, #tpu.memory_space<vmem>>, vector<8x128xbf16>
    tpu.vector_store %arg10[%c0_333, %c128_334], %691 {strides = array<i32>} : memref<8x256xbf16, #tpu.memory_space<vmem>>, vector<8x128xbf16>,
    %cst_335 = arith.constant 0.000000e+00 : f32
    %693 = vector.broadcast %cst_335 : f32 to vector<8x128xf32>
    %694 = arith.select %674, %646, %693 : vector<8x128xi1>, vector<8x128xf32>
    %cst_336 = arith.constant 0.000000e+00 : f32
    %695 = vector.broadcast %cst_336 : f32 to vector<8x128xf32>
    %696 = arith.select %676, %672, %695 : vector<8x128xi1>, vector<8x128xf32>
    %c6_337 = arith.constant 6 : index
    %c0_338 = arith.constant 0 : index
    %c0_339 = arith.constant 0 : index
    %697 = vector.load %arg6[%c6_337, %c0_338, %c0_339] : memref<8x8x128xf32, #tpu.memory_space<vmem>>, vector<1x8x128xf32>
    %698 = vector.shape_cast %697 : vector<1x8x128xf32> to vector<8x128xf32>
    %699 = arith.addf %698, %694 : vector<8x128xf32>
    %c6_340 = arith.constant 6 : index
    %c0_341 = arith.constant 0 : index
    %c0_342 = arith.constant 0 : index
    %700 = vector.load %arg6[%c6_340, %c0_341, %c0_342] : memref<8x8x128xf32, #tpu.memory_space<vmem>>, vector<1x8x128xf32>
    %701 = vector.shape_cast %700 : vector<1x8x128xf32> to vector<8x128xf32>
    %702 = vector.shape_cast %699 : vector<8x128xf32> to vector<1x8x128xf32>
    tpu.vector_store %arg6[%c6_340, %c0_341, %c0_342], %702 {strides = array<i32>} : memref<8x8x128xf32, #tpu.memory_space<vmem>>, vector<1x8x128xf32>,
    %c1_343 = arith.constant 1 : index
    %c0_344 = arith.constant 0 : index
    %c0_345 = arith.constant 0 : index
    %703 = vector.load %arg6[%c1_343, %c0_344, %c0_345] : memref<8x8x128xf32, #tpu.memory_space<vmem>>, vector<1x8x128xf32>
    %704 = vector.shape_cast %703 : vector<1x8x128xf32> to vector<8x128xf32>
    %705 = arith.addf %704, %696 : vector<8x128xf32>
    %c1_346 = arith.constant 1 : index
    %c0_347 = arith.constant 0 : index
    %c0_348 = arith.constant 0 : index
    %706 = vector.load %arg6[%c1_346, %c0_347, %c0_348] : memref<8x8x128xf32, #tpu.memory_space<vmem>>, vector<1x8x128xf32>
    %707 = vector.shape_cast %706 : vector<1x8x128xf32> to vector<8x128xf32>
    %708 = vector.shape_cast %705 : vector<8x128xf32> to vector<1x8x128xf32>
    tpu.vector_store %arg6[%c1_346, %c0_347, %c0_348], %708 {strides = array<i32>} : memref<8x8x128xf32, #tpu.memory_space<vmem>>, vector<1x8x128xf32>,
    %c0_349 = arith.constant 0 : index
    %c0_350 = arith.constant 0 : index
    %709 = vector.load %arg10[%c0_349, %c0_350] : memref<8x256xbf16, #tpu.memory_space<vmem>>, vector<8x256xbf16>
    %cst_351 = arith.constant dense<0.000000e+00> : vector<8x1024xf32>
    %710 = tpu.matmul %709, %18, %cst_351 {dimension_numbers = #tpu.dot_dimension_numbers<[1], [0], [0], [1], [0, 0, 1, 1], [], []>} : vector<8x256xbf16>, vector<256x1024xbf16>, vector<8x1024xf32> -> vector<8x1024xf32>
    %c56_352 = arith.constant 56 : index
    %c0_353 = arith.constant 0 : index
    %711 = vector.load %arg9[%c56_352, %c0_353] : memref<64x1024xbf16, #tpu.memory_space<vmem>>, vector<8x512xbf16>
    %712 = arith.extf %711 : vector<8x512xbf16> to vector<8x512xf32>
    %713 = vector.broadcast %13 : vector<1x512xf32> to vector<8x512xf32>
    %714 = arith.addf %712, %713 : vector<8x512xf32>
    %715 = vector.extract_strided_slice %710 {offsets = [0, 0], sizes = [8, 512], strides = [1, 1]} : vector<8x1024xf32> to vector<8x512xf32>
    %716 = arith.addf %714, %715 : vector<8x512xf32>
    %c0_354 = arith.constant 0 : index
    %c512_355 = arith.constant 512 : index
    %717 = vector.load %arg9[%c0_354, %c512_355] : memref<64x1024xbf16, #tpu.memory_space<vmem>>, vector<8x512xbf16>
    %718 = arith.extf %717 : vector<8x512xbf16> to vector<8x512xf32>
    %719 = vector.broadcast %14 : vector<1x512xf32> to vector<8x512xf32>
    %720 = arith.addf %718, %719 : vector<8x512xf32>
    %721 = vector.extract_strided_slice %710 {offsets = [0, 512], sizes = [8, 512], strides = [1, 1]} : vector<8x1024xf32> to vector<8x512xf32>
    %722 = arith.addf %720, %721 : vector<8x512xf32>
    %c0_356 = arith.constant 0 : index
    %c0_357 = arith.constant 0 : index
    %723 = vector.load %arg12[%c0_356, %c0_357] : memref<8x128xf32, #tpu.memory_space<vmem>>, vector<8x128xf32>
    %724 = vector.extract_strided_slice %716 {offsets = [0, 0], sizes = [8, 128], strides = [1, 1]} : vector<8x512xf32> to vector<8x128xf32>
    %725 = arith.negf %724 : vector<8x128xf32>
    %726 = math.exp %725 : vector<8x128xf32>
    %cst_358 = arith.constant 1.000000e+00 : f32
    %727 = vector.broadcast %cst_358 : f32 to vector<8x128xf32>
    %728 = arith.addf %727, %726 : vector<8x128xf32>
    %729 = arith.divf %727, %728 : vector<8x128xf32>
    %730 = vector.extract_strided_slice %716 {offsets = [0, 128], sizes = [8, 128], strides = [1, 1]} : vector<8x512xf32> to vector<8x128xf32>
    %731 = arith.negf %730 : vector<8x128xf32>
    %732 = math.exp %731 : vector<8x128xf32>
    %cst_359 = arith.constant 1.000000e+00 : f32
    %733 = vector.broadcast %cst_359 : f32 to vector<8x128xf32>
    %734 = arith.addf %733, %732 : vector<8x128xf32>
    %735 = arith.divf %733, %734 : vector<8x128xf32>
    %736 = vector.extract_strided_slice %716 {offsets = [0, 256], sizes = [8, 128], strides = [1, 1]} : vector<8x512xf32> to vector<8x128xf32>
    %737 = math.tanh %736 : vector<8x128xf32>
    %738 = vector.extract_strided_slice %716 {offsets = [0, 384], sizes = [8, 128], strides = [1, 1]} : vector<8x512xf32> to vector<8x128xf32>
    %739 = arith.negf %738 : vector<8x128xf32>
    %740 = math.exp %739 : vector<8x128xf32>
    %cst_360 = arith.constant 1.000000e+00 : f32
    %741 = vector.broadcast %cst_360 : f32 to vector<8x128xf32>
    %742 = arith.addf %741, %740 : vector<8x128xf32>
    %743 = arith.divf %741, %742 : vector<8x128xf32>
    %744 = arith.mulf %735, %723 : vector<8x128xf32>
    %745 = arith.mulf %729, %737 : vector<8x128xf32>
    %746 = arith.addf %744, %745 : vector<8x128xf32>
    %747 = math.tanh %746 : vector<8x128xf32>
    %748 = arith.mulf %743, %747 : vector<8x128xf32>
    %c0_361 = arith.constant 0 : index
    %c0_362 = arith.constant 0 : index
    %749 = vector.load %arg14[%c0_361, %c0_362] : memref<8x128xf32, #tpu.memory_space<vmem>>, vector<8x128xf32>
    %750 = vector.extract_strided_slice %722 {offsets = [0, 0], sizes = [8, 128], strides = [1, 1]} : vector<8x512xf32> to vector<8x128xf32>
    %751 = arith.negf %750 : vector<8x128xf32>
    %752 = math.exp %751 : vector<8x128xf32>
    %cst_363 = arith.constant 1.000000e+00 : f32
    %753 = vector.broadcast %cst_363 : f32 to vector<8x128xf32>
    %754 = arith.addf %753, %752 : vector<8x128xf32>
    %755 = arith.divf %753, %754 : vector<8x128xf32>
    %756 = vector.extract_strided_slice %722 {offsets = [0, 128], sizes = [8, 128], strides = [1, 1]} : vector<8x512xf32> to vector<8x128xf32>
    %757 = arith.negf %756 : vector<8x128xf32>
    %758 = math.exp %757 : vector<8x128xf32>
    %cst_364 = arith.constant 1.000000e+00 : f32
    %759 = vector.broadcast %cst_364 : f32 to vector<8x128xf32>
    %760 = arith.addf %759, %758 : vector<8x128xf32>
    %761 = arith.divf %759, %760 : vector<8x128xf32>
    %762 = vector.extract_strided_slice %722 {offsets = [0, 256], sizes = [8, 128], strides = [1, 1]} : vector<8x512xf32> to vector<8x128xf32>
    %763 = math.tanh %762 : vector<8x128xf32>
    %764 = vector.extract_strided_slice %722 {offsets = [0, 384], sizes = [8, 128], strides = [1, 1]} : vector<8x512xf32> to vector<8x128xf32>
    %765 = arith.negf %764 : vector<8x128xf32>
    %766 = math.exp %765 : vector<8x128xf32>
    %cst_365 = arith.constant 1.000000e+00 : f32
    %767 = vector.broadcast %cst_365 : f32 to vector<8x128xf32>
    %768 = arith.addf %767, %766 : vector<8x128xf32>
    %769 = arith.divf %767, %768 : vector<8x128xf32>
    %770 = arith.mulf %761, %749 : vector<8x128xf32>
    %771 = arith.mulf %755, %763 : vector<8x128xf32>
    %772 = arith.addf %770, %771 : vector<8x128xf32>
    %773 = math.tanh %772 : vector<8x128xf32>
    %774 = arith.mulf %769, %773 : vector<8x128xf32>
    %c7_i32_366 = arith.constant 7 : i32
    %775 = vector.broadcast %c7_i32_366 : i32 to vector<8x128xi32>
    %776 = arith.cmpi sgt, %17, %775 : vector<8x128xi32>
    %c0_i32_367 = arith.constant 0 : i32
    %777 = vector.broadcast %c0_i32_367 : i32 to vector<8x128xi32>
    %778 = arith.cmpi sgt, %17, %777 : vector<8x128xi32>
    %c0_368 = arith.constant 0 : index
    %c0_369 = arith.constant 0 : index
    %779 = vector.load %arg11[%c0_368, %c0_369] : memref<8x128xf32, #tpu.memory_space<vmem>>, vector<8x128xf32>
    %780 = arith.select %776, %748, %779 : vector<8x128xi1>, vector<8x128xf32>
    %c0_370 = arith.constant 0 : index
    %c0_371 = arith.constant 0 : index
    %781 = vector.load %arg13[%c0_370, %c0_371] : memref<8x128xf32, #tpu.memory_space<vmem>>, vector<8x128xf32>
    %782 = arith.select %778, %774, %781 : vector<8x128xi1>, vector<8x128xf32>
    %c0_372 = arith.constant 0 : index
    %c0_373 = arith.constant 0 : index
    %783 = vector.load %arg12[%c0_372, %c0_373] : memref<8x128xf32, #tpu.memory_space<vmem>>, vector<8x128xf32>
    %784 = arith.select %776, %746, %783 : vector<8x128xi1>, vector<8x128xf32>
    %c0_374 = arith.constant 0 : index
    %c0_375 = arith.constant 0 : index
    %785 = vector.load %arg12[%c0_374, %c0_375] : memref<8x128xf32, #tpu.memory_space<vmem>>, vector<8x128xf32>
    tpu.vector_store %arg12[%c0_374, %c0_375], %784 {strides = array<i32>} : memref<8x128xf32, #tpu.memory_space<vmem>>, vector<8x128xf32>,
    %c0_376 = arith.constant 0 : index
    %c0_377 = arith.constant 0 : index
    %786 = vector.load %arg14[%c0_376, %c0_377] : memref<8x128xf32, #tpu.memory_space<vmem>>, vector<8x128xf32>
    %787 = arith.select %778, %772, %786 : vector<8x128xi1>, vector<8x128xf32>
    %c0_378 = arith.constant 0 : index
    %c0_379 = arith.constant 0 : index
    %788 = vector.load %arg14[%c0_378, %c0_379] : memref<8x128xf32, #tpu.memory_space<vmem>>, vector<8x128xf32>
    tpu.vector_store %arg14[%c0_378, %c0_379], %787 {strides = array<i32>} : memref<8x128xf32, #tpu.memory_space<vmem>>, vector<8x128xf32>,
    %c0_380 = arith.constant 0 : index
    %c0_381 = arith.constant 0 : index
    %789 = vector.load %arg11[%c0_380, %c0_381] : memref<8x128xf32, #tpu.memory_space<vmem>>, vector<8x128xf32>
    tpu.vector_store %arg11[%c0_380, %c0_381], %780 {strides = array<i32>} : memref<8x128xf32, #tpu.memory_space<vmem>>, vector<8x128xf32>,
    %c0_382 = arith.constant 0 : index
    %c0_383 = arith.constant 0 : index
    %790 = vector.load %arg13[%c0_382, %c0_383] : memref<8x128xf32, #tpu.memory_space<vmem>>, vector<8x128xf32>
    tpu.vector_store %arg13[%c0_382, %c0_383], %782 {strides = array<i32>} : memref<8x128xf32, #tpu.memory_space<vmem>>, vector<8x128xf32>,
    %791 = arith.truncf %780 : vector<8x128xf32> to vector<8x128xbf16>
    %c0_384 = arith.constant 0 : index
    %c0_385 = arith.constant 0 : index
    %792 = vector.load %arg10[%c0_384, %c0_385] : memref<8x256xbf16, #tpu.memory_space<vmem>>, vector<8x128xbf16>
    tpu.vector_store %arg10[%c0_384, %c0_385], %791 {strides = array<i32>} : memref<8x256xbf16, #tpu.memory_space<vmem>>, vector<8x128xbf16>,
    %793 = arith.truncf %782 : vector<8x128xf32> to vector<8x128xbf16>
    %c0_386 = arith.constant 0 : index
    %c128_387 = arith.constant 128 : index
    %794 = vector.load %arg10[%c0_386, %c128_387] : memref<8x256xbf16, #tpu.memory_space<vmem>>, vector<8x128xbf16>
    tpu.vector_store %arg10[%c0_386, %c128_387], %793 {strides = array<i32>} : memref<8x256xbf16, #tpu.memory_space<vmem>>, vector<8x128xbf16>,
    %cst_388 = arith.constant 0.000000e+00 : f32
    %795 = vector.broadcast %cst_388 : f32 to vector<8x128xf32>
    %796 = arith.select %776, %748, %795 : vector<8x128xi1>, vector<8x128xf32>
    %cst_389 = arith.constant 0.000000e+00 : f32
    %797 = vector.broadcast %cst_389 : f32 to vector<8x128xf32>
    %798 = arith.select %778, %774, %797 : vector<8x128xi1>, vector<8x128xf32>
    %c7_390 = arith.constant 7 : index
    %c0_391 = arith.constant 0 : index
    %c0_392 = arith.constant 0 : index
    %799 = vector.load %arg6[%c7_390, %c0_391, %c0_392] : memref<8x8x128xf32, #tpu.memory_space<vmem>>, vector<1x8x128xf32>
    %800 = vector.shape_cast %799 : vector<1x8x128xf32> to vector<8x128xf32>
    %801 = arith.addf %800, %796 : vector<8x128xf32>
    %c7_393 = arith.constant 7 : index
    %c0_394 = arith.constant 0 : index
    %c0_395 = arith.constant 0 : index
    %802 = vector.load %arg6[%c7_393, %c0_394, %c0_395] : memref<8x8x128xf32, #tpu.memory_space<vmem>>, vector<1x8x128xf32>
    %803 = vector.shape_cast %802 : vector<1x8x128xf32> to vector<8x128xf32>
    %804 = vector.shape_cast %801 : vector<8x128xf32> to vector<1x8x128xf32>
    tpu.vector_store %arg6[%c7_393, %c0_394, %c0_395], %804 {strides = array<i32>} : memref<8x8x128xf32, #tpu.memory_space<vmem>>, vector<1x8x128xf32>,
    %c0_396 = arith.constant 0 : index
    %c0_397 = arith.constant 0 : index
    %c0_398 = arith.constant 0 : index
    %805 = vector.load %arg6[%c0_396, %c0_397, %c0_398] : memref<8x8x128xf32, #tpu.memory_space<vmem>>, vector<1x8x128xf32>
    %806 = vector.shape_cast %805 : vector<1x8x128xf32> to vector<8x128xf32>
    %807 = arith.addf %806, %798 : vector<8x128xf32>
    %c0_399 = arith.constant 0 : index
    %c0_400 = arith.constant 0 : index
    %c0_401 = arith.constant 0 : index
    %808 = vector.load %arg6[%c0_399, %c0_400, %c0_401] : memref<8x8x128xf32, #tpu.memory_space<vmem>>, vector<1x8x128xf32>
    %809 = vector.shape_cast %808 : vector<1x8x128xf32> to vector<8x128xf32>
    %810 = vector.shape_cast %807 : vector<8x128xf32> to vector<1x8x128xf32>
    tpu.vector_store %arg6[%c0_399, %c0_400, %c0_401], %810 {strides = array<i32>} : memref<8x8x128xf32, #tpu.memory_space<vmem>>, vector<1x8x128xf32>,
    %c0_402 = arith.constant 0 : index
    %c0_403 = arith.constant 0 : index
    %811 = vector.load %arg11[%c0_402, %c0_403] : memref<8x128xf32, #tpu.memory_space<vmem>>, vector<8x128xf32>
    %c0_404 = arith.constant 0 : index
    %c0_405 = arith.constant 0 : index
    %812 = vector.load %arg13[%c0_404, %c0_405] : memref<8x128xf32, #tpu.memory_space<vmem>>, vector<8x128xf32>
    %813 = arith.addf %811, %812 : vector<8x128xf32>
    %c0_406 = arith.constant 0 : index
    %c0_407 = arith.constant 0 : index
    %814 = vector.load %arg7[%c0_406, %c0_407] : memref<8x128xf32, #tpu.memory_space<vmem>>, vector<8x128xf32>
    tpu.vector_store %arg7[%c0_406, %c0_407], %813 {strides = array<i32>} : memref<8x128xf32, #tpu.memory_space<vmem>>, vector<8x128xf32>,
    %c0_408 = arith.constant 0 : index
    %c0_409 = arith.constant 0 : index
    %815 = vector.load %arg12[%c0_408, %c0_409] : memref<8x128xf32, #tpu.memory_space<vmem>>, vector<8x128xf32>
    %c0_410 = arith.constant 0 : index
    %c0_411 = arith.constant 0 : index
    %816 = vector.load %arg14[%c0_410, %c0_411] : memref<8x128xf32, #tpu.memory_space<vmem>>, vector<8x128xf32>
    %817 = arith.addf %815, %816 : vector<8x128xf32>
    %c0_412 = arith.constant 0 : index
    %c0_413 = arith.constant 0 : index
    %818 = vector.load %arg8[%c0_412, %c0_413] : memref<8x128xf32, #tpu.memory_space<vmem>>, vector<8x128xf32>
    tpu.vector_store %arg8[%c0_412, %c0_413], %817 {strides = array<i32>} : memref<8x128xf32, #tpu.memory_space<vmem>>, vector<8x128xf32>,
    return
  }
  func.func @transform_0(%arg0: i32) -> (i32, i32, i32) {
    %c0_i32 = arith.constant 0 : i32
    %c0_i32_0 = arith.constant 0 : i32
    %c0_i32_1 = arith.constant 0 : i32
    return %c0_i32, %arg0, %c0_i32_0 : i32, i32, i32
  }
  func.func @transform_1(%arg0: i32) -> (i32, i32) {
    %c0_i32 = arith.constant 0 : i32
    %c0_i32_0 = arith.constant 0 : i32
    return %arg0, %c0_i32 : i32, i32
  }
  func.func @transform_2(%arg0: i32) -> (i32, i32) {
    %c0_i32 = arith.constant 0 : i32
    %c0_i32_0 = arith.constant 0 : i32
    %c0_i32_1 = arith.constant 0 : i32
    return %c0_i32, %c0_i32_0 : i32, i32
  }
  func.func @transform_3(%arg0: i32) -> (i32, i32) {
    %c0_i32 = arith.constant 0 : i32
    %c0_i32_0 = arith.constant 0 : i32
    %c0_i32_1 = arith.constant 0 : i32
    return %c0_i32, %c0_i32_0 : i32, i32
  }
  func.func @transform_4(%arg0: i32) -> (i32, i32) {
    %c0_i32 = arith.constant 0 : i32
    %c0_i32_0 = arith.constant 0 : i32
    %c0_i32_1 = arith.constant 0 : i32
    return %c0_i32, %c0_i32_0 : i32, i32
  }
  func.func @transform_5(%arg0: i32) -> (i32, i32, i32) {
    %c0_i32 = arith.constant 0 : i32
    %c0_i32_0 = arith.constant 0 : i32
    %c0_i32_1 = arith.constant 0 : i32
    return %c0_i32, %arg0, %c0_i32_0 : i32, i32, i32
  }
  func.func @transform_6(%arg0: i32) -> (i32, i32) {
    %c0_i32 = arith.constant 0 : i32
    %c0_i32_0 = arith.constant 0 : i32
    return %arg0, %c0_i32 : i32, i32
  }
  func.func @transform_7(%arg0: i32) -> (i32, i32) {
    %c0_i32 = arith.constant 0 : i32
    %c0_i32_0 = arith.constant 0 : i32
    return %arg0, %c0_i32 : i32, i32
  }
}

</mosaic_0001>

<bundles_post_ra>
// kernel: encoder_forward.1
= control target key start
LH: loop header
LB: loop body
LE: loop exit
PB: predicated region body
PF: predicated region fallthrough
CT: control target
= control target key end

     0   :  { %v7019_v3 = vmov 0   ;;  %s7011_s2 = inlined_call_operand.vmem [shape: bf16[128,1024], index: 2, kind: input, shape index: {}]   ;;  %s7012_s0 = inlined_call_operand.vmem [shape: bf16[8,8,128], index: 0, kind: input, shape index: {}]   ;;  %s7013_s4 = inlined_call_operand.vmem [shape: bf16[256,1024], index: 4, kind: input, shape index: {}]   ;;  %s7014_s1 = inlined_call_operand.vmem [shape: s32[8,1], index: 1, kind: input, shape index: {}]   ;;  %s7015_s3 = inlined_call_operand.vmem [shape: f32[1,1024], index: 3, kind: input, shape index: {}]   ;;  %s7016_s5 = inlined_call_operand.vmem [shape: f32[8,8,128], index: 5, kind: output, shape index: {0}]   ;;  %s7017_s7 = inlined_call_operand.vmem [shape: f32[8,128], index: 7, kind: output, shape index: {2}]   ;;  %s7018_s6 = inlined_call_operand.vmem [shape: f32[8,128], index: 6, kind: output, shape index: {1}]  }
   0x1   :  { %v32_v0 = vld [vmem:[%s7011_s2] sm:$0xff]  ;;  %v33_v2 = vld [vmem:[%s7011_s2 + $0x8] sm:$0xff]  ;;  %472 = vmatprep.mubr.bf16.mxu0 %v7019_v3  ;;  %545 = vmatprep.mubr.bf16.mxu1 %v7019_v3  ;;  %v34_v63 = vld [vmem:[%s7011_s2 + $0x10] sm:$0xff] }
   0x2   :  { %v36_v1 = vld [vmem:[%s7011_s2 + $0x20] sm:$0xff]  ;;  %v37_v5 = vld [vmem:[%s7011_s2 + $0x28] sm:$0xff]  ;;  %4308 = vset.pattern.permute.xlu0 %v7019_v3 }
   0x3   :  { %v3953_v4 = vcombine.high %v32_v0, %v36_v1  ;;  %v3952_v6 = vcombine.low %v32_v0, %v36_v1  ;;  %v40_v7 = vld [vmem:[%s7011_s2 + $0x40] sm:$0xff]  ;;  %v3955_v9 = vcombine.high %v33_v2, %v37_v5  ;;  %v3954_v10 = vcombine.low %v33_v2, %v37_v5  ;;  %v41_v12 = vld [vmem:[%s7011_s2 + $0x48] sm:$0xff]  ;;  %v38_v0 = vld [vmem:[%s7011_s2 + $0x30] sm:$0xff] }
   0x4   :  { %v44_v8 = vld [vmem:[%s7011_s2 + $0x60] sm:$0xff]  ;;  %v45_v13 = vld [vmem:[%s7011_s2 + $0x68] sm:$0xff]  ;;  %v35_v1 = vld [vmem:[%s7011_s2 + $0x18] sm:$0xff] }
   0x5   :  { %v3961_v11 = vcombine.high %v40_v7, %v44_v8  ;;  %v48_v14 = vld [vmem:[%s7011_s2 + $0x80] sm:$0xff]  ;;  %440 = vmatprep.subr.bf16.mxu0 %v3953_v4  ;;  %v3963_v15 = vcombine.high %v41_v12, %v45_v13  ;;  %v49_v17 = vld [vmem:[%s7011_s2 + $0x88] sm:$0xff]  ;;  %513 = vmatprep.subr.bf16.mxu1 %v3955_v9  ;;  %v3960_v19 = vcombine.low %v40_v7, %v44_v8  ;;  %v39_v2 = vld [vmem:[%s7011_s2 + $0x38] sm:$0xff] }
   0x6   :  { %v52_v16 = vld [vmem:[%s7011_s2 + $0xa0] sm:$0xff]  ;;  %v53_v18 = vld [vmem:[%s7011_s2 + $0xa8] sm:$0xff]  ;;  %441 = vmatpush1.bf16.msra.mxu0 %v3952_v6  ;;  %514 = vmatpush1.bf16.msra.mxu1 %v3954_v10  ;;  %v3962_v20 = vcombine.low %v41_v12, %v45_v13  ;;  %v3957_v6 = vcombine.high %v34_v63, %v38_v0  ;;  %v3959_v7 = vcombine.high %v35_v1, %v39_v2  ;;  %v42_v8 = vld [vmem:[%s7011_s2 + $0x50] sm:$0xff] }
   0x7   :  { %442 = vmatprep.subr.bf16.mxu0 %v3961_v11  ;;  %v3969_v21 = vcombine.high %v48_v14, %v52_v16  ;;  %515 = vmatprep.subr.bf16.mxu1 %v3963_v15  ;;  %v3971_v22 = vcombine.high %v49_v17, %v53_v18  ;;  %v56_v23 = vld [vmem:[%s7011_s2 + $0xc0] sm:$0xff]  ;;  %v57_v25 = vld [vmem:[%s7011_s2 + $0xc8] sm:$0xff]  ;;  %v3968_v27 = vcombine.low %v48_v14, %v52_v16  ;;  %v46_v9 = vld [vmem:[%s7011_s2 + $0x70] sm:$0xff] }
   0x8   :  { %v60_v24 = vld [vmem:[%s7011_s2 + $0xe0] sm:$0xff]  ;;  %v61_v26 = vld [vmem:[%s7011_s2 + $0xe8] sm:$0xff]  ;;  %v3970_v28 = vcombine.low %v49_v17, %v53_v18  ;;  %v43_v11 = vld [vmem:[%s7011_s2 + $0x58] sm:$0xff]  ;;  %v3956_v13 = vcombine.low %v34_v63, %v38_v0  ;;  %v3958_v14 = vcombine.low %v35_v1, %v39_v2  ;;  %v3965_v15 = vcombine.high %v42_v8, %v46_v9 }
   0x9   :  { %v3977_v29 = vcombine.high %v56_v23, %v60_v24  ;;  %v3979_v30 = vcombine.high %v57_v25, %v61_v26  ;;  %v64_v31 = vld [vmem:[%s7011_s2 + $0x100] sm:$0xff]  ;;  %v65_v33 = vld [vmem:[%s7011_s2 + $0x108] sm:$0xff]  ;;  %v3976_v35 = vcombine.low %v56_v23, %v60_v24  ;;  %v3978_v36 = vcombine.low %v57_v25, %v61_v26  ;;  %v47_v12 = vld [vmem:[%s7011_s2 + $0x78] sm:$0xff] }
   0xa   :  { %443 = vmatpush1.bf16.msra.mxu0 %v3960_v19  ;;  %516 = vmatpush1.bf16.msra.mxu1 %v3962_v20  ;;  %v68_v32 = vld [vmem:[%s7011_s2 + $0x120] sm:$0xff]  ;;  %v69_v34 = vld [vmem:[%s7011_s2 + $0x128] sm:$0xff]  ;;  %v3967_v16 = vcombine.high %v43_v11, %v47_v12  ;;  %v50_v17 = vld [vmem:[%s7011_s2 + $0x90] sm:$0xff] }
   0xb   :  { %444 = vmatprep.subr.bf16.mxu0 %v3969_v21  ;;  %517 = vmatprep.subr.bf16.mxu1 %v3971_v22  ;;  %v3985_v37 = vcombine.high %v64_v31, %v68_v32  ;;  %v72_v38 = vld [vmem:[%s7011_s2 + $0x140] sm:$0xff]  ;;  %v3987_v39 = vcombine.high %v65_v33, %v69_v34  ;;  %v73_v41 = vld [vmem:[%s7011_s2 + $0x148] sm:$0xff]  ;;  %v3984_v43 = vcombine.low %v64_v31, %v68_v32  ;;  %v54_v18 = vld [vmem:[%s7011_s2 + $0xb0] sm:$0xff] }
   0xc   :  { %v76_v40 = vld [vmem:[%s7011_s2 + $0x160] sm:$0xff]  ;;  %v77_v42 = vld [vmem:[%s7011_s2 + $0x168] sm:$0xff]  ;;  %v3986_v44 = vcombine.low %v65_v33, %v69_v34  ;;  %v51_v19 = vld [vmem:[%s7011_s2 + $0x98] sm:$0xff]  ;;  %v3964_v21 = vcombine.low %v42_v8, %v46_v9  ;;  %v3966_v22 = vcombine.low %v43_v11, %v47_v12  ;;  %v3973_v23 = vcombine.high %v50_v17, %v54_v18 }
   0xd   :  { %v3993_v45 = vcombine.high %v72_v38, %v76_v40  ;;  %v80_v46 = vld [vmem:[%s7011_s2 + $0x180] sm:$0xff]  ;;  %v3995_v47 = vcombine.high %v73_v41, %v77_v42  ;;  %v81_v49 = vld [vmem:[%s7011_s2 + $0x188] sm:$0xff]  ;;  %v3992_v51 = vcombine.low %v72_v38, %v76_v40  ;;  %v3994_v52 = vcombine.low %v73_v41, %v77_v42  ;;  %v55_v20 = vld [vmem:[%s7011_s2 + $0xb8] sm:$0xff] }
   0xe   :  { %445 = vmatpush1.bf16.msra.mxu0 %v3968_v27  ;;  %518 = vmatpush1.bf16.msra.mxu1 %v3970_v28  ;;  %v84_v48 = vld [vmem:[%s7011_s2 + $0x1a0] sm:$0xff]  ;;  %v85_v50 = vld [vmem:[%s7011_s2 + $0x1a8] sm:$0xff]  ;;  %v3975_v24 = vcombine.high %v51_v19, %v55_v20  ;;  %v58_v25 = vld [vmem:[%s7011_s2 + $0xd0] sm:$0xff]  ;;  %v3974_v31 = vcombine.low %v51_v19, %v55_v20 }
   0xf   :  { %446 = vmatprep.subr.bf16.mxu0 %v3977_v29  ;;  %519 = vmatprep.subr.bf16.mxu1 %v3979_v30  ;;  %v4001_v53 = vcombine.high %v80_v46, %v84_v48  ;;  %v4003_v54 = vcombine.high %v81_v49, %v85_v50  ;;  %v88_v55 = vld [vmem:[%s7011_s2 + $0x1c0] sm:$0xff]  ;;  %v89_v57 = vld [vmem:[%s7011_s2 + $0x1c8] sm:$0xff]  ;;  %v4000_v59 = vcombine.low %v80_v46, %v84_v48  ;;  %v62_v26 = vld [vmem:[%s7011_s2 + $0xf0] sm:$0xff] }
  0x10   :  { %v92_v56 = vld [vmem:[%s7011_s2 + $0x1e0] sm:$0xff]  ;;  %v93_v58 = vld [vmem:[%s7011_s2 + $0x1e8] sm:$0xff]  ;;  %v4002_v60 = vcombine.low %v81_v49, %v85_v50  ;;  %v59_v28 = vld [vmem:[%s7011_s2 + $0xd8] sm:$0xff]  ;;  %v3972_v30 = vcombine.low %v50_v17, %v54_v18  ;;  %v3981_v32 = vcombine.high %v58_v25, %v62_v26  ;;  %v3980_v38 = vcombine.low %v58_v25, %v62_v26 }
  0x11   :  { %v4009_v61 = vcombine.high %v88_v55, %v92_v56  ;;  %v4011_v62 = vcombine.high %v89_v57, %v93_v58  ;;  %v4008_v4 = vcombine.low %v88_v55, %v92_v56  ;;  %v4010_v5 = vcombine.low %v89_v57, %v93_v58  ;;  %v4730_v10 = vld [vmem:[%s7012_s0] sm:$0xff]   ;;  %v4762_v27 = vld [vmem:[%s7012_s0 + $0x8] sm:$0xff]   ;;  %v63_v29 = vld [vmem:[%s7011_s2 + $0xf8] sm:$0xff] }
  0x12   :  { %447 = vmatpush1.bf16.msra.mxu0 %v3976_v35  ;;  %520 = vmatpush1.bf16.msra.mxu1 %v3978_v36  ;;  %v3983_v33 = vcombine.high %v59_v28, %v63_v29  ;;  %v66_v34 = vld [vmem:[%s7011_s2 + $0x110] sm:$0xff]  ;;  %v67_v36 = vld [vmem:[%s7011_s2 + $0x118] sm:$0xff]  ;;  %v812_v8 = vld [vmem:[%s7013_s4 + $0x28] sm:$0xff] }
  0x13   :  { %448 = vmatprep.subr.bf16.mxu0 %v3985_v37  ;;  %521 = vmatprep.subr.bf16.mxu1 %v3987_v39  ;;  %v70_v35 = vld [vmem:[%s7011_s2 + $0x130] sm:$0xff]  ;;  %v71_v37 = vld [vmem:[%s7011_s2 + $0x138] sm:$0xff]  ;;  %v3982_v39 = vcombine.low %v59_v28, %v63_v29  ;;  %v820_v17 = vld [vmem:[%s7013_s4 + $0x68] sm:$0xff] }
  0x14   :  { %v3989_v40 = vcombine.high %v66_v34, %v70_v35  ;;  %v3991_v41 = vcombine.high %v67_v36, %v71_v37  ;;  %v74_v42 = vld [vmem:[%s7011_s2 + $0x150] sm:$0xff]  ;;  %v79_v46 = vld [vmem:[%s7011_s2 + $0x178] sm:$0xff]  ;;  %v3990_v48 = vcombine.low %v67_v36, %v71_v37  ;;  %v828_v25 = vld [vmem:[%s7013_s4 + $0xa8] sm:$0xff] }
  0x15   :  { %v95_v63 = vld [vmem:[%s7011_s2 + $0x1f8] sm:$0xff] }
  0x16   :  { %449 = vmatpush1.bf16.msra.mxu0 %v3984_v43  ;;  %522 = vmatpush1.bf16.msra.mxu1 %v3986_v44  ;;  %v78_v43 = vld [vmem:[%s7011_s2 + $0x170] sm:$0xff] }
  0x17   :  { %450 = vmatprep.subr.bf16.mxu0 %v3993_v45  ;;  %523 = vmatprep.subr.bf16.mxu1 %v3995_v47  ;;  %v4795_v44 = vld [vmem:[%s7012_s0 + $0x10] sm:$0xff]   ;;  %v75_v45 = vld [vmem:[%s7011_s2 + $0x158] sm:$0xff]  ;;  %v3988_v47 = vcombine.low %v66_v34, %v70_v35  ;;  %v3997_v49 = vcombine.high %v74_v42, %v78_v43  ;;  %v3996_v55 = vcombine.low %v74_v42, %v78_v43 }
  0x18   :  { %v3999_v50 = vcombine.high %v75_v45, %v79_v46  ;;  %v3998_v56 = vcombine.low %v75_v45, %v79_v46 }
  0x1a   :  { %451 = vmatpush1.bf16.msra.mxu0 %v3992_v51  ;;  %524 = vmatpush1.bf16.msra.mxu1 %v3994_v52  ;;  %v82_v51 = vld [vmem:[%s7011_s2 + $0x190] sm:$0xff] }
  0x1b   :  { %452 = vmatprep.subr.bf16.mxu0 %v4001_v53  ;;  %525 = vmatprep.subr.bf16.mxu1 %v4003_v54  ;;  %v86_v52 = vld [vmem:[%s7011_s2 + $0x1b0] sm:$0xff]  ;;  %v83_v53 = vld [vmem:[%s7011_s2 + $0x198] sm:$0xff] }
  0x1c   :  { %v87_v54 = vld [vmem:[%s7011_s2 + $0x1b8] sm:$0xff]  ;;  %v4005_v57 = vcombine.high %v82_v51, %v86_v52  ;;  %v4004_v0 = vcombine.low %v82_v51, %v86_v52 }
  0x1d   :  { %v4007_v58 = vcombine.high %v83_v53, %v87_v54  ;;  %v4006_v1 = vcombine.low %v83_v53, %v87_v54  ;;  %v855_v54 = vld [vmem:[%s7013_s4 + $0x180] sm:$0xff] }
  0x1e   :  { %453 = vmatpush1.bf16.msra.mxu0 %v4000_v59  ;;  %526 = vmatpush1.bf16.msra.mxu1 %v4002_v60  ;;  %v90_v59 = vld [vmem:[%s7011_s2 + $0x1d0] sm:$0xff] }
  0x1f   :  { %454 = vmatprep.subr.bf16.mxu0 %v4009_v61  ;;  %527 = vmatprep.subr.bf16.mxu1 %v4011_v62  ;;  %v94_v60 = vld [vmem:[%s7011_s2 + $0x1f0] sm:$0xff]  ;;  %v4828_v61 = vld [vmem:[%s7012_s0 + $0x18] sm:$0xff]  }
  0x20   :  { %v91_v62 = vld [vmem:[%s7011_s2 + $0x1d8] sm:$0xff]  ;;  %v4013_v2 = vcombine.high %v90_v59, %v94_v60  ;;  %v4012_v9 = vcombine.low %v90_v59, %v94_v60 }
  0x21   :  { %v4014_v11 = vcombine.low %v91_v62, %v95_v63 }
  0x22   :  { %455 = vmatpush1.bf16.msra.mxu0 %v4008_v4  ;;  %528 = vmatpush1.bf16.msra.mxu1 %v4010_v5  ;;  %v4015_v4 = vcombine.high %v91_v62, %v95_v63  ;;  %v807_v5 = vld [vmem:[%s7013_s4] sm:$0xff] }
  0x23   :  { %586 = vmatprep.subr.bf16.mxu0 %v3957_v6  ;;  %659 = vmatprep.subr.bf16.mxu1 %v3959_v7  ;;  %v811_v6 = vld [vmem:[%s7013_s4 + $0x20] sm:$0xff]  ;;  %v808_v7 = vld [vmem:[%s7013_s4 + $0x8] sm:$0xff] }
  0x24   :  { %v4851_v12 = vcombine.high %v807_v5, %v811_v6  ;;  %v4869_v18 = vcombine.low %v807_v5, %v811_v6  ;;  %v4872_v19 = vcombine.low %v808_v7, %v812_v8  ;;  %v863_v63 = vld [vmem:[%s7013_s4 + $0x1c0] sm:$0xff] }
  0x25   :  { %473 = vmatmul.mubr.bf16.vlgmr.msra.gmra.mrb[0].mxu0 %v4730_v10  ;;  %546 = vmatmul.mubr.bf16.vlgmr.msra.gmra.mrb[0].mxu1 %v4730_v10 }
  0x26   :  { %587 = vmatpush1.bf16.msra.mxu0 %v3956_v13  ;;  %660 = vmatpush1.bf16.msra.mxu1 %v3958_v14  ;;  %7322 = vst [vmem:[#allocation8_spill] sm:$0xff] %v4851_v12  ;;  %v4854_v13 = vcombine.high %v808_v7, %v812_v8  ;;  %v815_v14 = vld [vmem:[%s7013_s4 + $0x40] sm:$0xff]  ;;  %7324 = vst [vmem:[#allocation10_spill] sm:$0xff] %v4869_v18 }
  0x27   :  { %588 = vmatprep.subr.bf16.mxu0 %v3965_v15  ;;  %661 = vmatprep.subr.bf16.mxu1 %v3967_v16  ;;  %v819_v15 = vld [vmem:[%s7013_s4 + $0x60] sm:$0xff]  ;;  %v816_v16 = vld [vmem:[%s7013_s4 + $0x48] sm:$0xff]  ;;  %7325 = vst [vmem:[#allocation11_spill] sm:$0xff] %v4872_v19 }
  0x28   :  { %482 = vmatprep.mubr.bf16.mxu0 %v7019_v3  ;;  %555 = vmatprep.mubr.bf16.mxu1 %v7019_v3  ;;  %7323 = vst [vmem:[#allocation9_spill] sm:$0xff] %v4854_v13  ;;  %v4874_v20 = vcombine.high %v815_v14, %v819_v15  ;;  %v4894_v26 = vcombine.low %v815_v14, %v819_v15  ;;  %v871_v7 = vld [vmem:[%s7013_s4 + $0x200] sm:$0xff]  ;;  %v876_v14 = vld [vmem:[%s7013_s4 + $0x228] sm:$0xff] }
  0x29   :  { %v4898_v28 = vcombine.low %v816_v16, %v820_v17  ;;  %v875_v8 = vld [vmem:[%s7013_s4 + $0x220] sm:$0xff] }
  0x2a   :  { %589 = vmatpush1.bf16.msra.mxu0 %v3964_v21  ;;  %662 = vmatpush1.bf16.msra.mxu1 %v3966_v22  ;;  %7326 = vst [vmem:[#allocation12_spill] sm:$0xff] %v4874_v20  ;;  %v4877_v21 = vcombine.high %v816_v16, %v820_v17  ;;  %v823_v22 = vld [vmem:[%s7013_s4 + $0x80] sm:$0xff]  ;;  %7328 = vst [vmem:[#allocation14_spill] sm:$0xff] %v4894_v26  ;;  %v5060_v17 = vcombine.high %v871_v7, %v875_v8 }
  0x2b   :  { %590 = vmatprep.subr.bf16.mxu0 %v3973_v23  ;;  %663 = vmatprep.subr.bf16.mxu1 %v3975_v24  ;;  %v827_v23 = vld [vmem:[%s7013_s4 + $0xa0] sm:$0xff]  ;;  %v824_v24 = vld [vmem:[%s7013_s4 + $0x88] sm:$0xff]  ;;  %7329 = vst [vmem:[#allocation15_spill] sm:$0xff] %v4898_v28 }
  0x2c   :  { %7327 = vst [vmem:[#allocation13_spill] sm:$0xff] %v4877_v21  ;;  %v4900_v29 = vcombine.high %v823_v22, %v827_v23  ;;  %v4920_v34 = vcombine.low %v823_v22, %v827_v23  ;;  %v4924_v35 = vcombine.low %v824_v24, %v828_v25  ;;  %7354 = vst [vmem:[#allocation40_spill] sm:$0xff] %v5060_v17  ;;  %v879_v23 = vld [vmem:[%s7013_s4 + $0x240] sm:$0xff] }
  0x2d   :  { %483 = vmatmul.mubr.bf16.gmra.mrb[4].mxu0 %v4762_v27  ;;  %556 = vmatmul.mubr.bf16.gmra.mrb[4].mxu1 %v4762_v27 }
  0x2e   :  { %591 = vmatpush1.bf16.msra.mxu0 %v3972_v30  ;;  %664 = vmatpush1.bf16.msra.mxu1 %v3974_v31  ;;  %7330 = vst [vmem:[#allocation16_spill] sm:$0xff] %v4900_v29  ;;  %v4903_v30 = vcombine.high %v824_v24, %v828_v25  ;;  %v835_v31 = vld [vmem:[%s7013_s4 + $0xe0] sm:$0xff]  ;;  %7332 = vst [vmem:[#allocation18_spill] sm:$0xff] %v4920_v34  ;;  %v880_v24 = vld [vmem:[%s7013_s4 + $0x248] sm:$0xff] }
  0x2f   :  { %592 = vmatprep.subr.bf16.mxu0 %v3981_v32  ;;  %665 = vmatprep.subr.bf16.mxu1 %v3983_v33  ;;  %v832_v32 = vld [vmem:[%s7013_s4 + $0xc8] sm:$0xff]  ;;  %7333 = vst [vmem:[#allocation19_spill] sm:$0xff] %v4924_v35 }
  0x30   :  { %492 = vmatprep.mubr.bf16.mxu0 %v7019_v3  ;;  %565 = vmatprep.mubr.bf16.mxu1 %v7019_v3  ;;  %7331 = vst [vmem:[#allocation17_spill] sm:$0xff] %v4903_v30  ;;  %v836_v33 = vld [vmem:[%s7013_s4 + $0xe8] sm:$0xff] }
  0x31   :  { %v4929_v37 = vcombine.high %v832_v32, %v836_v33  ;;  %v4950_v43 = vcombine.low %v832_v32, %v836_v33  ;;  %v884_v25 = vld [vmem:[%s7013_s4 + $0x268] sm:$0xff] }
  0x32   :  { %593 = vmatpush1.bf16.msra.mxu0 %v3980_v38  ;;  %666 = vmatpush1.bf16.msra.mxu1 %v3982_v39  ;;  %v839_v38 = vld [vmem:[%s7013_s4 + $0x100] sm:$0xff]  ;;  %v5089_v33 = vcombine.high %v880_v24, %v884_v25 }
  0x33   :  { %594 = vmatprep.subr.bf16.mxu0 %v3989_v40  ;;  %667 = vmatprep.subr.bf16.mxu1 %v3991_v41  ;;  %7335 = vst [vmem:[#allocation21_spill] sm:$0xff] %v4929_v37  ;;  %v843_v39 = vld [vmem:[%s7013_s4 + $0x120] sm:$0xff]  ;;  %v840_v40 = vld [vmem:[%s7013_s4 + $0x108] sm:$0xff]  ;;  %7337 = vst [vmem:[#allocation23_spill] sm:$0xff] %v4950_v43 }
  0x34   :  { %v844_v41 = vld [vmem:[%s7013_s4 + $0x128] sm:$0xff]  ;;  %v4952_v45 = vcombine.high %v839_v38, %v843_v39  ;;  %7359 = vst [vmem:[#allocation45_spill] sm:$0xff] %v5089_v33 }
  0x35   :  { %493 = vmatmul.mubr.bf16.gmra.mrb[8].mxu0 %v4795_v44  ;;  %566 = vmatmul.mubr.bf16.gmra.mrb[8].mxu1 %v4795_v44  ;;  %v4955_v46 = vcombine.high %v840_v40, %v844_v41  ;;  %v4976_v51 = vcombine.low %v840_v40, %v844_v41  ;;  %v888_v40 = vld [vmem:[%s7013_s4 + $0x288] sm:$0xff] }
  0x36   :  { %595 = vmatpush1.bf16.msra.mxu0 %v3988_v47  ;;  %668 = vmatpush1.bf16.msra.mxu1 %v3990_v48  ;;  %7338 = vst [vmem:[#allocation24_spill] sm:$0xff] %v4952_v45  ;;  %v847_v47 = vld [vmem:[%s7013_s4 + $0x140] sm:$0xff]  ;;  %v848_v48 = vld [vmem:[%s7013_s4 + $0x148] sm:$0xff] }
  0x37   :  { %596 = vmatprep.subr.bf16.mxu0 %v3997_v49  ;;  %669 = vmatprep.subr.bf16.mxu1 %v3999_v50  ;;  %7339 = vst [vmem:[#allocation25_spill] sm:$0xff] %v4955_v46  ;;  %v852_v49 = vld [vmem:[%s7013_s4 + $0x168] sm:$0xff]  ;;  %v4972_v50 = vcombine.low %v839_v38, %v843_v39  ;;  %7341 = vst [vmem:[#allocation27_spill] sm:$0xff] %v4976_v51  ;;  %v887_v38 = vld [vmem:[%s7013_s4 + $0x280] sm:$0xff] }
  0x38   :  { %502 = vmatprep.mubr.bf16.mxu0 %v7019_v3  ;;  %575 = vmatprep.mubr.bf16.mxu1 %v7019_v3  ;;  %v4981_v53 = vcombine.high %v848_v48, %v852_v49  ;;  %v5002_v59 = vcombine.low %v848_v48, %v852_v49  ;;  %v891_v39 = vld [vmem:[%s7013_s4 + $0x2a0] sm:$0xff]  ;;  %v892_v41 = vld [vmem:[%s7013_s4 + $0x2a8] sm:$0xff] }
  0x39   :  { %7340 = vst [vmem:[#allocation26_spill] sm:$0xff] %v4972_v50  ;;  %v5110_v48 = vcombine.high %v887_v38, %v891_v39  ;;  %v5113_v49 = vcombine.high %v888_v40, %v892_v41 }
  0x3a   :  { %597 = vmatpush1.bf16.msra.mxu0 %v3996_v55  ;;  %670 = vmatpush1.bf16.msra.mxu1 %v3998_v56  ;;  %7343 = vst [vmem:[#allocation29_spill] sm:$0xff] %v4981_v53  ;;  %v859_v55 = vld [vmem:[%s7013_s4 + $0x1a0] sm:$0xff]  ;;  %v856_v56 = vld [vmem:[%s7013_s4 + $0x188] sm:$0xff]  ;;  %7345 = vst [vmem:[#allocation31_spill] sm:$0xff] %v5002_v59 }
  0x3b   :  { %598 = vmatprep.subr.bf16.mxu0 %v4005_v57  ;;  %671 = vmatprep.subr.bf16.mxu1 %v4007_v58  ;;  %v860_v57 = vld [vmem:[%s7013_s4 + $0x1a8] sm:$0xff]  ;;  %v5004_v60 = vcombine.high %v855_v54, %v859_v55  ;;  %7362 = vst [vmem:[#allocation48_spill] sm:$0xff] %v5110_v48  ;;  %7363 = vst [vmem:[#allocation49_spill] sm:$0xff] %v5113_v49 }
  0x3c   :  { %v5007_v62 = vcombine.high %v856_v56, %v860_v57 }
  0x3d   :  { %503 = vmatmul.mubr.bf16.gmra.mrb[12].mxu0 %v4828_v61  ;;  %576 = vmatmul.mubr.bf16.gmra.mrb[12].mxu1 %v4828_v61  ;;  %7346 = vst [vmem:[#allocation32_spill] sm:$0xff] %v5004_v60 }
  0x3e   :  { %599 = vmatpush1.bf16.msra.mxu0 %v4004_v0  ;;  %672 = vmatpush1.bf16.msra.mxu1 %v4006_v1  ;;  %7347 = vst [vmem:[#allocation33_spill] sm:$0xff] %v5007_v62  ;;  %v864_v0 = vld [vmem:[%s7013_s4 + $0x1c8] sm:$0xff] }
  0x3f   :  { %600 = vmatprep.subr.bf16.mxu0 %v4013_v2  ;;  %673 = vmatprep.subr.bf16.mxu1 %v4015_v4  ;;  %v868_v1 = vld [vmem:[%s7013_s4 + $0x1e8] sm:$0xff]  ;;  %v5024_v2 = vcombine.low %v855_v54, %v859_v55  ;;  %v5028_v4 = vcombine.low %v856_v56, %v860_v57  ;;  %v895_v54 = vld [vmem:[%s7013_s4 + $0x2c0] sm:$0xff] }
  0x40   :  { %618 = vmatprep.mubr.bf16.mxu0 %v7019_v3  ;;  %691 = vmatprep.mubr.bf16.mxu1 %v7019_v3  ;;  %v5033_v6 = vcombine.high %v864_v0, %v868_v1  ;;  %v5058_v16 = vcombine.low %v864_v0, %v868_v1  ;;  %v899_v55 = vld [vmem:[%s7013_s4 + $0x2e0] sm:$0xff]  ;;  %v896_v56 = vld [vmem:[%s7013_s4 + $0x2c8] sm:$0xff] }
  0x41   :  { %7348 = vst [vmem:[#allocation34_spill] sm:$0xff] %v5024_v2  ;;  %7349 = vst [vmem:[#allocation35_spill] sm:$0xff] %v5028_v4  ;;  %v900_v57 = vld [vmem:[%s7013_s4 + $0x2e8] sm:$0xff]  ;;  %v5134_v0 = vcombine.high %v895_v54, %v899_v55 }
  0x42   :  { %601 = vmatpush1.bf16.msra.mxu0 %v4012_v9  ;;  %674 = vmatpush1.bf16.msra.mxu1 %v4014_v11  ;;  %7351 = vst [vmem:[#allocation37_spill] sm:$0xff] %v5033_v6  ;;  %v5043_v9 = vcombine.high %v7019_v3, %v7019_v3  ;;  %v872_v11 = vld [vmem:[%s7013_s4 + $0x208] sm:$0xff]  ;;  %7353 = vst [vmem:[#allocation39_spill] sm:$0xff] %v5058_v16  ;;  %v5137_v1 = vcombine.high %v896_v56, %v900_v57 }
  0x43   :  { %1583 = vmatprep.subr.bf16.mxu0 %v4851_v12  ;;  %1624 = vmatprep.subr.bf16.mxu1 %v4854_v13  ;;  %v5063_v22 = vcombine.high %v872_v11, %v876_v14  ;;  %7366 = vst [vmem:[#allocation52_spill] sm:$0xff] %v5134_v0 }
  0x44   :  { %7367 = vst [vmem:[#allocation53_spill] sm:$0xff] %v5137_v1 }
  0x45   :  { %619 = vmatmul.mubr.bf16.vlgmr.msra.gmra.mrb[16].mxu0 %v4730_v10  ;;  %692 = vmatmul.mubr.bf16.vlgmr.msra.gmra.mrb[16].mxu1 %v4730_v10  ;;  %v831_v10 = vld [vmem:[%s7013_s4 + $0xc0] sm:$0xff]  ;;  %7355 = vst [vmem:[#allocation41_spill] sm:$0xff] %v5063_v22 }
  0x46   :  { %1584 = vmatpush1.bf16.msra.mxu0 %v4869_v18  ;;  %1625 = vmatpush1.bf16.msra.mxu1 %v4872_v19  ;;  %v4926_v36 = vcombine.high %v831_v10, %v835_v31  ;;  %v4945_v42 = vcombine.low %v831_v10, %v835_v31  ;;  %v5080_v10 = vcombine.low %v871_v7, %v875_v8  ;;  %v903_v7 = vld [vmem:[%s7013_s4 + $0x300] sm:$0xff] }
  0x47   :  { %1585 = vmatprep.subr.bf16.mxu0 %v4874_v20  ;;  %1626 = vmatprep.subr.bf16.mxu1 %v4877_v21  ;;  %v5084_v31 = vcombine.low %v872_v11, %v876_v14  ;;  %v907_v8 = vld [vmem:[%s7013_s4 + $0x320] sm:$0xff]  ;;  %v904_v11 = vld [vmem:[%s7013_s4 + $0x308] sm:$0xff] }
  0x48   :  { %628 = vmatprep.mubr.bf16.mxu0 %v7019_v3  ;;  %701 = vmatprep.mubr.bf16.mxu1 %v7019_v3  ;;  %7334 = vst [vmem:[#allocation20_spill] sm:$0xff] %v4926_v36  ;;  %7336 = vst [vmem:[#allocation22_spill] sm:$0xff] %v4945_v42  ;;  %v908_v14 = vld [vmem:[%s7013_s4 + $0x328] sm:$0xff] }
  0x49   :  { %7356 = vst [vmem:[#allocation42_spill] sm:$0xff] %v5080_v10  ;;  %7357 = vst [vmem:[#allocation43_spill] sm:$0xff] %v5084_v31 }
  0x4a   :  { %1586 = vmatpush1.bf16.msra.mxu0 %v4894_v26  ;;  %1627 = vmatpush1.bf16.msra.mxu1 %v4898_v28 }
  0x4b   :  { %1587 = vmatprep.subr.bf16.mxu0 %v4900_v29  ;;  %1628 = vmatprep.subr.bf16.mxu1 %v4903_v30 }
  0x4d   :  { %629 = vmatmul.mubr.bf16.gmra.mrb[20].mxu0 %v4762_v27  ;;  %702 = vmatmul.mubr.bf16.gmra.mrb[20].mxu1 %v4762_v27  ;;  %v851_v27 = vld [vmem:[%s7013_s4 + $0x160] sm:$0xff] }
  0x4e   :  { %1588 = vmatpush1.bf16.msra.mxu0 %v4920_v34  ;;  %1629 = vmatpush1.bf16.msra.mxu1 %v4924_v35  ;;  %v4978_v52 = vcombine.high %v847_v47, %v851_v27  ;;  %v4997_v58 = vcombine.low %v847_v47, %v851_v27  ;;  %v5108_v27 = vcombine.low %v880_v24, %v884_v25 }
  0x4f   :  { %1589 = vmatprep.subr.bf16.mxu0 %v4926_v36  ;;  %1630 = vmatprep.subr.bf16.mxu1 %v4929_v37  ;;  %v5158_v24 = vcombine.high %v903_v7, %v907_v8  ;;  %v5161_v25 = vcombine.high %v904_v11, %v908_v14 }
  0x50   :  { %638 = vmatprep.mubr.bf16.mxu0 %v7019_v3  ;;  %711 = vmatprep.mubr.bf16.mxu1 %v7019_v3  ;;  %7342 = vst [vmem:[#allocation28_spill] sm:$0xff] %v4978_v52  ;;  %7344 = vst [vmem:[#allocation30_spill] sm:$0xff] %v4997_v58 }
  0x51   :  { %7361 = vst [vmem:[#allocation47_spill] sm:$0xff] %v5108_v27  ;;  %7370 = vst [vmem:[#allocation56_spill] sm:$0xff] %v5158_v24 }
  0x52   :  { %1590 = vmatpush1.bf16.msra.mxu0 %v4945_v42  ;;  %1631 = vmatpush1.bf16.msra.mxu1 %v4950_v43  ;;  %7371 = vst [vmem:[#allocation57_spill] sm:$0xff] %v5161_v25 }
  0x53   :  { %1591 = vmatprep.subr.bf16.mxu0 %v4952_v45  ;;  %1632 = vmatprep.subr.bf16.mxu1 %v4955_v46 }
  0x55   :  { %639 = vmatmul.mubr.bf16.gmra.mrb[24].mxu0 %v4795_v44  ;;  %712 = vmatmul.mubr.bf16.gmra.mrb[24].mxu1 %v4795_v44  ;;  %v867_v44 = vld [vmem:[%s7013_s4 + $0x1e0] sm:$0xff] }
  0x56   :  { %1592 = vmatpush1.bf16.msra.mxu0 %v4972_v50  ;;  %1633 = vmatpush1.bf16.msra.mxu1 %v4976_v51  ;;  %v5030_v5 = vcombine.high %v863_v63, %v867_v44  ;;  %v5053_v15 = vcombine.low %v863_v63, %v867_v44  ;;  %v5128_v63 = vcombine.low %v887_v38, %v891_v39  ;;  %v911_v38 = vld [vmem:[%s7013_s4 + $0x340] sm:$0xff] }
  0x57   :  { %1593 = vmatprep.subr.bf16.mxu0 %v4978_v52  ;;  %1634 = vmatprep.subr.bf16.mxu1 %v4981_v53  ;;  %v5132_v44 = vcombine.low %v888_v40, %v892_v41  ;;  %v915_v39 = vld [vmem:[%s7013_s4 + $0x360] sm:$0xff]  ;;  %v912_v40 = vld [vmem:[%s7013_s4 + $0x348] sm:$0xff] }
  0x58   :  { %648 = vmatprep.mubr.bf16.mxu0 %v7019_v3  ;;  %721 = vmatprep.mubr.bf16.mxu1 %v7019_v3  ;;  %7350 = vst [vmem:[#allocation36_spill] sm:$0xff] %v5030_v5  ;;  %7352 = vst [vmem:[#allocation38_spill] sm:$0xff] %v5053_v15  ;;  %v916_v41 = vld [vmem:[%s7013_s4 + $0x368] sm:$0xff]  ;;  %v919_v3 = vld [vmem:[%s7013_s4 + $0x380] sm:$0xff] }
  0x59   :  { %7364 = vst [vmem:[#allocation50_spill] sm:$0xff] %v5128_v63  ;;  %7365 = vst [vmem:[#allocation51_spill] sm:$0xff] %v5132_v44 }
  0x5a   :  { %1594 = vmatpush1.bf16.msra.mxu0 %v4997_v58  ;;  %1635 = vmatpush1.bf16.msra.mxu1 %v5002_v59 }
  0x5b   :  { %1595 = vmatprep.subr.bf16.mxu0 %v5004_v60  ;;  %1636 = vmatprep.subr.bf16.mxu1 %v5007_v62 }
  0x5d   :  { %649 = vmatmul.mubr.bf16.gmra.mrb[28].mxu0 %v4828_v61  ;;  %722 = vmatmul.mubr.bf16.gmra.mrb[28].mxu1 %v4828_v61  ;;  %v883_v61 = vld [vmem:[%s7013_s4 + $0x260] sm:$0xff] }
  0x5e   :  { %1596 = vmatpush1.bf16.msra.mxu0 %v5024_v2  ;;  %1637 = vmatpush1.bf16.msra.mxu1 %v5028_v4  ;;  %v5086_v32 = vcombine.high %v879_v23, %v883_v61  ;;  %v5104_v47 = vcombine.low %v879_v23, %v883_v61  ;;  %v5152_v23 = vcombine.low %v895_v54, %v899_v55 }
  0x5f   :  { %1597 = vmatprep.subr.bf16.mxu0 %v5030_v5  ;;  %1638 = vmatprep.subr.bf16.mxu1 %v5033_v6  ;;  %v5156_v61 = vcombine.low %v896_v56, %v900_v57  ;;  %v5176_v54 = vcombine.low %v903_v7, %v907_v8  ;;  %v5180_v55 = vcombine.low %v904_v11, %v908_v14  ;;  %v923_v7 = vld [vmem:[%s7013_s4 + $0x3a0] sm:$0xff]  ;;  %v920_v8 = vld [vmem:[%s7013_s4 + $0x388] sm:$0xff] }
  0x60   :  { %1615 = vmatprep.mubr.bf16.mxu0 %v5043_v9  ;;  %1656 = vmatprep.mubr.bf16.mxu1 %v5043_v9  ;;  %7358 = vst [vmem:[#allocation44_spill] sm:$0xff] %v5086_v32  ;;  %7360 = vst [vmem:[#allocation46_spill] sm:$0xff] %v5104_v47  ;;  %v5182_v56 = vcombine.high %v911_v38, %v915_v39  ;;  %v5185_v57 = vcombine.high %v912_v40, %v916_v41  ;;  %v924_v11 = vld [vmem:[%s7013_s4 + $0x3a8] sm:$0xff] }
  0x61   :  { %7368 = vst [vmem:[#allocation54_spill] sm:$0xff] %v5152_v23  ;;  %7369 = vst [vmem:[#allocation55_spill] sm:$0xff] %v5156_v61  ;;  %v5200_v14 = vcombine.low %v911_v38, %v915_v39  ;;  %v931_v38 = vld [vmem:[%s7013_s4 + $0x3e0] sm:$0xff]  ;;  %v928_v39 = vld [vmem:[%s7013_s4 + $0x3c8] sm:$0xff] }
  0x62   :  { %1598 = vmatpush1.bf16.msra.mxu0 %v5053_v15  ;;  %1639 = vmatpush1.bf16.msra.mxu1 %v5058_v16  ;;  %7372 = vst [vmem:[#allocation58_spill] sm:$0xff] %v5176_v54  ;;  %7373 = vst [vmem:[#allocation59_spill] sm:$0xff] %v5180_v55 }
  0x63   :  { %1599 = vmatprep.subr.bf16.mxu0 %v5060_v17  ;;  %1640 = vmatprep.subr.bf16.mxu1 %v5063_v22  ;;  %7374 = vst [vmem:[#allocation60_spill] sm:$0xff] %v5182_v56  ;;  %7375 = vst [vmem:[#allocation61_spill] sm:$0xff] %v5185_v57 }
  0x64   :  { %7376 = vst [vmem:[#allocation62_spill] sm:$0xff] %v5200_v14 }
  0x66   :  { %1600 = vmatpush1.bf16.msra.mxu0 %v5080_v10  ;;  %1641 = vmatpush1.bf16.msra.mxu1 %v5084_v31 }
  0x67   :  { %1601 = vmatprep.subr.bf16.mxu0 %v5086_v32  ;;  %1642 = vmatprep.subr.bf16.mxu1 %v5089_v33 }
  0x6a   :  { %1602 = vmatpush1.bf16.msra.mxu0 %v5104_v47  ;;  %1643 = vmatpush1.bf16.msra.mxu1 %v5108_v27 }
  0x6b   :  { %1603 = vmatprep.subr.bf16.mxu0 %v5110_v48  ;;  %1644 = vmatprep.subr.bf16.mxu1 %v5113_v49 }
  0x6e   :  { %1604 = vmatpush1.bf16.msra.mxu0 %v5128_v63  ;;  %1645 = vmatpush1.bf16.msra.mxu1 %v5132_v44 }
  0x6f   :  { %1605 = vmatprep.subr.bf16.mxu0 %v5134_v0  ;;  %1646 = vmatprep.subr.bf16.mxu1 %v5137_v1  ;;  %v809_v1 = vld [vmem:[%s7013_s4 + $0x10] sm:$0xff] }
  0x72   :  { %1606 = vmatpush1.bf16.msra.mxu0 %v5152_v23  ;;  %1647 = vmatpush1.bf16.msra.mxu1 %v5156_v61  ;;  %v5209_v61 = vcombine.high %v920_v8, %v924_v11  ;;  %v927_v23 = vld [vmem:[%s7013_s4 + $0x3c0] sm:$0xff] }
  0x73   :  { %1607 = vmatprep.subr.bf16.mxu0 %v5158_v24  ;;  %1648 = vmatprep.subr.bf16.mxu1 %v5161_v25  ;;  %v5204_v25 = vcombine.low %v912_v40, %v916_v41  ;;  %v5206_v24 = vcombine.high %v919_v3, %v923_v7  ;;  %v932_v40 = vld [vmem:[%s7013_s4 + $0x3e8] sm:$0xff]  ;;  %v803_v41 = vld [vmem:[%s7014_s1] sm:$0xff] }
  0x74   :  { %7379 = vst [vmem:[#allocation65_spill] sm:$0xff] %v5209_v61  ;;  %805 = vperm.xlu0 %4308, %v803_v41   ;;  %v5255_v41 = vcombine.low %v928_v39, %v932_v40 }
  0x75   :  { %7377 = vst [vmem:[#allocation63_spill] sm:$0xff] %v5204_v25  ;;  %7378 = vst [vmem:[#allocation64_spill] sm:$0xff] %v5206_v24 }
  0x76   :  { %1608 = vmatpush1.bf16.msra.mxu0 %v5176_v54  ;;  %1649 = vmatpush1.bf16.msra.mxu1 %v5180_v55  ;;  %v5233_v55 = vcombine.high %v927_v23, %v931_v38  ;;  %v5236_v54 = vcombine.high %v928_v39, %v932_v40  ;;  %7385 = vst [vmem:[#allocation71_spill] sm:$0xff] %v5255_v41  ;;  %v818_v39 = vld [vmem:[%s7013_s4 + $0x58] sm:$0xff] }
  0x77   :  { %1609 = vmatprep.subr.bf16.mxu0 %v5182_v56  ;;  %1650 = vmatprep.subr.bf16.mxu1 %v5185_v57  ;;  %v5227_v57 = vcombine.low %v919_v3, %v923_v7  ;;  %v5231_v56 = vcombine.low %v920_v8, %v924_v11  ;;  %v813_v3 = vld [vmem:[%s7013_s4 + $0x30] sm:$0xff]  ;;  %v810_v7 = vld [vmem:[%s7013_s4 + $0x18] sm:$0xff]  ;;  %v5251_v11 = vcombine.low %v927_v23, %v931_v38  ;;  %v7388_v38 = vmov 0  }
  0x78   :  { %7382 = vst [vmem:[#allocation68_spill] sm:$0xff] %v5233_v55  ;;  %7383 = vst [vmem:[#allocation69_spill] sm:$0xff] %v5236_v54  ;;  %v814_v8 = vld [vmem:[%s7013_s4 + $0x38] sm:$0xff]  ;;  %v821_v23 = vld [vmem:[%s7013_s4 + $0x70] sm:$0xff] }
  0x79   :  { %7380 = vst [vmem:[#allocation66_spill] sm:$0xff] %v5227_v57  ;;  %7381 = vst [vmem:[#allocation67_spill] sm:$0xff] %v5231_v56  ;;  %v822_v40 = vld [vmem:[%s7013_s4 + $0x78] sm:$0xff] }
  0x7a   :  { %1610 = vmatpush1.bf16.msra.mxu0 %v5200_v14  ;;  %1651 = vmatpush1.bf16.msra.mxu1 %v5204_v25  ;;  %7384 = vst [vmem:[#allocation70_spill] sm:$0xff] %v5251_v11  ;;  %v817_v25 = vld [vmem:[%s7013_s4 + $0x50] sm:$0xff] }
  0x7b   :  { %1611 = vmatprep.subr.bf16.mxu0 %v5206_v24  ;;  %1652 = vmatprep.subr.bf16.mxu1 %v5209_v61  ;;  %v5257_v61 = vcombine.high %v809_v1, %v813_v3  ;;  %v5260_v24 = vcombine.high %v810_v7, %v814_v8  ;;  %v825_v14 = vld [vmem:[%s7013_s4 + $0x90] sm:$0xff] }
  0x7d   :  { %7386 = vst [vmem:[#allocation72_spill] sm:$0xff] %v5257_v61  ;;  %7387 = vst [vmem:[#allocation73_spill] sm:$0xff] %v5260_v24 }
  0x7e   :  { %1612 = vmatpush1.bf16.msra.mxu0 %v5227_v57  ;;  %1653 = vmatpush1.bf16.msra.mxu1 %v5231_v56  ;;  %v5270_v56 = vcombine.low %v7388_v38, %v7388_v38  ;;  %v5285_v38 = vcombine.high %v817_v25, %v821_v23  ;;  %v5288_v57 = vcombine.high %v818_v39, %v822_v40 }
  0x7f   :  { %1613 = vmatprep.subr.bf16.mxu0 %v5233_v55  ;;  %1654 = vmatprep.subr.bf16.mxu1 %v5236_v54  ;;  %v5279_v54 = vcombine.low %v809_v1, %v813_v3  ;;  %v5283_v55 = vcombine.low %v810_v7, %v814_v8  ;;  %v829_v1 = vld [vmem:[%s7013_s4 + $0xb0] sm:$0xff]  ;;  %v826_v3 = vld [vmem:[%s7013_s4 + $0x98] sm:$0xff]  ;;  %v5305_v8 = vcombine.low %v817_v25, %v821_v23 }
  0x80   :  { %7391 = vst [vmem:[#allocation76_spill] sm:$0xff] %v5285_v38  ;;  %7392 = vst [vmem:[#allocation77_spill] sm:$0xff] %v5288_v57  ;;  %v830_v7 = vld [vmem:[%s7013_s4 + $0xb8] sm:$0xff]  ;;  %v837_v25 = vld [vmem:[%s7013_s4 + $0xf0] sm:$0xff] }
  0x81   :  { %7389 = vst [vmem:[#allocation74_spill] sm:$0xff] %v5279_v54  ;;  %7390 = vst [vmem:[#allocation75_spill] sm:$0xff] %v5283_v55  ;;  %v834_v23 = vld [vmem:[%s7013_s4 + $0xd8] sm:$0xff] }
  0x82   :  { %1614 = vmatpush1.bf16.msra.mxu0 %v5251_v11  ;;  %1655 = vmatpush1.bf16.msra.mxu1 %v5255_v41  ;;  %7393 = vst [vmem:[#allocation78_spill] sm:$0xff] %v5305_v8  ;;  %v5314_v41 = vcombine.high %v826_v3, %v830_v7  ;;  %v833_v11 = vld [vmem:[%s7013_s4 + $0xd0] sm:$0xff] }
  0x83   :  { %1665 = vmatprep.subr.bf16.mxu0 %v5257_v61  ;;  %1706 = vmatprep.subr.bf16.mxu1 %v5260_v24  ;;  %v5309_v24 = vcombine.low %v818_v39, %v822_v40  ;;  %v5311_v61 = vcombine.high %v825_v14, %v829_v1  ;;  %v838_v39 = vld [vmem:[%s7013_s4 + $0xf8] sm:$0xff]  ;;  %v5331_v40 = vcombine.low %v825_v14, %v829_v1  ;;  %v845_v14 = vld [vmem:[%s7013_s4 + $0x130] sm:$0xff] }
  0x84   :  { %7396 = vst [vmem:[#allocation81_spill] sm:$0xff] %v5314_v41  ;;  %v842_v1 = vld [vmem:[%s7013_s4 + $0x118] sm:$0xff] }
  0x85   :  { %1616 = vmatmul.mubr.bf16.vlgmr.msra.gmra.mrb[32].mxu0 %v5270_v56  ;;  %1657 = vmatmul.mubr.bf16.vlgmr.msra.gmra.mrb[32].mxu1 %v5270_v56  ;;  %7394 = vst [vmem:[#allocation79_spill] sm:$0xff] %v5309_v24  ;;  %7395 = vst [vmem:[#allocation80_spill] sm:$0xff] %v5311_v61 }
  0x86   :  { %1666 = vmatpush1.bf16.msra.mxu0 %v5279_v54  ;;  %1707 = vmatpush1.bf16.msra.mxu1 %v5283_v55  ;;  %7397 = vst [vmem:[#allocation82_spill] sm:$0xff] %v5331_v40  ;;  %v5340_v55 = vcombine.high %v834_v23, %v838_v39  ;;  %v881_v54 = vld [vmem:[%s7013_s4 + $0x250] sm:$0xff] }
  0x87   :  { %1667 = vmatprep.subr.bf16.mxu0 %v5285_v38  ;;  %1708 = vmatprep.subr.bf16.mxu1 %v5288_v57  ;;  %v5335_v57 = vcombine.low %v826_v3, %v830_v7  ;;  %v5337_v38 = vcombine.high %v833_v11, %v837_v25  ;;  %v846_v3 = vld [vmem:[%s7013_s4 + $0x138] sm:$0xff]  ;;  %v5355_v7 = vcombine.low %v833_v11, %v837_v25  ;;  %v853_v11 = vld [vmem:[%s7013_s4 + $0x170] sm:$0xff] }
  0x88   :  { %1697 = vmatprep.mubr.bf16.mxu0 %v5043_v9  ;;  %1738 = vmatprep.mubr.bf16.mxu1 %v5043_v9  ;;  %7400 = vst [vmem:[#allocation85_spill] sm:$0xff] %v5340_v55  ;;  %v841_v9 = vld [vmem:[%s7013_s4 + $0x110] sm:$0xff]  ;;  %v850_v25 = vld [vmem:[%s7013_s4 + $0x158] sm:$0xff] }
  0x89   :  { %7398 = vst [vmem:[#allocation83_spill] sm:$0xff] %v5335_v57  ;;  %7399 = vst [vmem:[#allocation84_spill] sm:$0xff] %v5337_v38 }
  0x8a   :  { %1668 = vmatpush1.bf16.msra.mxu0 %v5305_v8  ;;  %1709 = vmatpush1.bf16.msra.mxu1 %v5309_v24  ;;  %7401 = vst [vmem:[#allocation86_spill] sm:$0xff] %v5355_v7  ;;  %v5364_v24 = vcombine.high %v842_v1, %v846_v3  ;;  %v849_v8 = vld [vmem:[%s7013_s4 + $0x150] sm:$0xff] }
  0x8b   :  { %1669 = vmatprep.subr.bf16.mxu0 %v5311_v61  ;;  %1710 = vmatprep.subr.bf16.mxu1 %v5314_v41  ;;  %v5359_v41 = vcombine.low %v834_v23, %v838_v39  ;;  %v5361_v61 = vcombine.high %v841_v9, %v845_v14  ;;  %v854_v23 = vld [vmem:[%s7013_s4 + $0x178] sm:$0xff]  ;;  %v5379_v39 = vcombine.low %v841_v9, %v845_v14  ;;  %v861_v9 = vld [vmem:[%s7013_s4 + $0x1b0] sm:$0xff] }
  0x8c   :  { %7404 = vst [vmem:[#allocation89_spill] sm:$0xff] %v5364_v24  ;;  %v858_v14 = vld [vmem:[%s7013_s4 + $0x198] sm:$0xff] }
  0x8d   :  { %7402 = vst [vmem:[#allocation87_spill] sm:$0xff] %v5359_v41  ;;  %7403 = vst [vmem:[#allocation88_spill] sm:$0xff] %v5361_v61 }
  0x8e   :  { %1670 = vmatpush1.bf16.msra.mxu0 %v5331_v40  ;;  %1711 = vmatpush1.bf16.msra.mxu1 %v5335_v57  ;;  %7405 = vst [vmem:[#allocation90_spill] sm:$0xff] %v5379_v39  ;;  %v5388_v57 = vcombine.high %v850_v25, %v854_v23  ;;  %v857_v40 = vld [vmem:[%s7013_s4 + $0x190] sm:$0xff] }
  0x8f   :  { %1671 = vmatprep.subr.bf16.mxu0 %v5337_v38  ;;  %1712 = vmatprep.subr.bf16.mxu1 %v5340_v55  ;;  %v5383_v55 = vcombine.low %v842_v1, %v846_v3  ;;  %v5385_v38 = vcombine.high %v849_v8, %v853_v11  ;;  %v862_v1 = vld [vmem:[%s7013_s4 + $0x1b8] sm:$0xff]  ;;  %v5403_v3 = vcombine.low %v849_v8, %v853_v11  ;;  %v869_v8 = vld [vmem:[%s7013_s4 + $0x1f0] sm:$0xff] }
  0x90   :  { %7408 = vst [vmem:[#allocation93_spill] sm:$0xff] %v5388_v57  ;;  %v866_v11 = vld [vmem:[%s7013_s4 + $0x1d8] sm:$0xff] }
  0x91   :  { %7406 = vst [vmem:[#allocation91_spill] sm:$0xff] %v5383_v55  ;;  %7407 = vst [vmem:[#allocation92_spill] sm:$0xff] %v5385_v38 }
  0x92   :  { %1672 = vmatpush1.bf16.msra.mxu0 %v5355_v7  ;;  %1713 = vmatpush1.bf16.msra.mxu1 %v5359_v41  ;;  %7409 = vst [vmem:[#allocation94_spill] sm:$0xff] %v5403_v3  ;;  %v5412_v41 = vcombine.high %v858_v14, %v862_v1  ;;  %v865_v7 = vld [vmem:[%s7013_s4 + $0x1d0] sm:$0xff] }
  0x93   :  { %1673 = vmatprep.subr.bf16.mxu0 %v5361_v61  ;;  %1714 = vmatprep.subr.bf16.mxu1 %v5364_v24  ;;  %v5407_v24 = vcombine.low %v850_v25, %v854_v23  ;;  %v5409_v61 = vcombine.high %v857_v40, %v861_v9  ;;  %v870_v25 = vld [vmem:[%s7013_s4 + $0x1f8] sm:$0xff]  ;;  %v5427_v23 = vcombine.low %v857_v40, %v861_v9  ;;  %v877_v40 = vld [vmem:[%s7013_s4 + $0x230] sm:$0xff]  ;;  %v1756_v9 = vlaneseq }
  0x94   :  { %7412 = vst [vmem:[#allocation97_spill] sm:$0xff] %v5412_v41 }
  0x95   :  { %7410 = vst [vmem:[#allocation95_spill] sm:$0xff] %v5407_v24  ;;  %7411 = vst [vmem:[#allocation96_spill] sm:$0xff] %v5409_v61 }
  0x96   :  { %1674 = vmatpush1.bf16.msra.mxu0 %v5379_v39  ;;  %1715 = vmatpush1.bf16.msra.mxu1 %v5383_v55  ;;  %7413 = vst [vmem:[#allocation98_spill] sm:$0xff] %v5427_v23  ;;  %v5436_v55 = vcombine.high %v866_v11, %v870_v25  ;;  %v873_v39 = vld [vmem:[%s7013_s4 + $0x210] sm:$0xff] }
  0x97   :  { %1675 = vmatprep.subr.bf16.mxu0 %v5385_v38  ;;  %1716 = vmatprep.subr.bf16.mxu1 %v5388_v57  ;;  %v5431_v57 = vcombine.low %v858_v14, %v862_v1  ;;  %v5433_v38 = vcombine.high %v865_v7, %v869_v8  ;;  %v874_v14 = vld [vmem:[%s7013_s4 + $0x218] sm:$0xff] }
  0x98   :  { %7416 = vst [vmem:[#allocation101_spill] sm:$0xff] %v5436_v55  ;;  %v878_v1 = vld [vmem:[%s7013_s4 + $0x238] sm:$0xff] }
  0x99   :  { %7414 = vst [vmem:[#allocation99_spill] sm:$0xff] %v5431_v57  ;;  %7415 = vst [vmem:[#allocation100_spill] sm:$0xff] %v5433_v38 }
  0x9a   :  { %1676 = vmatpush1.bf16.msra.mxu0 %v5403_v3  ;;  %1717 = vmatpush1.bf16.msra.mxu1 %v5407_v24  ;;  %v5457_v24 = vcombine.high %v873_v39, %v877_v40  ;;  %v5460_v3 = vcombine.high %v874_v14, %v878_v1 }
  0x9b   :  { %1677 = vmatprep.subr.bf16.mxu0 %v5409_v61  ;;  %1718 = vmatprep.subr.bf16.mxu1 %v5412_v41  ;;  %v5451_v41 = vcombine.low %v865_v7, %v869_v8  ;;  %v5455_v61 = vcombine.low %v866_v11, %v870_v25  ;;  %v885_v7 = vld [vmem:[%s7013_s4 + $0x270] sm:$0xff]  ;;  %v5468_v8 = vshrl.u32 %v1756_v9, 7  ;;  %v882_v11 = vld [vmem:[%s7013_s4 + $0x258] sm:$0xff] }
  0x9c   :  { %7419 = vst [vmem:[#allocation104_spill] sm:$0xff] %v5457_v24  ;;  %7420 = vst [vmem:[#allocation105_spill] sm:$0xff] %v5460_v3  ;;  %v886_v25 = vld [vmem:[%s7013_s4 + $0x278] sm:$0xff]  ;;  %v5483_v9 = vcombine.high %v881_v54, %v885_v7 }
  0x9d   :  { %7417 = vst [vmem:[#allocation102_spill] sm:$0xff] %v5451_v41  ;;  %7418 = vst [vmem:[#allocation103_spill] sm:$0xff] %v5455_v61  ;;  %v7427_v0 = vsub.s32 2, %v5468_v8 }
  0x9e   :  { %1678 = vmatpush1.bf16.msra.mxu0 %v5427_v23  ;;  %1719 = vmatpush1.bf16.msra.mxu1 %v5431_v57  ;;  %7423 = vst [vmem:[#allocation108_spill] sm:$0xff] %v5483_v9  ;;  %v5486_v57 = vcombine.high %v882_v11, %v886_v25  ;;  %v889_v23 = vld [vmem:[%s7013_s4 + $0x290] sm:$0xff] }
  0x9f   :  { %1679 = vmatprep.subr.bf16.mxu0 %v5433_v38  ;;  %1720 = vmatprep.subr.bf16.mxu1 %v5436_v55  ;;  %v5477_v55 = vcombine.low %v873_v39, %v877_v40  ;;  %v5481_v38 = vcombine.low %v874_v14, %v878_v1  ;;  %v893_v39 = vld [vmem:[%s7013_s4 + $0x2b0] sm:$0xff]  ;;  %v7134_v40 = vsub.s32 0, %v5468_v8  ;;  %v890_v14 = vld [vmem:[%s7013_s4 + $0x298] sm:$0xff] }
  0xa0   :  { %7424 = vst [vmem:[#allocation109_spill] sm:$0xff] %v5486_v57  ;;  %v894_v1 = vld [vmem:[%s7013_s4 + $0x2b8] sm:$0xff]  ;;  %v5521_v63 = vcombine.high %v889_v23, %v893_v39 }
  0xa1   :  { %7421 = vst [vmem:[#allocation106_spill] sm:$0xff] %v5477_v55  ;;  %7422 = vst [vmem:[#allocation107_spill] sm:$0xff] %v5481_v38 }
  0xa2   :  { %1680 = vmatpush1.bf16.msra.mxu0 %v5451_v41  ;;  %1721 = vmatpush1.bf16.msra.mxu1 %v5455_v61  ;;  %v802_v61 = vld [vmem:[%s7015_s3 + $0x4] sm:$0xf]  ;;  %v5507_v41 = vcombine.low %v881_v54, %v885_v7  ;;  %7430 = vst [vmem:[#allocation114_spill] sm:$0xff] %v5521_v63  ;;  %v5528_v7 = vcombine.high %v890_v14, %v894_v1 }
  0xa3   :  { %1681 = vmatprep.subr.bf16.mxu0 %v5457_v24  ;;  %1722 = vmatprep.subr.bf16.mxu1 %v5460_v3  ;;  %v5511_v24 = vrot.slane %v802_v61, %v7134_v40  ;;  %v5515_v44 = vrot.slane %v802_v61, %v7427_v0  ;;  %v5519_v3 = vcombine.low %v882_v11, %v886_v25  ;;  %v897_v0 = vld [vmem:[%s7013_s4 + $0x2d0] sm:$0xff]  ;;  %v898_v11 = vld [vmem:[%s7013_s4 + $0x2d8] sm:$0xff] }
  0xa4   :  { %7425 = vst [vmem:[#allocation110_spill] sm:$0xff] %v5507_v41  ;;  %7433 = vst [vmem:[#allocation116_spill] sm:$0xff] %v5528_v7  ;;  %v901_v40 = vld [vmem:[%s7013_s4 + $0x2f0] sm:$0xff]  ;;  %v5543_v25 = vcombine.low %v889_v23, %v893_v39  ;;  %v906_v39 = vld [vmem:[%s7013_s4 + $0x318] sm:$0xff] }
  0xa5   :  { %7426 = vst [vmem:[#allocation111_spill] sm:$0xff] %v5511_v24  ;;  %7428 = vst [vmem:[#allocation112_spill] sm:$0xff] %v5515_v44  ;;  %v909_v23 = vld [vmem:[%s7013_s4 + $0x330] sm:$0xff] }
  0xa6   :  { %1682 = vmatpush1.bf16.msra.mxu0 %v5477_v55  ;;  %1723 = vmatpush1.bf16.msra.mxu1 %v5481_v38  ;;  %7429 = vst [vmem:[#allocation113_spill] sm:$0xff] %v5519_v3  ;;  %v7431_v55 = vsub.s32 1, %v5468_v8  ;;  %7434 = vst [vmem:[#allocation117_spill] sm:$0xff] %v5543_v25 }
  0xa7   :  { %1683 = vmatprep.subr.bf16.mxu0 %v5483_v9  ;;  %1724 = vmatprep.subr.bf16.mxu1 %v5486_v57  ;;  %v5547_v57 = vcombine.low %v890_v14, %v894_v1  ;;  %v5549_v9 = vcombine.high %v897_v0, %v901_v40  ;;  %v910_v14 = vld [vmem:[%s7013_s4 + $0x338] sm:$0xff]  ;;  %v5567_v1 = vcombine.low %v897_v0, %v901_v40  ;;  %v917_v40 = vld [vmem:[%s7013_s4 + $0x370] sm:$0xff] }
  0xa8   :  { %v5525_v54 = vrot.slane %v802_v61, %v7431_v55  ;;  %v902_v55 = vld [vmem:[%s7013_s4 + $0x2f8] sm:$0xff] }
  0xa9   :  { %7435 = vst [vmem:[#allocation118_spill] sm:$0xff] %v5547_v57  ;;  %7436 = vst [vmem:[#allocation119_spill] sm:$0xff] %v5549_v9  ;;  %v5552_v38 = vcombine.high %v898_v11, %v902_v55  ;;  %v914_v0 = vld [vmem:[%s7013_s4 + $0x358] sm:$0xff] }
  0xaa   :  { %7432 = vst [vmem:[#allocation115_spill] sm:$0xff] %v5525_v54  ;;  %1684 = vmatpush1.bf16.msra.mxu0 %v5507_v41  ;;  %1725 = vmatpush1.bf16.msra.mxu1 %v5519_v3  ;;  %v905_v54 = vld [vmem:[%s7013_s4 + $0x310] sm:$0xff]  ;;  %7438 = vst [vmem:[#allocation121_spill] sm:$0xff] %v5567_v1  ;;  %v5576_v3 = vcombine.high %v906_v39, %v910_v14 }
  0xab   :  { %1685 = vmatprep.subr.bf16.mxu0 %v5521_v63  ;;  %1726 = vmatprep.subr.bf16.mxu1 %v5528_v7  ;;  %7437 = vst [vmem:[#allocation120_spill] sm:$0xff] %v5552_v38  ;;  %v5571_v7 = vcombine.low %v898_v11, %v902_v55  ;;  %v5573_v63 = vcombine.high %v905_v54, %v909_v23  ;;  %v913_v41 = vld [vmem:[%s7013_s4 + $0x350] sm:$0xff]  ;;  %v918_v11 = vld [vmem:[%s7013_s4 + $0x378] sm:$0xff] }
  0xac   :  { %7441 = vst [vmem:[#allocation124_spill] sm:$0xff] %v5576_v3  ;;  %v5591_v55 = vcombine.low %v905_v54, %v909_v23  ;;  %v925_v54 = vld [vmem:[%s7013_s4 + $0x3b0] sm:$0xff] }
  0xad   :  { %7439 = vst [vmem:[#allocation122_spill] sm:$0xff] %v5571_v7  ;;  %7440 = vst [vmem:[#allocation123_spill] sm:$0xff] %v5573_v63 }
  0xae   :  { %1686 = vmatpush1.bf16.msra.mxu0 %v5543_v25  ;;  %1727 = vmatpush1.bf16.msra.mxu1 %v5547_v57  ;;  %7442 = vst [vmem:[#allocation125_spill] sm:$0xff] %v5591_v55  ;;  %v5598_v57 = vcombine.high %v913_v41, %v917_v40  ;;  %v5601_v25 = vcombine.high %v914_v0, %v918_v11 }
  0xaf   :  { %1687 = vmatprep.subr.bf16.mxu0 %v5549_v9  ;;  %1728 = vmatprep.subr.bf16.mxu1 %v5552_v38  ;;  %v7164_v38 = vsub.s32 3, %v5468_v8  ;;  %v5596_v9 = vcombine.low %v906_v39, %v910_v14  ;;  %v922_v39 = vld [vmem:[%s7013_s4 + $0x398] sm:$0xff] }
  0xb0   :  { %7444 = vst [vmem:[#allocation127_spill] sm:$0xff] %v5598_v57  ;;  %7445 = vst [vmem:[#allocation128_spill] sm:$0xff] %v5601_v25  ;;  %v926_v14 = vld [vmem:[%s7013_s4 + $0x3b8] sm:$0xff] }
  0xb1   :  { %7443 = vst [vmem:[#allocation126_spill] sm:$0xff] %v5596_v9  ;;  %v5611_v23 = vrot.slane %v802_v61, %v7164_v38  ;;  %v5629_v38 = vcombine.high %v922_v39, %v926_v14 }
  0xb2   :  { %1688 = vmatpush1.bf16.msra.mxu0 %v5567_v1  ;;  %1729 = vmatpush1.bf16.msra.mxu1 %v5571_v7  ;;  %v921_v1 = vld [vmem:[%s7013_s4 + $0x390] sm:$0xff] }
  0xb3   :  { %1689 = vmatprep.subr.bf16.mxu0 %v5573_v63  ;;  %1730 = vmatprep.subr.bf16.mxu1 %v5576_v3  ;;  %v5620_v3 = vcombine.low %v913_v41, %v917_v40  ;;  %v5624_v63 = vcombine.low %v914_v0, %v918_v11  ;;  %v5626_v61 = vcombine.high %v921_v1, %v925_v54  ;;  %v929_v7 = vld [vmem:[%s7013_s4 + $0x3d0] sm:$0xff]  ;;  %v930_v40 = vld [vmem:[%s7013_s4 + $0x3d8] sm:$0xff] }
  0xb4   :  { %7449 = vst [vmem:[#allocation132_spill] sm:$0xff] %v5629_v38  ;;  %v933_v41 = vld [vmem:[%s7013_s4 + $0x3f0] sm:$0xff]  ;;  %v934_v0 = vld [vmem:[%s7013_s4 + $0x3f8] sm:$0xff]  ;;  %v5644_v11 = vcombine.low %v921_v1, %v925_v54  ;;  %v7458_v54 = vld [vmem:[#allocation52_spill] sm:$0xff] }
  0xb5   :  { %7446 = vst [vmem:[#allocation129_spill] sm:$0xff] %v5620_v3  ;;  %7447 = vst [vmem:[#allocation130_spill] sm:$0xff] %v5624_v63  ;;  %v5660_v1 = vcombine.low %v930_v40, %v934_v0 }
  0xb6   :  { %1690 = vmatpush1.bf16.msra.mxu0 %v5591_v55  ;;  %1731 = vmatpush1.bf16.msra.mxu1 %v5596_v9  ;;  %7448 = vst [vmem:[#allocation131_spill] sm:$0xff] %v5626_v61  ;;  %7450 = vst [vmem:[#allocation133_spill] sm:$0xff] %v5644_v11  ;;  %v5653_v9 = vcombine.high %v930_v40, %v934_v0  ;;  %v5656_v55 = vcombine.low %v929_v7, %v933_v41  ;;  %v7462_v40 = vld [vmem:[#allocation56_spill] sm:$0xff]  ;;  %v7463_v0 = vld [vmem:[#allocation57_spill] sm:$0xff] }
  0xb7   :  { %1691 = vmatprep.subr.bf16.mxu0 %v5598_v57  ;;  %1732 = vmatprep.subr.bf16.mxu1 %v5601_v25  ;;  %v5648_v25 = vcombine.low %v922_v39, %v926_v14  ;;  %v5650_v57 = vcombine.high %v929_v7, %v933_v41  ;;  %7455 = vst [vmem:[#allocation138_spill] sm:$0xff] %v5660_v1  ;;  %v7457_v7 = vld [vmem:[#allocation51_spill] sm:$0xff]  ;;  %v7459_v39 = vld [vmem:[#allocation53_spill] sm:$0xff]  ;;  %v7460_v14 = vld [vmem:[#allocation54_spill] sm:$0xff] }
  0xb8   :  { %7453 = vst [vmem:[#allocation136_spill] sm:$0xff] %v5653_v9  ;;  %7454 = vst [vmem:[#allocation137_spill] sm:$0xff] %v5656_v55  ;;  %v7461_v41 = vld [vmem:[#allocation55_spill] sm:$0xff] }
  0xb9   :  { %7451 = vst [vmem:[#allocation134_spill] sm:$0xff] %v5648_v25  ;;  %7452 = vst [vmem:[#allocation135_spill] sm:$0xff] %v5650_v57 }
  0xba   :  { %1692 = vmatpush1.bf16.msra.mxu0 %v5620_v3  ;;  %1733 = vmatpush1.bf16.msra.mxu1 %v5624_v63 }
  0xbb   :  { %1693 = vmatprep.subr.bf16.mxu0 %v5626_v61  ;;  %1734 = vmatprep.subr.bf16.mxu1 %v5629_v38 }
  0xbe   :  { %1694 = vmatpush1.bf16.msra.mxu0 %v5644_v11  ;;  %1735 = vmatpush1.bf16.msra.mxu1 %v5648_v25 }
  0xbf   :  { %1695 = vmatprep.subr.bf16.mxu0 %v5650_v57  ;;  %1736 = vmatprep.subr.bf16.mxu1 %v5653_v9 }
  0xc2   :  { %1696 = vmatpush1.bf16.msra.mxu0 %v5656_v55  ;;  %1737 = vmatpush1.bf16.msra.mxu1 %v5660_v1 }
  0xc3   :  { %1913 = vmatprep.subr.bf16.mxu0 %v4851_v12  ;;  %1954 = vmatprep.subr.bf16.mxu1 %v4854_v13 }
  0xc5   :  { %1698 = vmatmul.mubr.bf16.vlgmr.msra.gmra.mrb[36].mxu0 %v5270_v56  ;;  %1739 = vmatmul.mubr.bf16.vlgmr.msra.gmra.mrb[36].mxu1 %v5270_v56  ;;  %v7456_v56 = vld [vmem:[#allocation50_spill] sm:$0xff] }
  0xc6   :  { %1914 = vmatpush1.bf16.msra.mxu0 %v4869_v18  ;;  %1955 = vmatpush1.bf16.msra.mxu1 %v4872_v19 }
  0xc7   :  { %1915 = vmatprep.subr.bf16.mxu0 %v4874_v20  ;;  %1956 = vmatprep.subr.bf16.mxu1 %v4877_v21 }
  0xca   :  { %1916 = vmatpush1.bf16.msra.mxu0 %v4894_v26  ;;  %1957 = vmatpush1.bf16.msra.mxu1 %v4898_v28 }
  0xcb   :  { %1917 = vmatprep.subr.bf16.mxu0 %v4900_v29  ;;  %1958 = vmatprep.subr.bf16.mxu1 %v4903_v30 }
  0xce   :  { %1918 = vmatpush1.bf16.msra.mxu0 %v4920_v34  ;;  %1959 = vmatpush1.bf16.msra.mxu1 %v4924_v35 }
  0xcf   :  { %1919 = vmatprep.subr.bf16.mxu0 %v4926_v36  ;;  %1960 = vmatprep.subr.bf16.mxu1 %v4929_v37 }
  0xd2   :  { %1920 = vmatpush1.bf16.msra.mxu0 %v4945_v42  ;;  %1961 = vmatpush1.bf16.msra.mxu1 %v4950_v43 }
  0xd3   :  { %1921 = vmatprep.subr.bf16.mxu0 %v4952_v45  ;;  %1962 = vmatprep.subr.bf16.mxu1 %v4955_v46 }
  0xd6   :  { %1922 = vmatpush1.bf16.msra.mxu0 %v4972_v50  ;;  %1963 = vmatpush1.bf16.msra.mxu1 %v4976_v51 }
  0xd7   :  { %1923 = vmatprep.subr.bf16.mxu0 %v4978_v52  ;;  %1964 = vmatprep.subr.bf16.mxu1 %v4981_v53 }
  0xda   :  { %1924 = vmatpush1.bf16.msra.mxu0 %v4997_v58  ;;  %1965 = vmatpush1.bf16.msra.mxu1 %v5002_v59 }
  0xdb   :  { %1925 = vmatprep.subr.bf16.mxu0 %v5004_v60  ;;  %1966 = vmatprep.subr.bf16.mxu1 %v5007_v62 }
  0xde   :  { %1926 = vmatpush1.bf16.msra.mxu0 %v5024_v2  ;;  %1967 = vmatpush1.bf16.msra.mxu1 %v5028_v4 }
  0xdf   :  { %1927 = vmatprep.subr.bf16.mxu0 %v5030_v5  ;;  %1968 = vmatprep.subr.bf16.mxu1 %v5033_v6 }
  0xe2   :  { %1928 = vmatpush1.bf16.msra.mxu0 %v5053_v15  ;;  %1969 = vmatpush1.bf16.msra.mxu1 %v5058_v16 }
  0xe3   :  { %1929 = vmatprep.subr.bf16.mxu0 %v5060_v17  ;;  %1970 = vmatprep.subr.bf16.mxu1 %v5063_v22  ;;  %v7472_v22 = vld [vmem:[#allocation66_spill] sm:$0xff] }
  0xe6   :  { %1930 = vmatpush1.bf16.msra.mxu0 %v5080_v10  ;;  %1971 = vmatpush1.bf16.msra.mxu1 %v5084_v31  ;;  %v7469_v31 = vld [vmem:[#allocation63_spill] sm:$0xff] }
  0xe7   :  { %1931 = vmatprep.subr.bf16.mxu0 %v5086_v32  ;;  %1972 = vmatprep.subr.bf16.mxu1 %v5089_v33 }
  0xea   :  { %1932 = vmatpush1.bf16.msra.mxu0 %v5104_v47  ;;  %1973 = vmatpush1.bf16.msra.mxu1 %v5108_v27  ;;  %v7464_v27 = vld [vmem:[#allocation58_spill] sm:$0xff] }
  0xeb   :  { %1933 = vmatprep.subr.bf16.mxu0 %v5110_v48  ;;  %1974 = vmatprep.subr.bf16.mxu1 %v5113_v49  ;;  %v7465_v48 = vld [vmem:[#allocation59_spill] sm:$0xff]  ;;  %v7466_v49 = vld [vmem:[#allocation60_spill] sm:$0xff] }
  0xee   :  { %1934 = vmatpush1.bf16.msra.mxu0 %v7456_v56  ;;  %1975 = vmatpush1.bf16.msra.mxu1 %v7457_v7  ;;  %v7467_v7 = vld [vmem:[#allocation61_spill] sm:$0xff] }
  0xef   :  { %1935 = vmatprep.subr.bf16.mxu0 %v7458_v54  ;;  %1976 = vmatprep.subr.bf16.mxu1 %v7459_v39 }
  0xf2   :  { %1936 = vmatpush1.bf16.msra.mxu0 %v7460_v14  ;;  %1977 = vmatpush1.bf16.msra.mxu1 %v7461_v41  ;;  %v7468_v14 = vld [vmem:[#allocation62_spill] sm:$0xff] }
  0xf3   :  { %1937 = vmatprep.subr.bf16.mxu0 %v7462_v40  ;;  %1978 = vmatprep.subr.bf16.mxu1 %v7463_v0  ;;  %v7470_v0 = vld [vmem:[#allocation64_spill] sm:$0xff] }
  0xf6   :  { %1938 = vmatpush1.bf16.msra.mxu0 %v7464_v27  ;;  %1979 = vmatpush1.bf16.msra.mxu1 %v7465_v48 }
  0xf7   :  { %1939 = vmatprep.subr.bf16.mxu0 %v7466_v49  ;;  %1980 = vmatprep.subr.bf16.mxu1 %v7467_v7  ;;  %v7471_v49 = vld [vmem:[#allocation65_spill] sm:$0xff] }
  0xf8   :  { %v474_v56 = vpop.f32.mrb[0].mxu0  ;;  %v547_v47 = vpop.f32.mrb[0].mxu1 }
  0xf9   :  { %v476_v54 = vpop.f32.mrb[1].mxu0  ;;  %v549_v33 = vpop.f32.mrb[1].mxu1 }
  0xfa   :  { %v478_v39 = vpop.f32.mrb[2].mxu0  ;;  %1940 = vmatpush1.bf16.msra.mxu0 %v7468_v14  ;;  %v551_v40 = vpop.f32.mrb[2].mxu1  ;;  %1981 = vmatpush1.bf16.msra.mxu1 %v7469_v31  ;;  %v7473_v14 = vld [vmem:[#allocation67_spill] sm:$0xff]  ;;  %v7475_v31 = vld [vmem:[#allocation69_spill] sm:$0xff] }
  0xfb   :  { %v732_v41 = vpack.c.bf16 %v478_v39, %v474_v56  ;;  %v480_v32 = vpop.f32.mrb[3].mxu0  ;;  %1941 = vmatprep.subr.bf16.mxu0 %v7470_v0  ;;  %v734_v48 = vpack.c.bf16 %v551_v40, %v547_v47  ;;  %v553_v10 = vpop.f32.mrb[3].mxu1  ;;  %1982 = vmatprep.subr.bf16.mxu1 %v7471_v49  ;;  %v7474_v56 = vld [vmem:[#allocation68_spill] sm:$0xff]  ;;  %v7476_v40 = vld [vmem:[#allocation70_spill] sm:$0xff] }
  0xfc   :  { %v733_v27 = vpack.c.bf16 %v480_v32, %v476_v54  ;;  %v735_v7 = vpack.c.bf16 %v553_v10, %v549_v33 }
  0xfd   :  { %764 = vst [vmem:[#allocation2] sm:$0xff] %v732_v41  ;;  %766 = vst [vmem:[#allocation2 + $0x10] sm:$0xff] %v734_v48  ;;  %v7478_v48 = vld [vmem:[#allocation72_spill] sm:$0xff] }
  0xfe   :  { %765 = vst [vmem:[#allocation2 + $0x8] sm:$0xff] %v733_v27  ;;  %1942 = vmatpush1.bf16.msra.mxu0 %v7472_v22  ;;  %767 = vst [vmem:[#allocation2 + $0x18] sm:$0xff] %v735_v7  ;;  %1983 = vmatpush1.bf16.msra.mxu1 %v7473_v14  ;;  %v7477_v27 = vld [vmem:[#allocation71_spill] sm:$0xff] }
  0xff   :  { %1943 = vmatprep.subr.bf16.mxu0 %v7474_v56  ;;  %1984 = vmatprep.subr.bf16.mxu1 %v7475_v31  ;;  %v7479_v56 = vld [vmem:[#allocation73_spill] sm:$0xff] }
 0x100   :  { %v484_v39 = vpop.f32.mrb[4].mxu0  ;;  %v557_v32 = vpop.f32.mrb[4].mxu1 }
 0x101   :  { %v486_v0 = vpop.f32.mrb[5].mxu0  ;;  %v559_v54 = vpop.f32.mrb[5].mxu1 }
 0x102   :  { %v488_v47 = vpop.f32.mrb[6].mxu0  ;;  %1944 = vmatpush1.bf16.msra.mxu0 %v7476_v40  ;;  %v561_v33 = vpop.f32.mrb[6].mxu1  ;;  %1985 = vmatpush1.bf16.msra.mxu1 %v7477_v27 }
 0x103   :  { %v740_v41 = vpack.c.bf16 %v488_v47, %v484_v39  ;;  %v490_v10 = vpop.f32.mrb[7].mxu0  ;;  %1995 = vmatprep.subr.bf16.mxu0 %v7478_v48  ;;  %v742_v14 = vpack.c.bf16 %v561_v33, %v557_v32  ;;  %v563_v22 = vpop.f32.mrb[7].mxu1  ;;  %2036 = vmatprep.subr.bf16.mxu1 %v7479_v56 }
 0x104   :  { %v741_v7 = vpack.c.bf16 %v490_v10, %v486_v0  ;;  %v743_v31 = vpack.c.bf16 %v563_v22, %v559_v54 }
 0x105   :  { %772 = vst [vmem:[#allocation2 + $0x40] sm:$0xff] %v740_v41  ;;  %774 = vst [vmem:[#allocation2 + $0x50] sm:$0xff] %v742_v14 }
 0x106   :  { %773 = vst [vmem:[#allocation2 + $0x48] sm:$0xff] %v741_v7  ;;  %775 = vst [vmem:[#allocation2 + $0x58] sm:$0xff] %v743_v31 }
 0x108   :  { %v494_v49 = vpop.f32.mrb[8].mxu0  ;;  %v567_v40 = vpop.f32.mrb[8].mxu1 }
 0x109   :  { %v496_v17 = vpop.f32.mrb[9].mxu0  ;;  %v569_v47 = vpop.f32.mrb[9].mxu1 }
 0x10a   :  { %v498_v39 = vpop.f32.mrb[10].mxu0  ;;  %v571_v27 = vpop.f32.mrb[10].mxu1 }
 0x10b   :  { %v748_v16 = vpack.c.bf16 %v498_v39, %v494_v49  ;;  %v500_v15 = vpop.f32.mrb[11].mxu0  ;;  %v750_v48 = vpack.c.bf16 %v571_v27, %v567_v40  ;;  %v573_v0 = vpop.f32.mrb[11].mxu1 }
 0x10c   :  { %v749_v6 = vpack.c.bf16 %v500_v15, %v496_v17  ;;  %v751_v32 = vpack.c.bf16 %v573_v0, %v569_v47 }
 0x10d   :  { %780 = vst [vmem:[#allocation2 + $0x80] sm:$0xff] %v748_v16  ;;  %782 = vst [vmem:[#allocation2 + $0x90] sm:$0xff] %v750_v48 }
 0x10e   :  { %781 = vst [vmem:[#allocation2 + $0x88] sm:$0xff] %v749_v6  ;;  %783 = vst [vmem:[#allocation2 + $0x98] sm:$0xff] %v751_v32 }
 0x110   :  { %v504_v22 = vpop.f32.mrb[12].mxu0  ;;  %v577_v14 = vpop.f32.mrb[12].mxu1 }
 0x111   :  { %v506_v54 = vpop.f32.mrb[13].mxu0  ;;  %v579_v41 = vpop.f32.mrb[13].mxu1 }
 0x112   :  { %v508_v31 = vpop.f32.mrb[14].mxu0  ;;  %v581_v7 = vpop.f32.mrb[14].mxu1 }
 0x113   :  { %v756_v10 = vpack.c.bf16 %v508_v31, %v504_v22  ;;  %v510_v33 = vpop.f32.mrb[15].mxu0  ;;  %v758_v49 = vpack.c.bf16 %v581_v7, %v577_v14  ;;  %v583_v39 = vpop.f32.mrb[15].mxu1 }
 0x114   :  { %v757_v56 = vpack.c.bf16 %v510_v33, %v506_v54  ;;  %v759_v15 = vpack.c.bf16 %v583_v39, %v579_v41 }
 0x115   :  { %788 = vst [vmem:[#allocation2 + $0xc0] sm:$0xff] %v756_v10  ;;  %790 = vst [vmem:[#allocation2 + $0xd0] sm:$0xff] %v758_v49 }
 0x116   :  { %789 = vst [vmem:[#allocation2 + $0xc8] sm:$0xff] %v757_v56  ;;  %791 = vst [vmem:[#allocation2 + $0xd8] sm:$0xff] %v759_v15 }
 0x118   :  { %v620_v16 = vpop.f32.mrb[16].mxu0  ;;  %v693_v17 = vpop.f32.mrb[16].mxu1 }
 0x119   :  { %v622_v6 = vpop.f32.mrb[17].mxu0  ;;  %v695_v27 = vpop.f32.mrb[17].mxu1 }
 0x11a   :  { %v624_v40 = vpop.f32.mrb[18].mxu0  ;;  %v697_v0 = vpop.f32.mrb[18].mxu1 }
 0x11b   :  { %v736_v48 = vpack.c.bf16 %v624_v40, %v620_v16  ;;  %v626_v47 = vpop.f32.mrb[19].mxu0  ;;  %v738_v22 = vpack.c.bf16 %v697_v0, %v693_v17  ;;  %v699_v31 = vpop.f32.mrb[19].mxu1 }
 0x11c   :  { %v737_v32 = vpack.c.bf16 %v626_v47, %v622_v6  ;;  %v739_v54 = vpack.c.bf16 %v699_v31, %v695_v27 }
 0x11d   :  { %768 = vst [vmem:[#allocation2 + $0x20] sm:$0xff] %v736_v48  ;;  %770 = vst [vmem:[#allocation2 + $0x30] sm:$0xff] %v738_v22 }
 0x11e   :  { %769 = vst [vmem:[#allocation2 + $0x28] sm:$0xff] %v737_v32  ;;  %771 = vst [vmem:[#allocation2 + $0x38] sm:$0xff] %v739_v54 }
 0x120   :  { %v630_v14 = vpop.f32.mrb[20].mxu0  ;;  %v703_v41 = vpop.f32.mrb[20].mxu1 }
 0x121   :  { %v632_v56 = vpop.f32.mrb[21].mxu0  ;;  %v705_v33 = vpop.f32.mrb[21].mxu1 }
 0x122   :  { %v634_v10 = vpop.f32.mrb[22].mxu0  ;;  %v707_v39 = vpop.f32.mrb[22].mxu1 }
 0x123   :  { %v744_v7 = vpack.c.bf16 %v634_v10, %v630_v14  ;;  %v636_v49 = vpop.f32.mrb[23].mxu0  ;;  %v746_v16 = vpack.c.bf16 %v707_v39, %v703_v41  ;;  %v709_v40 = vpop.f32.mrb[23].mxu1 }
 0x124   :  { %v745_v15 = vpack.c.bf16 %v636_v49, %v632_v56  ;;  %v747_v6 = vpack.c.bf16 %v709_v40, %v705_v33 }
 0x125   :  { %776 = vst [vmem:[#allocation2 + $0x60] sm:$0xff] %v744_v7  ;;  %778 = vst [vmem:[#allocation2 + $0x70] sm:$0xff] %v746_v16 }
 0x126   :  { %777 = vst [vmem:[#allocation2 + $0x68] sm:$0xff] %v745_v15  ;;  %779 = vst [vmem:[#allocation2 + $0x78] sm:$0xff] %v747_v6 }
 0x128   :  { %v640_v17 = vpop.f32.mrb[24].mxu0  ;;  %v713_v48 = vpop.f32.mrb[24].mxu1 }
 0x129   :  { %v642_v27 = vpop.f32.mrb[25].mxu0  ;;  %v715_v0 = vpop.f32.mrb[25].mxu1 }
 0x12a   :  { %v644_v47 = vpop.f32.mrb[26].mxu0  ;;  %v717_v31 = vpop.f32.mrb[26].mxu1 }
 0x12b   :  { %v752_v32 = vpack.c.bf16 %v644_v47, %v640_v17  ;;  %v646_v22 = vpop.f32.mrb[27].mxu0  ;;  %v754_v14 = vpack.c.bf16 %v717_v31, %v713_v48  ;;  %v719_v10 = vpop.f32.mrb[27].mxu1  ;;  %v801_v48 = vld [vmem:[%s7015_s3] sm:$0xf]  ;;  %v7480_v31 = vsub.s32 0, %v5468_v8 }
 0x12c   :  { %v753_v54 = vpack.c.bf16 %v646_v22, %v642_v27  ;;  %v755_v56 = vpack.c.bf16 %v719_v10, %v715_v0  ;;  %v1747_v0 = vld [vmem:[#allocation2] ss:$16 sps:$4 sm:$0xff]   ;;  %v7482_v10 = vsub.s32 1, %v5468_v8 }
 0x12d   :  { %784 = vst [vmem:[#allocation2 + $0xa0] sm:$0xff] %v752_v32  ;;  %786 = vst [vmem:[#allocation2 + $0xb0] sm:$0xff] %v754_v14  ;;  %v1748_v32 = vld [vmem:[#allocation2 + $0x8] ss:$16 sps:$4 sm:$0xff]   ;;  %v1751_v22 = vunpack.c.l.bf16 %v1747_v0 }
 0x12e   :  { %785 = vst [vmem:[#allocation2 + $0xa8] sm:$0xff] %v753_v54  ;;  %787 = vst [vmem:[#allocation2 + $0xb8] sm:$0xff] %v755_v56  ;;  %v5738_v54 = vrot.slane %v801_v48, %v7480_v31  ;;  %v1752_v14 = vunpack.c.l.bf16 %v1748_v32  ;;  %v5742_v56 = vrot.slane %v801_v48, %v7482_v10 }
 0x130   :  { %v650_v41 = vpop.f32.mrb[28].mxu0  ;;  %v723_v7 = vpop.f32.mrb[28].mxu1  ;;  %7481 = vst [vmem:[#allocation139_spill] sm:$0xff] %v5738_v54  ;;  %7483 = vst [vmem:[#allocation140_spill] sm:$0xff] %v5742_v56 }
 0x131   :  { %v652_v33 = vpop.f32.mrb[29].mxu0  ;;  %v725_v39 = vpop.f32.mrb[29].mxu1 }
 0x132   :  { %v654_v49 = vpop.f32.mrb[30].mxu0  ;;  %v727_v40 = vpop.f32.mrb[30].mxu1 }
 0x133   :  { %v760_v15 = vpack.c.bf16 %v654_v49, %v650_v41  ;;  %v656_v16 = vpop.f32.mrb[31].mxu0  ;;  %v762_v17 = vpack.c.bf16 %v727_v40, %v723_v7  ;;  %v729_v47 = vpop.f32.mrb[31].mxu1  ;;  %v1776_v41 = vadd.f32 %v5738_v54, %v1751_v22  ;;  %v1777_v7 = vadd.f32 %v5742_v56, %v1752_v14 }
 0x134   :  { %v761_v6 = vpack.c.bf16 %v656_v16, %v652_v33  ;;  %v763_v27 = vpack.c.bf16 %v729_v47, %v725_v39  ;;  %v1753_v14 = vunpack.c.h.bf16 %v1747_v0 }
 0x135   :  { %792 = vst [vmem:[#allocation2 + $0xe0] sm:$0xff] %v760_v15  ;;  %794 = vst [vmem:[#allocation2 + $0xf0] sm:$0xff] %v762_v17  ;;  %v7484_v17 = vsub.s32 3, %v5468_v8 }
 0x136   :  { %793 = vst [vmem:[#allocation2 + $0xe8] sm:$0xff] %v761_v6  ;;  %795 = vst [vmem:[#allocation2 + $0xf8] sm:$0xff] %v763_v27  ;;  %v1754_v6 = vunpack.c.h.bf16 %v1748_v32 }
 0x137   :  { %v5748_v47 = vrot.slane %v801_v48, %v7484_v17 }
 0x139   :  { %7485 = vst [vmem:[#allocation141_spill] sm:$0xff] %v5748_v47  ;;  %v1779_v22 = vadd.f32 %v5748_v47, %v1754_v6 }
 0x158   :  { %v1617_v33 = vpop.f32.mrb[32].mxu0  ;;  %v1658_v39 = vpop.f32.mrb[32].mxu1 }
 0x159   :  { %v1780_v49 = vadd.f32 %v1776_v41, %v1617_v33  ;;  %v1619_v15 = vpop.f32.mrb[33].mxu0  ;;  %v1660_v40 = vpop.f32.mrb[33].mxu1  ;;  %v7486_v41 = vsub.s32 2, %v5468_v8 }
 0x15a   :  { %v1781_v16 = vadd.f32 %v1777_v7, %v1619_v15  ;;  %v1621_v27 = vpop.f32.mrb[34].mxu0  ;;  %v1662_v10 = vpop.f32.mrb[34].mxu1  ;;  %v1783_v32 = vadd.f32 %v1779_v22, %v1660_v40 }
 0x15b   :  { %v4146_v31 = vmul.f32 -1.442695, %v1780_v49  ;;  %v1622_v5 = vpop.f32.mrb[35].mxu0  ;;  %v1663_v2 = vpop.f32.mrb[35].mxu1  ;;  %v5753_v33 = vrot.slane %v801_v48, %v7486_v41 }
 0x15c   :  { %v4147_v4 = vmul.f32 -1.442695, %v1781_v16  ;;  %v4148_v15 = vmul.f32 -1.442695, %v1783_v32  ;;  %v5759_v10 = vpop.permute.xlu0 %805  ;;  %v1784_v32 = vld [vmem:[#allocation2 + $0xe0] sm:$0xf0] }
 0x15d   :  { %4313 = vpow2.f32 %v4146_v31  ;;  %7487 = vst [vmem:[#allocation142_spill] sm:$0xff] %v5753_v33  ;;  %v1778_v7 = vadd.f32 %v5753_v33, %v1753_v14  ;;  %vm1883_vm0 = vcmp.gt.s32.totalorder %v5759_v10, 0  ;;  %vm1884_vm1 = vcmp.gt.s32.totalorder %v5759_v10, 7 }
 0x15e   :  { %4315 = vpow2.f32 %v4147_v4  ;;  %vm4271_vm2 = vmpackc.low %vm1884_vm1, %vm1884_vm1  ;;  %vm2171_vm4 = vcmp.gt.s32.totalorder %v5759_v10, 1  ;;  %vm2172_vm5 = vcmp.gt.s32.totalorder %v5759_v10, 6  ;;  %vm2460_vm6 = vcmp.gt.s32.totalorder %v5759_v10, 2 }
 0x15f   :  { %v1782_v17 = vadd.f32 %v1778_v7, %v1658_v39  ;;  %4317 = vpow2.f32 %v4148_v15  ;;  %v1786_v7 = vld [vmem:[#allocation2 + $0xf0] sm:$0xf0]  ;;  %v1785_v15 = vld [vmem:[#allocation2 + $0xe8] sm:$0xf0]  ;;  %vm5787_vm3 = vmpackc.low %vm1883_vm0, %vm1883_vm0  ;;  %vm2461_vm7 = vcmp.gt.s32.totalorder %v5759_v10, 5  ;;  %vm2749_vm8 = vcmp.gt.s32.totalorder %v5759_v10, 3 }
 0x160   :  { %vm2750_vm9 = vcmp.gt.s32.totalorder %v5759_v10, 4 }
 0x161   :  { %4319 = vtanh.f32 %v1782_v17  ;;  %v1787_v17 = vld [vmem:[#allocation2 + $0xf8] sm:$0xf0] }
 0x167   :  { %v4314_v27 = vpop.eup %4313 }
 0x168   :  { %v4316_v49 = vpop.eup %4315  ;;  %v1837_v5 = vadd.f32 1.0, %v4314_v27  ;;  %v1792_v27 = vrot.slane %v1784_v32, 4 }
 0x169   :  { %v1843_v2 = vadd.f32 1.0, %v4316_v49  ;;  %v4318_v4 = vpop.eup %4317  ;;  %v1794_v49 = vrot.slane %v1786_v7, 4 }
 0x16a   :  { %4321 = vrcp.f32 %v1837_v5  ;;  %v1850_v48 = vadd.f32 1.0, %v4318_v4  ;;  %v1793_v5 = vrot.slane %v1785_v15, 4  ;;  %v1800_v4 = vunpack.c.l.bf16 %v1792_v27 }
 0x16b   :  { %4323 = vrcp.f32 %v1843_v2  ;;  %v4320_v16 = vpop.eup %4319  ;;  %v1795_v2 = vrot.slane %v1787_v17, 4 }
 0x16c   :  { %4325 = vrcp.f32 %v1850_v48 }
 0x174   :  { %v4322_v0 = vpop.eup %4321 }
 0x175   :  { %v4324_v6 = vpop.eup %4323  ;;  %v1854_v8 = vmul.f32 %v4322_v0, %v4320_v16  ;;  %v1802_v16 = vunpack.c.l.bf16 %v1794_v49  ;;  %v1801_v0 = vunpack.c.l.bf16 %v1793_v5 }
 0x176   :  { %v1853_v31 = vmul.f32 0.0, %v4324_v6  ;;  %v4326_v39 = vpop.eup %4325  ;;  %v1803_v6 = vunpack.c.l.bf16 %v1795_v2 }
 0x178   :  { %v5756_v40 = vadd.f32 %v1854_v8, %v1853_v31  ;;  %v1825_v8 = vadd.f32 %v5511_v24, %v1800_v4  ;;  %v1827_v31 = vadd.f32 %v5515_v44, %v1802_v16  ;;  %v1828_v56 = vadd.f32 %v5611_v23, %v1803_v6 }
 0x17a   :  { %7488 = vst [vmem:[#allocation143_spill] sm:$0xff] %v5756_v40  ;;  %4327 = vtanh.f32 %v5756_v40 }
 0x184   :  { %v4328_v22 = vpop.eup %4327 }
 0x185   :  { %v5761_v14 = vmul.f32 %v4328_v22, %v4326_v39  ;;  %v7490_v39 = vld [vmem:[#allocation115_spill] sm:$0xff] }
 0x186   :  { %v1826_v22 = vadd.f32 %v7490_v39, %v1801_v0 }
 0x187   :  { %v5767_v41 = vsel %vm1883_vm0, %v5761_v14, 0.0 }
 0x188   :  { %7489 = vst [vmem:[#allocation144_spill] sm:$0xff] %v5767_v41  ;;  %1902 = vst [vmem:[%s7016_s5] sm:$0xff] %v5767_v41 }
 0x198   :  { %v1699_v48 = vpop.f32.mrb[36].mxu0  ;;  %v1740_v40 = vpop.f32.mrb[36].mxu1 }
 0x199   :  { %v1829_v41 = vadd.f32 %v1825_v8, %v1699_v48  ;;  %v1701_v47 = vpop.f32.mrb[37].mxu0  ;;  %v1831_v32 = vadd.f32 %v1827_v31, %v1740_v40  ;;  %v1742_v15 = vpop.f32.mrb[37].mxu1 }
 0x19a   :  { %v1830_v7 = vadd.f32 %v1826_v22, %v1701_v47  ;;  %v1703_v17 = vpop.f32.mrb[38].mxu0  ;;  %v1832_v49 = vadd.f32 %v1828_v56, %v1742_v15  ;;  %v1744_v2 = vpop.f32.mrb[38].mxu1 }
 0x19b   :  { %v4149_v27 = vmul.f32 -1.442695, %v1829_v41  ;;  %v1704_v5 = vpop.f32.mrb[39].mxu0  ;;  %v1745_v4 = vpop.f32.mrb[39].mxu1  ;;  %v7494_v2 = vld [vmem:[#allocation75_spill] sm:$0xff]  ;;  %v7545_v17 = vld [vmem:[#allocation34_spill] sm:$0xff] }
 0x19c   :  { %v4150_v33 = vmul.f32 -1.442695, %v1830_v7  ;;  %v4151_v16 = vmul.f32 -1.442695, %v1832_v49  ;;  %v5797_v49 = vpack.c.bf16 %v5761_v14, %v5761_v14  ;;  %v7493_v5 = vld [vmem:[#allocation74_spill] sm:$0xff]  ;;  %v7495_v14 = vld [vmem:[#allocation76_spill] sm:$0xff] }
 0x19d   :  { %4329 = vpow2.f32 %v4149_v27  ;;  %v7496_v4 = vld [vmem:[#allocation77_spill] sm:$0xff] }
 0x19e   :  { %4331 = vpow2.f32 %v4150_v33 }
 0x19f   :  { %4333 = vpow2.f32 %v4151_v16  ;;  %v7497_v16 = vld [vmem:[#allocation78_spill] sm:$0xff] }
 0x1a0   :  { %4335 = vtanh.f32 %v1831_v32 }
 0x1a7   :  { %v4330_v44 = vpop.eup %4329 }
 0x1a8   :  { %v4332_v0 = vpop.eup %4331  ;;  %v1862_v8 = vadd.f32 1.0, %v4330_v44 }
 0x1a9   :  { %v1868_v48 = vadd.f32 1.0, %v4332_v0  ;;  %v4334_v47 = vpop.eup %4333  ;;  %v7498_v0 = vld [vmem:[#allocation79_spill] sm:$0xff] }
 0x1aa   :  { %4337 = vrcp.f32 %v1862_v8  ;;  %v4336_v40 = vpop.eup %4335  ;;  %v1875_v31 = vadd.f32 1.0, %v4334_v47  ;;  %v7499_v8 = vld [vmem:[#allocation80_spill] sm:$0xff]  ;;  %v7501_v47 = vld [vmem:[#allocation82_spill] sm:$0xff] }
 0x1ab   :  { %4339 = vrcp.f32 %v1868_v48  ;;  %v7500_v48 = vld [vmem:[#allocation81_spill] sm:$0xff] }
 0x1ac   :  { %4341 = vrcp.f32 %v1875_v31  ;;  %v7506_v31 = vld [vmem:[#allocation87_spill] sm:$0xff] }
 0x1b4   :  { %v4338_v6 = vpop.eup %4337 }
 0x1b5   :  { %v4340_v41 = vpop.eup %4339  ;;  %v1879_v56 = vmul.f32 %v4338_v6, %v4336_v40  ;;  %v7502_v40 = vld [vmem:[#allocation83_spill] sm:$0xff]  ;;  %v7503_v6 = vld [vmem:[#allocation84_spill] sm:$0xff] }
 0x1b6   :  { %v1878_v22 = vmul.f32 0.0, %v4340_v41  ;;  %v4342_v33 = vpop.eup %4341  ;;  %v7504_v41 = vld [vmem:[#allocation85_spill] sm:$0xff] }
 0x1b8   :  { %v5777_v7 = vadd.f32 %v1879_v56, %v1878_v22  ;;  %v7505_v56 = vld [vmem:[#allocation86_spill] sm:$0xff]  ;;  %v7507_v22 = vld [vmem:[#allocation88_spill] sm:$0xff] }
 0x1ba   :  { %4343 = vtanh.f32 %v5777_v7 }
 0x1c4   :  { %v4344_v15 = vpop.eup %4343 }
 0x1c5   :  { %v1882_v44 = vmul.f32 %v4344_v15, %v4342_v33  ;;  %v7508_v33 = vld [vmem:[#allocation89_spill] sm:$0xff]  ;;  %v7509_v15 = vld [vmem:[#allocation90_spill] sm:$0xff] }
 0x1c7   :  { %v4272_v32 = vpack.c.bf16 %v1882_v44, %v1882_v44  ;;  %v5793_v27 = vsel %vm1884_vm1, %v1882_v44, 0.0  ;;  %v7510_v44 = vld [vmem:[#allocation91_spill] sm:$0xff] }
 0x1c8   :  { %4152 = vst [vmem:[%s7016_s5 + $0x38] sm:$0xff] %v5793_v27 }
 0x1c9   :  { %4273 = vmatprep.mubr.msk.bf16.mxu0 %vm4271_vm2, %v4272_v32  ;;  %4279 = vmatprep.mubr.msk.bf16.mxu1 %vm4271_vm2, %v4272_v32 }
 0x1ca   :  { %4276 = vmatmul.mubr.msk.bf16.vlgmr.msra.gmra.mrb[40].mxu0 %vm5787_vm3, %v5797_v49  ;;  %4282 = vmatmul.mubr.msk.bf16.vlgmr.msra.gmra.mrb[40].mxu1 %vm5787_vm3, %v5797_v49 }
 0x1cb   :  { %1996 = vmatpush1.bf16.msra.mxu0 %v7493_v5  ;;  %2037 = vmatpush1.bf16.msra.mxu1 %v7494_v2 }
 0x1cc   :  { %4285 = vmatprep.mubr.msk.bf16.mxu0 %vm4271_vm2, %v4272_v32  ;;  %4291 = vmatprep.mubr.msk.bf16.mxu1 %vm4271_vm2, %v4272_v32  ;;  %v7511_v32 = vld [vmem:[#allocation92_spill] sm:$0xff] }
 0x1cd   :  { %1997 = vmatprep.subr.bf16.mxu0 %v7495_v14  ;;  %2038 = vmatprep.subr.bf16.mxu1 %v7496_v4 }
 0x1cf   :  { %1998 = vmatpush1.bf16.msra.mxu0 %v7497_v16  ;;  %2039 = vmatpush1.bf16.msra.mxu1 %v7498_v0 }
 0x1d0   :  { %1999 = vmatprep.subr.bf16.mxu0 %v7499_v8  ;;  %2040 = vmatprep.subr.bf16.mxu1 %v7500_v48 }
 0x1d3   :  { %2000 = vmatpush1.bf16.msra.mxu0 %v7501_v47  ;;  %2041 = vmatpush1.bf16.msra.mxu1 %v7502_v40  ;;  %v7512_v47 = vld [vmem:[#allocation93_spill] sm:$0xff]  ;;  %v7513_v40 = vld [vmem:[#allocation94_spill] sm:$0xff] }
 0x1d4   :  { %2001 = vmatprep.subr.bf16.mxu0 %v7503_v6  ;;  %2042 = vmatprep.subr.bf16.mxu1 %v7504_v41  ;;  %v7514_v6 = vld [vmem:[#allocation95_spill] sm:$0xff]  ;;  %v7515_v41 = vld [vmem:[#allocation96_spill] sm:$0xff] }
 0x1d7   :  { %2002 = vmatpush1.bf16.msra.mxu0 %v7505_v56  ;;  %2043 = vmatpush1.bf16.msra.mxu1 %v7506_v31  ;;  %v7516_v56 = vld [vmem:[#allocation97_spill] sm:$0xff]  ;;  %v7517_v31 = vld [vmem:[#allocation98_spill] sm:$0xff] }
 0x1d8   :  { %2003 = vmatprep.subr.bf16.mxu0 %v7507_v22  ;;  %2044 = vmatprep.subr.bf16.mxu1 %v7508_v33  ;;  %v7518_v22 = vld [vmem:[#allocation99_spill] sm:$0xff]  ;;  %v7519_v33 = vld [vmem:[#allocation100_spill] sm:$0xff] }
 0x1db   :  { %2004 = vmatpush1.bf16.msra.mxu0 %v7509_v15  ;;  %2045 = vmatpush1.bf16.msra.mxu1 %v7510_v44  ;;  %v7520_v15 = vld [vmem:[#allocation101_spill] sm:$0xff]  ;;  %v7521_v44 = vld [vmem:[#allocation102_spill] sm:$0xff] }
 0x1dc   :  { %2005 = vmatprep.subr.bf16.mxu0 %v7511_v32  ;;  %2046 = vmatprep.subr.bf16.mxu1 %v7512_v47  ;;  %v7522_v32 = vld [vmem:[#allocation103_spill] sm:$0xff]  ;;  %v7523_v47 = vld [vmem:[#allocation104_spill] sm:$0xff] }
 0x1df   :  { %2006 = vmatpush1.bf16.msra.mxu0 %v7513_v40  ;;  %2047 = vmatpush1.bf16.msra.mxu1 %v7514_v6  ;;  %v7524_v40 = vld [vmem:[#allocation105_spill] sm:$0xff]  ;;  %v7525_v6 = vld [vmem:[#allocation106_spill] sm:$0xff] }
 0x1e0   :  { %2007 = vmatprep.subr.bf16.mxu0 %v7515_v41  ;;  %2048 = vmatprep.subr.bf16.mxu1 %v7516_v56  ;;  %v7526_v41 = vld [vmem:[#allocation107_spill] sm:$0xff]  ;;  %v7527_v56 = vld [vmem:[#allocation108_spill] sm:$0xff] }
 0x1e3   :  { %2008 = vmatpush1.bf16.msra.mxu0 %v7517_v31  ;;  %2049 = vmatpush1.bf16.msra.mxu1 %v7518_v22  ;;  %v7528_v31 = vld [vmem:[#allocation109_spill] sm:$0xff]  ;;  %v7529_v22 = vld [vmem:[#allocation110_spill] sm:$0xff] }
 0x1e4   :  { %2009 = vmatprep.subr.bf16.mxu0 %v7519_v33  ;;  %2050 = vmatprep.subr.bf16.mxu1 %v7520_v15  ;;  %v7530_v33 = vld [vmem:[#allocation113_spill] sm:$0xff]  ;;  %v7531_v15 = vld [vmem:[#allocation114_spill] sm:$0xff] }
 0x1e7   :  { %2010 = vmatpush1.bf16.msra.mxu0 %v7521_v44  ;;  %2051 = vmatpush1.bf16.msra.mxu1 %v7522_v32  ;;  %v7532_v44 = vld [vmem:[#allocation116_spill] sm:$0xff]  ;;  %v7533_v32 = vld [vmem:[#allocation117_spill] sm:$0xff] }
 0x1e8   :  { %2011 = vmatprep.subr.bf16.mxu0 %v7523_v47  ;;  %2052 = vmatprep.subr.bf16.mxu1 %v7524_v40  ;;  %v7534_v47 = vld [vmem:[#allocation118_spill] sm:$0xff]  ;;  %v7535_v40 = vld [vmem:[#allocation119_spill] sm:$0xff] }
 0x1eb   :  { %2012 = vmatpush1.bf16.msra.mxu0 %v7525_v6  ;;  %2053 = vmatpush1.bf16.msra.mxu1 %v7526_v41  ;;  %v7536_v6 = vld [vmem:[#allocation120_spill] sm:$0xff]  ;;  %v7537_v41 = vld [vmem:[#allocation121_spill] sm:$0xff] }
 0x1ec   :  { %2013 = vmatprep.subr.bf16.mxu0 %v7527_v56  ;;  %2054 = vmatprep.subr.bf16.mxu1 %v7528_v31  ;;  %v7538_v56 = vld [vmem:[#allocation122_spill] sm:$0xff]  ;;  %v7539_v31 = vld [vmem:[#allocation123_spill] sm:$0xff] }
 0x1ef   :  { %2014 = vmatpush1.bf16.msra.mxu0 %v7529_v22  ;;  %2055 = vmatpush1.bf16.msra.mxu1 %v7530_v33  ;;  %v7540_v22 = vld [vmem:[#allocation124_spill] sm:$0xff]  ;;  %v7541_v33 = vld [vmem:[#allocation125_spill] sm:$0xff] }
 0x1f0   :  { %2015 = vmatprep.subr.bf16.mxu0 %v7531_v15  ;;  %2056 = vmatprep.subr.bf16.mxu1 %v7532_v44  ;;  %v7542_v15 = vld [vmem:[#allocation126_spill] sm:$0xff]  ;;  %v7543_v44 = vld [vmem:[#allocation127_spill] sm:$0xff] }
 0x1f3   :  { %2016 = vmatpush1.bf16.msra.mxu0 %v7533_v32  ;;  %2057 = vmatpush1.bf16.msra.mxu1 %v7534_v47  ;;  %v7544_v32 = vld [vmem:[#allocation128_spill] sm:$0xff] }
 0x1f4   :  { %2017 = vmatprep.subr.bf16.mxu0 %v7535_v40  ;;  %2058 = vmatprep.subr.bf16.mxu1 %v7536_v6 }
 0x1f7   :  { %2018 = vmatpush1.bf16.msra.mxu0 %v7537_v41  ;;  %2059 = vmatpush1.bf16.msra.mxu1 %v7538_v56 }
 0x1f8   :  { %2019 = vmatprep.subr.bf16.mxu0 %v7539_v31  ;;  %2060 = vmatprep.subr.bf16.mxu1 %v7540_v22 }
 0x1fb   :  { %2020 = vmatpush1.bf16.msra.mxu0 %v7541_v33  ;;  %2061 = vmatpush1.bf16.msra.mxu1 %v7542_v15 }
 0x1fc   :  { %2021 = vmatprep.subr.bf16.mxu0 %v7543_v44  ;;  %2062 = vmatprep.subr.bf16.mxu1 %v7544_v32 }
 0x1ff   :  { %2022 = vmatpush1.bf16.msra.mxu0 %v5620_v3  ;;  %2063 = vmatpush1.bf16.msra.mxu1 %v5624_v63 }
 0x200   :  { %2023 = vmatprep.subr.bf16.mxu0 %v5626_v61  ;;  %2064 = vmatprep.subr.bf16.mxu1 %v5629_v38 }
 0x203   :  { %2024 = vmatpush1.bf16.msra.mxu0 %v5644_v11  ;;  %2065 = vmatpush1.bf16.msra.mxu1 %v5648_v25 }
 0x204   :  { %2025 = vmatprep.subr.bf16.mxu0 %v5650_v57  ;;  %2066 = vmatprep.subr.bf16.mxu1 %v5653_v9 }
 0x207   :  { %2026 = vmatpush1.bf16.msra.mxu0 %v5656_v55  ;;  %2067 = vmatpush1.bf16.msra.mxu1 %v5660_v1 }
 0x208   :  { %2202 = vmatprep.subr.bf16.mxu0 %v4851_v12  ;;  %2243 = vmatprep.subr.bf16.mxu1 %v4854_v13 }
 0x20a   :  { %4288 = vmatmul.mubr.msk.bf16.vlgmr.msra.gmra.mrb[44].mxu0 %vm5787_vm3, %v5797_v49  ;;  %4294 = vmatmul.mubr.msk.bf16.vlgmr.msra.gmra.mrb[44].mxu1 %vm5787_vm3, %v5797_v49  ;;  %v7546_v49 = vld [vmem:[#allocation35_spill] sm:$0xff] }
 0x20b   :  { %2203 = vmatpush1.bf16.msra.mxu0 %v4869_v18  ;;  %2244 = vmatpush1.bf16.msra.mxu1 %v4872_v19 }
 0x20c   :  { %2204 = vmatprep.subr.bf16.mxu0 %v4874_v20  ;;  %2245 = vmatprep.subr.bf16.mxu1 %v4877_v21 }
 0x20f   :  { %2205 = vmatpush1.bf16.msra.mxu0 %v4894_v26  ;;  %2246 = vmatpush1.bf16.msra.mxu1 %v4898_v28 }
 0x210   :  { %2206 = vmatprep.subr.bf16.mxu0 %v4900_v29  ;;  %2247 = vmatprep.subr.bf16.mxu1 %v4903_v30  ;;  %v7586_v30 = vld [vmem:[#allocation140_spill] sm:$0xff]  ;;  %v7587_v29 = vld [vmem:[#allocation141_spill] sm:$0xff] }
 0x213   :  { %2207 = vmatpush1.bf16.msra.mxu0 %v4920_v34  ;;  %2248 = vmatpush1.bf16.msra.mxu1 %v4924_v35  ;;  %v7585_v35 = vld [vmem:[#allocation142_spill] sm:$0xff] }
 0x214   :  { %2208 = vmatprep.subr.bf16.mxu0 %v4926_v36  ;;  %2249 = vmatprep.subr.bf16.mxu1 %v4929_v37 }
 0x217   :  { %2209 = vmatpush1.bf16.msra.mxu0 %v4945_v42  ;;  %2250 = vmatpush1.bf16.msra.mxu1 %v4950_v43 }
 0x218   :  { %2210 = vmatprep.subr.bf16.mxu0 %v4952_v45  ;;  %2251 = vmatprep.subr.bf16.mxu1 %v4955_v46  ;;  %v7547_v46 = vld [vmem:[#allocation36_spill] sm:$0xff]  ;;  %v2078_v45 = vld [vmem:[#allocation2 + $0x8] sm:$0xf0] }
 0x219   :  { %v2086_v42 = vrot.slane %v2078_v45, 4 }
 0x21b   :  { %2211 = vmatpush1.bf16.msra.mxu0 %v4972_v50  ;;  %2252 = vmatpush1.bf16.msra.mxu1 %v4976_v51  ;;  %v7548_v50 = vld [vmem:[#allocation37_spill] sm:$0xff]  ;;  %v7549_v51 = vld [vmem:[#allocation38_spill] sm:$0xff]  ;;  %v2094_v36 = vunpack.c.l.bf16 %v2086_v42 }
 0x21c   :  { %2212 = vmatprep.subr.bf16.mxu0 %v4978_v52  ;;  %2253 = vmatprep.subr.bf16.mxu1 %v4981_v53  ;;  %v7550_v52 = vld [vmem:[#allocation39_spill] sm:$0xff]  ;;  %v7551_v53 = vld [vmem:[#allocation40_spill] sm:$0xff] }
 0x21f   :  { %2213 = vmatpush1.bf16.msra.mxu0 %v4997_v58  ;;  %2254 = vmatpush1.bf16.msra.mxu1 %v5002_v59  ;;  %v7552_v58 = vld [vmem:[#allocation41_spill] sm:$0xff]  ;;  %v7553_v59 = vld [vmem:[#allocation42_spill] sm:$0xff] }
 0x220   :  { %2214 = vmatprep.subr.bf16.mxu0 %v5004_v60  ;;  %2255 = vmatprep.subr.bf16.mxu1 %v5007_v62  ;;  %v7554_v60 = vld [vmem:[#allocation43_spill] sm:$0xff]  ;;  %v7555_v62 = vld [vmem:[#allocation44_spill] sm:$0xff] }
 0x223   :  { %2215 = vmatpush1.bf16.msra.mxu0 %v7545_v17  ;;  %2256 = vmatpush1.bf16.msra.mxu1 %v7546_v49  ;;  %v7556_v17 = vld [vmem:[#allocation45_spill] sm:$0xff]  ;;  %v7557_v49 = vld [vmem:[#allocation46_spill] sm:$0xff] }
 0x224   :  { %2216 = vmatprep.subr.bf16.mxu0 %v7547_v46  ;;  %2257 = vmatprep.subr.bf16.mxu1 %v7548_v50  ;;  %v7558_v46 = vld [vmem:[#allocation47_spill] sm:$0xff]  ;;  %v7559_v50 = vld [vmem:[#allocation48_spill] sm:$0xff] }
 0x227   :  { %2217 = vmatpush1.bf16.msra.mxu0 %v7549_v51  ;;  %2258 = vmatpush1.bf16.msra.mxu1 %v7550_v52  ;;  %v7560_v51 = vld [vmem:[#allocation49_spill] sm:$0xff]  ;;  %v7561_v52 = vld [vmem:[#allocation50_spill] sm:$0xff] }
 0x228   :  { %2218 = vmatprep.subr.bf16.mxu0 %v7551_v53  ;;  %2259 = vmatprep.subr.bf16.mxu1 %v7552_v58  ;;  %v7562_v53 = vld [vmem:[#allocation51_spill] sm:$0xff]  ;;  %v7563_v58 = vld [vmem:[#allocation52_spill] sm:$0xff] }
 0x22b   :  { %2219 = vmatpush1.bf16.msra.mxu0 %v7553_v59  ;;  %2260 = vmatpush1.bf16.msra.mxu1 %v7554_v60  ;;  %v7564_v59 = vld [vmem:[#allocation53_spill] sm:$0xff]  ;;  %v7565_v60 = vld [vmem:[#allocation54_spill] sm:$0xff] }
 0x22c   :  { %2220 = vmatprep.subr.bf16.mxu0 %v7555_v62  ;;  %2261 = vmatprep.subr.bf16.mxu1 %v7556_v17  ;;  %v7566_v62 = vld [vmem:[#allocation55_spill] sm:$0xff]  ;;  %v7567_v17 = vld [vmem:[#allocation56_spill] sm:$0xff] }
 0x22f   :  { %2221 = vmatpush1.bf16.msra.mxu0 %v7557_v49  ;;  %2262 = vmatpush1.bf16.msra.mxu1 %v7558_v46  ;;  %v7568_v49 = vld [vmem:[#allocation57_spill] sm:$0xff]  ;;  %v7569_v46 = vld [vmem:[#allocation58_spill] sm:$0xff] }
 0x230   :  { %2222 = vmatprep.subr.bf16.mxu0 %v7559_v50  ;;  %2263 = vmatprep.subr.bf16.mxu1 %v7560_v51  ;;  %v7570_v50 = vld [vmem:[#allocation59_spill] sm:$0xff]  ;;  %v7571_v51 = vld [vmem:[#allocation60_spill] sm:$0xff] }
 0x233   :  { %2223 = vmatpush1.bf16.msra.mxu0 %v7561_v52  ;;  %2264 = vmatpush1.bf16.msra.mxu1 %v7562_v53  ;;  %v7572_v52 = vld [vmem:[#allocation61_spill] sm:$0xff]  ;;  %v7573_v53 = vld [vmem:[#allocation62_spill] sm:$0xff] }
 0x234   :  { %2224 = vmatprep.subr.bf16.mxu0 %v7563_v58  ;;  %2265 = vmatprep.subr.bf16.mxu1 %v7564_v59  ;;  %v7574_v58 = vld [vmem:[#allocation63_spill] sm:$0xff]  ;;  %v7575_v59 = vld [vmem:[#allocation64_spill] sm:$0xff] }
 0x237   :  { %2225 = vmatpush1.bf16.msra.mxu0 %v7565_v60  ;;  %2266 = vmatpush1.bf16.msra.mxu1 %v7566_v62  ;;  %v7576_v60 = vld [vmem:[#allocation65_spill] sm:$0xff]  ;;  %v7577_v62 = vld [vmem:[#allocation66_spill] sm:$0xff] }
 0x238   :  { %2226 = vmatprep.subr.bf16.mxu0 %v7567_v17  ;;  %2267 = vmatprep.subr.bf16.mxu1 %v7568_v49  ;;  %v7578_v17 = vld [vmem:[#allocation67_spill] sm:$0xff]  ;;  %v7579_v49 = vld [vmem:[#allocation68_spill] sm:$0xff] }
 0x23b   :  { %2227 = vmatpush1.bf16.msra.mxu0 %v7569_v46  ;;  %2268 = vmatpush1.bf16.msra.mxu1 %v7570_v50  ;;  %v7580_v46 = vld [vmem:[#allocation69_spill] sm:$0xff]  ;;  %v7581_v50 = vld [vmem:[#allocation70_spill] sm:$0xff] }
 0x23c   :  { %2228 = vmatprep.subr.bf16.mxu0 %v7571_v51  ;;  %2269 = vmatprep.subr.bf16.mxu1 %v7572_v52  ;;  %v7582_v51 = vld [vmem:[#allocation71_spill] sm:$0xff]  ;;  %v7583_v52 = vld [vmem:[#allocation72_spill] sm:$0xff] }
 0x23f   :  { %2229 = vmatpush1.bf16.msra.mxu0 %v7573_v53  ;;  %2270 = vmatpush1.bf16.msra.mxu1 %v7574_v58  ;;  %v7584_v53 = vld [vmem:[#allocation73_spill] sm:$0xff]  ;;  %v2077_v58 = vld [vmem:[#allocation2] sm:$0xf0] }
 0x240   :  { %2230 = vmatprep.subr.bf16.mxu0 %v7575_v59  ;;  %2271 = vmatprep.subr.bf16.mxu1 %v7576_v60  ;;  %v2079_v59 = vld [vmem:[#allocation2 + $0x10] sm:$0xf0]  ;;  %v2080_v60 = vld [vmem:[#allocation2 + $0x18] sm:$0xf0]  ;;  %v2085_v43 = vrot.slane %v2077_v58, 4 }
 0x242   :  { %v2093_v37 = vunpack.c.l.bf16 %v2085_v43 }
 0x243   :  { %2231 = vmatpush1.bf16.msra.mxu0 %v7577_v62  ;;  %2272 = vmatpush1.bf16.msra.mxu1 %v7578_v17  ;;  %v2087_v62 = vrot.slane %v2079_v59, 4  ;;  %v2088_v17 = vrot.slane %v2080_v60, 4 }
 0x244   :  { %2232 = vmatprep.subr.bf16.mxu0 %v7579_v49  ;;  %2273 = vmatprep.subr.bf16.mxu1 %v7580_v46 }
 0x245   :  { %v2095_v49 = vunpack.c.l.bf16 %v2087_v62  ;;  %v2096_v46 = vunpack.c.l.bf16 %v2088_v17 }
 0x247   :  { %2233 = vmatpush1.bf16.msra.mxu0 %v7581_v50  ;;  %2274 = vmatpush1.bf16.msra.mxu1 %v7582_v51  ;;  %v2097_v50 = vadd.f32 %v2093_v37, %v5738_v54  ;;  %v2099_v51 = vadd.f32 %v2095_v49, %v7585_v35  ;;  %v2100_v28 = vadd.f32 %v2096_v46, %v7587_v29 }
 0x248   :  { %2284 = vmatprep.subr.bf16.mxu0 %v7583_v52  ;;  %2325 = vmatprep.subr.bf16.mxu1 %v7584_v53  ;;  %v2098_v53 = vadd.f32 %v2094_v36, %v7586_v30 }
 0x29d   :  { %v1947_v34 = vpop.f32.mrb[40].mxu0  ;;  %v1988_v52 = vpop.f32.mrb[40].mxu1 }
 0x29e   :  { %v2101_v26 = vadd.f32 %v2097_v50, %v1947_v34  ;;  %v2103_v21 = vadd.f32 %v2099_v51, %v1988_v52  ;;  %v1949_v58 = vpop.f32.mrb[41].mxu0  ;;  %v1990_v59 = vpop.f32.mrb[41].mxu1 }
 0x29f   :  { %v2102_v45 = vadd.f32 %v2098_v53, %v1949_v58  ;;  %v2104_v60 = vadd.f32 %v2100_v28, %v1990_v59  ;;  %v1951_v43 = vpop.f32.mrb[42].mxu0  ;;  %v1992_v62 = vpop.f32.mrb[42].mxu1 }
 0x2a0   :  { %v4155_v42 = vmul.f32 -1.442695, %v2101_v26  ;;  %v1952_v17 = vpop.f32.mrb[43].mxu0  ;;  %v1993_v20 = vpop.f32.mrb[43].mxu1  ;;  %v7588_v26 = vld [vmem:[#allocation143_spill] sm:$0xff] }
 0x2a1   :  { %v4156_v37 = vmul.f32 -1.442695, %v2102_v45  ;;  %v4157_v49 = vmul.f32 -1.442695, %v2104_v60  ;;  %v1889_v20 = vsel %vm1883_vm0, %v7588_v26, 0.0 }
 0x2a2   :  { %4345 = vpow2.f32 %v4155_v42  ;;  %v2105_v43 = vld [vmem:[#allocation2 + $0xe0] ss:$16 sps:$4 sm:$0xff]   ;;  %v2106_v62 = vld [vmem:[#allocation2 + $0xe8] ss:$16 sps:$4 sm:$0xff]  }
 0x2a3   :  { %4347 = vpow2.f32 %v4156_v37  ;;  %v2109_v42 = vunpack.c.l.bf16 %v2105_v43  ;;  %v2111_v17 = vunpack.c.h.bf16 %v2105_v43  ;;  %v2110_v37 = vunpack.c.l.bf16 %v2106_v62 }
 0x2a4   :  { %4349 = vpow2.f32 %v4157_v49  ;;  %v2112_v49 = vunpack.c.h.bf16 %v2106_v62 }
 0x2a5   :  { %4351 = vtanh.f32 %v2103_v21 }
 0x2ac   :  { %v4346_v35 = vpop.eup %4345 }
 0x2ad   :  { %v4348_v54 = vpop.eup %4347  ;;  %v2125_v36 = vadd.f32 1.0, %v4346_v35 }
 0x2ae   :  { %v2131_v34 = vadd.f32 1.0, %v4348_v54  ;;  %v4350_v46 = vpop.eup %4349 }
 0x2af   :  { %4353 = vrcp.f32 %v2125_v36  ;;  %v4352_v50 = vpop.eup %4351  ;;  %v2138_v53 = vadd.f32 1.0, %v4350_v46  ;;  %v2113_v36 = vadd.f32 %v2109_v42, %v5511_v24 }
 0x2b0   :  { %4355 = vrcp.f32 %v2131_v34  ;;  %v7590_v34 = vld [vmem:[#allocation112_spill] sm:$0xff] }
 0x2b1   :  { %4357 = vrcp.f32 %v2138_v53  ;;  %v2115_v46 = vadd.f32 %v2111_v17, %v7590_v34 }
 0x2b9   :  { %v4354_v28 = vpop.eup %4353 }
 0x2ba   :  { %v4356_v51 = vpop.eup %4355  ;;  %v2142_v52 = vmul.f32 %v4354_v28, %v4352_v50 }
 0x2bb   :  { %v2141_v58 = vmul.f32 %v4356_v51, %v1889_v20  ;;  %v4358_v35 = vpop.eup %4357  ;;  %v2114_v51 = vadd.f32 %v2110_v37, %v7490_v39 }
 0x2bd   :  { %v2143_v59 = vadd.f32 %v2142_v52, %v2141_v58  ;;  %v2116_v52 = vadd.f32 %v2112_v49, %v5611_v23 }
 0x2bf   :  { %4359 = vtanh.f32 %v2143_v59  ;;  %v5953_v21 = vsel %vm2171_vm4, %v2143_v59, %v1889_v20 }
 0x2c0   :  { %7589 = vst [vmem:[#allocation115_spill] sm:$0xff] %v5953_v21 }
 0x2c9   :  { %v4360_v54 = vpop.eup %4359 }
 0x2ca   :  { %v2145_v45 = vmul.f32 %v4360_v54, %v4358_v35 }
 0x2cc   :  { %v2188_v60 = vsel %vm2171_vm4, %v2145_v45, 0.0 }
 0x2cd   :  { %4161 = vst [vmem:[%s7016_s5 + $0x8] sm:$0xff] %v2188_v60 }
 0x2dd   :  { %v2029_v50 = vpop.f32.mrb[44].mxu0  ;;  %v2070_v28 = vpop.f32.mrb[44].mxu1 }
 0x2de   :  { %v2117_v26 = vadd.f32 %v2113_v36, %v2029_v50  ;;  %v2119_v20 = vadd.f32 %v2115_v46, %v2070_v28  ;;  %v2031_v53 = vpop.f32.mrb[45].mxu0  ;;  %v2072_v58 = vpop.f32.mrb[45].mxu1 }
 0x2df   :  { %v2118_v59 = vadd.f32 %v2114_v51, %v2031_v53  ;;  %v2120_v35 = vadd.f32 %v2116_v52, %v2072_v58  ;;  %v2033_v54 = vpop.f32.mrb[46].mxu0  ;;  %v2074_v60 = vpop.f32.mrb[46].mxu1 }
 0x2e0   :  { %v4158_v43 = vmul.f32 -1.442695, %v2117_v26  ;;  %v2034_v62 = vpop.f32.mrb[47].mxu0  ;;  %v2075_v21 = vpop.f32.mrb[47].mxu1 }
 0x2e1   :  { %v4159_v42 = vmul.f32 -1.442695, %v2118_v59  ;;  %v4160_v17 = vmul.f32 -1.442695, %v2120_v35  ;;  %v1892_v21 = vsel %vm1884_vm1, %v5777_v7, 0.0  ;;  %v7591_v59 = vld [vmem:[#allocation144_spill] sm:$0xff] }
 0x2e2   :  { %4361 = vpow2.f32 %v4158_v43  ;;  %v5975_v35 = vsel %vm2171_vm4, %v2145_v45, %v7591_v59  ;;  %v7593_v45 = vld [vmem:[#allocation83_spill] sm:$0xff]  ;;  %v7594_v62 = vld [vmem:[#allocation84_spill] sm:$0xff]  ;;  %v7611_v59 = vld [vmem:[#allocation101_spill] sm:$0xff] }
 0x2e3   :  { %4363 = vpow2.f32 %v4159_v42  ;;  %v5991_v43 = vpack.c.bf16 %v5975_v35, %v5975_v35  ;;  %v7595_v42 = vld [vmem:[#allocation85_spill] sm:$0xff] }
 0x2e4   :  { %4365 = vpow2.f32 %v4160_v17  ;;  %v7596_v17 = vld [vmem:[#allocation86_spill] sm:$0xff] }
 0x2e5   :  { %4367 = vtanh.f32 %v2119_v20 }
 0x2ec   :  { %v4362_v34 = vpop.eup %4361 }
 0x2ed   :  { %v4364_v24 = vpop.eup %4363  ;;  %v2150_v37 = vadd.f32 1.0, %v4362_v34 }
 0x2ee   :  { %v2156_v49 = vadd.f32 1.0, %v4364_v24  ;;  %v4366_v36 = vpop.eup %4365 }
 0x2ef   :  { %4369 = vrcp.f32 %v2150_v37  ;;  %v4368_v46 = vpop.eup %4367  ;;  %v2163_v52 = vadd.f32 1.0, %v4366_v36  ;;  %v7597_v37 = vld [vmem:[#allocation87_spill] sm:$0xff]  ;;  %v7599_v36 = vld [vmem:[#allocation89_spill] sm:$0xff] }
 0x2f0   :  { %4371 = vrcp.f32 %v2156_v49  ;;  %v7598_v49 = vld [vmem:[#allocation88_spill] sm:$0xff] }
 0x2f1   :  { %4373 = vrcp.f32 %v2163_v52  ;;  %v7605_v52 = vld [vmem:[#allocation95_spill] sm:$0xff] }
 0x2f9   :  { %v4370_v50 = vpop.eup %4369 }
 0x2fa   :  { %v4372_v28 = vpop.eup %4371  ;;  %v2167_v51 = vmul.f32 %v4370_v50, %v4368_v46  ;;  %v7600_v46 = vld [vmem:[#allocation90_spill] sm:$0xff]  ;;  %v7601_v50 = vld [vmem:[#allocation91_spill] sm:$0xff] }
 0x2fb   :  { %v2166_v26 = vmul.f32 %v4372_v28, %v1892_v21  ;;  %v4374_v34 = vpop.eup %4373  ;;  %v7602_v28 = vld [vmem:[#allocation92_spill] sm:$0xff] }
 0x2fd   :  { %v2168_v53 = vadd.f32 %v2167_v51, %v2166_v26  ;;  %v7604_v51 = vld [vmem:[#allocation94_spill] sm:$0xff]  ;;  %v7606_v26 = vld [vmem:[#allocation96_spill] sm:$0xff] }
 0x2ff   :  { %4375 = vtanh.f32 %v2168_v53  ;;  %v5970_v24 = vsel %vm2172_vm5, %v2168_v53, %v1892_v21  ;;  %v7603_v21 = vld [vmem:[#allocation93_spill] sm:$0xff] }
 0x300   :  { %v7607_v53 = vld [vmem:[#allocation97_spill] sm:$0xff] }
 0x309   :  { %v4376_v20 = vpop.eup %4375 }
 0x30a   :  { %v2170_v58 = vmul.f32 %v4376_v20, %v4374_v34  ;;  %v7608_v34 = vld [vmem:[#allocation98_spill] sm:$0xff]  ;;  %v7609_v20 = vld [vmem:[#allocation99_spill] sm:$0xff] }
 0x30c   :  { %v5980_v7 = vsel %vm2172_vm5, %v2170_v58, %v5793_v27  ;;  %v2189_v54 = vsel %vm2172_vm5, %v2170_v58, 0.0  ;;  %v7592_v27 = vld [vmem:[#allocation82_spill] sm:$0xff]  ;;  %v7610_v58 = vld [vmem:[#allocation100_spill] sm:$0xff] }
 0x30d   :  { %4162 = vst [vmem:[%s7016_s5 + $0x30] sm:$0xff] %v2189_v54  ;;  %v4296_v60 = vpack.c.bf16 %v5980_v7, %v5980_v7  ;;  %v7612_v54 = vld [vmem:[#allocation102_spill] sm:$0xff] }
 0x30f   :  { %2234 = vmatprep.mubr.bf16.mxu0 %v4296_v60  ;;  %2275 = vmatprep.mubr.bf16.mxu1 %v4296_v60 }
 0x310   :  { %2235 = vmatmul.mubr.bf16.vlgmr.msra.gmra.mrb[48].mxu0 %v5991_v43  ;;  %2276 = vmatmul.mubr.bf16.vlgmr.msra.gmra.mrb[48].mxu1 %v5991_v43 }
 0x311   :  { %2285 = vmatpush1.bf16.msra.mxu0 %v7493_v5  ;;  %2326 = vmatpush1.bf16.msra.mxu1 %v7494_v2 }
 0x312   :  { %2316 = vmatprep.mubr.bf16.mxu0 %v4296_v60  ;;  %2357 = vmatprep.mubr.bf16.mxu1 %v4296_v60  ;;  %v7613_v60 = vld [vmem:[#allocation103_spill] sm:$0xff] }
 0x313   :  { %2286 = vmatprep.subr.bf16.mxu0 %v7495_v14  ;;  %2327 = vmatprep.subr.bf16.mxu1 %v7496_v4 }
 0x315   :  { %2287 = vmatpush1.bf16.msra.mxu0 %v7497_v16  ;;  %2328 = vmatpush1.bf16.msra.mxu1 %v7498_v0 }
 0x316   :  { %2288 = vmatprep.subr.bf16.mxu0 %v7499_v8  ;;  %2329 = vmatprep.subr.bf16.mxu1 %v7500_v48 }
 0x319   :  { %2289 = vmatpush1.bf16.msra.mxu0 %v7592_v27  ;;  %2330 = vmatpush1.bf16.msra.mxu1 %v7593_v45 }
 0x31a   :  { %2290 = vmatprep.subr.bf16.mxu0 %v7594_v62  ;;  %2331 = vmatprep.subr.bf16.mxu1 %v7595_v42 }
 0x31d   :  { %2291 = vmatpush1.bf16.msra.mxu0 %v7596_v17  ;;  %2332 = vmatpush1.bf16.msra.mxu1 %v7597_v37 }
 0x31e   :  { %2292 = vmatprep.subr.bf16.mxu0 %v7598_v49  ;;  %2333 = vmatprep.subr.bf16.mxu1 %v7599_v36 }
 0x321   :  { %2293 = vmatpush1.bf16.msra.mxu0 %v7600_v46  ;;  %2334 = vmatpush1.bf16.msra.mxu1 %v7601_v50 }
 0x322   :  { %2294 = vmatprep.subr.bf16.mxu0 %v7602_v28  ;;  %2335 = vmatprep.subr.bf16.mxu1 %v7603_v21  ;;  %v7614_v21 = vld [vmem:[#allocation104_spill] sm:$0xff] }
 0x325   :  { %2295 = vmatpush1.bf16.msra.mxu0 %v7604_v51  ;;  %2336 = vmatpush1.bf16.msra.mxu1 %v7605_v52  ;;  %v7615_v51 = vld [vmem:[#allocation105_spill] sm:$0xff]  ;;  %v7616_v52 = vld [vmem:[#allocation106_spill] sm:$0xff] }
 0x326   :  { %2296 = vmatprep.subr.bf16.mxu0 %v7606_v26  ;;  %2337 = vmatprep.subr.bf16.mxu1 %v7607_v53  ;;  %v7617_v26 = vld [vmem:[#allocation107_spill] sm:$0xff]  ;;  %v7618_v53 = vld [vmem:[#allocation108_spill] sm:$0xff] }
 0x329   :  { %2297 = vmatpush1.bf16.msra.mxu0 %v7608_v34  ;;  %2338 = vmatpush1.bf16.msra.mxu1 %v7609_v20  ;;  %v7619_v34 = vld [vmem:[#allocation109_spill] sm:$0xff]  ;;  %v7620_v20 = vld [vmem:[#allocation110_spill] sm:$0xff] }
 0x32a   :  { %2298 = vmatprep.subr.bf16.mxu0 %v7610_v58  ;;  %2339 = vmatprep.subr.bf16.mxu1 %v7611_v59  ;;  %v7621_v58 = vld [vmem:[#allocation113_spill] sm:$0xff]  ;;  %v7622_v59 = vld [vmem:[#allocation114_spill] sm:$0xff] }
 0x32d   :  { %2299 = vmatpush1.bf16.msra.mxu0 %v7612_v54  ;;  %2340 = vmatpush1.bf16.msra.mxu1 %v7613_v60  ;;  %v7623_v54 = vld [vmem:[#allocation116_spill] sm:$0xff]  ;;  %v7624_v60 = vld [vmem:[#allocation117_spill] sm:$0xff] }
 0x32e   :  { %2300 = vmatprep.subr.bf16.mxu0 %v7614_v21  ;;  %2341 = vmatprep.subr.bf16.mxu1 %v7615_v51 }
 0x331   :  { %2301 = vmatpush1.bf16.msra.mxu0 %v7616_v52  ;;  %2342 = vmatpush1.bf16.msra.mxu1 %v7617_v26 }
 0x332   :  { %2302 = vmatprep.subr.bf16.mxu0 %v7618_v53  ;;  %2343 = vmatprep.subr.bf16.mxu1 %v7619_v34 }
 0x335   :  { %2303 = vmatpush1.bf16.msra.mxu0 %v7620_v20  ;;  %2344 = vmatpush1.bf16.msra.mxu1 %v7621_v58 }
 0x336   :  { %2304 = vmatprep.subr.bf16.mxu0 %v7622_v59  ;;  %2345 = vmatprep.subr.bf16.mxu1 %v7623_v54 }
 0x339   :  { %2305 = vmatpush1.bf16.msra.mxu0 %v7624_v60  ;;  %2346 = vmatpush1.bf16.msra.mxu1 %v7534_v47 }
 0x33a   :  { %2306 = vmatprep.subr.bf16.mxu0 %v7535_v40  ;;  %2347 = vmatprep.subr.bf16.mxu1 %v7536_v6 }
 0x33d   :  { %2307 = vmatpush1.bf16.msra.mxu0 %v7537_v41  ;;  %2348 = vmatpush1.bf16.msra.mxu1 %v7538_v56 }
 0x33e   :  { %2308 = vmatprep.subr.bf16.mxu0 %v7539_v31  ;;  %2349 = vmatprep.subr.bf16.mxu1 %v7540_v22 }
 0x341   :  { %2309 = vmatpush1.bf16.msra.mxu0 %v7541_v33  ;;  %2350 = vmatpush1.bf16.msra.mxu1 %v7542_v15 }
 0x342   :  { %2310 = vmatprep.subr.bf16.mxu0 %v7543_v44  ;;  %2351 = vmatprep.subr.bf16.mxu1 %v7544_v32 }
 0x345   :  { %2311 = vmatpush1.bf16.msra.mxu0 %v5620_v3  ;;  %2352 = vmatpush1.bf16.msra.mxu1 %v5624_v63  ;;  %v7687_v63 = vld [vmem:[#allocation139_spill] sm:$0xff]  ;;  %v7688_v3 = vld [vmem:[#allocation142_spill] sm:$0xff] }
 0x346   :  { %2312 = vmatprep.subr.bf16.mxu0 %v5626_v61  ;;  %2353 = vmatprep.subr.bf16.mxu1 %v5629_v38 }
 0x349   :  { %2313 = vmatpush1.bf16.msra.mxu0 %v5644_v11  ;;  %2354 = vmatpush1.bf16.msra.mxu1 %v5648_v25  ;;  %v7625_v25 = vld [vmem:[#allocation12_spill] sm:$0xff]  ;;  %v7632_v11 = vld [vmem:[#allocation19_spill] sm:$0xff] }
 0x34a   :  { %2314 = vmatprep.subr.bf16.mxu0 %v5650_v57  ;;  %2355 = vmatprep.subr.bf16.mxu1 %v5653_v9  ;;  %v7626_v57 = vld [vmem:[#allocation13_spill] sm:$0xff]  ;;  %v7627_v9 = vld [vmem:[#allocation14_spill] sm:$0xff] }
 0x34d   :  { %2315 = vmatpush1.bf16.msra.mxu0 %v5656_v55  ;;  %2356 = vmatpush1.bf16.msra.mxu1 %v5660_v1  ;;  %v7628_v55 = vld [vmem:[#allocation15_spill] sm:$0xff]  ;;  %v7629_v1 = vld [vmem:[#allocation16_spill] sm:$0xff] }
 0x34e   :  { %2491 = vmatprep.subr.bf16.mxu0 %v4851_v12  ;;  %2532 = vmatprep.subr.bf16.mxu1 %v4854_v13  ;;  %v7630_v12 = vld [vmem:[#allocation17_spill] sm:$0xff]  ;;  %v7631_v13 = vld [vmem:[#allocation18_spill] sm:$0xff] }
 0x350   :  { %2317 = vmatmul.mubr.bf16.vlgmr.msra.gmra.mrb[52].mxu0 %v5991_v43  ;;  %2358 = vmatmul.mubr.bf16.vlgmr.msra.gmra.mrb[52].mxu1 %v5991_v43  ;;  %v7633_v43 = vld [vmem:[#allocation20_spill] sm:$0xff] }
 0x351   :  { %2492 = vmatpush1.bf16.msra.mxu0 %v4869_v18  ;;  %2533 = vmatpush1.bf16.msra.mxu1 %v4872_v19  ;;  %v7634_v18 = vld [vmem:[#allocation21_spill] sm:$0xff]  ;;  %v7635_v19 = vld [vmem:[#allocation22_spill] sm:$0xff] }
 0x352   :  { %2493 = vmatprep.subr.bf16.mxu0 %v7625_v25  ;;  %2534 = vmatprep.subr.bf16.mxu1 %v7626_v57  ;;  %v7636_v25 = vld [vmem:[#allocation23_spill] sm:$0xff]  ;;  %v7637_v57 = vld [vmem:[#allocation24_spill] sm:$0xff] }
 0x355   :  { %2494 = vmatpush1.bf16.msra.mxu0 %v7627_v9  ;;  %2535 = vmatpush1.bf16.msra.mxu1 %v7628_v55  ;;  %v7638_v9 = vld [vmem:[#allocation25_spill] sm:$0xff]  ;;  %v7639_v55 = vld [vmem:[#allocation26_spill] sm:$0xff] }
 0x356   :  { %2495 = vmatprep.subr.bf16.mxu0 %v7629_v1  ;;  %2536 = vmatprep.subr.bf16.mxu1 %v7630_v12  ;;  %v7640_v1 = vld [vmem:[#allocation27_spill] sm:$0xff]  ;;  %v7641_v12 = vld [vmem:[#allocation28_spill] sm:$0xff] }
 0x359   :  { %2496 = vmatpush1.bf16.msra.mxu0 %v7631_v13  ;;  %2537 = vmatpush1.bf16.msra.mxu1 %v7632_v11  ;;  %v7642_v13 = vld [vmem:[#allocation29_spill] sm:$0xff]  ;;  %v7643_v11 = vld [vmem:[#allocation30_spill] sm:$0xff] }
 0x35a   :  { %2497 = vmatprep.subr.bf16.mxu0 %v7633_v43  ;;  %2538 = vmatprep.subr.bf16.mxu1 %v7634_v18  ;;  %v7644_v43 = vld [vmem:[#allocation31_spill] sm:$0xff]  ;;  %v7645_v18 = vld [vmem:[#allocation32_spill] sm:$0xff] }
 0x35d   :  { %2498 = vmatpush1.bf16.msra.mxu0 %v7635_v19  ;;  %2539 = vmatpush1.bf16.msra.mxu1 %v7636_v25  ;;  %v7646_v19 = vld [vmem:[#allocation33_spill] sm:$0xff]  ;;  %v7647_v25 = vld [vmem:[#allocation34_spill] sm:$0xff] }
 0x35e   :  { %2499 = vmatprep.subr.bf16.mxu0 %v7637_v57  ;;  %2540 = vmatprep.subr.bf16.mxu1 %v7638_v9  ;;  %v7648_v57 = vld [vmem:[#allocation35_spill] sm:$0xff]  ;;  %v7649_v9 = vld [vmem:[#allocation36_spill] sm:$0xff] }
 0x361   :  { %2500 = vmatpush1.bf16.msra.mxu0 %v7639_v55  ;;  %2541 = vmatpush1.bf16.msra.mxu1 %v7640_v1  ;;  %v7650_v55 = vld [vmem:[#allocation37_spill] sm:$0xff]  ;;  %v7651_v1 = vld [vmem:[#allocation38_spill] sm:$0xff] }
 0x362   :  { %2501 = vmatprep.subr.bf16.mxu0 %v7641_v12  ;;  %2542 = vmatprep.subr.bf16.mxu1 %v7642_v13  ;;  %v7652_v12 = vld [vmem:[#allocation39_spill] sm:$0xff]  ;;  %v7653_v13 = vld [vmem:[#allocation40_spill] sm:$0xff] }
 0x365   :  { %2502 = vmatpush1.bf16.msra.mxu0 %v7643_v11  ;;  %2543 = vmatpush1.bf16.msra.mxu1 %v7644_v43  ;;  %v7654_v11 = vld [vmem:[#allocation41_spill] sm:$0xff]  ;;  %v7655_v43 = vld [vmem:[#allocation42_spill] sm:$0xff] }
 0x366   :  { %2503 = vmatprep.subr.bf16.mxu0 %v7645_v18  ;;  %2544 = vmatprep.subr.bf16.mxu1 %v7646_v19  ;;  %v7656_v18 = vld [vmem:[#allocation43_spill] sm:$0xff]  ;;  %v7657_v19 = vld [vmem:[#allocation44_spill] sm:$0xff] }
 0x369   :  { %2504 = vmatpush1.bf16.msra.mxu0 %v7647_v25  ;;  %2545 = vmatpush1.bf16.msra.mxu1 %v7648_v57  ;;  %v7658_v25 = vld [vmem:[#allocation45_spill] sm:$0xff]  ;;  %v7659_v57 = vld [vmem:[#allocation46_spill] sm:$0xff] }
 0x36a   :  { %2505 = vmatprep.subr.bf16.mxu0 %v7649_v9  ;;  %2546 = vmatprep.subr.bf16.mxu1 %v7650_v55  ;;  %v7660_v9 = vld [vmem:[#allocation47_spill] sm:$0xff]  ;;  %v7661_v55 = vld [vmem:[#allocation48_spill] sm:$0xff] }
 0x36d   :  { %2506 = vmatpush1.bf16.msra.mxu0 %v7651_v1  ;;  %2547 = vmatpush1.bf16.msra.mxu1 %v7652_v12  ;;  %v7662_v1 = vld [vmem:[#allocation49_spill] sm:$0xff]  ;;  %v7663_v12 = vld [vmem:[#allocation50_spill] sm:$0xff] }
 0x36e   :  { %2507 = vmatprep.subr.bf16.mxu0 %v7653_v13  ;;  %2548 = vmatprep.subr.bf16.mxu1 %v7654_v11  ;;  %v7664_v13 = vld [vmem:[#allocation51_spill] sm:$0xff]  ;;  %v7665_v11 = vld [vmem:[#allocation52_spill] sm:$0xff] }
 0x371   :  { %2508 = vmatpush1.bf16.msra.mxu0 %v7655_v43  ;;  %2549 = vmatpush1.bf16.msra.mxu1 %v7656_v18  ;;  %v7666_v43 = vld [vmem:[#allocation53_spill] sm:$0xff]  ;;  %v7667_v18 = vld [vmem:[#allocation54_spill] sm:$0xff] }
 0x372   :  { %2509 = vmatprep.subr.bf16.mxu0 %v7657_v19  ;;  %2550 = vmatprep.subr.bf16.mxu1 %v7658_v25  ;;  %v7668_v19 = vld [vmem:[#allocation55_spill] sm:$0xff]  ;;  %v7669_v25 = vld [vmem:[#allocation56_spill] sm:$0xff] }
 0x375   :  { %2510 = vmatpush1.bf16.msra.mxu0 %v7659_v57  ;;  %2551 = vmatpush1.bf16.msra.mxu1 %v7660_v9  ;;  %v7670_v57 = vld [vmem:[#allocation57_spill] sm:$0xff]  ;;  %v7671_v9 = vld [vmem:[#allocation58_spill] sm:$0xff] }
 0x376   :  { %2511 = vmatprep.subr.bf16.mxu0 %v7661_v55  ;;  %2552 = vmatprep.subr.bf16.mxu1 %v7662_v1  ;;  %v7672_v55 = vld [vmem:[#allocation59_spill] sm:$0xff]  ;;  %v7673_v1 = vld [vmem:[#allocation60_spill] sm:$0xff] }
 0x379   :  { %2512 = vmatpush1.bf16.msra.mxu0 %v7663_v12  ;;  %2553 = vmatpush1.bf16.msra.mxu1 %v7664_v13  ;;  %v7674_v12 = vld [vmem:[#allocation61_spill] sm:$0xff]  ;;  %v7675_v13 = vld [vmem:[#allocation62_spill] sm:$0xff] }
 0x37a   :  { %2513 = vmatprep.subr.bf16.mxu0 %v7665_v11  ;;  %2554 = vmatprep.subr.bf16.mxu1 %v7666_v43  ;;  %v7676_v11 = vld [vmem:[#allocation63_spill] sm:$0xff]  ;;  %v7677_v43 = vld [vmem:[#allocation64_spill] sm:$0xff] }
 0x37d   :  { %2514 = vmatpush1.bf16.msra.mxu0 %v7667_v18  ;;  %2555 = vmatpush1.bf16.msra.mxu1 %v7668_v19  ;;  %v7678_v18 = vld [vmem:[#allocation65_spill] sm:$0xff]  ;;  %v7679_v19 = vld [vmem:[#allocation66_spill] sm:$0xff] }
 0x37e   :  { %2515 = vmatprep.subr.bf16.mxu0 %v7669_v25  ;;  %2556 = vmatprep.subr.bf16.mxu1 %v7670_v57  ;;  %v7680_v25 = vld [vmem:[#allocation67_spill] sm:$0xff]  ;;  %v7681_v57 = vld [vmem:[#allocation68_spill] sm:$0xff] }
 0x381   :  { %2516 = vmatpush1.bf16.msra.mxu0 %v7671_v9  ;;  %2557 = vmatpush1.bf16.msra.mxu1 %v7672_v55  ;;  %v7682_v9 = vld [vmem:[#allocation69_spill] sm:$0xff]  ;;  %v7683_v55 = vld [vmem:[#allocation70_spill] sm:$0xff] }
 0x382   :  { %2517 = vmatprep.subr.bf16.mxu0 %v7673_v1  ;;  %2558 = vmatprep.subr.bf16.mxu1 %v7674_v12  ;;  %v7684_v1 = vld [vmem:[#allocation71_spill] sm:$0xff]  ;;  %v7685_v12 = vld [vmem:[#allocation72_spill] sm:$0xff] }
 0x385   :  { %2518 = vmatpush1.bf16.msra.mxu0 %v7675_v13  ;;  %2559 = vmatpush1.bf16.msra.mxu1 %v7676_v11  ;;  %v7686_v13 = vld [vmem:[#allocation73_spill] sm:$0xff]  ;;  %v2366_v11 = vld [vmem:[#allocation2 + $0x40] ss:$16 sps:$4 sm:$0xff]  }
 0x386   :  { %2519 = vmatprep.subr.bf16.mxu0 %v7677_v43  ;;  %2560 = vmatprep.subr.bf16.mxu1 %v7678_v18  ;;  %v2367_v43 = vld [vmem:[#allocation2 + $0x48] ss:$16 sps:$4 sm:$0xff]   ;;  %v2370_v38 = vunpack.c.l.bf16 %v2366_v11  ;;  %v2372_v18 = vunpack.c.h.bf16 %v2366_v11 }
 0x387   :  { %v2371_v61 = vunpack.c.l.bf16 %v2367_v43 }
 0x389   :  { %2520 = vmatpush1.bf16.msra.mxu0 %v7679_v19  ;;  %2561 = vmatpush1.bf16.msra.mxu1 %v7680_v25  ;;  %v2373_v19 = vunpack.c.h.bf16 %v2367_v43  ;;  %v2374_v25 = vadd.f32 %v2370_v38, %v7687_v63 }
 0x38a   :  { %2521 = vmatprep.subr.bf16.mxu0 %v7681_v57  ;;  %2562 = vmatprep.subr.bf16.mxu1 %v7682_v9  ;;  %v2376_v57 = vadd.f32 %v2372_v18, %v7688_v3 }
 0x38d   :  { %2522 = vmatpush1.bf16.msra.mxu0 %v7683_v55  ;;  %2563 = vmatpush1.bf16.msra.mxu1 %v7684_v1  ;;  %v2375_v55 = vadd.f32 %v2371_v61, %v7586_v30  ;;  %v2377_v1 = vadd.f32 %v2373_v19, %v7587_v29 }
 0x38e   :  { %2573 = vmatprep.subr.bf16.mxu0 %v7685_v12  ;;  %2614 = vmatprep.subr.bf16.mxu1 %v7686_v13 }
 0x3e3   :  { %v2236_v32 = vpop.f32.mrb[48].mxu0  ;;  %v2277_v9 = vpop.f32.mrb[48].mxu1 }
 0x3e4   :  { %v2378_v44 = vadd.f32 %v2374_v25, %v2236_v32  ;;  %v2380_v12 = vadd.f32 %v2376_v57, %v2277_v9  ;;  %v2238_v15 = vpop.f32.mrb[49].mxu0  ;;  %v2279_v13 = vpop.f32.mrb[49].mxu1  ;;  %v2383_v32 = vld [vmem:[#allocation2 + $0xa8] sm:$0xf0] }
 0x3e5   :  { %v2379_v33 = vadd.f32 %v2375_v55, %v2238_v15  ;;  %v2381_v22 = vadd.f32 %v2377_v1, %v2279_v13  ;;  %v2240_v31 = vpop.f32.mrb[50].mxu0  ;;  %v2281_v11 = vpop.f32.mrb[50].mxu1  ;;  %v2382_v15 = vld [vmem:[#allocation2 + $0xa0] sm:$0xf0] }
 0x3e6   :  { %v4165_v56 = vmul.f32 -1.442695, %v2378_v44  ;;  %v2241_v43 = vpop.f32.mrb[51].mxu0  ;;  %v2282_v41 = vpop.f32.mrb[51].mxu1  ;;  %v7689_v31 = vld [vmem:[#allocation115_spill] sm:$0xff] }
 0x3e7   :  { %v4166_v38 = vmul.f32 -1.442695, %v2379_v33  ;;  %v4167_v18 = vmul.f32 -1.442695, %v2381_v22  ;;  %v2384_v44 = vld [vmem:[#allocation2 + $0xb0] sm:$0xf0] }
 0x3e8   :  { %4377 = vpow2.f32 %v4165_v56  ;;  %v2385_v11 = vld [vmem:[#allocation2 + $0xb8] sm:$0xf0]  ;;  %v2390_v43 = vrot.slane %v2382_v15, 4 }
 0x3e9   :  { %4379 = vpow2.f32 %v4166_v38  ;;  %v2392_v38 = vrot.slane %v2384_v44, 4 }
 0x3ea   :  { %4381 = vpow2.f32 %v4167_v18  ;;  %v2391_v18 = vrot.slane %v2383_v32, 4 }
 0x3eb   :  { %4383 = vtanh.f32 %v2380_v12 }
 0x3f2   :  { %v4378_v3 = vpop.eup %4377 }
 0x3f3   :  { %v4380_v63 = vpop.eup %4379  ;;  %v2414_v61 = vadd.f32 1.0, %v4378_v3 }
 0x3f4   :  { %v2420_v19 = vadd.f32 1.0, %v4380_v63  ;;  %v4382_v57 = vpop.eup %4381 }
 0x3f5   :  { %4385 = vrcp.f32 %v2414_v61  ;;  %v4384_v9 = vpop.eup %4383  ;;  %v2427_v1 = vadd.f32 1.0, %v4382_v57  ;;  %v2393_v61 = vrot.slane %v2385_v11, 4  ;;  %v2400_v57 = vunpack.c.l.bf16 %v2392_v38 }
 0x3f6   :  { %4387 = vrcp.f32 %v2420_v19  ;;  %v2398_v19 = vunpack.c.l.bf16 %v2390_v43 }
 0x3f7   :  { %4389 = vrcp.f32 %v2427_v1  ;;  %v7692_v1 = vld [vmem:[#allocation112_spill] sm:$0xff] }
 0x3ff   :  { %v4386_v13 = vpop.eup %4385 }
 0x400   :  { %v4388_v25 = vpop.eup %4387  ;;  %v2431_v55 = vmul.f32 %v4386_v13, %v4384_v9  ;;  %v2399_v9 = vunpack.c.l.bf16 %v2391_v18  ;;  %v2401_v13 = vunpack.c.l.bf16 %v2393_v61 }
 0x401   :  { %v2430_v41 = vmul.f32 %v4388_v25, %v7689_v31  ;;  %v4390_v63 = vpop.eup %4389  ;;  %v7691_v25 = vld [vmem:[#allocation111_spill] sm:$0xff] }
 0x403   :  { %v2432_v33 = vadd.f32 %v2431_v55, %v2430_v41  ;;  %v2402_v55 = vadd.f32 %v2398_v19, %v7691_v25 }
 0x405   :  { %4391 = vtanh.f32 %v2432_v33  ;;  %v6134_v12 = vsel %vm2460_vm6, %v2432_v33, %v7689_v31  ;;  %v2404_v31 = vadd.f32 %v2400_v57, %v7692_v1 }
 0x406   :  { %7690 = vst [vmem:[#allocation74_spill] sm:$0xff] %v6134_v12 }
 0x40f   :  { %v4392_v3 = vpop.eup %4391 }
 0x410   :  { %v2434_v56 = vmul.f32 %v4392_v3, %v4390_v63  ;;  %v2403_v63 = vadd.f32 %v2399_v9, %v7490_v39  ;;  %v2405_v3 = vadd.f32 %v2401_v13, %v5611_v23 }
 0x412   :  { %v2477_v22 = vsel %vm2460_vm6, %v2434_v56, 0.0 }
 0x413   :  { %4171 = vst [vmem:[%s7016_s5 + $0x10] sm:$0xff] %v2477_v22 }
 0x423   :  { %v2318_v41 = vpop.f32.mrb[52].mxu0  ;;  %v2359_v33 = vpop.f32.mrb[52].mxu1 }
 0x424   :  { %v2406_v22 = vadd.f32 %v2402_v55, %v2318_v41  ;;  %v2408_v12 = vadd.f32 %v2404_v31, %v2359_v33  ;;  %v2320_v15 = vpop.f32.mrb[53].mxu0  ;;  %v2361_v44 = vpop.f32.mrb[53].mxu1 }
 0x425   :  { %v2407_v32 = vadd.f32 %v2403_v63, %v2320_v15  ;;  %v2409_v11 = vadd.f32 %v2405_v3, %v2361_v44  ;;  %v2322_v43 = vpop.f32.mrb[54].mxu0  ;;  %v2363_v38 = vpop.f32.mrb[54].mxu1  ;;  %v6155_v44 = vsel %vm2460_vm6, %v2434_v56, %v5975_v35  ;;  %v7693_v35 = vld [vmem:[#allocation93_spill] sm:$0xff]  ;;  %v7695_v56 = vld [vmem:[#allocation95_spill] sm:$0xff] }
 0x426   :  { %v4168_v18 = vmul.f32 -1.442695, %v2406_v22  ;;  %v2323_v61 = vpop.f32.mrb[55].mxu0  ;;  %v2364_v29 = vpop.f32.mrb[55].mxu1  ;;  %v6171_v43 = vpack.c.bf16 %v6155_v44, %v6155_v44  ;;  %v7696_v38 = vld [vmem:[#allocation96_spill] sm:$0xff] }
 0x427   :  { %v4169_v19 = vmul.f32 -1.442695, %v2407_v32  ;;  %v4170_v57 = vmul.f32 -1.442695, %v2409_v11  ;;  %v7698_v61 = vld [vmem:[#allocation98_spill] sm:$0xff] }
 0x428   :  { %4393 = vpow2.f32 %v4168_v18  ;;  %v7697_v18 = vld [vmem:[#allocation97_spill] sm:$0xff] }
 0x429   :  { %4395 = vpow2.f32 %v4169_v19  ;;  %v7699_v19 = vld [vmem:[#allocation99_spill] sm:$0xff] }
 0x42a   :  { %4397 = vpow2.f32 %v4170_v57  ;;  %v7700_v57 = vld [vmem:[#allocation100_spill] sm:$0xff] }
 0x42b   :  { %4399 = vtanh.f32 %v2408_v12 }
 0x432   :  { %v4394_v1 = vpop.eup %4393 }
 0x433   :  { %v4396_v25 = vpop.eup %4395  ;;  %v2439_v9 = vadd.f32 1.0, %v4394_v1 }
 0x434   :  { %v2445_v13 = vadd.f32 1.0, %v4396_v25  ;;  %v4398_v55 = vpop.eup %4397 }
 0x435   :  { %4401 = vrcp.f32 %v2439_v9  ;;  %v4400_v31 = vpop.eup %4399  ;;  %v2452_v3 = vadd.f32 1.0, %v4398_v55  ;;  %v7701_v9 = vld [vmem:[#allocation101_spill] sm:$0xff]  ;;  %v7703_v55 = vld [vmem:[#allocation103_spill] sm:$0xff] }
 0x436   :  { %4403 = vrcp.f32 %v2445_v13  ;;  %v7702_v13 = vld [vmem:[#allocation102_spill] sm:$0xff] }
 0x437   :  { %4405 = vrcp.f32 %v2452_v3  ;;  %v7708_v3 = vld [vmem:[#allocation125_spill] sm:$0xff] }
 0x43f   :  { %v4402_v41 = vpop.eup %4401 }
 0x440   :  { %v4404_v33 = vpop.eup %4403  ;;  %v2456_v63 = vmul.f32 %v4402_v41, %v4400_v31  ;;  %v7704_v31 = vld [vmem:[#allocation121_spill] sm:$0xff]  ;;  %v7705_v41 = vld [vmem:[#allocation122_spill] sm:$0xff] }
 0x441   :  { %v2455_v29 = vmul.f32 %v4404_v33, %v5970_v24  ;;  %v4406_v25 = vpop.eup %4405  ;;  %v7706_v33 = vld [vmem:[#allocation123_spill] sm:$0xff] }
 0x443   :  { %v2457_v22 = vadd.f32 %v2456_v63, %v2455_v29  ;;  %v7707_v63 = vld [vmem:[#allocation124_spill] sm:$0xff]  ;;  %v7709_v29 = vld [vmem:[#allocation126_spill] sm:$0xff] }
 0x445   :  { %4407 = vtanh.f32 %v2457_v22  ;;  %v6150_v12 = vsel %vm2461_vm7, %v2457_v22, %v5970_v24  ;;  %v7710_v22 = vld [vmem:[#allocation127_spill] sm:$0xff] }
 0x44f   :  { %v4408_v1 = vpop.eup %4407 }
 0x450   :  { %v2459_v15 = vmul.f32 %v4408_v1, %v4406_v25  ;;  %v7711_v25 = vld [vmem:[#allocation128_spill] sm:$0xff]  ;;  %v7712_v1 = vld [vmem:[#allocation129_spill] sm:$0xff] }
 0x452   :  { %v6160_v32 = vsel %vm2461_vm7, %v2459_v15, %v5980_v7  ;;  %v2478_v11 = vsel %vm2461_vm7, %v2459_v15, 0.0  ;;  %v7694_v7 = vld [vmem:[#allocation94_spill] sm:$0xff] }
 0x453   :  { %4172 = vst [vmem:[%s7016_s5 + $0x28] sm:$0xff] %v2478_v11  ;;  %v4298_v24 = vpack.c.bf16 %v6160_v32, %v6160_v32  ;;  %v7713_v15 = vld [vmem:[#allocation130_spill] sm:$0xff]  ;;  %v7714_v11 = vld [vmem:[#allocation131_spill] sm:$0xff] }
 0x455   :  { %2523 = vmatprep.mubr.bf16.mxu0 %v4298_v24  ;;  %2564 = vmatprep.mubr.bf16.mxu1 %v4298_v24 }
 0x456   :  { %2524 = vmatmul.mubr.bf16.vlgmr.msra.gmra.mrb[56].mxu0 %v6171_v43  ;;  %2565 = vmatmul.mubr.bf16.vlgmr.msra.gmra.mrb[56].mxu1 %v6171_v43 }
 0x457   :  { %2574 = vmatpush1.bf16.msra.mxu0 %v7493_v5  ;;  %2615 = vmatpush1.bf16.msra.mxu1 %v7494_v2 }
 0x458   :  { %2605 = vmatprep.mubr.bf16.mxu0 %v4298_v24  ;;  %2646 = vmatprep.mubr.bf16.mxu1 %v4298_v24  ;;  %v7715_v24 = vld [vmem:[#allocation132_spill] sm:$0xff] }
 0x459   :  { %2575 = vmatprep.subr.bf16.mxu0 %v7495_v14  ;;  %2616 = vmatprep.subr.bf16.mxu1 %v7496_v4 }
 0x45b   :  { %2576 = vmatpush1.bf16.msra.mxu0 %v7497_v16  ;;  %2617 = vmatpush1.bf16.msra.mxu1 %v7498_v0 }
 0x45c   :  { %2577 = vmatprep.subr.bf16.mxu0 %v7499_v8  ;;  %2618 = vmatprep.subr.bf16.mxu1 %v7500_v48 }
 0x45f   :  { %2578 = vmatpush1.bf16.msra.mxu0 %v7592_v27  ;;  %2619 = vmatpush1.bf16.msra.mxu1 %v7593_v45 }
 0x460   :  { %2579 = vmatprep.subr.bf16.mxu0 %v7594_v62  ;;  %2620 = vmatprep.subr.bf16.mxu1 %v7595_v42 }
 0x463   :  { %2580 = vmatpush1.bf16.msra.mxu0 %v7596_v17  ;;  %2621 = vmatpush1.bf16.msra.mxu1 %v7597_v37 }
 0x464   :  { %2581 = vmatprep.subr.bf16.mxu0 %v7598_v49  ;;  %2622 = vmatprep.subr.bf16.mxu1 %v7599_v36 }
 0x467   :  { %2582 = vmatpush1.bf16.msra.mxu0 %v7600_v46  ;;  %2623 = vmatpush1.bf16.msra.mxu1 %v7601_v50 }
 0x468   :  { %2583 = vmatprep.subr.bf16.mxu0 %v7602_v28  ;;  %2624 = vmatprep.subr.bf16.mxu1 %v7693_v35 }
 0x46b   :  { %2584 = vmatpush1.bf16.msra.mxu0 %v7694_v7  ;;  %2625 = vmatpush1.bf16.msra.mxu1 %v7695_v56 }
 0x46c   :  { %2585 = vmatprep.subr.bf16.mxu0 %v7696_v38  ;;  %2626 = vmatprep.subr.bf16.mxu1 %v7697_v18 }
 0x46f   :  { %2586 = vmatpush1.bf16.msra.mxu0 %v7698_v61  ;;  %2627 = vmatpush1.bf16.msra.mxu1 %v7699_v19 }
 0x470   :  { %2587 = vmatprep.subr.bf16.mxu0 %v7700_v57  ;;  %2628 = vmatprep.subr.bf16.mxu1 %v7701_v9 }
 0x473   :  { %2588 = vmatpush1.bf16.msra.mxu0 %v7702_v13  ;;  %2629 = vmatpush1.bf16.msra.mxu1 %v7703_v55 }
 0x474   :  { %2589 = vmatprep.subr.bf16.mxu0 %v7614_v21  ;;  %2630 = vmatprep.subr.bf16.mxu1 %v7615_v51 }
 0x477   :  { %2590 = vmatpush1.bf16.msra.mxu0 %v7616_v52  ;;  %2631 = vmatpush1.bf16.msra.mxu1 %v7617_v26 }
 0x478   :  { %2591 = vmatprep.subr.bf16.mxu0 %v7618_v53  ;;  %2632 = vmatprep.subr.bf16.mxu1 %v7619_v34 }
 0x47b   :  { %2592 = vmatpush1.bf16.msra.mxu0 %v7620_v20  ;;  %2633 = vmatpush1.bf16.msra.mxu1 %v7621_v58  ;;  %v7790_v58 = vld [vmem:[#allocation141_spill] sm:$0xff] }
 0x47c   :  { %2593 = vmatprep.subr.bf16.mxu0 %v7622_v59  ;;  %2634 = vmatprep.subr.bf16.mxu1 %v7623_v54  ;;  %v7789_v54 = vld [vmem:[#allocation142_spill] sm:$0xff] }
 0x47f   :  { %2594 = vmatpush1.bf16.msra.mxu0 %v7624_v60  ;;  %2635 = vmatpush1.bf16.msra.mxu1 %v7534_v47  ;;  %v7788_v60 = vld [vmem:[#allocation139_spill] sm:$0xff] }
 0x480   :  { %2595 = vmatprep.subr.bf16.mxu0 %v7535_v40  ;;  %2636 = vmatprep.subr.bf16.mxu1 %v7536_v6 }
 0x483   :  { %2596 = vmatpush1.bf16.msra.mxu0 %v7704_v31  ;;  %2637 = vmatpush1.bf16.msra.mxu1 %v7705_v41  ;;  %v7716_v41 = vld [vmem:[#allocation133_spill] sm:$0xff] }
 0x484   :  { %2597 = vmatprep.subr.bf16.mxu0 %v7706_v33  ;;  %2638 = vmatprep.subr.bf16.mxu1 %v7707_v63  ;;  %v7717_v33 = vld [vmem:[#allocation134_spill] sm:$0xff]  ;;  %v7718_v63 = vld [vmem:[#allocation135_spill] sm:$0xff] }
 0x487   :  { %2598 = vmatpush1.bf16.msra.mxu0 %v7708_v3  ;;  %2639 = vmatpush1.bf16.msra.mxu1 %v7709_v29  ;;  %v7719_v3 = vld [vmem:[#allocation136_spill] sm:$0xff]  ;;  %v7720_v29 = vld [vmem:[#allocation137_spill] sm:$0xff] }
 0x488   :  { %2599 = vmatprep.subr.bf16.mxu0 %v7710_v22  ;;  %2640 = vmatprep.subr.bf16.mxu1 %v7711_v25  ;;  %v7721_v22 = vld [vmem:[#allocation138_spill] sm:$0xff]  ;;  %v7722_v25 = vld [vmem:[#allocation8_spill] sm:$0xff] }
 0x48b   :  { %2600 = vmatpush1.bf16.msra.mxu0 %v7712_v1  ;;  %2641 = vmatpush1.bf16.msra.mxu1 %v7713_v15  ;;  %v7723_v1 = vld [vmem:[#allocation9_spill] sm:$0xff] }
 0x48c   :  { %2601 = vmatprep.subr.bf16.mxu0 %v7714_v11  ;;  %2642 = vmatprep.subr.bf16.mxu1 %v7715_v24  ;;  %v7724_v24 = vld [vmem:[#allocation10_spill] sm:$0xff]  ;;  %v7733_v11 = vld [vmem:[#allocation19_spill] sm:$0xff]  ;;  %v2656_v15 = vld [vmem:[#allocation2 + $0x48] sm:$0xf0] }
 0x48d   :  { %v2664_v6 = vrot.slane %v2656_v15, 4 }
 0x48f   :  { %2602 = vmatpush1.bf16.msra.mxu0 %v7716_v41  ;;  %2643 = vmatpush1.bf16.msra.mxu1 %v7717_v33  ;;  %v7725_v41 = vld [vmem:[#allocation11_spill] sm:$0xff]  ;;  %v7726_v33 = vld [vmem:[#allocation12_spill] sm:$0xff]  ;;  %v2672_v47 = vunpack.c.l.bf16 %v2664_v6 }
 0x490   :  { %2603 = vmatprep.subr.bf16.mxu0 %v7718_v63  ;;  %2644 = vmatprep.subr.bf16.mxu1 %v7719_v3  ;;  %v7727_v63 = vld [vmem:[#allocation13_spill] sm:$0xff]  ;;  %v7728_v3 = vld [vmem:[#allocation14_spill] sm:$0xff] }
 0x493   :  { %2604 = vmatpush1.bf16.msra.mxu0 %v7720_v29  ;;  %2645 = vmatpush1.bf16.msra.mxu1 %v7721_v22  ;;  %v7729_v29 = vld [vmem:[#allocation15_spill] sm:$0xff]  ;;  %v7730_v22 = vld [vmem:[#allocation16_spill] sm:$0xff] }
 0x494   :  { %2780 = vmatprep.subr.bf16.mxu0 %v7722_v25  ;;  %2821 = vmatprep.subr.bf16.mxu1 %v7723_v1  ;;  %v7731_v25 = vld [vmem:[#allocation17_spill] sm:$0xff]  ;;  %v7732_v1 = vld [vmem:[#allocation18_spill] sm:$0xff] }
 0x496   :  { %2606 = vmatmul.mubr.bf16.vlgmr.msra.gmra.mrb[60].mxu0 %v6171_v43  ;;  %2647 = vmatmul.mubr.bf16.vlgmr.msra.gmra.mrb[60].mxu1 %v6171_v43  ;;  %v7734_v43 = vld [vmem:[#allocation20_spill] sm:$0xff] }
 0x497   :  { %2781 = vmatpush1.bf16.msra.mxu0 %v7724_v24  ;;  %2822 = vmatpush1.bf16.msra.mxu1 %v7725_v41  ;;  %v7735_v24 = vld [vmem:[#allocation21_spill] sm:$0xff]  ;;  %v7736_v41 = vld [vmem:[#allocation22_spill] sm:$0xff] }
 0x498   :  { %2782 = vmatprep.subr.bf16.mxu0 %v7726_v33  ;;  %2823 = vmatprep.subr.bf16.mxu1 %v7727_v63  ;;  %v7737_v33 = vld [vmem:[#allocation23_spill] sm:$0xff]  ;;  %v7738_v63 = vld [vmem:[#allocation24_spill] sm:$0xff] }
 0x49b   :  { %2783 = vmatpush1.bf16.msra.mxu0 %v7728_v3  ;;  %2824 = vmatpush1.bf16.msra.mxu1 %v7729_v29  ;;  %v7739_v3 = vld [vmem:[#allocation25_spill] sm:$0xff]  ;;  %v7740_v29 = vld [vmem:[#allocation26_spill] sm:$0xff] }
 0x49c   :  { %2784 = vmatprep.subr.bf16.mxu0 %v7730_v22  ;;  %2825 = vmatprep.subr.bf16.mxu1 %v7731_v25  ;;  %v7741_v22 = vld [vmem:[#allocation27_spill] sm:$0xff]  ;;  %v7742_v25 = vld [vmem:[#allocation28_spill] sm:$0xff] }
 0x49f   :  { %2785 = vmatpush1.bf16.msra.mxu0 %v7732_v1  ;;  %2826 = vmatpush1.bf16.msra.mxu1 %v7733_v11  ;;  %v7743_v1 = vld [vmem:[#allocation29_spill] sm:$0xff]  ;;  %v7744_v11 = vld [vmem:[#allocation30_spill] sm:$0xff] }
 0x4a0   :  { %2786 = vmatprep.subr.bf16.mxu0 %v7734_v43  ;;  %2827 = vmatprep.subr.bf16.mxu1 %v7735_v24  ;;  %v7745_v43 = vld [vmem:[#allocation31_spill] sm:$0xff]  ;;  %v7746_v24 = vld [vmem:[#allocation32_spill] sm:$0xff] }
 0x4a3   :  { %2787 = vmatpush1.bf16.msra.mxu0 %v7736_v41  ;;  %2828 = vmatpush1.bf16.msra.mxu1 %v7737_v33  ;;  %v7747_v41 = vld [vmem:[#allocation33_spill] sm:$0xff]  ;;  %v7748_v33 = vld [vmem:[#allocation34_spill] sm:$0xff] }
 0x4a4   :  { %2788 = vmatprep.subr.bf16.mxu0 %v7738_v63  ;;  %2829 = vmatprep.subr.bf16.mxu1 %v7739_v3  ;;  %v7749_v63 = vld [vmem:[#allocation35_spill] sm:$0xff]  ;;  %v7750_v3 = vld [vmem:[#allocation36_spill] sm:$0xff] }
 0x4a7   :  { %2789 = vmatpush1.bf16.msra.mxu0 %v7740_v29  ;;  %2830 = vmatpush1.bf16.msra.mxu1 %v7741_v22  ;;  %v7751_v29 = vld [vmem:[#allocation37_spill] sm:$0xff]  ;;  %v7752_v22 = vld [vmem:[#allocation38_spill] sm:$0xff] }
 0x4a8   :  { %2790 = vmatprep.subr.bf16.mxu0 %v7742_v25  ;;  %2831 = vmatprep.subr.bf16.mxu1 %v7743_v1  ;;  %v7753_v25 = vld [vmem:[#allocation39_spill] sm:$0xff]  ;;  %v7754_v1 = vld [vmem:[#allocation40_spill] sm:$0xff] }
 0x4ab   :  { %2791 = vmatpush1.bf16.msra.mxu0 %v7744_v11  ;;  %2832 = vmatpush1.bf16.msra.mxu1 %v7745_v43  ;;  %v7755_v11 = vld [vmem:[#allocation41_spill] sm:$0xff]  ;;  %v7756_v43 = vld [vmem:[#allocation42_spill] sm:$0xff] }
 0x4ac   :  { %2792 = vmatprep.subr.bf16.mxu0 %v7746_v24  ;;  %2833 = vmatprep.subr.bf16.mxu1 %v7747_v41  ;;  %v7757_v24 = vld [vmem:[#allocation43_spill] sm:$0xff]  ;;  %v7758_v41 = vld [vmem:[#allocation44_spill] sm:$0xff] }
 0x4af   :  { %2793 = vmatpush1.bf16.msra.mxu0 %v7748_v33  ;;  %2834 = vmatpush1.bf16.msra.mxu1 %v7749_v63  ;;  %v7759_v33 = vld [vmem:[#allocation45_spill] sm:$0xff]  ;;  %v7760_v63 = vld [vmem:[#allocation46_spill] sm:$0xff] }
 0x4b0   :  { %2794 = vmatprep.subr.bf16.mxu0 %v7750_v3  ;;  %2835 = vmatprep.subr.bf16.mxu1 %v7751_v29  ;;  %v7761_v3 = vld [vmem:[#allocation47_spill] sm:$0xff]  ;;  %v7762_v29 = vld [vmem:[#allocation48_spill] sm:$0xff] }
 0x4b3   :  { %2795 = vmatpush1.bf16.msra.mxu0 %v7752_v22  ;;  %2836 = vmatpush1.bf16.msra.mxu1 %v7753_v25  ;;  %v7763_v22 = vld [vmem:[#allocation49_spill] sm:$0xff]  ;;  %v7764_v25 = vld [vmem:[#allocation50_spill] sm:$0xff] }
 0x4b4   :  { %2796 = vmatprep.subr.bf16.mxu0 %v7754_v1  ;;  %2837 = vmatprep.subr.bf16.mxu1 %v7755_v11  ;;  %v7765_v1 = vld [vmem:[#allocation51_spill] sm:$0xff]  ;;  %v7766_v11 = vld [vmem:[#allocation52_spill] sm:$0xff] }
 0x4b7   :  { %2797 = vmatpush1.bf16.msra.mxu0 %v7756_v43  ;;  %2838 = vmatpush1.bf16.msra.mxu1 %v7757_v24  ;;  %v7767_v43 = vld [vmem:[#allocation53_spill] sm:$0xff]  ;;  %v7768_v24 = vld [vmem:[#allocation54_spill] sm:$0xff] }
 0x4b8   :  { %2798 = vmatprep.subr.bf16.mxu0 %v7758_v41  ;;  %2839 = vmatprep.subr.bf16.mxu1 %v7759_v33  ;;  %v7769_v41 = vld [vmem:[#allocation55_spill] sm:$0xff]  ;;  %v7770_v33 = vld [vmem:[#allocation56_spill] sm:$0xff] }
 0x4bb   :  { %2799 = vmatpush1.bf16.msra.mxu0 %v7760_v63  ;;  %2840 = vmatpush1.bf16.msra.mxu1 %v7761_v3  ;;  %v7771_v63 = vld [vmem:[#allocation57_spill] sm:$0xff]  ;;  %v7772_v3 = vld [vmem:[#allocation58_spill] sm:$0xff] }
 0x4bc   :  { %2800 = vmatprep.subr.bf16.mxu0 %v7762_v29  ;;  %2841 = vmatprep.subr.bf16.mxu1 %v7763_v22  ;;  %v7773_v29 = vld [vmem:[#allocation59_spill] sm:$0xff]  ;;  %v7774_v22 = vld [vmem:[#allocation60_spill] sm:$0xff] }
 0x4bf   :  { %2801 = vmatpush1.bf16.msra.mxu0 %v7764_v25  ;;  %2842 = vmatpush1.bf16.msra.mxu1 %v7765_v1  ;;  %v7775_v25 = vld [vmem:[#allocation61_spill] sm:$0xff]  ;;  %v7776_v1 = vld [vmem:[#allocation62_spill] sm:$0xff] }
 0x4c0   :  { %2802 = vmatprep.subr.bf16.mxu0 %v7766_v11  ;;  %2843 = vmatprep.subr.bf16.mxu1 %v7767_v43  ;;  %v7777_v11 = vld [vmem:[#allocation63_spill] sm:$0xff]  ;;  %v7778_v43 = vld [vmem:[#allocation64_spill] sm:$0xff] }
 0x4c3   :  { %2803 = vmatpush1.bf16.msra.mxu0 %v7768_v24  ;;  %2844 = vmatpush1.bf16.msra.mxu1 %v7769_v41  ;;  %v7779_v24 = vld [vmem:[#allocation65_spill] sm:$0xff]  ;;  %v7780_v41 = vld [vmem:[#allocation66_spill] sm:$0xff] }
 0x4c4   :  { %2804 = vmatprep.subr.bf16.mxu0 %v7770_v33  ;;  %2845 = vmatprep.subr.bf16.mxu1 %v7771_v63  ;;  %v7781_v33 = vld [vmem:[#allocation67_spill] sm:$0xff]  ;;  %v7782_v63 = vld [vmem:[#allocation68_spill] sm:$0xff] }
 0x4c7   :  { %2805 = vmatpush1.bf16.msra.mxu0 %v7772_v3  ;;  %2846 = vmatpush1.bf16.msra.mxu1 %v7773_v29  ;;  %v7783_v3 = vld [vmem:[#allocation69_spill] sm:$0xff]  ;;  %v7784_v29 = vld [vmem:[#allocation70_spill] sm:$0xff] }
 0x4c8   :  { %2806 = vmatprep.subr.bf16.mxu0 %v7774_v22  ;;  %2847 = vmatprep.subr.bf16.mxu1 %v7775_v25  ;;  %v7785_v22 = vld [vmem:[#allocation71_spill] sm:$0xff]  ;;  %v7786_v25 = vld [vmem:[#allocation72_spill] sm:$0xff] }
 0x4cb   :  { %2807 = vmatpush1.bf16.msra.mxu0 %v7776_v1  ;;  %2848 = vmatpush1.bf16.msra.mxu1 %v7777_v11  ;;  %v7787_v1 = vld [vmem:[#allocation73_spill] sm:$0xff]  ;;  %v2655_v11 = vld [vmem:[#allocation2 + $0x40] sm:$0xf0] }
 0x4cc   :  { %2808 = vmatprep.subr.bf16.mxu0 %v7778_v43  ;;  %2849 = vmatprep.subr.bf16.mxu1 %v7779_v24  ;;  %v2657_v43 = vld [vmem:[#allocation2 + $0x50] sm:$0xf0]  ;;  %v2658_v24 = vld [vmem:[#allocation2 + $0x58] sm:$0xf0]  ;;  %v2663_v31 = vrot.slane %v2655_v11, 4 }
 0x4ce   :  { %v2671_v40 = vunpack.c.l.bf16 %v2663_v31 }
 0x4cf   :  { %2809 = vmatpush1.bf16.msra.mxu0 %v7780_v41  ;;  %2850 = vmatpush1.bf16.msra.mxu1 %v7781_v33  ;;  %v2665_v41 = vrot.slane %v2657_v43, 4  ;;  %v2666_v33 = vrot.slane %v2658_v24, 4 }
 0x4d0   :  { %2810 = vmatprep.subr.bf16.mxu0 %v7782_v63  ;;  %2851 = vmatprep.subr.bf16.mxu1 %v7783_v3 }
 0x4d1   :  { %v2673_v63 = vunpack.c.l.bf16 %v2665_v41  ;;  %v2674_v3 = vunpack.c.l.bf16 %v2666_v33 }
 0x4d3   :  { %2811 = vmatpush1.bf16.msra.mxu0 %v7784_v29  ;;  %2852 = vmatpush1.bf16.msra.mxu1 %v7785_v22  ;;  %v2675_v29 = vadd.f32 %v2671_v40, %v7788_v60  ;;  %v2677_v22 = vadd.f32 %v2673_v63, %v7789_v54  ;;  %v2678_v20 = vadd.f32 %v2674_v3, %v7790_v58 }
 0x4d4   :  { %2862 = vmatprep.subr.bf16.mxu0 %v7786_v25  ;;  %2903 = vmatprep.subr.bf16.mxu1 %v7787_v1  ;;  %v2676_v1 = vadd.f32 %v2672_v47, %v7586_v30 }
 0x529   :  { %v2525_v59 = vpop.f32.mrb[56].mxu0  ;;  %v2566_v25 = vpop.f32.mrb[56].mxu1 }
 0x52a   :  { %v2679_v34 = vadd.f32 %v2675_v29, %v2525_v59  ;;  %v2681_v53 = vadd.f32 %v2677_v22, %v2566_v25  ;;  %v2527_v11 = vpop.f32.mrb[57].mxu0  ;;  %v2568_v43 = vpop.f32.mrb[57].mxu1 }
 0x52b   :  { %v2680_v15 = vadd.f32 %v2676_v1, %v2527_v11  ;;  %v2682_v24 = vadd.f32 %v2678_v20, %v2568_v43  ;;  %v2529_v31 = vpop.f32.mrb[58].mxu0  ;;  %v2570_v41 = vpop.f32.mrb[58].mxu1  ;;  %v7791_v1 = vld [vmem:[#allocation74_spill] sm:$0xff] }
 0x52c   :  { %v4175_v6 = vmul.f32 -1.442695, %v2679_v34  ;;  %v2530_v33 = vpop.f32.mrb[59].mxu0  ;;  %v2571_v26 = vpop.f32.mrb[59].mxu1 }
 0x52d   :  { %v4176_v40 = vmul.f32 -1.442695, %v2680_v15  ;;  %v4177_v63 = vmul.f32 -1.442695, %v2682_v24  ;;  %v2683_v15 = vld [vmem:[#allocation2 + $0xa0] ss:$16 sps:$4 sm:$0xff]  }
 0x52e   :  { %4409 = vpow2.f32 %v4175_v6  ;;  %v2684_v24 = vld [vmem:[#allocation2 + $0xa8] ss:$16 sps:$4 sm:$0xff]   ;;  %v2687_v31 = vunpack.c.l.bf16 %v2683_v15  ;;  %v2689_v41 = vunpack.c.h.bf16 %v2683_v15 }
 0x52f   :  { %4411 = vpow2.f32 %v4176_v40  ;;  %v2688_v6 = vunpack.c.l.bf16 %v2684_v24  ;;  %v2690_v33 = vunpack.c.h.bf16 %v2684_v24  ;;  %v7793_v40 = vld [vmem:[#allocation111_spill] sm:$0xff] }
 0x530   :  { %4413 = vpow2.f32 %v4177_v63  ;;  %v2691_v63 = vadd.f32 %v2687_v31, %v7793_v40 }
 0x531   :  { %4415 = vtanh.f32 %v2681_v53 }
 0x538   :  { %v4410_v54 = vpop.eup %4409 }
 0x539   :  { %v4412_v60 = vpop.eup %4411  ;;  %v2703_v47 = vadd.f32 1.0, %v4410_v54 }
 0x53a   :  { %v2709_v59 = vadd.f32 1.0, %v4412_v60  ;;  %v4414_v3 = vpop.eup %4413 }
 0x53b   :  { %4417 = vrcp.f32 %v2703_v47  ;;  %v4416_v29 = vpop.eup %4415  ;;  %v2716_v34 = vadd.f32 1.0, %v4414_v3  ;;  %v7794_v47 = vld [vmem:[#allocation112_spill] sm:$0xff] }
 0x53c   :  { %4419 = vrcp.f32 %v2709_v59  ;;  %v2693_v59 = vadd.f32 %v2689_v41, %v7794_v47 }
 0x53d   :  { %4421 = vrcp.f32 %v2716_v34 }
 0x545   :  { %v4418_v20 = vpop.eup %4417 }
 0x546   :  { %v4420_v22 = vpop.eup %4419  ;;  %v2720_v25 = vmul.f32 %v4418_v20, %v4416_v29  ;;  %v2692_v20 = vadd.f32 %v2688_v6, %v7490_v39 }
 0x547   :  { %v2719_v26 = vmul.f32 %v4420_v22, %v7791_v1  ;;  %v4422_v54 = vpop.eup %4421  ;;  %v2694_v22 = vadd.f32 %v2690_v33, %v5611_v23 }
 0x549   :  { %v2721_v11 = vadd.f32 %v2720_v25, %v2719_v26 }
 0x54b   :  { %4423 = vtanh.f32 %v2721_v11  ;;  %v6314_v53 = vsel %vm2749_vm8, %v2721_v11, %v7791_v1 }
 0x54c   :  { %7792 = vst [vmem:[#allocation75_spill] sm:$0xff] %v6314_v53 }
 0x555   :  { %v4424_v60 = vpop.eup %4423 }
 0x556   :  { %v6316_v43 = vmul.f32 %v4424_v60, %v4422_v54 }
 0x569   :  { %v2607_v3 = vpop.f32.mrb[60].mxu0  ;;  %v2648_v29 = vpop.f32.mrb[60].mxu1 }
 0x56a   :  { %v2695_v25 = vadd.f32 %v2691_v63, %v2607_v3  ;;  %v2697_v34 = vadd.f32 %v2693_v59, %v2648_v29  ;;  %v2609_v1 = vpop.f32.mrb[61].mxu0  ;;  %v2650_v26 = vpop.f32.mrb[61].mxu1 }
 0x56b   :  { %v2696_v11 = vadd.f32 %v2692_v20, %v2609_v1  ;;  %v2698_v54 = vadd.f32 %v2694_v22, %v2650_v26  ;;  %v2611_v60 = vpop.f32.mrb[62].mxu0  ;;  %v2652_v15 = vpop.f32.mrb[62].mxu1  ;;  %v6335_v1 = vsel %vm2749_vm8, %v6316_v43, %v6155_v44  ;;  %v7795_v44 = vld [vmem:[#allocation107_spill] sm:$0xff] }
 0x56c   :  { %v4178_v53 = vmul.f32 -1.442695, %v2695_v25  ;;  %v2612_v24 = vpop.f32.mrb[63].mxu0  ;;  %v2653_v58 = vpop.f32.mrb[63].mxu1  ;;  %v7798_v60 = vld [vmem:[#allocation110_spill] sm:$0xff]  ;;  %v7799_v15 = vld [vmem:[#allocation113_spill] sm:$0xff] }
 0x56d   :  { %v4179_v31 = vmul.f32 -1.442695, %v2696_v11  ;;  %v4180_v41 = vmul.f32 -1.442695, %v2698_v54  ;;  %v6347_v11 = vpack.c.bf16 %v6335_v1, %v6335_v1  ;;  %v7797_v54 = vld [vmem:[#allocation109_spill] sm:$0xff]  ;;  %v7800_v24 = vld [vmem:[#allocation114_spill] sm:$0xff] }
 0x56e   :  { %4425 = vpow2.f32 %v4178_v53 }
 0x56f   :  { %4427 = vpow2.f32 %v4179_v31  ;;  %v7801_v31 = vld [vmem:[#allocation116_spill] sm:$0xff] }
 0x570   :  { %4429 = vpow2.f32 %v4180_v41  ;;  %v7802_v41 = vld [vmem:[#allocation117_spill] sm:$0xff] }
 0x571   :  { %4431 = vtanh.f32 %v2697_v34 }
 0x578   :  { %v4426_v47 = vpop.eup %4425 }
 0x579   :  { %v4428_v40 = vpop.eup %4427  ;;  %v2728_v6 = vadd.f32 1.0, %v4426_v47 }
 0x57a   :  { %v2734_v33 = vadd.f32 1.0, %v4428_v40  ;;  %v4430_v63 = vpop.eup %4429 }
 0x57b   :  { %4433 = vrcp.f32 %v2728_v6  ;;  %v4432_v59 = vpop.eup %4431  ;;  %v2741_v22 = vadd.f32 1.0, %v4430_v63  ;;  %v7803_v6 = vld [vmem:[#allocation118_spill] sm:$0xff]  ;;  %v7805_v63 = vld [vmem:[#allocation120_spill] sm:$0xff] }
 0x57c   :  { %4435 = vrcp.f32 %v2734_v33  ;;  %v7804_v33 = vld [vmem:[#allocation119_spill] sm:$0xff] }
 0x57d   :  { %4437 = vrcp.f32 %v2741_v22  ;;  %v7810_v22 = vld [vmem:[#allocation125_spill] sm:$0xff] }
 0x585   :  { %v4434_v3 = vpop.eup %4433 }
 0x586   :  { %v4436_v29 = vpop.eup %4435  ;;  %v2745_v20 = vmul.f32 %v4434_v3, %v4432_v59  ;;  %v7806_v59 = vld [vmem:[#allocation121_spill] sm:$0xff]  ;;  %v7807_v3 = vld [vmem:[#allocation122_spill] sm:$0xff] }
 0x587   :  { %v2744_v58 = vmul.f32 %v4436_v29, %v6150_v12  ;;  %v4438_v40 = vpop.eup %4437  ;;  %v7808_v29 = vld [vmem:[#allocation123_spill] sm:$0xff] }
 0x589   :  { %v2746_v25 = vadd.f32 %v2745_v20, %v2744_v58  ;;  %v7809_v20 = vld [vmem:[#allocation124_spill] sm:$0xff]  ;;  %v7811_v58 = vld [vmem:[#allocation126_spill] sm:$0xff] }
 0x58b   :  { %4439 = vtanh.f32 %v2746_v25  ;;  %v6327_v53 = vsel %vm2750_vm9, %v2746_v25, %v6150_v12  ;;  %v7812_v25 = vld [vmem:[#allocation127_spill] sm:$0xff] }
 0x595   :  { %v4440_v47 = vpop.eup %4439 }
 0x596   :  { %v6329_v34 = vmul.f32 %v4440_v47, %v4438_v40  ;;  %v7813_v40 = vld [vmem:[#allocation128_spill] sm:$0xff]  ;;  %v7814_v47 = vld [vmem:[#allocation129_spill] sm:$0xff] }
 0x598   :  { %v6341_v26 = vsel %vm2750_vm9, %v6329_v34, %v6160_v32  ;;  %v7796_v32 = vld [vmem:[#allocation108_spill] sm:$0xff] }
 0x599   :  { %v4300_v12 = vpack.c.bf16 %v6341_v26, %v6341_v26 }
 0x59b   :  { %2812 = vmatprep.mubr.bf16.mxu0 %v4300_v12  ;;  %2853 = vmatprep.mubr.bf16.mxu1 %v4300_v12 }
 0x59c   :  { %2813 = vmatmul.mubr.bf16.vlgmr.msra.gmra.mrb[64].mxu0 %v6347_v11  ;;  %2854 = vmatmul.mubr.bf16.vlgmr.msra.gmra.mrb[64].mxu1 %v6347_v11 }
 0x59d   :  { %2863 = vmatpush1.bf16.msra.mxu0 %v7493_v5  ;;  %2904 = vmatpush1.bf16.msra.mxu1 %v7494_v2 }
 0x59e   :  { %2894 = vmatprep.mubr.bf16.mxu0 %v4300_v12  ;;  %2935 = vmatprep.mubr.bf16.mxu1 %v4300_v12  ;;  %v7815_v12 = vld [vmem:[#allocation130_spill] sm:$0xff] }
 0x59f   :  { %2864 = vmatprep.subr.bf16.mxu0 %v7495_v14  ;;  %2905 = vmatprep.subr.bf16.mxu1 %v7496_v4 }
 0x5a1   :  { %2865 = vmatpush1.bf16.msra.mxu0 %v7497_v16  ;;  %2906 = vmatpush1.bf16.msra.mxu1 %v7498_v0 }
 0x5a2   :  { %2866 = vmatprep.subr.bf16.mxu0 %v7499_v8  ;;  %2907 = vmatprep.subr.bf16.mxu1 %v7500_v48 }
 0x5a5   :  { %2867 = vmatpush1.bf16.msra.mxu0 %v7592_v27  ;;  %2908 = vmatpush1.bf16.msra.mxu1 %v7593_v45 }
 0x5a6   :  { %2868 = vmatprep.subr.bf16.mxu0 %v7594_v62  ;;  %2909 = vmatprep.subr.bf16.mxu1 %v7595_v42 }
 0x5a9   :  { %2869 = vmatpush1.bf16.msra.mxu0 %v7596_v17  ;;  %2910 = vmatpush1.bf16.msra.mxu1 %v7597_v37 }
 0x5aa   :  { %2870 = vmatprep.subr.bf16.mxu0 %v7598_v49  ;;  %2911 = vmatprep.subr.bf16.mxu1 %v7599_v36 }
 0x5ad   :  { %2871 = vmatpush1.bf16.msra.mxu0 %v7600_v46  ;;  %2912 = vmatpush1.bf16.msra.mxu1 %v7601_v50 }
 0x5ae   :  { %2872 = vmatprep.subr.bf16.mxu0 %v7602_v28  ;;  %2913 = vmatprep.subr.bf16.mxu1 %v7693_v35 }
 0x5b1   :  { %2873 = vmatpush1.bf16.msra.mxu0 %v7694_v7  ;;  %2914 = vmatpush1.bf16.msra.mxu1 %v7695_v56 }
 0x5b2   :  { %2874 = vmatprep.subr.bf16.mxu0 %v7696_v38  ;;  %2915 = vmatprep.subr.bf16.mxu1 %v7697_v18 }
 0x5b5   :  { %2875 = vmatpush1.bf16.msra.mxu0 %v7698_v61  ;;  %2916 = vmatpush1.bf16.msra.mxu1 %v7699_v19 }
 0x5b6   :  { %2876 = vmatprep.subr.bf16.mxu0 %v7700_v57  ;;  %2917 = vmatprep.subr.bf16.mxu1 %v7701_v9 }
 0x5b9   :  { %2877 = vmatpush1.bf16.msra.mxu0 %v7702_v13  ;;  %2918 = vmatpush1.bf16.msra.mxu1 %v7703_v55 }
 0x5ba   :  { %2878 = vmatprep.subr.bf16.mxu0 %v7614_v21  ;;  %2919 = vmatprep.subr.bf16.mxu1 %v7615_v51 }
 0x5bd   :  { %2879 = vmatpush1.bf16.msra.mxu0 %v7616_v52  ;;  %2920 = vmatpush1.bf16.msra.mxu1 %v7795_v44 }
 0x5be   :  { %2880 = vmatprep.subr.bf16.mxu0 %v7796_v32  ;;  %2921 = vmatprep.subr.bf16.mxu1 %v7797_v54 }
 0x5c1   :  { %2881 = vmatpush1.bf16.msra.mxu0 %v7798_v60  ;;  %2922 = vmatpush1.bf16.msra.mxu1 %v7799_v15 }
 0x5c2   :  { %2882 = vmatprep.subr.bf16.mxu0 %v7800_v24  ;;  %2923 = vmatprep.subr.bf16.mxu1 %v7801_v31  ;;  %v7892_v24 = vld [vmem:[#allocation141_spill] sm:$0xff] }
 0x5c5   :  { %2883 = vmatpush1.bf16.msra.mxu0 %v7802_v41  ;;  %2924 = vmatpush1.bf16.msra.mxu1 %v7803_v6  ;;  %v7890_v6 = vld [vmem:[#allocation139_spill] sm:$0xff]  ;;  %v7891_v41 = vld [vmem:[#allocation142_spill] sm:$0xff] }
 0x5c6   :  { %2884 = vmatprep.subr.bf16.mxu0 %v7804_v33  ;;  %2925 = vmatprep.subr.bf16.mxu1 %v7805_v63  ;;  %v7816_v63 = vld [vmem:[#allocation131_spill] sm:$0xff] }
 0x5c9   :  { %2885 = vmatpush1.bf16.msra.mxu0 %v7806_v59  ;;  %2926 = vmatpush1.bf16.msra.mxu1 %v7807_v3  ;;  %v7817_v59 = vld [vmem:[#allocation132_spill] sm:$0xff]  ;;  %v7818_v3 = vld [vmem:[#allocation133_spill] sm:$0xff] }
 0x5ca   :  { %2886 = vmatprep.subr.bf16.mxu0 %v7808_v29  ;;  %2927 = vmatprep.subr.bf16.mxu1 %v7809_v20  ;;  %v7819_v29 = vld [vmem:[#allocation134_spill] sm:$0xff]  ;;  %v7820_v20 = vld [vmem:[#allocation135_spill] sm:$0xff] }
 0x5cd   :  { %2887 = vmatpush1.bf16.msra.mxu0 %v7810_v22  ;;  %2928 = vmatpush1.bf16.msra.mxu1 %v7811_v58  ;;  %v7821_v22 = vld [vmem:[#allocation136_spill] sm:$0xff]  ;;  %v7822_v58 = vld [vmem:[#allocation137_spill] sm:$0xff] }
 0x5ce   :  { %2888 = vmatprep.subr.bf16.mxu0 %v7812_v25  ;;  %2929 = vmatprep.subr.bf16.mxu1 %v7813_v40  ;;  %v7823_v25 = vld [vmem:[#allocation138_spill] sm:$0xff]  ;;  %v7824_v40 = vld [vmem:[#allocation8_spill] sm:$0xff] }
 0x5d1   :  { %2889 = vmatpush1.bf16.msra.mxu0 %v7814_v47  ;;  %2930 = vmatpush1.bf16.msra.mxu1 %v7815_v12  ;;  %v7825_v47 = vld [vmem:[#allocation9_spill] sm:$0xff] }
 0x5d2   :  { %2890 = vmatprep.subr.bf16.mxu0 %v7816_v63  ;;  %2931 = vmatprep.subr.bf16.mxu1 %v7817_v59  ;;  %v7826_v59 = vld [vmem:[#allocation10_spill] sm:$0xff]  ;;  %v7835_v63 = vld [vmem:[#allocation19_spill] sm:$0xff] }
 0x5d5   :  { %2891 = vmatpush1.bf16.msra.mxu0 %v7818_v3  ;;  %2932 = vmatpush1.bf16.msra.mxu1 %v7819_v29  ;;  %v7827_v3 = vld [vmem:[#allocation11_spill] sm:$0xff]  ;;  %v7828_v29 = vld [vmem:[#allocation12_spill] sm:$0xff] }
 0x5d6   :  { %2892 = vmatprep.subr.bf16.mxu0 %v7820_v20  ;;  %2933 = vmatprep.subr.bf16.mxu1 %v7821_v22  ;;  %v7829_v20 = vld [vmem:[#allocation13_spill] sm:$0xff]  ;;  %v7830_v22 = vld [vmem:[#allocation14_spill] sm:$0xff] }
 0x5d9   :  { %2893 = vmatpush1.bf16.msra.mxu0 %v7822_v58  ;;  %2934 = vmatpush1.bf16.msra.mxu1 %v7823_v25  ;;  %v7831_v58 = vld [vmem:[#allocation15_spill] sm:$0xff]  ;;  %v7832_v25 = vld [vmem:[#allocation16_spill] sm:$0xff] }
 0x5da   :  { %3069 = vmatprep.subr.bf16.mxu0 %v7824_v40  ;;  %3110 = vmatprep.subr.bf16.mxu1 %v7825_v47  ;;  %v7833_v40 = vld [vmem:[#allocation17_spill] sm:$0xff]  ;;  %v7834_v47 = vld [vmem:[#allocation18_spill] sm:$0xff] }
 0x5dc   :  { %2895 = vmatmul.mubr.bf16.vlgmr.msra.gmra.mrb[68].mxu0 %v6347_v11  ;;  %2936 = vmatmul.mubr.bf16.vlgmr.msra.gmra.mrb[68].mxu1 %v6347_v11  ;;  %v7836_v11 = vld [vmem:[#allocation20_spill] sm:$0xff] }
 0x5dd   :  { %3070 = vmatpush1.bf16.msra.mxu0 %v7826_v59  ;;  %3111 = vmatpush1.bf16.msra.mxu1 %v7827_v3  ;;  %v7837_v59 = vld [vmem:[#allocation21_spill] sm:$0xff]  ;;  %v7838_v3 = vld [vmem:[#allocation22_spill] sm:$0xff] }
 0x5de   :  { %3071 = vmatprep.subr.bf16.mxu0 %v7828_v29  ;;  %3112 = vmatprep.subr.bf16.mxu1 %v7829_v20  ;;  %v7839_v29 = vld [vmem:[#allocation23_spill] sm:$0xff]  ;;  %v7840_v20 = vld [vmem:[#allocation24_spill] sm:$0xff] }
 0x5e1   :  { %3072 = vmatpush1.bf16.msra.mxu0 %v7830_v22  ;;  %3113 = vmatpush1.bf16.msra.mxu1 %v7831_v58  ;;  %v7841_v22 = vld [vmem:[#allocation25_spill] sm:$0xff]  ;;  %v7842_v58 = vld [vmem:[#allocation26_spill] sm:$0xff] }
 0x5e2   :  { %3073 = vmatprep.subr.bf16.mxu0 %v7832_v25  ;;  %3114 = vmatprep.subr.bf16.mxu1 %v7833_v40  ;;  %v7843_v25 = vld [vmem:[#allocation27_spill] sm:$0xff]  ;;  %v7844_v40 = vld [vmem:[#allocation28_spill] sm:$0xff] }
 0x5e5   :  { %3074 = vmatpush1.bf16.msra.mxu0 %v7834_v47  ;;  %3115 = vmatpush1.bf16.msra.mxu1 %v7835_v63  ;;  %v7845_v47 = vld [vmem:[#allocation29_spill] sm:$0xff]  ;;  %v7846_v63 = vld [vmem:[#allocation30_spill] sm:$0xff] }
 0x5e6   :  { %3075 = vmatprep.subr.bf16.mxu0 %v7836_v11  ;;  %3116 = vmatprep.subr.bf16.mxu1 %v7837_v59  ;;  %v7847_v11 = vld [vmem:[#allocation31_spill] sm:$0xff]  ;;  %v7848_v59 = vld [vmem:[#allocation32_spill] sm:$0xff] }
 0x5e9   :  { %3076 = vmatpush1.bf16.msra.mxu0 %v7838_v3  ;;  %3117 = vmatpush1.bf16.msra.mxu1 %v7839_v29  ;;  %v7849_v3 = vld [vmem:[#allocation33_spill] sm:$0xff]  ;;  %v7850_v29 = vld [vmem:[#allocation34_spill] sm:$0xff] }
 0x5ea   :  { %3077 = vmatprep.subr.bf16.mxu0 %v7840_v20  ;;  %3118 = vmatprep.subr.bf16.mxu1 %v7841_v22  ;;  %v7851_v20 = vld [vmem:[#allocation35_spill] sm:$0xff]  ;;  %v7852_v22 = vld [vmem:[#allocation36_spill] sm:$0xff] }
 0x5ed   :  { %3078 = vmatpush1.bf16.msra.mxu0 %v7842_v58  ;;  %3119 = vmatpush1.bf16.msra.mxu1 %v7843_v25  ;;  %v7853_v58 = vld [vmem:[#allocation37_spill] sm:$0xff]  ;;  %v7854_v25 = vld [vmem:[#allocation38_spill] sm:$0xff] }
 0x5ee   :  { %3079 = vmatprep.subr.bf16.mxu0 %v7844_v40  ;;  %3120 = vmatprep.subr.bf16.mxu1 %v7845_v47  ;;  %v7855_v40 = vld [vmem:[#allocation39_spill] sm:$0xff]  ;;  %v7856_v47 = vld [vmem:[#allocation40_spill] sm:$0xff] }
 0x5f1   :  { %3080 = vmatpush1.bf16.msra.mxu0 %v7846_v63  ;;  %3121 = vmatpush1.bf16.msra.mxu1 %v7847_v11  ;;  %v7857_v63 = vld [vmem:[#allocation41_spill] sm:$0xff]  ;;  %v7858_v11 = vld [vmem:[#allocation42_spill] sm:$0xff] }
 0x5f2   :  { %3081 = vmatprep.subr.bf16.mxu0 %v7848_v59  ;;  %3122 = vmatprep.subr.bf16.mxu1 %v7849_v3  ;;  %v7859_v59 = vld [vmem:[#allocation43_spill] sm:$0xff]  ;;  %v7860_v3 = vld [vmem:[#allocation44_spill] sm:$0xff] }
 0x5f5   :  { %3082 = vmatpush1.bf16.msra.mxu0 %v7850_v29  ;;  %3123 = vmatpush1.bf16.msra.mxu1 %v7851_v20  ;;  %v7861_v29 = vld [vmem:[#allocation45_spill] sm:$0xff]  ;;  %v7862_v20 = vld [vmem:[#allocation46_spill] sm:$0xff] }
 0x5f6   :  { %3083 = vmatprep.subr.bf16.mxu0 %v7852_v22  ;;  %3124 = vmatprep.subr.bf16.mxu1 %v7853_v58  ;;  %v7863_v22 = vld [vmem:[#allocation47_spill] sm:$0xff]  ;;  %v7864_v58 = vld [vmem:[#allocation48_spill] sm:$0xff] }
 0x5f9   :  { %3084 = vmatpush1.bf16.msra.mxu0 %v7854_v25  ;;  %3125 = vmatpush1.bf16.msra.mxu1 %v7855_v40  ;;  %v7865_v25 = vld [vmem:[#allocation49_spill] sm:$0xff]  ;;  %v7866_v40 = vld [vmem:[#allocation50_spill] sm:$0xff] }
 0x5fa   :  { %3085 = vmatprep.subr.bf16.mxu0 %v7856_v47  ;;  %3126 = vmatprep.subr.bf16.mxu1 %v7857_v63  ;;  %v7867_v47 = vld [vmem:[#allocation51_spill] sm:$0xff]  ;;  %v7868_v63 = vld [vmem:[#allocation52_spill] sm:$0xff] }
 0x5fd   :  { %3086 = vmatpush1.bf16.msra.mxu0 %v7858_v11  ;;  %3127 = vmatpush1.bf16.msra.mxu1 %v7859_v59  ;;  %v7869_v11 = vld [vmem:[#allocation53_spill] sm:$0xff]  ;;  %v7870_v59 = vld [vmem:[#allocation54_spill] sm:$0xff] }
 0x5fe   :  { %3087 = vmatprep.subr.bf16.mxu0 %v7860_v3  ;;  %3128 = vmatprep.subr.bf16.mxu1 %v7861_v29  ;;  %v7871_v3 = vld [vmem:[#allocation55_spill] sm:$0xff]  ;;  %v7872_v29 = vld [vmem:[#allocation56_spill] sm:$0xff] }
 0x601   :  { %3088 = vmatpush1.bf16.msra.mxu0 %v7862_v20  ;;  %3129 = vmatpush1.bf16.msra.mxu1 %v7863_v22  ;;  %v7873_v20 = vld [vmem:[#allocation57_spill] sm:$0xff]  ;;  %v7874_v22 = vld [vmem:[#allocation58_spill] sm:$0xff] }
 0x602   :  { %3089 = vmatprep.subr.bf16.mxu0 %v7864_v58  ;;  %3130 = vmatprep.subr.bf16.mxu1 %v7865_v25  ;;  %v7875_v58 = vld [vmem:[#allocation59_spill] sm:$0xff]  ;;  %v7876_v25 = vld [vmem:[#allocation60_spill] sm:$0xff] }
 0x605   :  { %3090 = vmatpush1.bf16.msra.mxu0 %v7866_v40  ;;  %3131 = vmatpush1.bf16.msra.mxu1 %v7867_v47  ;;  %v7877_v40 = vld [vmem:[#allocation61_spill] sm:$0xff]  ;;  %v7878_v47 = vld [vmem:[#allocation62_spill] sm:$0xff] }
 0x606   :  { %3091 = vmatprep.subr.bf16.mxu0 %v7868_v63  ;;  %3132 = vmatprep.subr.bf16.mxu1 %v7869_v11  ;;  %v7879_v63 = vld [vmem:[#allocation63_spill] sm:$0xff]  ;;  %v7880_v11 = vld [vmem:[#allocation64_spill] sm:$0xff] }
 0x609   :  { %3092 = vmatpush1.bf16.msra.mxu0 %v7870_v59  ;;  %3133 = vmatpush1.bf16.msra.mxu1 %v7871_v3  ;;  %v7881_v59 = vld [vmem:[#allocation65_spill] sm:$0xff]  ;;  %v7882_v3 = vld [vmem:[#allocation66_spill] sm:$0xff] }
 0x60a   :  { %3093 = vmatprep.subr.bf16.mxu0 %v7872_v29  ;;  %3134 = vmatprep.subr.bf16.mxu1 %v7873_v20  ;;  %v7883_v29 = vld [vmem:[#allocation67_spill] sm:$0xff]  ;;  %v7884_v20 = vld [vmem:[#allocation68_spill] sm:$0xff] }
 0x60d   :  { %3094 = vmatpush1.bf16.msra.mxu0 %v7874_v22  ;;  %3135 = vmatpush1.bf16.msra.mxu1 %v7875_v58  ;;  %v7885_v22 = vld [vmem:[#allocation69_spill] sm:$0xff]  ;;  %v7886_v58 = vld [vmem:[#allocation70_spill] sm:$0xff] }
 0x60e   :  { %3095 = vmatprep.subr.bf16.mxu0 %v7876_v25  ;;  %3136 = vmatprep.subr.bf16.mxu1 %v7877_v40  ;;  %v7887_v25 = vld [vmem:[#allocation71_spill] sm:$0xff]  ;;  %v7888_v40 = vld [vmem:[#allocation72_spill] sm:$0xff] }
 0x611   :  { %3096 = vmatpush1.bf16.msra.mxu0 %v7878_v47  ;;  %3137 = vmatpush1.bf16.msra.mxu1 %v7879_v63  ;;  %v7889_v47 = vld [vmem:[#allocation73_spill] sm:$0xff]  ;;  %v2944_v63 = vld [vmem:[#allocation2 + $0x80] ss:$16 sps:$4 sm:$0xff]  }
 0x612   :  { %3097 = vmatprep.subr.bf16.mxu0 %v7880_v11  ;;  %3138 = vmatprep.subr.bf16.mxu1 %v7881_v59  ;;  %v2945_v11 = vld [vmem:[#allocation2 + $0x88] ss:$16 sps:$4 sm:$0xff]   ;;  %v2948_v12 = vunpack.c.l.bf16 %v2944_v63  ;;  %v2950_v59 = vunpack.c.h.bf16 %v2944_v63 }
 0x613   :  { %v2949_v33 = vunpack.c.l.bf16 %v2945_v11 }
 0x615   :  { %3098 = vmatpush1.bf16.msra.mxu0 %v7882_v3  ;;  %3139 = vmatpush1.bf16.msra.mxu1 %v7883_v29  ;;  %v2951_v3 = vunpack.c.h.bf16 %v2945_v11  ;;  %v2952_v29 = vadd.f32 %v2948_v12, %v7890_v6 }
 0x616   :  { %3099 = vmatprep.subr.bf16.mxu0 %v7884_v20  ;;  %3140 = vmatprep.subr.bf16.mxu1 %v7885_v22  ;;  %v2954_v20 = vadd.f32 %v2950_v59, %v7891_v41 }
 0x619   :  { %3100 = vmatpush1.bf16.msra.mxu0 %v7886_v58  ;;  %3141 = vmatpush1.bf16.msra.mxu1 %v7887_v25  ;;  %v2953_v58 = vadd.f32 %v2949_v33, %v7586_v30  ;;  %v2955_v25 = vadd.f32 %v2951_v3, %v7892_v24 }
 0x61a   :  { %3151 = vmatprep.subr.bf16.mxu0 %v7888_v40  ;;  %3192 = vmatprep.subr.bf16.mxu1 %v7889_v47 }
 0x66f   :  { %v2814_v31 = vpop.f32.mrb[64].mxu0  ;;  %v2855_v22 = vpop.f32.mrb[64].mxu1 }
 0x670   :  { %v2956_v15 = vadd.f32 %v2952_v29, %v2814_v31  ;;  %v2958_v40 = vadd.f32 %v2954_v20, %v2855_v22  ;;  %v2816_v60 = vpop.f32.mrb[65].mxu0  ;;  %v2857_v47 = vpop.f32.mrb[65].mxu1  ;;  %v7893_v22 = vld [vmem:[#allocation75_spill] sm:$0xff] }
 0x671   :  { %v2957_v54 = vadd.f32 %v2953_v58, %v2816_v60  ;;  %v2959_v32 = vadd.f32 %v2955_v25, %v2857_v47  ;;  %v2818_v44 = vpop.f32.mrb[66].mxu0  ;;  %v2859_v63 = vpop.f32.mrb[66].mxu1  ;;  %v2767_v58 = vsel %vm2750_vm9, %v6329_v34, 0.0  ;;  %v2960_v47 = vld [vmem:[#allocation2 + $0x60] sm:$0xf0] }
 0x672   :  { %v4185_v52 = vmul.f32 -1.442695, %v2956_v15  ;;  %v2819_v11 = vpop.f32.mrb[67].mxu0  ;;  %v2860_v51 = vpop.f32.mrb[67].mxu1  ;;  %v2962_v63 = vld [vmem:[#allocation2 + $0x70] sm:$0xf0] }
 0x673   :  { %v4186_v12 = vmul.f32 -1.442695, %v2957_v54  ;;  %v4187_v59 = vmul.f32 -1.442695, %v2959_v32  ;;  %v2961_v11 = vld [vmem:[#allocation2 + $0x68] sm:$0xf0] }
 0x674   :  { %4441 = vpow2.f32 %v4185_v52 }
 0x675   :  { %4443 = vpow2.f32 %v4186_v12  ;;  %v2963_v12 = vld [vmem:[#allocation2 + $0x78] sm:$0xf0] }
 0x676   :  { %4445 = vpow2.f32 %v4187_v59  ;;  %v2968_v59 = vrot.slane %v2960_v47, 4 }
 0x677   :  { %4447 = vtanh.f32 %v2958_v40 }
 0x67e   :  { %v4442_v41 = vpop.eup %4441 }
 0x67f   :  { %v4444_v6 = vpop.eup %4443  ;;  %v2992_v33 = vadd.f32 1.0, %v4442_v41 }
 0x680   :  { %v2998_v31 = vadd.f32 1.0, %v4444_v6  ;;  %v4446_v3 = vpop.eup %4445 }
 0x681   :  { %4449 = vrcp.f32 %v2992_v33  ;;  %v4448_v60 = vpop.eup %4447  ;;  %v3005_v15 = vadd.f32 1.0, %v4446_v3  ;;  %v2970_v33 = vrot.slane %v2962_v63, 4  ;;  %v2971_v3 = vrot.slane %v2963_v12, 4 }
 0x682   :  { %4451 = vrcp.f32 %v2998_v31  ;;  %v2969_v31 = vrot.slane %v2961_v11, 4 }
 0x683   :  { %4453 = vrcp.f32 %v3005_v15  ;;  %v2979_v34 = vunpack.c.l.bf16 %v2971_v3 }
 0x68b   :  { %v4450_v29 = vpop.eup %4449 }
 0x68c   :  { %v4452_v44 = vpop.eup %4451  ;;  %v3009_v20 = vmul.f32 %v4450_v29, %v4448_v60  ;;  %v2976_v60 = vunpack.c.l.bf16 %v2968_v59  ;;  %v2978_v29 = vunpack.c.l.bf16 %v2970_v33 }
 0x68d   :  { %v3008_v51 = vmul.f32 %v4452_v44, %v7893_v22  ;;  %v4454_v32 = vpop.eup %4453  ;;  %v2977_v44 = vunpack.c.l.bf16 %v2969_v31 }
 0x68f   :  { %v3010_v54 = vadd.f32 %v3009_v20, %v3008_v51  ;;  %v7895_v20 = vld [vmem:[#allocation111_spill] sm:$0xff] }
 0x690   :  { %v2980_v15 = vadd.f32 %v2976_v60, %v7895_v20 }
 0x691   :  { %4455 = vtanh.f32 %v3010_v54  ;;  %v6489_v52 = vsel %vm2750_vm9, %v3010_v54, %v7893_v22  ;;  %v7896_v22 = vld [vmem:[#allocation112_spill] sm:$0xff] }
 0x692   :  { %7894 = vst [vmem:[#allocation76_spill] sm:$0xff] %v6489_v52  ;;  %v2982_v51 = vadd.f32 %v2978_v29, %v7896_v22 }
 0x69b   :  { %v4456_v41 = vpop.eup %4455 }
 0x69c   :  { %v3012_v6 = vmul.f32 %v4456_v41, %v4454_v32  ;;  %v2981_v41 = vadd.f32 %v2977_v44, %v7490_v39 }
 0x69e   :  { %v3053_v25 = vsel %vm2750_vm9, %v3012_v6, 0.0 }
 0x69f   :  { %v3056_v40 = vadd.f32 %v3053_v25, %v2767_v58  ;;  %v2983_v58 = vadd.f32 %v2979_v34, %v5611_v23 }
 0x6a1   :  { %4192 = vst [vmem:[%s7016_s5 + $0x20] sm:$0xff] %v3056_v40 }
 0x6af   :  { %v2896_v54 = vpop.f32.mrb[68].mxu0  ;;  %v2937_v32 = vpop.f32.mrb[68].mxu1 }
 0x6b0   :  { %v2984_v25 = vadd.f32 %v2980_v15, %v2896_v54  ;;  %v2986_v40 = vadd.f32 %v2982_v51, %v2937_v32  ;;  %v2898_v47 = vpop.f32.mrb[69].mxu0  ;;  %v2939_v63 = vpop.f32.mrb[69].mxu1 }
 0x6b1   :  { %v2985_v11 = vadd.f32 %v2981_v41, %v2898_v47  ;;  %v2987_v12 = vadd.f32 %v2983_v58, %v2939_v63  ;;  %v2900_v59 = vpop.f32.mrb[70].mxu0  ;;  %v2941_v33 = vpop.f32.mrb[70].mxu1  ;;  %v6512_v63 = vsel %vm2750_vm9, %v3012_v6, %v6335_v1  ;;  %v7899_v6 = vld [vmem:[#allocation107_spill] sm:$0xff] }
 0x6b2   :  { %v4188_v31 = vmul.f32 -1.442695, %v2984_v25  ;;  %v2901_v3 = vpop.f32.mrb[71].mxu0  ;;  %v2942_v52 = vpop.f32.mrb[71].mxu1  ;;  %v6528_v1 = vpack.c.bf16 %v6512_v63, %v6512_v63 }
 0x6b3   :  { %v4189_v60 = vmul.f32 -1.442695, %v2985_v11  ;;  %v4190_v29 = vmul.f32 -1.442695, %v2987_v12  ;;  %v2766_v11 = vsel %vm2749_vm8, %v6316_v43, 0.0  ;;  %v7897_v43 = vld [vmem:[#allocation105_spill] sm:$0xff] }
 0x6b4   :  { %4457 = vpow2.f32 %v4188_v31  ;;  %v7900_v31 = vld [vmem:[#allocation108_spill] sm:$0xff]  ;;  %v7901_v3 = vld [vmem:[#allocation109_spill] sm:$0xff] }
 0x6b5   :  { %4459 = vpow2.f32 %v4189_v60  ;;  %v7902_v60 = vld [vmem:[#allocation110_spill] sm:$0xff] }
 0x6b6   :  { %4461 = vpow2.f32 %v4190_v29  ;;  %v7903_v29 = vld [vmem:[#allocation113_spill] sm:$0xff] }
 0x6b7   :  { %4463 = vtanh.f32 %v2986_v40 }
 0x6be   :  { %v4458_v22 = vpop.eup %4457 }
 0x6bf   :  { %v4460_v20 = vpop.eup %4459  ;;  %v3017_v44 = vadd.f32 1.0, %v4458_v22 }
 0x6c0   :  { %v3023_v34 = vadd.f32 1.0, %v4460_v20  ;;  %v4462_v15 = vpop.eup %4461 }
 0x6c1   :  { %4465 = vrcp.f32 %v3017_v44  ;;  %v4464_v51 = vpop.eup %4463  ;;  %v3030_v58 = vadd.f32 1.0, %v4462_v15  ;;  %v7904_v44 = vld [vmem:[#allocation114_spill] sm:$0xff]  ;;  %v7906_v15 = vld [vmem:[#allocation117_spill] sm:$0xff] }
 0x6c2   :  { %4467 = vrcp.f32 %v3023_v34  ;;  %v7905_v34 = vld [vmem:[#allocation116_spill] sm:$0xff] }
 0x6c3   :  { %4469 = vrcp.f32 %v3030_v58  ;;  %v7911_v58 = vld [vmem:[#allocation122_spill] sm:$0xff] }
 0x6cb   :  { %v4466_v54 = vpop.eup %4465 }
 0x6cc   :  { %v4468_v32 = vpop.eup %4467  ;;  %v3034_v41 = vmul.f32 %v4466_v54, %v4464_v51  ;;  %v7907_v51 = vld [vmem:[#allocation118_spill] sm:$0xff]  ;;  %v7908_v54 = vld [vmem:[#allocation119_spill] sm:$0xff] }
 0x6cd   :  { %v3033_v52 = vmul.f32 %v4468_v32, %v6327_v53  ;;  %v4470_v40 = vpop.eup %4469  ;;  %v7909_v32 = vld [vmem:[#allocation120_spill] sm:$0xff] }
 0x6cf   :  { %v3035_v25 = vadd.f32 %v3034_v41, %v3033_v52  ;;  %v7910_v41 = vld [vmem:[#allocation121_spill] sm:$0xff]  ;;  %v7912_v52 = vld [vmem:[#allocation123_spill] sm:$0xff] }
 0x6d1   :  { %4471 = vtanh.f32 %v3035_v25  ;;  %v6507_v22 = vsel %vm2749_vm8, %v3035_v25, %v6327_v53  ;;  %v7913_v25 = vld [vmem:[#allocation124_spill] sm:$0xff] }
 0x6db   :  { %v4472_v20 = vpop.eup %4471 }
 0x6dc   :  { %v3037_v47 = vmul.f32 %v4472_v20, %v4470_v40  ;;  %v7914_v40 = vld [vmem:[#allocation125_spill] sm:$0xff]  ;;  %v7915_v20 = vld [vmem:[#allocation126_spill] sm:$0xff] }
 0x6de   :  { %v6520_v12 = vsel %vm2749_vm8, %v3037_v47, %v6341_v26  ;;  %v3054_v53 = vsel %vm2749_vm8, %v3037_v47, 0.0  ;;  %v7898_v26 = vld [vmem:[#allocation106_spill] sm:$0xff]  ;;  %v7916_v47 = vld [vmem:[#allocation127_spill] sm:$0xff] }
 0x6df   :  { %v3059_v59 = vadd.f32 %v3054_v53, %v2766_v11  ;;  %v4302_v33 = vpack.c.bf16 %v6520_v12, %v6520_v12  ;;  %v7917_v11 = vld [vmem:[#allocation128_spill] sm:$0xff]  ;;  %v7918_v53 = vld [vmem:[#allocation129_spill] sm:$0xff] }
 0x6e1   :  { %4194 = vst [vmem:[%s7016_s5 + $0x18] sm:$0xff] %v3059_v59  ;;  %3101 = vmatprep.mubr.bf16.mxu0 %v4302_v33  ;;  %3142 = vmatprep.mubr.bf16.mxu1 %v4302_v33  ;;  %v7919_v59 = vld [vmem:[#allocation130_spill] sm:$0xff] }
 0x6e2   :  { %3102 = vmatmul.mubr.bf16.vlgmr.msra.gmra.mrb[72].mxu0 %v6528_v1  ;;  %3143 = vmatmul.mubr.bf16.vlgmr.msra.gmra.mrb[72].mxu1 %v6528_v1 }
 0x6e3   :  { %3152 = vmatpush1.bf16.msra.mxu0 %v7493_v5  ;;  %3193 = vmatpush1.bf16.msra.mxu1 %v7494_v2 }
 0x6e4   :  { %3183 = vmatprep.mubr.bf16.mxu0 %v4302_v33  ;;  %3224 = vmatprep.mubr.bf16.mxu1 %v4302_v33  ;;  %v7920_v33 = vld [vmem:[#allocation131_spill] sm:$0xff] }
 0x6e5   :  { %3153 = vmatprep.subr.bf16.mxu0 %v7495_v14  ;;  %3194 = vmatprep.subr.bf16.mxu1 %v7496_v4 }
 0x6e7   :  { %3154 = vmatpush1.bf16.msra.mxu0 %v7497_v16  ;;  %3195 = vmatpush1.bf16.msra.mxu1 %v7498_v0 }
 0x6e8   :  { %3155 = vmatprep.subr.bf16.mxu0 %v7499_v8  ;;  %3196 = vmatprep.subr.bf16.mxu1 %v7500_v48 }
 0x6eb   :  { %3156 = vmatpush1.bf16.msra.mxu0 %v7592_v27  ;;  %3197 = vmatpush1.bf16.msra.mxu1 %v7593_v45 }
 0x6ec   :  { %3157 = vmatprep.subr.bf16.mxu0 %v7594_v62  ;;  %3198 = vmatprep.subr.bf16.mxu1 %v7595_v42 }
 0x6ef   :  { %3158 = vmatpush1.bf16.msra.mxu0 %v7596_v17  ;;  %3199 = vmatpush1.bf16.msra.mxu1 %v7597_v37 }
 0x6f0   :  { %3159 = vmatprep.subr.bf16.mxu0 %v7598_v49  ;;  %3200 = vmatprep.subr.bf16.mxu1 %v7599_v36 }
 0x6f3   :  { %3160 = vmatpush1.bf16.msra.mxu0 %v7600_v46  ;;  %3201 = vmatpush1.bf16.msra.mxu1 %v7601_v50 }
 0x6f4   :  { %3161 = vmatprep.subr.bf16.mxu0 %v7602_v28  ;;  %3202 = vmatprep.subr.bf16.mxu1 %v7693_v35 }
 0x6f7   :  { %3162 = vmatpush1.bf16.msra.mxu0 %v7694_v7  ;;  %3203 = vmatpush1.bf16.msra.mxu1 %v7695_v56 }
 0x6f8   :  { %3163 = vmatprep.subr.bf16.mxu0 %v7696_v38  ;;  %3204 = vmatprep.subr.bf16.mxu1 %v7697_v18 }
 0x6fb   :  { %3164 = vmatpush1.bf16.msra.mxu0 %v7698_v61  ;;  %3205 = vmatpush1.bf16.msra.mxu1 %v7699_v19 }
 0x6fc   :  { %3165 = vmatprep.subr.bf16.mxu0 %v7700_v57  ;;  %3206 = vmatprep.subr.bf16.mxu1 %v7701_v9 }
 0x6ff   :  { %3166 = vmatpush1.bf16.msra.mxu0 %v7702_v13  ;;  %3207 = vmatpush1.bf16.msra.mxu1 %v7703_v55 }
 0x700   :  { %3167 = vmatprep.subr.bf16.mxu0 %v7614_v21  ;;  %3208 = vmatprep.subr.bf16.mxu1 %v7897_v43 }
 0x703   :  { %3168 = vmatpush1.bf16.msra.mxu0 %v7898_v26  ;;  %3209 = vmatpush1.bf16.msra.mxu1 %v7899_v6 }
 0x704   :  { %3169 = vmatprep.subr.bf16.mxu0 %v7900_v31  ;;  %3210 = vmatprep.subr.bf16.mxu1 %v7901_v3 }
 0x707   :  { %3170 = vmatpush1.bf16.msra.mxu0 %v7902_v60  ;;  %3211 = vmatpush1.bf16.msra.mxu1 %v7903_v29 }
 0x708   :  { %3171 = vmatprep.subr.bf16.mxu0 %v7904_v44  ;;  %3212 = vmatprep.subr.bf16.mxu1 %v7905_v34  ;;  %v7994_v34 = vld [vmem:[#allocation139_spill] sm:$0xff]  ;;  %v7995_v44 = vld [vmem:[#allocation142_spill] sm:$0xff] }
 0x70b   :  { %3172 = vmatpush1.bf16.msra.mxu0 %v7906_v15  ;;  %3213 = vmatpush1.bf16.msra.mxu1 %v7907_v51 }
 0x70c   :  { %3173 = vmatprep.subr.bf16.mxu0 %v7908_v54  ;;  %3214 = vmatprep.subr.bf16.mxu1 %v7909_v32 }
 0x70f   :  { %3174 = vmatpush1.bf16.msra.mxu0 %v7910_v41  ;;  %3215 = vmatpush1.bf16.msra.mxu1 %v7911_v58  ;;  %v7921_v41 = vld [vmem:[#allocation132_spill] sm:$0xff]  ;;  %v7922_v58 = vld [vmem:[#allocation133_spill] sm:$0xff] }
 0x710   :  { %3175 = vmatprep.subr.bf16.mxu0 %v7912_v52  ;;  %3216 = vmatprep.subr.bf16.mxu1 %v7913_v25  ;;  %v7923_v52 = vld [vmem:[#allocation134_spill] sm:$0xff]  ;;  %v7924_v25 = vld [vmem:[#allocation135_spill] sm:$0xff] }
 0x713   :  { %3176 = vmatpush1.bf16.msra.mxu0 %v7914_v40  ;;  %3217 = vmatpush1.bf16.msra.mxu1 %v7915_v20  ;;  %v7925_v40 = vld [vmem:[#allocation136_spill] sm:$0xff]  ;;  %v7926_v20 = vld [vmem:[#allocation137_spill] sm:$0xff] }
 0x714   :  { %3177 = vmatprep.subr.bf16.mxu0 %v7916_v47  ;;  %3218 = vmatprep.subr.bf16.mxu1 %v7917_v11  ;;  %v7927_v47 = vld [vmem:[#allocation138_spill] sm:$0xff]  ;;  %v7928_v11 = vld [vmem:[#allocation8_spill] sm:$0xff] }
 0x717   :  { %3178 = vmatpush1.bf16.msra.mxu0 %v7918_v53  ;;  %3219 = vmatpush1.bf16.msra.mxu1 %v7919_v59  ;;  %v7929_v53 = vld [vmem:[#allocation9_spill] sm:$0xff] }
 0x718   :  { %3179 = vmatprep.subr.bf16.mxu0 %v7920_v33  ;;  %3220 = vmatprep.subr.bf16.mxu1 %v7921_v41  ;;  %v7930_v41 = vld [vmem:[#allocation10_spill] sm:$0xff]  ;;  %v7939_v33 = vld [vmem:[#allocation19_spill] sm:$0xff]  ;;  %v3234_v59 = vld [vmem:[#allocation2 + $0x88] sm:$0xf0] }
 0x719   :  { %v3242_v54 = vrot.slane %v3234_v59, 4 }
 0x71b   :  { %3180 = vmatpush1.bf16.msra.mxu0 %v7922_v58  ;;  %3221 = vmatpush1.bf16.msra.mxu1 %v7923_v52  ;;  %v7931_v58 = vld [vmem:[#allocation11_spill] sm:$0xff]  ;;  %v7932_v52 = vld [vmem:[#allocation12_spill] sm:$0xff]  ;;  %v3250_v15 = vunpack.c.l.bf16 %v3242_v54 }
 0x71c   :  { %3181 = vmatprep.subr.bf16.mxu0 %v7924_v25  ;;  %3222 = vmatprep.subr.bf16.mxu1 %v7925_v40  ;;  %v7933_v25 = vld [vmem:[#allocation13_spill] sm:$0xff]  ;;  %v7934_v40 = vld [vmem:[#allocation14_spill] sm:$0xff] }
 0x71f   :  { %3182 = vmatpush1.bf16.msra.mxu0 %v7926_v20  ;;  %3223 = vmatpush1.bf16.msra.mxu1 %v7927_v47  ;;  %v7935_v20 = vld [vmem:[#allocation15_spill] sm:$0xff]  ;;  %v7936_v47 = vld [vmem:[#allocation16_spill] sm:$0xff] }
 0x720   :  { %3358 = vmatprep.subr.bf16.mxu0 %v7928_v11  ;;  %3399 = vmatprep.subr.bf16.mxu1 %v7929_v53  ;;  %v7937_v11 = vld [vmem:[#allocation17_spill] sm:$0xff]  ;;  %v7938_v53 = vld [vmem:[#allocation18_spill] sm:$0xff] }
 0x722   :  { %3184 = vmatmul.mubr.bf16.vlgmr.msra.gmra.mrb[76].mxu0 %v6528_v1  ;;  %3225 = vmatmul.mubr.bf16.vlgmr.msra.gmra.mrb[76].mxu1 %v6528_v1  ;;  %v7940_v1 = vld [vmem:[#allocation20_spill] sm:$0xff] }
 0x723   :  { %3359 = vmatpush1.bf16.msra.mxu0 %v7930_v41  ;;  %3400 = vmatpush1.bf16.msra.mxu1 %v7931_v58  ;;  %v7941_v41 = vld [vmem:[#allocation21_spill] sm:$0xff]  ;;  %v7942_v58 = vld [vmem:[#allocation22_spill] sm:$0xff] }
 0x724   :  { %3360 = vmatprep.subr.bf16.mxu0 %v7932_v52  ;;  %3401 = vmatprep.subr.bf16.mxu1 %v7933_v25  ;;  %v7943_v52 = vld [vmem:[#allocation23_spill] sm:$0xff]  ;;  %v7944_v25 = vld [vmem:[#allocation24_spill] sm:$0xff] }
 0x727   :  { %3361 = vmatpush1.bf16.msra.mxu0 %v7934_v40  ;;  %3402 = vmatpush1.bf16.msra.mxu1 %v7935_v20  ;;  %v7945_v40 = vld [vmem:[#allocation25_spill] sm:$0xff]  ;;  %v7946_v20 = vld [vmem:[#allocation26_spill] sm:$0xff] }
 0x728   :  { %3362 = vmatprep.subr.bf16.mxu0 %v7936_v47  ;;  %3403 = vmatprep.subr.bf16.mxu1 %v7937_v11  ;;  %v7947_v47 = vld [vmem:[#allocation27_spill] sm:$0xff]  ;;  %v7948_v11 = vld [vmem:[#allocation28_spill] sm:$0xff] }
 0x72b   :  { %3363 = vmatpush1.bf16.msra.mxu0 %v7938_v53  ;;  %3404 = vmatpush1.bf16.msra.mxu1 %v7939_v33  ;;  %v7949_v53 = vld [vmem:[#allocation29_spill] sm:$0xff]  ;;  %v7950_v33 = vld [vmem:[#allocation30_spill] sm:$0xff] }
 0x72c   :  { %3364 = vmatprep.subr.bf16.mxu0 %v7940_v1  ;;  %3405 = vmatprep.subr.bf16.mxu1 %v7941_v41  ;;  %v7951_v1 = vld [vmem:[#allocation31_spill] sm:$0xff]  ;;  %v7952_v41 = vld [vmem:[#allocation32_spill] sm:$0xff] }
 0x72f   :  { %3365 = vmatpush1.bf16.msra.mxu0 %v7942_v58  ;;  %3406 = vmatpush1.bf16.msra.mxu1 %v7943_v52  ;;  %v7953_v58 = vld [vmem:[#allocation33_spill] sm:$0xff]  ;;  %v7954_v52 = vld [vmem:[#allocation34_spill] sm:$0xff] }
 0x730   :  { %3366 = vmatprep.subr.bf16.mxu0 %v7944_v25  ;;  %3407 = vmatprep.subr.bf16.mxu1 %v7945_v40  ;;  %v7955_v25 = vld [vmem:[#allocation35_spill] sm:$0xff]  ;;  %v7956_v40 = vld [vmem:[#allocation36_spill] sm:$0xff] }
 0x733   :  { %3367 = vmatpush1.bf16.msra.mxu0 %v7946_v20  ;;  %3408 = vmatpush1.bf16.msra.mxu1 %v7947_v47  ;;  %v7957_v20 = vld [vmem:[#allocation37_spill] sm:$0xff]  ;;  %v7958_v47 = vld [vmem:[#allocation38_spill] sm:$0xff] }
 0x734   :  { %3368 = vmatprep.subr.bf16.mxu0 %v7948_v11  ;;  %3409 = vmatprep.subr.bf16.mxu1 %v7949_v53  ;;  %v7959_v11 = vld [vmem:[#allocation39_spill] sm:$0xff]  ;;  %v7960_v53 = vld [vmem:[#allocation40_spill] sm:$0xff] }
 0x737   :  { %3369 = vmatpush1.bf16.msra.mxu0 %v7950_v33  ;;  %3410 = vmatpush1.bf16.msra.mxu1 %v7951_v1  ;;  %v7961_v33 = vld [vmem:[#allocation41_spill] sm:$0xff]  ;;  %v7962_v1 = vld [vmem:[#allocation42_spill] sm:$0xff] }
 0x738   :  { %3370 = vmatprep.subr.bf16.mxu0 %v7952_v41  ;;  %3411 = vmatprep.subr.bf16.mxu1 %v7953_v58  ;;  %v7963_v41 = vld [vmem:[#allocation43_spill] sm:$0xff]  ;;  %v7964_v58 = vld [vmem:[#allocation44_spill] sm:$0xff] }
 0x73b   :  { %3371 = vmatpush1.bf16.msra.mxu0 %v7954_v52  ;;  %3412 = vmatpush1.bf16.msra.mxu1 %v7955_v25  ;;  %v7965_v52 = vld [vmem:[#allocation45_spill] sm:$0xff]  ;;  %v7966_v25 = vld [vmem:[#allocation46_spill] sm:$0xff] }
 0x73c   :  { %3372 = vmatprep.subr.bf16.mxu0 %v7956_v40  ;;  %3413 = vmatprep.subr.bf16.mxu1 %v7957_v20  ;;  %v7967_v40 = vld [vmem:[#allocation47_spill] sm:$0xff]  ;;  %v7968_v20 = vld [vmem:[#allocation48_spill] sm:$0xff] }
 0x73f   :  { %3373 = vmatpush1.bf16.msra.mxu0 %v7958_v47  ;;  %3414 = vmatpush1.bf16.msra.mxu1 %v7959_v11  ;;  %v7969_v47 = vld [vmem:[#allocation49_spill] sm:$0xff]  ;;  %v7970_v11 = vld [vmem:[#allocation50_spill] sm:$0xff] }
 0x740   :  { %3374 = vmatprep.subr.bf16.mxu0 %v7960_v53  ;;  %3415 = vmatprep.subr.bf16.mxu1 %v7961_v33  ;;  %v7971_v53 = vld [vmem:[#allocation51_spill] sm:$0xff]  ;;  %v7972_v33 = vld [vmem:[#allocation52_spill] sm:$0xff] }
 0x743   :  { %3375 = vmatpush1.bf16.msra.mxu0 %v7962_v1  ;;  %3416 = vmatpush1.bf16.msra.mxu1 %v7963_v41  ;;  %v7973_v1 = vld [vmem:[#allocation53_spill] sm:$0xff]  ;;  %v7974_v41 = vld [vmem:[#allocation54_spill] sm:$0xff] }
 0x744   :  { %3376 = vmatprep.subr.bf16.mxu0 %v7964_v58  ;;  %3417 = vmatprep.subr.bf16.mxu1 %v7965_v52  ;;  %v7975_v58 = vld [vmem:[#allocation55_spill] sm:$0xff]  ;;  %v7976_v52 = vld [vmem:[#allocation56_spill] sm:$0xff] }
 0x747   :  { %3377 = vmatpush1.bf16.msra.mxu0 %v7966_v25  ;;  %3418 = vmatpush1.bf16.msra.mxu1 %v7967_v40  ;;  %v7977_v25 = vld [vmem:[#allocation57_spill] sm:$0xff]  ;;  %v7978_v40 = vld [vmem:[#allocation58_spill] sm:$0xff] }
 0x748   :  { %3378 = vmatprep.subr.bf16.mxu0 %v7968_v20  ;;  %3419 = vmatprep.subr.bf16.mxu1 %v7969_v47  ;;  %v7979_v20 = vld [vmem:[#allocation59_spill] sm:$0xff]  ;;  %v7980_v47 = vld [vmem:[#allocation60_spill] sm:$0xff] }
 0x74b   :  { %3379 = vmatpush1.bf16.msra.mxu0 %v7970_v11  ;;  %3420 = vmatpush1.bf16.msra.mxu1 %v7971_v53  ;;  %v7981_v11 = vld [vmem:[#allocation61_spill] sm:$0xff]  ;;  %v7982_v53 = vld [vmem:[#allocation62_spill] sm:$0xff] }
 0x74c   :  { %3380 = vmatprep.subr.bf16.mxu0 %v7972_v33  ;;  %3421 = vmatprep.subr.bf16.mxu1 %v7973_v1  ;;  %v7983_v33 = vld [vmem:[#allocation63_spill] sm:$0xff]  ;;  %v7984_v1 = vld [vmem:[#allocation64_spill] sm:$0xff] }
 0x74f   :  { %3381 = vmatpush1.bf16.msra.mxu0 %v7974_v41  ;;  %3422 = vmatpush1.bf16.msra.mxu1 %v7975_v58  ;;  %v7985_v41 = vld [vmem:[#allocation65_spill] sm:$0xff]  ;;  %v7986_v58 = vld [vmem:[#allocation66_spill] sm:$0xff] }
 0x750   :  { %3382 = vmatprep.subr.bf16.mxu0 %v7976_v52  ;;  %3423 = vmatprep.subr.bf16.mxu1 %v7977_v25  ;;  %v7987_v52 = vld [vmem:[#allocation67_spill] sm:$0xff]  ;;  %v7988_v25 = vld [vmem:[#allocation68_spill] sm:$0xff] }
 0x753   :  { %3383 = vmatpush1.bf16.msra.mxu0 %v7978_v40  ;;  %3424 = vmatpush1.bf16.msra.mxu1 %v7979_v20  ;;  %v7989_v40 = vld [vmem:[#allocation69_spill] sm:$0xff]  ;;  %v7990_v20 = vld [vmem:[#allocation70_spill] sm:$0xff] }
 0x754   :  { %3384 = vmatprep.subr.bf16.mxu0 %v7980_v47  ;;  %3425 = vmatprep.subr.bf16.mxu1 %v7981_v11  ;;  %v7991_v47 = vld [vmem:[#allocation71_spill] sm:$0xff]  ;;  %v7992_v11 = vld [vmem:[#allocation72_spill] sm:$0xff] }
 0x757   :  { %3385 = vmatpush1.bf16.msra.mxu0 %v7982_v53  ;;  %3426 = vmatpush1.bf16.msra.mxu1 %v7983_v33  ;;  %v7993_v53 = vld [vmem:[#allocation73_spill] sm:$0xff]  ;;  %v3233_v33 = vld [vmem:[#allocation2 + $0x80] sm:$0xf0] }
 0x758   :  { %3386 = vmatprep.subr.bf16.mxu0 %v7984_v1  ;;  %3427 = vmatprep.subr.bf16.mxu1 %v7985_v41  ;;  %v3235_v1 = vld [vmem:[#allocation2 + $0x90] sm:$0xf0]  ;;  %v3236_v41 = vld [vmem:[#allocation2 + $0x98] sm:$0xf0]  ;;  %v3241_v32 = vrot.slane %v3233_v33, 4 }
 0x75a   :  { %v3249_v51 = vunpack.c.l.bf16 %v3241_v32 }
 0x75b   :  { %3387 = vmatpush1.bf16.msra.mxu0 %v7986_v58  ;;  %3428 = vmatpush1.bf16.msra.mxu1 %v7987_v52  ;;  %v3243_v58 = vrot.slane %v3235_v1, 4  ;;  %v3244_v52 = vrot.slane %v3236_v41, 4 }
 0x75c   :  { %3388 = vmatprep.subr.bf16.mxu0 %v7988_v25  ;;  %3429 = vmatprep.subr.bf16.mxu1 %v7989_v40 }
 0x75d   :  { %v3251_v25 = vunpack.c.l.bf16 %v3243_v58  ;;  %v3252_v40 = vunpack.c.l.bf16 %v3244_v52 }
 0x75f   :  { %3389 = vmatpush1.bf16.msra.mxu0 %v7990_v20  ;;  %3430 = vmatpush1.bf16.msra.mxu1 %v7991_v47  ;;  %v3253_v20 = vadd.f32 %v3249_v51, %v7994_v34  ;;  %v3255_v47 = vadd.f32 %v3251_v25, %v7995_v44  ;;  %v3256_v60 = vadd.f32 %v3252_v40, %v7892_v24 }
 0x760   :  { %3440 = vmatprep.subr.bf16.mxu0 %v7992_v11  ;;  %3481 = vmatprep.subr.bf16.mxu1 %v7993_v53  ;;  %v3254_v53 = vadd.f32 %v3250_v15, %v7586_v30 }
 0x7b5   :  { %v3103_v29 = vpop.f32.mrb[72].mxu0  ;;  %v3144_v11 = vpop.f32.mrb[72].mxu1 }
 0x7b6   :  { %v3257_v3 = vadd.f32 %v3253_v20, %v3103_v29  ;;  %v3259_v31 = vadd.f32 %v3255_v47, %v3144_v11  ;;  %v3105_v33 = vpop.f32.mrb[73].mxu0  ;;  %v3146_v1 = vpop.f32.mrb[73].mxu1 }
 0x7b7   :  { %v3258_v59 = vadd.f32 %v3254_v53, %v3105_v33  ;;  %v3260_v41 = vadd.f32 %v3256_v60, %v3146_v1  ;;  %v3107_v32 = vpop.f32.mrb[74].mxu0  ;;  %v3148_v58 = vpop.f32.mrb[74].mxu1  ;;  %v7996_v53 = vld [vmem:[#allocation76_spill] sm:$0xff] }
 0x7b8   :  { %v4197_v54 = vmul.f32 -1.442695, %v3257_v3  ;;  %v3108_v52 = vpop.f32.mrb[75].mxu0  ;;  %v3149_v6 = vpop.f32.mrb[75].mxu1  ;;  %v3261_v58 = vld [vmem:[#allocation2 + $0x60] ss:$16 sps:$4 sm:$0xff]  }
 0x7b9   :  { %v4198_v51 = vmul.f32 -1.442695, %v3258_v59  ;;  %v4199_v25 = vmul.f32 -1.442695, %v3260_v41  ;;  %v4203_v41 = vld [vmem:[%s7016_s5 + $0x28] sm:$0xff]  ;;  %v3265_v52 = vunpack.c.l.bf16 %v3261_v58 }
 0x7ba   :  { %4473 = vpow2.f32 %v4197_v54  ;;  %v3262_v54 = vld [vmem:[#allocation2 + $0x68] ss:$16 sps:$4 sm:$0xff]  }
 0x7bb   :  { %4475 = vpow2.f32 %v4198_v51  ;;  %v3267_v51 = vunpack.c.h.bf16 %v3261_v58 }
 0x7bc   :  { %4477 = vpow2.f32 %v4199_v25  ;;  %v3266_v25 = vunpack.c.l.bf16 %v3262_v54 }
 0x7bd   :  { %4479 = vtanh.f32 %v3259_v31 }
 0x7c4   :  { %v4474_v44 = vpop.eup %4473 }
 0x7c5   :  { %v4476_v34 = vpop.eup %4475  ;;  %v3281_v15 = vadd.f32 1.0, %v4474_v44 }
 0x7c6   :  { %v3287_v29 = vadd.f32 1.0, %v4476_v34  ;;  %v4478_v40 = vpop.eup %4477 }
 0x7c7   :  { %4481 = vrcp.f32 %v3281_v15  ;;  %v4480_v20 = vpop.eup %4479  ;;  %v3294_v3 = vadd.f32 1.0, %v4478_v40  ;;  %v3268_v15 = vunpack.c.h.bf16 %v3262_v54 }
 0x7c8   :  { %4483 = vrcp.f32 %v3287_v29  ;;  %v7998_v29 = vld [vmem:[#allocation111_spill] sm:$0xff] }
 0x7c9   :  { %4485 = vrcp.f32 %v3294_v3  ;;  %v3269_v40 = vadd.f32 %v3265_v52, %v7998_v29  ;;  %v3270_v3 = vadd.f32 %v3266_v25, %v7490_v39 }
 0x7d1   :  { %v4482_v60 = vpop.eup %4481 }
 0x7d2   :  { %v4484_v47 = vpop.eup %4483  ;;  %v3298_v11 = vmul.f32 %v4482_v60, %v4480_v20  ;;  %v7999_v20 = vld [vmem:[#allocation112_spill] sm:$0xff] }
 0x7d3   :  { %v3297_v6 = vmul.f32 %v4484_v47, %v7996_v53  ;;  %v4486_v31 = vpop.eup %4485  ;;  %v3271_v60 = vadd.f32 %v3267_v51, %v7999_v20 }
 0x7d5   :  { %v3299_v33 = vadd.f32 %v3298_v11, %v3297_v6 }
 0x7d7   :  { %4487 = vtanh.f32 %v3299_v33  ;;  %v6673_v44 = vsel %vm2461_vm7, %v3299_v33, %v7996_v53  ;;  %v3272_v53 = vadd.f32 %v3268_v15, %v5611_v23 }
 0x7d8   :  { %7997 = vst [vmem:[#allocation77_spill] sm:$0xff] %v6673_v44 }
 0x7e1   :  { %v4488_v34 = vpop.eup %4487 }
 0x7e2   :  { %v3301_v1 = vmul.f32 %v4488_v34, %v4486_v31 }
 0x7e4   :  { %v3342_v59 = vsel %vm2461_vm7, %v3301_v1, 0.0 }
 0x7e5   :  { %v3345_v32 = vadd.f32 %v4203_v41, %v3342_v59 }
 0x7e7   :  { %4204 = vst [vmem:[%s7016_s5 + $0x28] sm:$0xff] %v3345_v32 }
 0x7f5   :  { %v3185_v47 = vpop.f32.mrb[76].mxu0  ;;  %v3226_v11 = vpop.f32.mrb[76].mxu1 }
 0x7f6   :  { %v3273_v6 = vadd.f32 %v3269_v40, %v3185_v47  ;;  %v3275_v33 = vadd.f32 %v3271_v60, %v3226_v11  ;;  %v3187_v31 = vpop.f32.mrb[77].mxu0  ;;  %v3228_v34 = vpop.f32.mrb[77].mxu1 }
 0x7f7   :  { %v3274_v59 = vadd.f32 %v3270_v3, %v3187_v31  ;;  %v3276_v41 = vadd.f32 %v3272_v53, %v3228_v34  ;;  %v3189_v32 = vpop.f32.mrb[78].mxu0  ;;  %v3230_v58 = vpop.f32.mrb[78].mxu1  ;;  %v6696_v31 = vsel %vm2461_vm7, %v3301_v1, %v6512_v63  ;;  %v8001_v1 = vld [vmem:[#allocation108_spill] sm:$0xff] }
 0x7f8   :  { %v4200_v44 = vmul.f32 -1.442695, %v3273_v6  ;;  %v3190_v54 = vpop.f32.mrb[79].mxu0  ;;  %v3231_v24 = vpop.f32.mrb[79].mxu1  ;;  %v6712_v63 = vpack.c.bf16 %v6696_v31, %v6696_v31  ;;  %v8002_v58 = vld [vmem:[#allocation109_spill] sm:$0xff] }
 0x7f9   :  { %v4201_v52 = vmul.f32 -1.442695, %v3274_v59  ;;  %v4202_v51 = vmul.f32 -1.442695, %v3276_v41  ;;  %v8003_v54 = vld [vmem:[#allocation110_spill] sm:$0xff] }
 0x7fa   :  { %4489 = vpow2.f32 %v4200_v44 }
 0x7fb   :  { %4491 = vpow2.f32 %v4201_v52  ;;  %v8004_v52 = vld [vmem:[#allocation113_spill] sm:$0xff] }
 0x7fc   :  { %4493 = vpow2.f32 %v4202_v51  ;;  %v8005_v51 = vld [vmem:[#allocation114_spill] sm:$0xff] }
 0x7fd   :  { %4495 = vtanh.f32 %v3275_v33 }
 0x804   :  { %v4490_v20 = vpop.eup %4489 }
 0x805   :  { %v4492_v29 = vpop.eup %4491  ;;  %v3306_v25 = vadd.f32 1.0, %v4490_v20 }
 0x806   :  { %v3312_v15 = vadd.f32 1.0, %v4492_v29  ;;  %v4494_v40 = vpop.eup %4493 }
 0x807   :  { %4497 = vrcp.f32 %v3306_v25  ;;  %v4496_v60 = vpop.eup %4495  ;;  %v3319_v53 = vadd.f32 1.0, %v4494_v40  ;;  %v8006_v25 = vld [vmem:[#allocation116_spill] sm:$0xff]  ;;  %v8008_v40 = vld [vmem:[#allocation118_spill] sm:$0xff] }
 0x808   :  { %4499 = vrcp.f32 %v3312_v15  ;;  %v8007_v15 = vld [vmem:[#allocation117_spill] sm:$0xff] }
 0x809   :  { %4501 = vrcp.f32 %v3319_v53  ;;  %v8013_v53 = vld [vmem:[#allocation123_spill] sm:$0xff] }
 0x811   :  { %v4498_v47 = vpop.eup %4497 }
 0x812   :  { %v4500_v11 = vpop.eup %4499  ;;  %v3323_v3 = vmul.f32 %v4498_v47, %v4496_v60  ;;  %v8009_v60 = vld [vmem:[#allocation119_spill] sm:$0xff]  ;;  %v8010_v47 = vld [vmem:[#allocation120_spill] sm:$0xff] }
 0x813   :  { %v3322_v24 = vmul.f32 %v4500_v11, %v6507_v22  ;;  %v4502_v20 = vpop.eup %4501  ;;  %v8011_v11 = vld [vmem:[#allocation121_spill] sm:$0xff] }
 0x815   :  { %v3324_v6 = vadd.f32 %v3323_v3, %v3322_v24  ;;  %v8012_v3 = vld [vmem:[#allocation122_spill] sm:$0xff]  ;;  %v8014_v24 = vld [vmem:[#allocation124_spill] sm:$0xff] }
 0x817   :  { %4503 = vtanh.f32 %v3324_v6  ;;  %v6691_v44 = vsel %vm2460_vm6, %v3324_v6, %v6507_v22  ;;  %v4205_v22 = vld [vmem:[%s7016_s5 + $0x10] sm:$0xff]  ;;  %v8015_v6 = vld [vmem:[#allocation125_spill] sm:$0xff] }
 0x821   :  { %v4504_v29 = vpop.eup %4503 }
 0x822   :  { %v3326_v33 = vmul.f32 %v4504_v29, %v4502_v20  ;;  %v8016_v20 = vld [vmem:[#allocation126_spill] sm:$0xff]  ;;  %v8017_v29 = vld [vmem:[#allocation127_spill] sm:$0xff] }
 0x824   :  { %v6701_v34 = vsel %vm2460_vm6, %v3326_v33, %v6520_v12  ;;  %v3343_v59 = vsel %vm2460_vm6, %v3326_v33, 0.0  ;;  %v8000_v12 = vld [vmem:[#allocation107_spill] sm:$0xff]  ;;  %v8018_v33 = vld [vmem:[#allocation128_spill] sm:$0xff] }
 0x825   :  { %v3348_v41 = vadd.f32 %v4205_v22, %v3343_v59  ;;  %v4304_v32 = vpack.c.bf16 %v6701_v34, %v6701_v34  ;;  %v8019_v59 = vld [vmem:[#allocation129_spill] sm:$0xff]  ;;  %v8020_v22 = vld [vmem:[#allocation130_spill] sm:$0xff] }
 0x827   :  { %4206 = vst [vmem:[%s7016_s5 + $0x10] sm:$0xff] %v3348_v41  ;;  %3390 = vmatprep.mubr.bf16.mxu0 %v4304_v32  ;;  %3431 = vmatprep.mubr.bf16.mxu1 %v4304_v32  ;;  %v8021_v41 = vld [vmem:[#allocation131_spill] sm:$0xff] }
 0x828   :  { %3391 = vmatmul.mubr.bf16.vlgmr.msra.gmra.mrb[80].mxu0 %v6712_v63  ;;  %3432 = vmatmul.mubr.bf16.vlgmr.msra.gmra.mrb[80].mxu1 %v6712_v63 }
 0x829   :  { %3441 = vmatpush1.bf16.msra.mxu0 %v7493_v5  ;;  %3482 = vmatpush1.bf16.msra.mxu1 %v7494_v2 }
 0x82a   :  { %3472 = vmatprep.mubr.bf16.mxu0 %v4304_v32  ;;  %3513 = vmatprep.mubr.bf16.mxu1 %v4304_v32  ;;  %v8022_v32 = vld [vmem:[#allocation132_spill] sm:$0xff] }
 0x82b   :  { %3442 = vmatprep.subr.bf16.mxu0 %v7495_v14  ;;  %3483 = vmatprep.subr.bf16.mxu1 %v7496_v4 }
 0x82d   :  { %3443 = vmatpush1.bf16.msra.mxu0 %v7497_v16  ;;  %3484 = vmatpush1.bf16.msra.mxu1 %v7498_v0 }
 0x82e   :  { %3444 = vmatprep.subr.bf16.mxu0 %v7499_v8  ;;  %3485 = vmatprep.subr.bf16.mxu1 %v7500_v48 }
 0x831   :  { %3445 = vmatpush1.bf16.msra.mxu0 %v7592_v27  ;;  %3486 = vmatpush1.bf16.msra.mxu1 %v7593_v45 }
 0x832   :  { %3446 = vmatprep.subr.bf16.mxu0 %v7594_v62  ;;  %3487 = vmatprep.subr.bf16.mxu1 %v7595_v42 }
 0x835   :  { %3447 = vmatpush1.bf16.msra.mxu0 %v7596_v17  ;;  %3488 = vmatpush1.bf16.msra.mxu1 %v7597_v37 }
 0x836   :  { %3448 = vmatprep.subr.bf16.mxu0 %v7598_v49  ;;  %3489 = vmatprep.subr.bf16.mxu1 %v7599_v36 }
 0x839   :  { %3449 = vmatpush1.bf16.msra.mxu0 %v7600_v46  ;;  %3490 = vmatpush1.bf16.msra.mxu1 %v7601_v50 }
 0x83a   :  { %3450 = vmatprep.subr.bf16.mxu0 %v7602_v28  ;;  %3491 = vmatprep.subr.bf16.mxu1 %v7693_v35 }
 0x83d   :  { %3451 = vmatpush1.bf16.msra.mxu0 %v7694_v7  ;;  %3492 = vmatpush1.bf16.msra.mxu1 %v7695_v56 }
 0x83e   :  { %3452 = vmatprep.subr.bf16.mxu0 %v7696_v38  ;;  %3493 = vmatprep.subr.bf16.mxu1 %v7697_v18 }
 0x841   :  { %3453 = vmatpush1.bf16.msra.mxu0 %v7698_v61  ;;  %3494 = vmatpush1.bf16.msra.mxu1 %v7699_v19 }
 0x842   :  { %3454 = vmatprep.subr.bf16.mxu0 %v7700_v57  ;;  %3495 = vmatprep.subr.bf16.mxu1 %v7701_v9 }
 0x845   :  { %3455 = vmatpush1.bf16.msra.mxu0 %v7702_v13  ;;  %3496 = vmatpush1.bf16.msra.mxu1 %v7703_v55 }
 0x846   :  { %3456 = vmatprep.subr.bf16.mxu0 %v7614_v21  ;;  %3497 = vmatprep.subr.bf16.mxu1 %v7897_v43 }
 0x849   :  { %3457 = vmatpush1.bf16.msra.mxu0 %v7898_v26  ;;  %3498 = vmatpush1.bf16.msra.mxu1 %v8000_v12 }
 0x84a   :  { %3458 = vmatprep.subr.bf16.mxu0 %v8001_v1  ;;  %3499 = vmatprep.subr.bf16.mxu1 %v8002_v58 }
 0x84d   :  { %3459 = vmatpush1.bf16.msra.mxu0 %v8003_v54  ;;  %3500 = vmatpush1.bf16.msra.mxu1 %v8004_v52 }
 0x84e   :  { %3460 = vmatprep.subr.bf16.mxu0 %v8005_v51  ;;  %3501 = vmatprep.subr.bf16.mxu1 %v8006_v25 }
 0x851   :  { %3461 = vmatpush1.bf16.msra.mxu0 %v8007_v15  ;;  %3502 = vmatpush1.bf16.msra.mxu1 %v8008_v40  ;;  %v8097_v15 = vld [vmem:[#allocation141_spill] sm:$0xff] }
 0x852   :  { %3462 = vmatprep.subr.bf16.mxu0 %v8009_v60  ;;  %3503 = vmatprep.subr.bf16.mxu1 %v8010_v47  ;;  %v8095_v47 = vld [vmem:[#allocation139_spill] sm:$0xff]  ;;  %v8096_v60 = vld [vmem:[#allocation142_spill] sm:$0xff] }
 0x855   :  { %3463 = vmatpush1.bf16.msra.mxu0 %v8011_v11  ;;  %3504 = vmatpush1.bf16.msra.mxu1 %v8012_v3  ;;  %v8023_v3 = vld [vmem:[#allocation133_spill] sm:$0xff] }
 0x856   :  { %3464 = vmatprep.subr.bf16.mxu0 %v8013_v53  ;;  %3505 = vmatprep.subr.bf16.mxu1 %v8014_v24  ;;  %v8024_v53 = vld [vmem:[#allocation134_spill] sm:$0xff]  ;;  %v8025_v24 = vld [vmem:[#allocation135_spill] sm:$0xff] }
 0x859   :  { %3465 = vmatpush1.bf16.msra.mxu0 %v8015_v6  ;;  %3506 = vmatpush1.bf16.msra.mxu1 %v8016_v20  ;;  %v8026_v6 = vld [vmem:[#allocation136_spill] sm:$0xff]  ;;  %v8027_v20 = vld [vmem:[#allocation137_spill] sm:$0xff] }
 0x85a   :  { %3466 = vmatprep.subr.bf16.mxu0 %v8017_v29  ;;  %3507 = vmatprep.subr.bf16.mxu1 %v8018_v33  ;;  %v8028_v29 = vld [vmem:[#allocation138_spill] sm:$0xff]  ;;  %v8029_v33 = vld [vmem:[#allocation8_spill] sm:$0xff] }
 0x85d   :  { %3467 = vmatpush1.bf16.msra.mxu0 %v8019_v59  ;;  %3508 = vmatpush1.bf16.msra.mxu1 %v8020_v22  ;;  %v8030_v59 = vld [vmem:[#allocation9_spill] sm:$0xff] }
 0x85e   :  { %3468 = vmatprep.subr.bf16.mxu0 %v8021_v41  ;;  %3509 = vmatprep.subr.bf16.mxu1 %v8022_v32  ;;  %v8031_v32 = vld [vmem:[#allocation10_spill] sm:$0xff]  ;;  %v8040_v41 = vld [vmem:[#allocation19_spill] sm:$0xff] }
 0x861   :  { %3469 = vmatpush1.bf16.msra.mxu0 %v8023_v3  ;;  %3510 = vmatpush1.bf16.msra.mxu1 %v8024_v53  ;;  %v8032_v3 = vld [vmem:[#allocation11_spill] sm:$0xff]  ;;  %v8033_v53 = vld [vmem:[#allocation12_spill] sm:$0xff] }
 0x862   :  { %3470 = vmatprep.subr.bf16.mxu0 %v8025_v24  ;;  %3511 = vmatprep.subr.bf16.mxu1 %v8026_v6  ;;  %v8034_v24 = vld [vmem:[#allocation13_spill] sm:$0xff]  ;;  %v8035_v6 = vld [vmem:[#allocation14_spill] sm:$0xff] }
 0x865   :  { %3471 = vmatpush1.bf16.msra.mxu0 %v8027_v20  ;;  %3512 = vmatpush1.bf16.msra.mxu1 %v8028_v29  ;;  %v8036_v20 = vld [vmem:[#allocation15_spill] sm:$0xff]  ;;  %v8037_v29 = vld [vmem:[#allocation16_spill] sm:$0xff] }
 0x866   :  { %3647 = vmatprep.subr.bf16.mxu0 %v8029_v33  ;;  %3688 = vmatprep.subr.bf16.mxu1 %v8030_v59  ;;  %v8038_v33 = vld [vmem:[#allocation17_spill] sm:$0xff]  ;;  %v8039_v59 = vld [vmem:[#allocation18_spill] sm:$0xff] }
 0x868   :  { %3473 = vmatmul.mubr.bf16.vlgmr.msra.gmra.mrb[84].mxu0 %v6712_v63  ;;  %3514 = vmatmul.mubr.bf16.vlgmr.msra.gmra.mrb[84].mxu1 %v6712_v63  ;;  %v8041_v63 = vld [vmem:[#allocation20_spill] sm:$0xff] }
 0x869   :  { %3648 = vmatpush1.bf16.msra.mxu0 %v8031_v32  ;;  %3689 = vmatpush1.bf16.msra.mxu1 %v8032_v3  ;;  %v8042_v32 = vld [vmem:[#allocation21_spill] sm:$0xff]  ;;  %v8043_v3 = vld [vmem:[#allocation22_spill] sm:$0xff] }
 0x86a   :  { %3649 = vmatprep.subr.bf16.mxu0 %v8033_v53  ;;  %3690 = vmatprep.subr.bf16.mxu1 %v8034_v24  ;;  %v8044_v53 = vld [vmem:[#allocation23_spill] sm:$0xff]  ;;  %v8045_v24 = vld [vmem:[#allocation24_spill] sm:$0xff] }
 0x86d   :  { %3650 = vmatpush1.bf16.msra.mxu0 %v8035_v6  ;;  %3691 = vmatpush1.bf16.msra.mxu1 %v8036_v20  ;;  %v8046_v6 = vld [vmem:[#allocation25_spill] sm:$0xff]  ;;  %v8047_v20 = vld [vmem:[#allocation26_spill] sm:$0xff] }
 0x86e   :  { %3651 = vmatprep.subr.bf16.mxu0 %v8037_v29  ;;  %3692 = vmatprep.subr.bf16.mxu1 %v8038_v33  ;;  %v8048_v29 = vld [vmem:[#allocation27_spill] sm:$0xff]  ;;  %v8049_v33 = vld [vmem:[#allocation28_spill] sm:$0xff] }
 0x871   :  { %3652 = vmatpush1.bf16.msra.mxu0 %v8039_v59  ;;  %3693 = vmatpush1.bf16.msra.mxu1 %v8040_v41  ;;  %v8050_v59 = vld [vmem:[#allocation29_spill] sm:$0xff]  ;;  %v8051_v41 = vld [vmem:[#allocation30_spill] sm:$0xff] }
 0x872   :  { %3653 = vmatprep.subr.bf16.mxu0 %v8041_v63  ;;  %3694 = vmatprep.subr.bf16.mxu1 %v8042_v32  ;;  %v8052_v63 = vld [vmem:[#allocation31_spill] sm:$0xff]  ;;  %v8053_v32 = vld [vmem:[#allocation32_spill] sm:$0xff] }
 0x875   :  { %3654 = vmatpush1.bf16.msra.mxu0 %v8043_v3  ;;  %3695 = vmatpush1.bf16.msra.mxu1 %v8044_v53  ;;  %v8054_v3 = vld [vmem:[#allocation33_spill] sm:$0xff]  ;;  %v8055_v53 = vld [vmem:[#allocation34_spill] sm:$0xff] }
 0x876   :  { %3655 = vmatprep.subr.bf16.mxu0 %v8045_v24  ;;  %3696 = vmatprep.subr.bf16.mxu1 %v8046_v6  ;;  %v8056_v24 = vld [vmem:[#allocation35_spill] sm:$0xff]  ;;  %v8057_v6 = vld [vmem:[#allocation36_spill] sm:$0xff] }
 0x879   :  { %3656 = vmatpush1.bf16.msra.mxu0 %v8047_v20  ;;  %3697 = vmatpush1.bf16.msra.mxu1 %v8048_v29  ;;  %v8058_v20 = vld [vmem:[#allocation37_spill] sm:$0xff]  ;;  %v8059_v29 = vld [vmem:[#allocation38_spill] sm:$0xff] }
 0x87a   :  { %3657 = vmatprep.subr.bf16.mxu0 %v8049_v33  ;;  %3698 = vmatprep.subr.bf16.mxu1 %v8050_v59  ;;  %v8060_v33 = vld [vmem:[#allocation39_spill] sm:$0xff]  ;;  %v8061_v59 = vld [vmem:[#allocation40_spill] sm:$0xff] }
 0x87d   :  { %3658 = vmatpush1.bf16.msra.mxu0 %v8051_v41  ;;  %3699 = vmatpush1.bf16.msra.mxu1 %v8052_v63  ;;  %v8062_v41 = vld [vmem:[#allocation41_spill] sm:$0xff]  ;;  %v8063_v63 = vld [vmem:[#allocation42_spill] sm:$0xff] }
 0x87e   :  { %3659 = vmatprep.subr.bf16.mxu0 %v8053_v32  ;;  %3700 = vmatprep.subr.bf16.mxu1 %v8054_v3  ;;  %v8064_v32 = vld [vmem:[#allocation43_spill] sm:$0xff]  ;;  %v8065_v3 = vld [vmem:[#allocation44_spill] sm:$0xff] }
 0x881   :  { %3660 = vmatpush1.bf16.msra.mxu0 %v8055_v53  ;;  %3701 = vmatpush1.bf16.msra.mxu1 %v8056_v24  ;;  %v8066_v53 = vld [vmem:[#allocation45_spill] sm:$0xff]  ;;  %v8067_v24 = vld [vmem:[#allocation46_spill] sm:$0xff] }
 0x882   :  { %3661 = vmatprep.subr.bf16.mxu0 %v8057_v6  ;;  %3702 = vmatprep.subr.bf16.mxu1 %v8058_v20  ;;  %v8068_v6 = vld [vmem:[#allocation47_spill] sm:$0xff]  ;;  %v8069_v20 = vld [vmem:[#allocation48_spill] sm:$0xff] }
 0x885   :  { %3662 = vmatpush1.bf16.msra.mxu0 %v8059_v29  ;;  %3703 = vmatpush1.bf16.msra.mxu1 %v8060_v33  ;;  %v8070_v29 = vld [vmem:[#allocation49_spill] sm:$0xff]  ;;  %v8071_v33 = vld [vmem:[#allocation50_spill] sm:$0xff] }
 0x886   :  { %3663 = vmatprep.subr.bf16.mxu0 %v8061_v59  ;;  %3704 = vmatprep.subr.bf16.mxu1 %v8062_v41  ;;  %v8072_v59 = vld [vmem:[#allocation51_spill] sm:$0xff]  ;;  %v8073_v41 = vld [vmem:[#allocation52_spill] sm:$0xff] }
 0x889   :  { %3664 = vmatpush1.bf16.msra.mxu0 %v8063_v63  ;;  %3705 = vmatpush1.bf16.msra.mxu1 %v8064_v32  ;;  %v8074_v63 = vld [vmem:[#allocation53_spill] sm:$0xff]  ;;  %v8075_v32 = vld [vmem:[#allocation54_spill] sm:$0xff] }
 0x88a   :  { %3665 = vmatprep.subr.bf16.mxu0 %v8065_v3  ;;  %3706 = vmatprep.subr.bf16.mxu1 %v8066_v53  ;;  %v8076_v3 = vld [vmem:[#allocation55_spill] sm:$0xff]  ;;  %v8077_v53 = vld [vmem:[#allocation56_spill] sm:$0xff] }
 0x88d   :  { %3666 = vmatpush1.bf16.msra.mxu0 %v8067_v24  ;;  %3707 = vmatpush1.bf16.msra.mxu1 %v8068_v6  ;;  %v8078_v24 = vld [vmem:[#allocation57_spill] sm:$0xff]  ;;  %v8079_v6 = vld [vmem:[#allocation58_spill] sm:$0xff] }
 0x88e   :  { %3667 = vmatprep.subr.bf16.mxu0 %v8069_v20  ;;  %3708 = vmatprep.subr.bf16.mxu1 %v8070_v29  ;;  %v8080_v20 = vld [vmem:[#allocation59_spill] sm:$0xff]  ;;  %v8081_v29 = vld [vmem:[#allocation60_spill] sm:$0xff] }
 0x891   :  { %3668 = vmatpush1.bf16.msra.mxu0 %v8071_v33  ;;  %3709 = vmatpush1.bf16.msra.mxu1 %v8072_v59  ;;  %v8082_v33 = vld [vmem:[#allocation61_spill] sm:$0xff]  ;;  %v8083_v59 = vld [vmem:[#allocation62_spill] sm:$0xff] }
 0x892   :  { %3669 = vmatprep.subr.bf16.mxu0 %v8073_v41  ;;  %3710 = vmatprep.subr.bf16.mxu1 %v8074_v63  ;;  %v8084_v41 = vld [vmem:[#allocation63_spill] sm:$0xff]  ;;  %v8085_v63 = vld [vmem:[#allocation64_spill] sm:$0xff] }
 0x895   :  { %3670 = vmatpush1.bf16.msra.mxu0 %v8075_v32  ;;  %3711 = vmatpush1.bf16.msra.mxu1 %v8076_v3  ;;  %v8086_v32 = vld [vmem:[#allocation65_spill] sm:$0xff]  ;;  %v8087_v3 = vld [vmem:[#allocation66_spill] sm:$0xff] }
 0x896   :  { %3671 = vmatprep.subr.bf16.mxu0 %v8077_v53  ;;  %3712 = vmatprep.subr.bf16.mxu1 %v8078_v24  ;;  %v8088_v53 = vld [vmem:[#allocation67_spill] sm:$0xff]  ;;  %v8089_v24 = vld [vmem:[#allocation68_spill] sm:$0xff] }
 0x899   :  { %3672 = vmatpush1.bf16.msra.mxu0 %v8079_v6  ;;  %3713 = vmatpush1.bf16.msra.mxu1 %v8080_v20  ;;  %v8090_v6 = vld [vmem:[#allocation69_spill] sm:$0xff]  ;;  %v8091_v20 = vld [vmem:[#allocation70_spill] sm:$0xff] }
 0x89a   :  { %3673 = vmatprep.subr.bf16.mxu0 %v8081_v29  ;;  %3714 = vmatprep.subr.bf16.mxu1 %v8082_v33  ;;  %v8092_v29 = vld [vmem:[#allocation71_spill] sm:$0xff]  ;;  %v8093_v33 = vld [vmem:[#allocation72_spill] sm:$0xff] }
 0x89d   :  { %3674 = vmatpush1.bf16.msra.mxu0 %v8083_v59  ;;  %3715 = vmatpush1.bf16.msra.mxu1 %v8084_v41  ;;  %v8094_v59 = vld [vmem:[#allocation73_spill] sm:$0xff]  ;;  %v3522_v41 = vld [vmem:[#allocation2 + $0xc0] ss:$16 sps:$4 sm:$0xff]  }
 0x89e   :  { %3675 = vmatprep.subr.bf16.mxu0 %v8085_v63  ;;  %3716 = vmatprep.subr.bf16.mxu1 %v8086_v32  ;;  %v3523_v63 = vld [vmem:[#allocation2 + $0xc8] ss:$16 sps:$4 sm:$0xff]   ;;  %v3526_v22 = vunpack.c.l.bf16 %v3522_v41  ;;  %v3528_v32 = vunpack.c.h.bf16 %v3522_v41 }
 0x89f   :  { %v3527_v11 = vunpack.c.l.bf16 %v3523_v63 }
 0x8a1   :  { %3676 = vmatpush1.bf16.msra.mxu0 %v8087_v3  ;;  %3717 = vmatpush1.bf16.msra.mxu1 %v8088_v53  ;;  %v3529_v3 = vunpack.c.h.bf16 %v3523_v63  ;;  %v3530_v53 = vadd.f32 %v3526_v22, %v8095_v47 }
 0x8a2   :  { %3677 = vmatprep.subr.bf16.mxu0 %v8089_v24  ;;  %3718 = vmatprep.subr.bf16.mxu1 %v8090_v6  ;;  %v3532_v24 = vadd.f32 %v3528_v32, %v8096_v60 }
 0x8a5   :  { %3678 = vmatpush1.bf16.msra.mxu0 %v8091_v20  ;;  %3719 = vmatpush1.bf16.msra.mxu1 %v8092_v29  ;;  %v3531_v20 = vadd.f32 %v3527_v11, %v7586_v30  ;;  %v3533_v29 = vadd.f32 %v3529_v3, %v8097_v15 }
 0x8a6   :  { %3729 = vmatprep.subr.bf16.mxu0 %v8093_v33  ;;  %3770 = vmatprep.subr.bf16.mxu1 %v8094_v59 }
 0x8fb   :  { %v3392_v40 = vpop.f32.mrb[80].mxu0  ;;  %v3433_v6 = vpop.f32.mrb[80].mxu1 }
 0x8fc   :  { %v3534_v25 = vadd.f32 %v3530_v53, %v3392_v40  ;;  %v3536_v33 = vadd.f32 %v3532_v24, %v3433_v6  ;;  %v3394_v51 = vpop.f32.mrb[81].mxu0  ;;  %v3435_v59 = vpop.f32.mrb[81].mxu1  ;;  %v8098_v6 = vld [vmem:[#allocation77_spill] sm:$0xff] }
 0x8fd   :  { %v3535_v52 = vadd.f32 %v3531_v20, %v3394_v51  ;;  %v3537_v54 = vadd.f32 %v3533_v29, %v3435_v59  ;;  %v3396_v58 = vpop.f32.mrb[82].mxu0  ;;  %v3437_v41 = vpop.f32.mrb[82].mxu1  ;;  %v4215_v29 = vld [vmem:[%s7016_s5 + $0x30] sm:$0xff]  ;;  %v3538_v59 = vld [vmem:[#allocation2 + $0x20] sm:$0xf0] }
 0x8fe   :  { %v4209_v1 = vmul.f32 -1.442695, %v3534_v25  ;;  %v3397_v63 = vpop.f32.mrb[83].mxu0  ;;  %v3438_v12 = vpop.f32.mrb[83].mxu1  ;;  %v3540_v41 = vld [vmem:[#allocation2 + $0x30] sm:$0xf0] }
 0x8ff   :  { %v4210_v22 = vmul.f32 -1.442695, %v3535_v52  ;;  %v4211_v32 = vmul.f32 -1.442695, %v3537_v54  ;;  %v3539_v63 = vld [vmem:[#allocation2 + $0x28] sm:$0xf0] }
 0x900   :  { %4505 = vpow2.f32 %v4209_v1 }
 0x901   :  { %4507 = vpow2.f32 %v4210_v22  ;;  %v3541_v22 = vld [vmem:[#allocation2 + $0x38] sm:$0xf0] }
 0x902   :  { %4509 = vpow2.f32 %v4211_v32  ;;  %v3546_v32 = vrot.slane %v3538_v59, 4 }
 0x903   :  { %4511 = vtanh.f32 %v3536_v33 }
 0x90a   :  { %v4506_v60 = vpop.eup %4505 }
 0x90b   :  { %v4508_v47 = vpop.eup %4507  ;;  %v3570_v11 = vadd.f32 1.0, %v4506_v60 }
 0x90c   :  { %v3576_v40 = vadd.f32 1.0, %v4508_v47  ;;  %v4510_v3 = vpop.eup %4509 }
 0x90d   :  { %4513 = vrcp.f32 %v3570_v11  ;;  %v4512_v51 = vpop.eup %4511  ;;  %v3583_v25 = vadd.f32 1.0, %v4510_v3  ;;  %v3548_v11 = vrot.slane %v3540_v41, 4  ;;  %v3549_v3 = vrot.slane %v3541_v22, 4 }
 0x90e   :  { %4515 = vrcp.f32 %v3576_v40  ;;  %v3547_v40 = vrot.slane %v3539_v63, 4 }
 0x90f   :  { %4517 = vrcp.f32 %v3583_v25  ;;  %v8100_v25 = vld [vmem:[#allocation111_spill] sm:$0xff] }
 0x917   :  { %v4514_v53 = vpop.eup %4513 }
 0x918   :  { %v4516_v58 = vpop.eup %4515  ;;  %v3587_v24 = vmul.f32 %v4514_v53, %v4512_v51  ;;  %v3554_v51 = vunpack.c.l.bf16 %v3546_v32  ;;  %v3556_v53 = vunpack.c.l.bf16 %v3548_v11 }
 0x919   :  { %v3586_v12 = vmul.f32 %v4516_v58, %v8098_v6  ;;  %v4518_v54 = vpop.eup %4517  ;;  %v3555_v58 = vunpack.c.l.bf16 %v3547_v40 }
 0x91b   :  { %v3588_v52 = vadd.f32 %v3587_v24, %v3586_v12  ;;  %v3557_v24 = vunpack.c.l.bf16 %v3549_v3  ;;  %v8101_v12 = vld [vmem:[#allocation112_spill] sm:$0xff] }
 0x91d   :  { %4519 = vtanh.f32 %v3588_v52  ;;  %v6857_v1 = vsel %vm2172_vm5, %v3588_v52, %v8098_v6  ;;  %v3558_v6 = vadd.f32 %v3554_v51, %v8100_v25  ;;  %v3560_v52 = vadd.f32 %v3556_v53, %v8101_v12 }
 0x91e   :  { %8099 = vst [vmem:[#allocation78_spill] sm:$0xff] %v6857_v1 }
 0x927   :  { %v4520_v60 = vpop.eup %4519 }
 0x928   :  { %v3590_v47 = vmul.f32 %v4520_v60, %v4518_v54 }
 0x92a   :  { %v3631_v20 = vsel %vm2172_vm5, %v3590_v47, 0.0 }
 0x92b   :  { %v3634_v33 = vadd.f32 %v4215_v29, %v3631_v20  ;;  %v3559_v20 = vadd.f32 %v3555_v58, %v7490_v39  ;;  %v3561_v29 = vadd.f32 %v3557_v24, %v5611_v23 }
 0x92d   :  { %4216 = vst [vmem:[%s7016_s5 + $0x30] sm:$0xff] %v3634_v33 }
 0x93b   :  { %v3474_v54 = vpop.f32.mrb[84].mxu0  ;;  %v3515_v60 = vpop.f32.mrb[84].mxu1 }
 0x93c   :  { %v3562_v33 = vadd.f32 %v3558_v6, %v3474_v54  ;;  %v3564_v1 = vadd.f32 %v3560_v52, %v3515_v60  ;;  %v3476_v59 = vpop.f32.mrb[85].mxu0  ;;  %v3517_v41 = vpop.f32.mrb[85].mxu1 }
 0x93d   :  { %v3563_v63 = vadd.f32 %v3559_v20, %v3476_v59  ;;  %v3565_v22 = vadd.f32 %v3561_v29, %v3517_v41  ;;  %v3478_v32 = vpop.f32.mrb[86].mxu0  ;;  %v3519_v11 = vpop.f32.mrb[86].mxu1  ;;  %v6880_v41 = vsel %vm2172_vm5, %v3590_v47, %v6696_v31 }
 0x93e   :  { %v4212_v40 = vmul.f32 -1.442695, %v3562_v33  ;;  %v3479_v3 = vpop.f32.mrb[87].mxu0  ;;  %v3520_v15 = vpop.f32.mrb[87].mxu1  ;;  %v6896_v31 = vpack.c.bf16 %v6880_v41, %v6880_v41 }
 0x93f   :  { %v4213_v51 = vmul.f32 -1.442695, %v3563_v63  ;;  %v4214_v53 = vmul.f32 -1.442695, %v3565_v22 }
 0x940   :  { %4521 = vpow2.f32 %v4212_v40 }
 0x941   :  { %4523 = vpow2.f32 %v4213_v51 }
 0x942   :  { %4525 = vpow2.f32 %v4214_v53 }
 0x943   :  { %4527 = vtanh.f32 %v3564_v1 }
 0x94a   :  { %v4522_v12 = vpop.eup %4521 }
 0x94b   :  { %v4524_v25 = vpop.eup %4523  ;;  %v3595_v58 = vadd.f32 1.0, %v4522_v12 }
 0x94c   :  { %v3601_v24 = vadd.f32 1.0, %v4524_v25  ;;  %v4526_v6 = vpop.eup %4525 }
 0x94d   :  { %4529 = vrcp.f32 %v3595_v58  ;;  %v4528_v52 = vpop.eup %4527  ;;  %v3608_v29 = vadd.f32 1.0, %v4526_v6  ;;  %v8131_v6 = vld [vmem:[#allocation139_spill] sm:$0xff] }
 0x94e   :  { %4531 = vrcp.f32 %v3601_v24 }
 0x94f   :  { %4533 = vrcp.f32 %v3608_v29 }
 0x957   :  { %v4530_v54 = vpop.eup %4529 }
 0x958   :  { %v4532_v60 = vpop.eup %4531  ;;  %v3612_v20 = vmul.f32 %v4530_v54, %v4528_v52  ;;  %v8132_v54 = vld [vmem:[#allocation142_spill] sm:$0xff] }
 0x959   :  { %v3611_v15 = vmul.f32 %v4532_v60, %v6691_v44  ;;  %v4534_v1 = vpop.eup %4533 }
 0x95b   :  { %v3613_v33 = vadd.f32 %v3612_v20, %v3611_v15 }
 0x95d   :  { %4535 = vtanh.f32 %v3613_v33  ;;  %v6875_v12 = vsel %vm2171_vm4, %v3613_v33, %v6691_v44  ;;  %v4217_v44 = vld [vmem:[%s7016_s5 + $0x8] sm:$0xff] }
 0x95e   :  { %v8133_v33 = vld [vmem:[#allocation141_spill] sm:$0xff] }
 0x967   :  { %v4536_v25 = vpop.eup %4535 }
 0x968   :  { %v3615_v59 = vmul.f32 %v4536_v25, %v4534_v1 }
 0x96a   :  { %v6885_v63 = vsel %vm2171_vm4, %v3615_v59, %v6701_v34  ;;  %v3632_v22 = vsel %vm2171_vm4, %v3615_v59, 0.0 }
 0x96b   :  { %v3637_v32 = vadd.f32 %v4217_v44, %v3632_v22  ;;  %v4306_v11 = vpack.c.bf16 %v6885_v63, %v6885_v63 }
 0x96d   :  { %4218 = vst [vmem:[%s7016_s5 + $0x8] sm:$0xff] %v3637_v32  ;;  %3679 = vmatprep.mubr.bf16.mxu0 %v4306_v11  ;;  %3720 = vmatprep.mubr.bf16.mxu1 %v4306_v11 }
 0x96e   :  { %3680 = vmatmul.mubr.bf16.vlgmr.msra.gmra.mrb[88].mxu0 %v6896_v31  ;;  %3721 = vmatmul.mubr.bf16.vlgmr.msra.gmra.mrb[88].mxu1 %v6896_v31 }
 0x96f   :  { %3730 = vmatpush1.bf16.msra.mxu0 %v7493_v5  ;;  %3771 = vmatpush1.bf16.msra.mxu1 %v7494_v2  ;;  %v8102_v5 = vld [vmem:[#allocation107_spill] sm:$0xff]  ;;  %v8103_v2 = vld [vmem:[#allocation108_spill] sm:$0xff] }
 0x970   :  { %3761 = vmatprep.mubr.bf16.mxu0 %v4306_v11  ;;  %3802 = vmatprep.mubr.bf16.mxu1 %v4306_v11 }
 0x971   :  { %3731 = vmatprep.subr.bf16.mxu0 %v7495_v14  ;;  %3772 = vmatprep.subr.bf16.mxu1 %v7496_v4  ;;  %v8104_v14 = vld [vmem:[#allocation109_spill] sm:$0xff]  ;;  %v8105_v4 = vld [vmem:[#allocation110_spill] sm:$0xff] }
 0x973   :  { %3732 = vmatpush1.bf16.msra.mxu0 %v7497_v16  ;;  %3773 = vmatpush1.bf16.msra.mxu1 %v7498_v0  ;;  %v8106_v16 = vld [vmem:[#allocation113_spill] sm:$0xff]  ;;  %v8107_v0 = vld [vmem:[#allocation114_spill] sm:$0xff] }
 0x974   :  { %3733 = vmatprep.subr.bf16.mxu0 %v7499_v8  ;;  %3774 = vmatprep.subr.bf16.mxu1 %v7500_v48  ;;  %v8108_v8 = vld [vmem:[#allocation116_spill] sm:$0xff]  ;;  %v8109_v48 = vld [vmem:[#allocation117_spill] sm:$0xff] }
 0x977   :  { %3734 = vmatpush1.bf16.msra.mxu0 %v7592_v27  ;;  %3775 = vmatpush1.bf16.msra.mxu1 %v7593_v45  ;;  %v8110_v27 = vld [vmem:[#allocation118_spill] sm:$0xff]  ;;  %v8111_v45 = vld [vmem:[#allocation119_spill] sm:$0xff] }
 0x978   :  { %3735 = vmatprep.subr.bf16.mxu0 %v7594_v62  ;;  %3776 = vmatprep.subr.bf16.mxu1 %v7595_v42  ;;  %v8112_v62 = vld [vmem:[#allocation120_spill] sm:$0xff]  ;;  %v8113_v42 = vld [vmem:[#allocation121_spill] sm:$0xff] }
 0x97b   :  { %3736 = vmatpush1.bf16.msra.mxu0 %v7596_v17  ;;  %3777 = vmatpush1.bf16.msra.mxu1 %v7597_v37  ;;  %v8114_v17 = vld [vmem:[#allocation122_spill] sm:$0xff]  ;;  %v8115_v37 = vld [vmem:[#allocation123_spill] sm:$0xff] }
 0x97c   :  { %3737 = vmatprep.subr.bf16.mxu0 %v7598_v49  ;;  %3778 = vmatprep.subr.bf16.mxu1 %v7599_v36  ;;  %v8116_v49 = vld [vmem:[#allocation124_spill] sm:$0xff]  ;;  %v8117_v36 = vld [vmem:[#allocation125_spill] sm:$0xff] }
 0x97f   :  { %3738 = vmatpush1.bf16.msra.mxu0 %v7600_v46  ;;  %3779 = vmatpush1.bf16.msra.mxu1 %v7601_v50  ;;  %v8118_v46 = vld [vmem:[#allocation126_spill] sm:$0xff]  ;;  %v8119_v50 = vld [vmem:[#allocation127_spill] sm:$0xff] }
 0x980   :  { %3739 = vmatprep.subr.bf16.mxu0 %v7602_v28  ;;  %3780 = vmatprep.subr.bf16.mxu1 %v7693_v35  ;;  %v8120_v28 = vld [vmem:[#allocation128_spill] sm:$0xff]  ;;  %v8122_v35 = vld [vmem:[#allocation130_spill] sm:$0xff] }
 0x983   :  { %3740 = vmatpush1.bf16.msra.mxu0 %v7694_v7  ;;  %3781 = vmatpush1.bf16.msra.mxu1 %v7695_v56  ;;  %v8123_v7 = vld [vmem:[#allocation131_spill] sm:$0xff]  ;;  %v8124_v56 = vld [vmem:[#allocation132_spill] sm:$0xff] }
 0x984   :  { %3741 = vmatprep.subr.bf16.mxu0 %v7696_v38  ;;  %3782 = vmatprep.subr.bf16.mxu1 %v7697_v18  ;;  %v8125_v38 = vld [vmem:[#allocation133_spill] sm:$0xff]  ;;  %v8126_v18 = vld [vmem:[#allocation134_spill] sm:$0xff] }
 0x987   :  { %3742 = vmatpush1.bf16.msra.mxu0 %v7698_v61  ;;  %3783 = vmatpush1.bf16.msra.mxu1 %v7699_v19  ;;  %v8127_v61 = vld [vmem:[#allocation135_spill] sm:$0xff]  ;;  %v8128_v19 = vld [vmem:[#allocation136_spill] sm:$0xff] }
 0x988   :  { %3743 = vmatprep.subr.bf16.mxu0 %v7700_v57  ;;  %3784 = vmatprep.subr.bf16.mxu1 %v7701_v9  ;;  %v8129_v57 = vld [vmem:[#allocation137_spill] sm:$0xff]  ;;  %v8130_v9 = vld [vmem:[#allocation138_spill] sm:$0xff] }
 0x98b   :  { %3744 = vmatpush1.bf16.msra.mxu0 %v7702_v13  ;;  %3785 = vmatpush1.bf16.msra.mxu1 %v7703_v55  ;;  %v3811_v13 = vld [vmem:[#allocation2 + $0xc0] sm:$0xf0]  ;;  %v3813_v55 = vld [vmem:[#allocation2 + $0xd0] sm:$0xf0] }
 0x98c   :  { %3745 = vmatprep.subr.bf16.mxu0 %v7614_v21  ;;  %3786 = vmatprep.subr.bf16.mxu1 %v7897_v43  ;;  %v8121_v21 = vld [vmem:[#allocation129_spill] sm:$0xff]  ;;  %v3819_v34 = vrot.slane %v3811_v13, 4  ;;  %v3821_v47 = vrot.slane %v3813_v55, 4 }
 0x98d   :  { %v3812_v43 = vld [vmem:[#allocation2 + $0xc8] sm:$0xf0] }
 0x98e   :  { %v3820_v40 = vrot.slane %v3812_v43, 4  ;;  %v3827_v51 = vunpack.c.l.bf16 %v3819_v34  ;;  %v3829_v53 = vunpack.c.l.bf16 %v3821_v47  ;;  %v8136_v47 = vld [vmem:[#allocation112_spill] sm:$0xff] }
 0x98f   :  { %3746 = vmatpush1.bf16.msra.mxu0 %v7898_v26  ;;  %3787 = vmatpush1.bf16.msra.mxu1 %v8102_v5  ;;  %v3814_v26 = vld [vmem:[#allocation2 + $0xd8] sm:$0xf0] }
 0x990   :  { %3747 = vmatprep.subr.bf16.mxu0 %v8103_v2  ;;  %3788 = vmatprep.subr.bf16.mxu1 %v8104_v14  ;;  %v3822_v3 = vrot.slane %v3814_v26, 4  ;;  %v3828_v58 = vunpack.c.l.bf16 %v3820_v40  ;;  %v3831_v52 = vadd.f32 %v3827_v51, %v8131_v6  ;;  %v3833_v60 = vadd.f32 %v3829_v53, %v8132_v54  ;;  %v8135_v26 = vld [vmem:[#allocation111_spill] sm:$0xff] }
 0x992   :  { %v3830_v24 = vunpack.c.l.bf16 %v3822_v3  ;;  %v3832_v15 = vadd.f32 %v3828_v58, %v7586_v30 }
 0x993   :  { %3748 = vmatpush1.bf16.msra.mxu0 %v8105_v4  ;;  %3789 = vmatpush1.bf16.msra.mxu1 %v8106_v16 }
 0x994   :  { %3749 = vmatprep.subr.bf16.mxu0 %v8107_v0  ;;  %3790 = vmatprep.subr.bf16.mxu1 %v8108_v8  ;;  %v3834_v1 = vadd.f32 %v3830_v24, %v8133_v33 }
 0x997   :  { %3750 = vmatpush1.bf16.msra.mxu0 %v8109_v48  ;;  %3791 = vmatpush1.bf16.msra.mxu1 %v8110_v27 }
 0x998   :  { %3751 = vmatprep.subr.bf16.mxu0 %v8111_v45  ;;  %3792 = vmatprep.subr.bf16.mxu1 %v8112_v62 }
 0x99b   :  { %3752 = vmatpush1.bf16.msra.mxu0 %v8113_v42  ;;  %3793 = vmatpush1.bf16.msra.mxu1 %v8114_v17 }
 0x99c   :  { %3753 = vmatprep.subr.bf16.mxu0 %v8115_v37  ;;  %3794 = vmatprep.subr.bf16.mxu1 %v8116_v49 }
 0x99f   :  { %3754 = vmatpush1.bf16.msra.mxu0 %v8117_v36  ;;  %3795 = vmatpush1.bf16.msra.mxu1 %v8118_v46  ;;  %v8134_v36 = vld [vmem:[#allocation78_spill] sm:$0xff] }
 0x9a0   :  { %3755 = vmatprep.subr.bf16.mxu0 %v8119_v50  ;;  %3796 = vmatprep.subr.bf16.mxu1 %v8120_v28 }
 0x9a3   :  { %3756 = vmatpush1.bf16.msra.mxu0 %v8121_v21  ;;  %3797 = vmatpush1.bf16.msra.mxu1 %v8122_v35 }
 0x9a4   :  { %3757 = vmatprep.subr.bf16.mxu0 %v8123_v7  ;;  %3798 = vmatprep.subr.bf16.mxu1 %v8124_v56 }
 0x9a7   :  { %3758 = vmatpush1.bf16.msra.mxu0 %v8125_v38  ;;  %3799 = vmatpush1.bf16.msra.mxu1 %v8126_v18  ;;  %v4227_v38 = vld [vmem:[%s7016_s5 + $0x38] sm:$0xff] }
 0x9a8   :  { %3759 = vmatprep.subr.bf16.mxu0 %v8127_v61  ;;  %3800 = vmatprep.subr.bf16.mxu1 %v8128_v19  ;;  %v3839_v61 = vld [vmem:[#allocation2 + $0x20] ss:$16 sps:$4 sm:$0xff]   ;;  %v3840_v19 = vld [vmem:[#allocation2 + $0x28] sm:$0xf] }
 0x9a9   :  { %v3845_v13 = vunpack.c.h.bf16 %v3839_v61  ;;  %v3844_v55 = vunpack.c.l.bf16 %v3840_v19 }
 0x9ab   :  { %3760 = vmatpush1.bf16.msra.mxu0 %v8129_v57  ;;  %3801 = vmatpush1.bf16.msra.mxu1 %v8130_v9  ;;  %v3842_v57 = vld [vmem:[#allocation2 + $0x38] sm:$0xf]  ;;  %v3843_v9 = vunpack.c.l.bf16 %v3839_v61  ;;  %v3849_v40 = vadd.f32 %v3845_v13, %v8136_v47  ;;  %v3848_v53 = vadd.f32 %v3844_v55, %v7490_v39 }
 0x9ac   :  { %v3846_v43 = vunpack.c.l.bf16 %v3842_v57 }
 0x9ad   :  { %v3847_v34 = vadd.f32 %v3843_v9, %v8135_v26 }
 0x9ae   :  { %3762 = vmatmul.mubr.bf16.vlgmr.msra.gmra.mrb[92].mxu0 %v6896_v31  ;;  %3803 = vmatmul.mubr.bf16.vlgmr.msra.gmra.mrb[92].mxu1 %v6896_v31  ;;  %v3850_v58 = vadd.f32 %v3846_v43, %v5611_v23 }
 0xa41   :  { %v3681_v20 = vpop.f32.mrb[88].mxu0  ;;  %v3722_v29 = vpop.f32.mrb[88].mxu1 }
 0xa42   :  { %v3835_v25 = vadd.f32 %v3831_v52, %v3681_v20  ;;  %v3837_v59 = vadd.f32 %v3833_v60, %v3722_v29  ;;  %v3683_v22 = vpop.f32.mrb[89].mxu0  ;;  %v3724_v44 = vpop.f32.mrb[89].mxu1 }
 0xa43   :  { %v3836_v32 = vadd.f32 %v3832_v15, %v3683_v22  ;;  %v3838_v11 = vadd.f32 %v3834_v1, %v3724_v44  ;;  %v3685_v31 = vpop.f32.mrb[90].mxu0  ;;  %v3726_v5 = vpop.f32.mrb[90].mxu1 }
 0xa44   :  { %v4221_v2 = vmul.f32 -1.442695, %v3835_v25  ;;  %v3686_v14 = vpop.f32.mrb[91].mxu0  ;;  %v3727_v4 = vpop.f32.mrb[91].mxu1 }
 0xa45   :  { %v4222_v16 = vmul.f32 -1.442695, %v3836_v32  ;;  %v4223_v0 = vmul.f32 -1.442695, %v3838_v11 }
 0xa46   :  { %4537 = vpow2.f32 %v4221_v2 }
 0xa47   :  { %4539 = vpow2.f32 %v4222_v16 }
 0xa48   :  { %4541 = vpow2.f32 %v4223_v0 }
 0xa49   :  { %4543 = vtanh.f32 %v3837_v59 }
 0xa50   :  { %v4538_v8 = vpop.eup %4537 }
 0xa51   :  { %v4540_v48 = vpop.eup %4539  ;;  %v3859_v30 = vadd.f32 1.0, %v4538_v8 }
 0xa52   :  { %v3865_v27 = vadd.f32 1.0, %v4540_v48  ;;  %v4542_v45 = vpop.eup %4541 }
 0xa53   :  { %4545 = vrcp.f32 %v3859_v30  ;;  %v4544_v62 = vpop.eup %4543  ;;  %v3872_v49 = vadd.f32 1.0, %v4542_v45 }
 0xa54   :  { %4547 = vrcp.f32 %v3865_v27 }
 0xa55   :  { %4549 = vrcp.f32 %v3872_v49 }
 0xa5d   :  { %v4546_v42 = vpop.eup %4545 }
 0xa5e   :  { %v4548_v17 = vpop.eup %4547  ;;  %v3876_v37 = vmul.f32 %v4546_v42, %v4544_v62 }
 0xa5f   :  { %v3875_v46 = vmul.f32 %v4548_v17, %v8134_v36  ;;  %v4550_v21 = vpop.eup %4549 }
 0xa61   :  { %v3877_v50 = vadd.f32 %v3876_v37, %v3875_v46 }
 0xa63   :  { %4551 = vtanh.f32 %v3877_v50  ;;  %v3909_v28 = vsel %vm1884_vm1, %v3877_v50, %v8134_v36 }
 0xa6d   :  { %v4552_v35 = vpop.eup %4551 }
 0xa6e   :  { %v3879_v7 = vmul.f32 %v4552_v35, %v4550_v21 }
 0xa70   :  { %v3920_v56 = vsel %vm1884_vm1, %v3879_v7, 0.0  ;;  %v3906_v62 = vsel %vm1884_vm1, %v3879_v7, %v6880_v41 }
 0xa71   :  { %v3923_v18 = vadd.f32 %v4227_v38, %v3920_v56 }
 0xa73   :  { %4228 = vst [vmem:[%s7016_s5 + $0x38] sm:$0xff] %v3923_v18 }
 0xa81   :  { %v3763_v3 = vpop.f32.mrb[92].mxu0  ;;  %v3804_v51 = vpop.f32.mrb[92].mxu1 }
 0xa82   :  { %v3851_v24 = vadd.f32 %v3847_v34, %v3763_v3  ;;  %v3853_v6 = vadd.f32 %v3849_v40, %v3804_v51  ;;  %v3765_v52 = vpop.f32.mrb[93].mxu0  ;;  %v3806_v54 = vpop.f32.mrb[93].mxu1 }
 0xa83   :  { %v3852_v60 = vadd.f32 %v3848_v53, %v3765_v52  ;;  %v3854_v20 = vadd.f32 %v3850_v58, %v3806_v54  ;;  %v3767_v29 = vpop.f32.mrb[94].mxu0  ;;  %v3808_v15 = vpop.f32.mrb[94].mxu1 }
 0xa84   :  { %v4224_v33 = vmul.f32 -1.442695, %v3851_v24  ;;  %v3768_v1 = vpop.f32.mrb[95].mxu0  ;;  %v3809_v25 = vpop.f32.mrb[95].mxu1 }
 0xa85   :  { %v4225_v59 = vmul.f32 -1.442695, %v3852_v60  ;;  %v4226_v22 = vmul.f32 -1.442695, %v3854_v20 }
 0xa86   :  { %4553 = vpow2.f32 %v4224_v33 }
 0xa87   :  { %4555 = vpow2.f32 %v4225_v59 }
 0xa88   :  { %4557 = vpow2.f32 %v4226_v22 }
 0xa89   :  { %4559 = vtanh.f32 %v3853_v6 }
 0xa90   :  { %v4554_v44 = vpop.eup %4553 }
 0xa91   :  { %v4556_v32 = vpop.eup %4555  ;;  %v3884_v39 = vadd.f32 1.0, %v4554_v44 }
 0xa92   :  { %v3890_v23 = vadd.f32 1.0, %v4556_v32  ;;  %v4558_v11 = vpop.eup %4557 }
 0xa93   :  { %4561 = vrcp.f32 %v3884_v39  ;;  %v4560_v31 = vpop.eup %4559  ;;  %v3897_v4 = vadd.f32 1.0, %v4558_v11 }
 0xa94   :  { %4563 = vrcp.f32 %v3890_v23 }
 0xa95   :  { %4565 = vrcp.f32 %v3897_v4 }
 0xa9d   :  { %v4562_v5 = vpop.eup %4561 }
 0xa9e   :  { %v4564_v2 = vpop.eup %4563  ;;  %v3901_v14 = vmul.f32 %v4562_v5, %v4560_v31 }
 0xa9f   :  { %v3900_v16 = vmul.f32 %v4564_v2, %v6875_v12  ;;  %v4566_v30 = vpop.eup %4565 }
 0xaa1   :  { %v3902_v0 = vadd.f32 %v3901_v14, %v3900_v16 }
 0xaa3   :  { %4567 = vtanh.f32 %v3902_v0  ;;  %v3912_v8 = vsel %vm1883_vm0, %v3902_v0, %v6875_v12  ;;  %v3925_v12 = vld [vmem:[%s7016_s5] sm:$0xff] }
 0xaa4   :  { %v3934_v48 = vadd.f32 %v3912_v8, %v3909_v28 }
 0xaa6   :  { %3935 = vst [vmem:[%s7017_s7] sm:$0xff] %v3934_v48 }
 0xaad   :  { %v4568_v27 = vpop.eup %4567 }
 0xaae   :  { %v3904_v45 = vmul.f32 %v4568_v27, %v4566_v30 }
 0xab0   :  { %v3908_v42 = vsel %vm1883_vm0, %v3904_v45, %v6885_v63  ;;  %v3921_v17 = vsel %vm1883_vm0, %v3904_v45, 0.0 }
 0xab1   :  { %v3926_v37 = vadd.f32 %v3925_v12, %v3921_v17  ;;  %v3930_v49 = vadd.f32 %v3908_v42, %v3906_v62 }
 0xab3   :  { %3927 = vst [vmem:[%s7016_s5] sm:$0xff] %v3926_v37  ;;  %3931 = vst [vmem:[%s7018_s6] sm:$0xff] %v3930_v49 }

</bundles_post_ra>
